<compile_context>
chip_gen: v7x
topology: tpu7x:2x2x1
jax: 0.10.0
libtpu: 0.0.40
codegen_flags: <defaults>
</compile_context>

<pallas_src>
import jax
import jax.numpy as jnp
from jax import lax
from jax.experimental import pallas as pl
from jax.experimental.pallas import tpu as pltpu

NEG_SLOPE = 0.2
BN_EPS = 1e-5
LANES = 128
_CHANS = (3, 16, 32, 64, 128)


# ---------------------------------------------------------------------------
# Pallas kernels (full-block, single grid step; everything is VMEM resident)
# ---------------------------------------------------------------------------
def _conv_act_kernel(a_ref, w_ref, b_ref, o_ref):
    """conv1: (Cout,K)@(K,Mblk) + bias + LeakyReLU (no BatchNorm)."""
    acc = jnp.dot(w_ref[...], a_ref[...], preferred_element_type=jnp.float32)
    acc = acc + b_ref[...]                                   # (Cout,Mblk) + (Cout,1)
    o_ref[...] = jnp.where(acc >= 0.0, acc, NEG_SLOPE * acc)


def _conv_bn_act_kernel(a_ref, w_ref, b_ref, g_ref, bt_ref, o_ref):
    """conv + batch-stat BatchNorm + LeakyReLU, fully fused (single grid step)."""
    acc = jnp.dot(w_ref[...], a_ref[...], preferred_element_type=jnp.float32)
    acc = acc + b_ref[...]                                   # (Cout, M)
    inv_m = 1.0 / acc.shape[1]
    mean = jnp.sum(acc, axis=1, keepdims=True) * inv_m
    diff = acc - mean
    var = jnp.sum(diff * diff, axis=1, keepdims=True) * inv_m
    scale = g_ref[...] * lax.rsqrt(var + BN_EPS)
    y = diff * scale + bt_ref[...]
    o_ref[...] = jnp.where(y >= 0.0, y, NEG_SLOPE * y)


def _conv_bn_fc_sigmoid_kernel(a_ref, w_ref, b_ref, g_ref, bt_ref,
                               wfc_ref, sel_ref, bfc_ref, o_ref):
    """conv4 + BN + LeakyReLU + Linear(128*8*8 -> 1) + Sigmoid, fully fused."""
    acc = jnp.dot(w_ref[...], a_ref[...], preferred_element_type=jnp.float32)
    acc = acc + b_ref[...]                                   # (128, M4)
    inv_m = 1.0 / acc.shape[1]
    mean = jnp.sum(acc, axis=1, keepdims=True) * inv_m
    diff = acc - mean
    var = jnp.sum(diff * diff, axis=1, keepdims=True) * inv_m
    scale = g_ref[...] * lax.rsqrt(var + BN_EPS)
    y = diff * scale + bt_ref[...]
    y = jnp.where(y >= 0.0, y, NEG_SLOPE * y)                # (128, M4) channel-major acts
    # FC: z[n] = sum_{c,hw} y[c, n*HW+hw] * wfc[c, hw] + bfc  (wfc already batch-tiled)
    p = y * wfc_ref[...]                                     # (128, M4)
    q = jnp.dot(p, sel_ref[...], preferred_element_type=jnp.float32)   # (128, LANES)
    z = jnp.sum(q, axis=0, keepdims=True) + bfc_ref[...]                # (1, LANES)
    o_ref[...] = 1.0 / (1.0 + jnp.exp(-z))


# ---------------------------------------------------------------------------
# pallas_call wrappers
# ---------------------------------------------------------------------------
def _spec2(shape):
    return pl.BlockSpec(shape, lambda i: (0, 0))


_ARB = pltpu.CompilerParams(dimension_semantics=("arbitrary",))


def conv_act(a, w, b):
    k, m = a.shape
    cout = w.shape[0]
    # Lane-split into 2 "parallel" blocks when possible so a v7x megacore can share
    # the largest matmul; on v5e/v6e the extra step is essentially free.
    nblk = 2 if m % (2 * LANES) == 0 else 1
    bm = m // nblk
    return pl.pallas_call(
        _conv_act_kernel,
        grid=(nblk,),
        in_specs=[pl.BlockSpec((k, bm), lambda i: (0, i)),
                  _spec2(w.shape),
                  _spec2(b.shape)],
        out_specs=pl.BlockSpec((cout, bm), lambda i: (0, i)),
        out_shape=jax.ShapeDtypeStruct((cout, m), jnp.float32),
        compiler_params=pltpu.CompilerParams(dimension_semantics=("parallel",)),
    )(a, w, b)


def conv_bn_act(a, w, b, gamma, beta):
    _, m = a.shape
    cout = w.shape[0]
    return pl.pallas_call(
        _conv_bn_act_kernel,
        grid=(1,),
        in_specs=[_spec2(a.shape), _spec2(w.shape), _spec2(b.shape),
                  _spec2(gamma.shape), _spec2(beta.shape)],
        out_specs=_spec2((cout, m)),
        out_shape=jax.ShapeDtypeStruct((cout, m), jnp.float32),
        compiler_params=_ARB,
    )(a, w, b, gamma, beta)


def conv_bn_fc_sigmoid(a, w, b, gamma, beta, wfc_t, sel, bfc):
    return pl.pallas_call(
        _conv_bn_fc_sigmoid_kernel,
        grid=(1,),
        in_specs=[_spec2(a.shape), _spec2(w.shape), _spec2(b.shape),
                  _spec2(gamma.shape), _spec2(beta.shape),
                  _spec2(wfc_t.shape), _spec2(sel.shape), _spec2(bfc.shape)],
        out_specs=_spec2((1, LANES)),
        out_shape=jax.ShapeDtypeStruct((1, LANES), jnp.float32),
        compiler_params=_ARB,
    )(a, w, b, gamma, beta, wfc_t, sel, bfc)


# ---------------------------------------------------------------------------
# Glue: channel-major im2col for k=3, stride=2, padding=1
# ---------------------------------------------------------------------------
def _im2col_taps(x4):
    """x4: (C, N, H, W) -> (9*C, N*(H//2)*(W//2)); rows ordered (kh,kw)-major, cin-minor."""
    c, n, h, w = x4.shape
    ho, wo = h // 2, w // 2
    xp = jnp.pad(x4, ((0, 0), (0, 0), (1, 1), (1, 1)))
    taps = [xp[:, :, kh:kh + 2 * ho:2, kw:kw + 2 * wo:2].reshape(c, n * ho * wo)
            for kh in range(3) for kw in range(3)]
    return jnp.concatenate(taps, axis=0), ho, wo


# ---------------------------------------------------------------------------
# Parameters (deterministic, synthetic) and forward pass
# ---------------------------------------------------------------------------
def init_params(key):
    params = {}
    keys = jax.random.split(key, 16)
    ki = 0
    for li in range(1, 5):
        cin, cout = _CHANS[li - 1], _CHANS[li]
        bound = 1.0 / (9 * cin) ** 0.5
        # (Cout, 9*Cin): columns ordered (kh,kw,cin) to match _im2col_taps rows.
        params[f"w{li}"] = jax.random.uniform(keys[ki], (cout, 9 * cin), jnp.float32, -bound, bound); ki += 1
        params[f"b{li}"] = jax.random.uniform(keys[ki], (cout, 1), jnp.float32, -bound, bound); ki += 1
        if li > 1:  # BatchNorm affine params for conv2..conv4
            params[f"gamma{li}"] = jax.random.uniform(keys[ki], (cout, 1), jnp.float32, 0.5, 1.5); ki += 1
            params[f"beta{li}"] = jax.random.uniform(keys[ki], (cout, 1), jnp.float32, -0.5, 0.5); ki += 1
    kfc = 128 * 8 * 8
    bound = 1.0 / kfc ** 0.5
    params["wfc"] = jax.random.uniform(keys[ki], (kfc, 1), jnp.float32, -bound, bound); ki += 1
    params["bfc"] = jax.random.uniform(keys[ki], (1, 1), jnp.float32, -bound, bound)
    return params


@jax.jit
def discriminator_forward(img, params):
    """img: (N, 3, 128, 128) NCHW float32 (fc1 expects 128*8*8 features)."""
    n = img.shape[0]
    x4 = jnp.transpose(img, (1, 0, 2, 3)).astype(jnp.float32)      # -> (C, N, H, W)

    # conv1 + LeakyReLU
    a, ho, wo = _im2col_taps(x4)
    y = conv_act(a, params["w1"], params["b1"])
    x4 = y.reshape(_CHANS[1], n, ho, wo)

    # conv2, conv3: conv + BN(batch stats) + LeakyReLU, one fused kernel each
    for li in (2, 3):
        a, ho, wo = _im2col_taps(x4)
        y = conv_bn_act(a, params[f"w{li}"], params[f"b{li}"],
                        params[f"gamma{li}"], params[f"beta{li}"])
        x4 = y.reshape(_CHANS[li], n, ho, wo)

    # conv4 + BN + LeakyReLU + Linear + Sigmoid, all in one kernel
    a, ho, wo = _im2col_taps(x4)
    hw = ho * wo                                                    # 64
    m4 = n * hw
    # FC weight is stored in PyTorch NCHW-flatten order (idx = c*hw + h*W + w);
    # reshape to channel-major (C, HW) and tile across the batch lanes.
    wfc_t = jnp.tile(params["wfc"].reshape(_CHANS[4], hw), (1, n))  # (128, m4)
    # Selection matrix: column j sums the lanes belonging to batch element j (j < n).
    sel = (jnp.arange(m4)[:, None] // hw == jnp.arange(LANES)[None, :]
           ).astype(jnp.float32)                                    # (m4, LANES)
    o = conv_bn_fc_sigmoid(a, params["w4"], params["b4"],
                           params["gamma4"], params["beta4"],
                           wfc_t, sel, params["bfc"])               # (1, LANES)
    return o[0, :n].reshape(n, 1)


# ---------------------------------------------------------------------------
# Pure-JAX reference (sanity check)
# ---------------------------------------------------------------------------
def _reference_forward(img, params):
    n = img.shape[0]
    x4 = jnp.transpose(img, (1, 0, 2, 3)).astype(jnp.float32)
    a, ho, wo = _im2col_taps(x4)
    y = params["w1"] @ a + params["b1"]
    y = jnp.where(y >= 0, y, NEG_SLOPE * y)
    x4 = y.reshape(_CHANS[1], n, ho, wo)
    for li in (2, 3, 4):
        a, ho, wo = _im2col_taps(x4)
        y = params[f"w{li}"] @ a + params[f"b{li}"]
        mean = jnp.mean(y, axis=1, keepdims=True)
        var = jnp.mean((y - mean) ** 2, axis=1, keepdims=True)
        y = (y - mean) / jnp.sqrt(var + BN_EPS) * params[f"gamma{li}"] + params[f"beta{li}"]
        y = jnp.where(y >= 0, y, NEG_SLOPE * y)
        x4 = y.reshape(_CHANS[li], n, ho, wo)
    # Flatten in PyTorch NCHW .view order: feat[n, c*hw + s] = y[c, n*hw + s]
    c = x4.shape[0]
    hw = ho * wo
    feat = jnp.transpose(x4.reshape(c, n, hw), (1, 0, 2)).reshape(n, c * hw)
    z = feat @ params["wfc"] + params["bfc"]
    return jax.nn.sigmoid(z)


if __name__ == "__main__":
    key = jax.random.PRNGKey(0)
    kx, kp = jax.random.split(key)
    # fc1 expects 128*8*8 features -> spatial input must be 128x128; batch kept small.
    img = jax.random.normal(kx, (2, 3, 128, 128), jnp.float32)
    params = init_params(kp)

    out = jax.block_until_ready(discriminator_forward(img, params))
    ref = _reference_forward(img, params)

    assert out.shape == (2, 1), out.shape
    assert jnp.allclose(out, ref, atol=1e-3, rtol=1e-3), (out, ref)

    print("KERNEL_OK")
</pallas_src>

<mosaic_0001>
module attributes {stable_mosaic.version = 11 : i64} {
  func.func @_conv_act_kernel(%arg0: i32, %arg1: memref<27x4096xf32, #tpu.memory_space<vmem>>, %arg2: memref<16x27xf32, #tpu.memory_space<vmem>>, %arg3: memref<16x1xf32, #tpu.memory_space<vmem>>, %arg4: memref<16x4096xf32, #tpu.memory_space<vmem>>) attributes {dimension_semantics = [#tpu.dimension_semantics<parallel>], iteration_bounds = array<i64: 2>, scalar_prefetch = 0 : i64, scratch_operands = 0 : i64, tpu.core_type = #tpu.core_type<tc>, window_params = [{transform_indices = @transform_0, window_bounds = array<i64: 27, 4096>}, {pipeline_mode = #tpu.pipeline_mode<synchronous>, transform_indices = @transform_1, window_bounds = array<i64: 16, 27>}, {pipeline_mode = #tpu.pipeline_mode<synchronous>, transform_indices = @transform_2, window_bounds = array<i64: 16, 1>}, {transform_indices = @transform_3, window_bounds = array<i64: 16, 4096>}]} {
    %c0 = arith.constant 0 : index
    %c0_0 = arith.constant 0 : index
    %0 = vector.load %arg2[%c0, %c0_0] : memref<16x27xf32, #tpu.memory_space<vmem>>, vector<16x27xf32>
    %c0_1 = arith.constant 0 : index
    %c0_2 = arith.constant 0 : index
    %1 = vector.load %arg1[%c0_1, %c0_2] : memref<27x4096xf32, #tpu.memory_space<vmem>>, vector<27x4096xf32>
    %cst = arith.constant dense<0.000000e+00> : vector<16x4096xf32>
    %2 = tpu.matmul %0, %1, %cst {dimension_numbers = #tpu.dot_dimension_numbers<[1], [0], [0], [1], [0, 0, 1, 1], [], []>} : vector<16x27xf32>, vector<27x4096xf32>, vector<16x4096xf32> -> vector<16x4096xf32>
    %c0_3 = arith.constant 0 : index
    %c0_4 = arith.constant 0 : index
    %3 = vector.load %arg3[%c0_3, %c0_4] : memref<16x1xf32, #tpu.memory_space<vmem>>, vector<16x1xf32>
    %4 = vector.broadcast %3 : vector<16x1xf32> to vector<16x4096xf32>
    %5 = arith.addf %2, %4 : vector<16x4096xf32>
    %cst_5 = arith.constant 0.000000e+00 : f32
    %6 = vector.broadcast %cst_5 : f32 to vector<16x4096xf32>
    %7 = arith.cmpf oge, %5, %6 : vector<16x4096xf32>
    %cst_6 = arith.constant 2.000000e-01 : f32
    %8 = vector.broadcast %cst_6 : f32 to vector<16x4096xf32>
    %9 = arith.mulf %8, %5 : vector<16x4096xf32>
    %10 = arith.select %7, %5, %9 : vector<16x4096xi1>, vector<16x4096xf32>
    %c0_7 = arith.constant 0 : index
    %c0_8 = arith.constant 0 : index
    %11 = vector.load %arg4[%c0_7, %c0_8] : memref<16x4096xf32, #tpu.memory_space<vmem>>, vector<16x4096xf32>
    tpu.vector_store %arg4[%c0_7, %c0_8], %10 {strides = array<i32>} : memref<16x4096xf32, #tpu.memory_space<vmem>>, vector<16x4096xf32>,
    return
  }
  func.func @transform_0(%arg0: i32) -> (i32, i32) {
    %c0_i32 = arith.constant 0 : i32
    %c0_i32_0 = arith.constant 0 : i32
    return %c0_i32, %arg0 : i32, i32
  }
  func.func @transform_1(%arg0: i32) -> (i32, i32) {
    %c0_i32 = arith.constant 0 : i32
    %c0_i32_0 = arith.constant 0 : i32
    %c0_i32_1 = arith.constant 0 : i32
    return %c0_i32, %c0_i32_0 : i32, i32
  }
  func.func @transform_2(%arg0: i32) -> (i32, i32) {
    %c0_i32 = arith.constant 0 : i32
    %c0_i32_0 = arith.constant 0 : i32
    %c0_i32_1 = arith.constant 0 : i32
    return %c0_i32, %c0_i32_0 : i32, i32
  }
  func.func @transform_3(%arg0: i32) -> (i32, i32) {
    %c0_i32 = arith.constant 0 : i32
    %c0_i32_0 = arith.constant 0 : i32
    return %c0_i32, %arg0 : i32, i32
  }
}

module attributes {stable_mosaic.version = 11 : i64} {
  func.func @_conv_bn_act_kernel(%arg0: i32, %arg1: memref<144x2048xf32, #tpu.memory_space<vmem>>, %arg2: memref<32x144xf32, #tpu.memory_space<vmem>>, %arg3: memref<32x1xf32, #tpu.memory_space<vmem>>, %arg4: memref<32x1xf32, #tpu.memory_space<vmem>>, %arg5: memref<32x1xf32, #tpu.memory_space<vmem>>, %arg6: memref<32x2048xf32, #tpu.memory_space<vmem>>) attributes {dimension_semantics = [#tpu.dimension_semantics<arbitrary>], iteration_bounds = array<i64: 1>, scalar_prefetch = 0 : i64, scratch_operands = 0 : i64, tpu.core_type = #tpu.core_type<tc>, window_params = [{pipeline_mode = #tpu.pipeline_mode<synchronous>, transform_indices = @transform_0, window_bounds = array<i64: 144, 2048>}, {pipeline_mode = #tpu.pipeline_mode<synchronous>, transform_indices = @transform_1, window_bounds = array<i64: 32, 144>}, {pipeline_mode = #tpu.pipeline_mode<synchronous>, transform_indices = @transform_2, window_bounds = array<i64: 32, 1>}, {pipeline_mode = #tpu.pipeline_mode<synchronous>, transform_indices = @transform_3, window_bounds = array<i64: 32, 1>}, {pipeline_mode = #tpu.pipeline_mode<synchronous>, transform_indices = @transform_4, window_bounds = array<i64: 32, 1>}, {pipeline_mode = #tpu.pipeline_mode<synchronous>, transform_indices = @transform_5, window_bounds = array<i64: 32, 2048>}]} {
    %c0 = arith.constant 0 : index
    %c0_0 = arith.constant 0 : index
    %0 = vector.load %arg2[%c0, %c0_0] : memref<32x144xf32, #tpu.memory_space<vmem>>, vector<32x144xf32>
    %c0_1 = arith.constant 0 : index
    %c0_2 = arith.constant 0 : index
    %1 = vector.load %arg1[%c0_1, %c0_2] : memref<144x2048xf32, #tpu.memory_space<vmem>>, vector<144x2048xf32>
    %cst = arith.constant dense<0.000000e+00> : vector<32x2048xf32>
    %2 = tpu.matmul %0, %1, %cst {dimension_numbers = #tpu.dot_dimension_numbers<[1], [0], [0], [1], [0, 0, 1, 1], [], []>} : vector<32x144xf32>, vector<144x2048xf32>, vector<32x2048xf32> -> vector<32x2048xf32>
    %c0_3 = arith.constant 0 : index
    %c0_4 = arith.constant 0 : index
    %3 = vector.load %arg3[%c0_3, %c0_4] : memref<32x1xf32, #tpu.memory_space<vmem>>, vector<32x1xf32>
    %4 = vector.broadcast %3 : vector<32x1xf32> to vector<32x2048xf32>
    %5 = arith.addf %2, %4 : vector<32x2048xf32>
    %cst_5 = arith.constant dense<0.000000e+00> : vector<32xf32>
    %6 = vector.multi_reduction <add>, %5, %cst_5 [1] : vector<32x2048xf32> to vector<32xf32>
    %7 = vector.shape_cast %6 : vector<32xf32> to vector<32x1xf32>
    %cst_6 = arith.constant 4.8828125E-4 : f32
    %8 = vector.broadcast %cst_6 : f32 to vector<32x1xf32>
    %9 = arith.mulf %7, %8 : vector<32x1xf32>
    %10 = vector.broadcast %9 : vector<32x1xf32> to vector<32x2048xf32>
    %11 = arith.subf %5, %10 : vector<32x2048xf32>
    %12 = arith.mulf %11, %11 : vector<32x2048xf32>
    %cst_7 = arith.constant dense<0.000000e+00> : vector<32xf32>
    %13 = vector.multi_reduction <add>, %12, %cst_7 [1] : vector<32x2048xf32> to vector<32xf32>
    %14 = vector.shape_cast %13 : vector<32xf32> to vector<32x1xf32>
    %cst_8 = arith.constant 4.8828125E-4 : f32
    %15 = vector.broadcast %cst_8 : f32 to vector<32x1xf32>
    %16 = arith.mulf %14, %15 : vector<32x1xf32>
    %c0_9 = arith.constant 0 : index
    %c0_10 = arith.constant 0 : index
    %17 = vector.load %arg4[%c0_9, %c0_10] : memref<32x1xf32, #tpu.memory_space<vmem>>, vector<32x1xf32>
    %cst_11 = arith.constant 9.99999974E-6 : f32
    %18 = vector.broadcast %cst_11 : f32 to vector<32x1xf32>
    %19 = arith.addf %16, %18 : vector<32x1xf32>
    %20 = math.rsqrt %19 : vector<32x1xf32>
    %21 = arith.mulf %17, %20 : vector<32x1xf32>
    %22 = vector.broadcast %21 : vector<32x1xf32> to vector<32x2048xf32>
    %23 = arith.mulf %11, %22 : vector<32x2048xf32>
    %c0_12 = arith.constant 0 : index
    %c0_13 = arith.constant 0 : index
    %24 = vector.load %arg5[%c0_12, %c0_13] : memref<32x1xf32, #tpu.memory_space<vmem>>, vector<32x1xf32>
    %25 = vector.broadcast %24 : vector<32x1xf32> to vector<32x2048xf32>
    %26 = arith.addf %23, %25 : vector<32x2048xf32>
    %cst_14 = arith.constant 0.000000e+00 : f32
    %27 = vector.broadcast %cst_14 : f32 to vector<32x2048xf32>
    %28 = arith.cmpf oge, %26, %27 : vector<32x2048xf32>
    %cst_15 = arith.constant 2.000000e-01 : f32
    %29 = vector.broadcast %cst_15 : f32 to vector<32x2048xf32>
    %30 = arith.mulf %29, %26 : vector<32x2048xf32>
    %31 = arith.select %28, %26, %30 : vector<32x2048xi1>, vector<32x2048xf32>
    %c0_16 = arith.constant 0 : index
    %c0_17 = arith.constant 0 : index
    %32 = vector.load %arg6[%c0_16, %c0_17] : memref<32x2048xf32, #tpu.memory_space<vmem>>, vector<32x2048xf32>
    tpu.vector_store %arg6[%c0_16, %c0_17], %31 {strides = array<i32>} : memref<32x2048xf32, #tpu.memory_space<vmem>>, vector<32x2048xf32>,
    return
  }
  func.func @transform_0(%arg0: i32) -> (i32, i32) {
    %c0_i32 = arith.constant 0 : i32
    %c0_i32_0 = arith.constant 0 : i32
    %c0_i32_1 = arith.constant 0 : i32
    return %c0_i32, %c0_i32_0 : i32, i32
  }
  func.func @transform_1(%arg0: i32) -> (i32, i32) {
    %c0_i32 = arith.constant 0 : i32
    %c0_i32_0 = arith.constant 0 : i32
    %c0_i32_1 = arith.constant 0 : i32
    return %c0_i32, %c0_i32_0 : i32, i32
  }
  func.func @transform_2(%arg0: i32) -> (i32, i32) {
    %c0_i32 = arith.constant 0 : i32
    %c0_i32_0 = arith.constant 0 : i32
    %c0_i32_1 = arith.constant 0 : i32
    return %c0_i32, %c0_i32_0 : i32, i32
  }
  func.func @transform_3(%arg0: i32) -> (i32, i32) {
    %c0_i32 = arith.constant 0 : i32
    %c0_i32_0 = arith.constant 0 : i32
    %c0_i32_1 = arith.constant 0 : i32
    return %c0_i32, %c0_i32_0 : i32, i32
  }
  func.func @transform_4(%arg0: i32) -> (i32, i32) {
    %c0_i32 = arith.constant 0 : i32
    %c0_i32_0 = arith.constant 0 : i32
    %c0_i32_1 = arith.constant 0 : i32
    return %c0_i32, %c0_i32_0 : i32, i32
  }
  func.func @transform_5(%arg0: i32) -> (i32, i32) {
    %c0_i32 = arith.constant 0 : i32
    %c0_i32_0 = arith.constant 0 : i32
    %c0_i32_1 = arith.constant 0 : i32
    return %c0_i32, %c0_i32_0 : i32, i32
  }
}

module attributes {stable_mosaic.version = 11 : i64} {
  func.func @_conv_bn_act_kernel(%arg0: i32, %arg1: memref<288x512xf32, #tpu.memory_space<vmem>>, %arg2: memref<64x288xf32, #tpu.memory_space<vmem>>, %arg3: memref<64x1xf32, #tpu.memory_space<vmem>>, %arg4: memref<64x1xf32, #tpu.memory_space<vmem>>, %arg5: memref<64x1xf32, #tpu.memory_space<vmem>>, %arg6: memref<64x512xf32, #tpu.memory_space<vmem>>) attributes {dimension_semantics = [#tpu.dimension_semantics<arbitrary>], iteration_bounds = array<i64: 1>, scalar_prefetch = 0 : i64, scratch_operands = 0 : i64, tpu.core_type = #tpu.core_type<tc>, window_params = [{pipeline_mode = #tpu.pipeline_mode<synchronous>, transform_indices = @transform_0, window_bounds = array<i64: 288, 512>}, {pipeline_mode = #tpu.pipeline_mode<synchronous>, transform_indices = @transform_1, window_bounds = array<i64: 64, 288>}, {pipeline_mode = #tpu.pipeline_mode<synchronous>, transform_indices = @transform_2, window_bounds = array<i64: 64, 1>}, {pipeline_mode = #tpu.pipeline_mode<synchronous>, transform_indices = @transform_3, window_bounds = array<i64: 64, 1>}, {pipeline_mode = #tpu.pipeline_mode<synchronous>, transform_indices = @transform_4, window_bounds = array<i64: 64, 1>}, {pipeline_mode = #tpu.pipeline_mode<synchronous>, transform_indices = @transform_5, window_bounds = array<i64: 64, 512>}]} {
    %c0 = arith.constant 0 : index
    %c0_0 = arith.constant 0 : index
    %0 = vector.load %arg2[%c0, %c0_0] : memref<64x288xf32, #tpu.memory_space<vmem>>, vector<64x288xf32>
    %c0_1 = arith.constant 0 : index
    %c0_2 = arith.constant 0 : index
    %1 = vector.load %arg1[%c0_1, %c0_2] : memref<288x512xf32, #tpu.memory_space<vmem>>, vector<288x512xf32>
    %cst = arith.constant dense<0.000000e+00> : vector<64x512xf32>
    %2 = tpu.matmul %0, %1, %cst {dimension_numbers = #tpu.dot_dimension_numbers<[1], [0], [0], [1], [0, 0, 1, 1], [], []>} : vector<64x288xf32>, vector<288x512xf32>, vector<64x512xf32> -> vector<64x512xf32>
    %c0_3 = arith.constant 0 : index
    %c0_4 = arith.constant 0 : index
    %3 = vector.load %arg3[%c0_3, %c0_4] : memref<64x1xf32, #tpu.memory_space<vmem>>, vector<64x1xf32>
    %4 = vector.broadcast %3 : vector<64x1xf32> to vector<64x512xf32>
    %5 = arith.addf %2, %4 : vector<64x512xf32>
    %cst_5 = arith.constant dense<0.000000e+00> : vector<64xf32>
    %6 = vector.multi_reduction <add>, %5, %cst_5 [1] : vector<64x512xf32> to vector<64xf32>
    %7 = vector.shape_cast %6 : vector<64xf32> to vector<64x1xf32>
    %cst_6 = arith.constant 0.001953125 : f32
    %8 = vector.broadcast %cst_6 : f32 to vector<64x1xf32>
    %9 = arith.mulf %7, %8 : vector<64x1xf32>
    %10 = vector.broadcast %9 : vector<64x1xf32> to vector<64x512xf32>
    %11 = arith.subf %5, %10 : vector<64x512xf32>
    %12 = arith.mulf %11, %11 : vector<64x512xf32>
    %cst_7 = arith.constant dense<0.000000e+00> : vector<64xf32>
    %13 = vector.multi_reduction <add>, %12, %cst_7 [1] : vector<64x512xf32> to vector<64xf32>
    %14 = vector.shape_cast %13 : vector<64xf32> to vector<64x1xf32>
    %cst_8 = arith.constant 0.001953125 : f32
    %15 = vector.broadcast %cst_8 : f32 to vector<64x1xf32>
    %16 = arith.mulf %14, %15 : vector<64x1xf32>
    %c0_9 = arith.constant 0 : index
    %c0_10 = arith.constant 0 : index
    %17 = vector.load %arg4[%c0_9, %c0_10] : memref<64x1xf32, #tpu.memory_space<vmem>>, vector<64x1xf32>
    %cst_11 = arith.constant 9.99999974E-6 : f32
    %18 = vector.broadcast %cst_11 : f32 to vector<64x1xf32>
    %19 = arith.addf %16, %18 : vector<64x1xf32>
    %20 = math.rsqrt %19 : vector<64x1xf32>
    %21 = arith.mulf %17, %20 : vector<64x1xf32>
    %22 = vector.broadcast %21 : vector<64x1xf32> to vector<64x512xf32>
    %23 = arith.mulf %11, %22 : vector<64x512xf32>
    %c0_12 = arith.constant 0 : index
    %c0_13 = arith.constant 0 : index
    %24 = vector.load %arg5[%c0_12, %c0_13] : memref<64x1xf32, #tpu.memory_space<vmem>>, vector<64x1xf32>
    %25 = vector.broadcast %24 : vector<64x1xf32> to vector<64x512xf32>
    %26 = arith.addf %23, %25 : vector<64x512xf32>
    %cst_14 = arith.constant 0.000000e+00 : f32
    %27 = vector.broadcast %cst_14 : f32 to vector<64x512xf32>
    %28 = arith.cmpf oge, %26, %27 : vector<64x512xf32>
    %cst_15 = arith.constant 2.000000e-01 : f32
    %29 = vector.broadcast %cst_15 : f32 to vector<64x512xf32>
    %30 = arith.mulf %29, %26 : vector<64x512xf32>
    %31 = arith.select %28, %26, %30 : vector<64x512xi1>, vector<64x512xf32>
    %c0_16 = arith.constant 0 : index
    %c0_17 = arith.constant 0 : index
    %32 = vector.load %arg6[%c0_16, %c0_17] : memref<64x512xf32, #tpu.memory_space<vmem>>, vector<64x512xf32>
    tpu.vector_store %arg6[%c0_16, %c0_17], %31 {strides = array<i32>} : memref<64x512xf32, #tpu.memory_space<vmem>>, vector<64x512xf32>,
    return
  }
  func.func @transform_0(%arg0: i32) -> (i32, i32) {
    %c0_i32 = arith.constant 0 : i32
    %c0_i32_0 = arith.constant 0 : i32
    %c0_i32_1 = arith.constant 0 : i32
    return %c0_i32, %c0_i32_0 : i32, i32
  }
  func.func @transform_1(%arg0: i32) -> (i32, i32) {
    %c0_i32 = arith.constant 0 : i32
    %c0_i32_0 = arith.constant 0 : i32
    %c0_i32_1 = arith.constant 0 : i32
    return %c0_i32, %c0_i32_0 : i32, i32
  }
  func.func @transform_2(%arg0: i32) -> (i32, i32) {
    %c0_i32 = arith.constant 0 : i32
    %c0_i32_0 = arith.constant 0 : i32
    %c0_i32_1 = arith.constant 0 : i32
    return %c0_i32, %c0_i32_0 : i32, i32
  }
  func.func @transform_3(%arg0: i32) -> (i32, i32) {
    %c0_i32 = arith.constant 0 : i32
    %c0_i32_0 = arith.constant 0 : i32
    %c0_i32_1 = arith.constant 0 : i32
    return %c0_i32, %c0_i32_0 : i32, i32
  }
  func.func @transform_4(%arg0: i32) -> (i32, i32) {
    %c0_i32 = arith.constant 0 : i32
    %c0_i32_0 = arith.constant 0 : i32
    %c0_i32_1 = arith.constant 0 : i32
    return %c0_i32, %c0_i32_0 : i32, i32
  }
  func.func @transform_5(%arg0: i32) -> (i32, i32) {
    %c0_i32 = arith.constant 0 : i32
    %c0_i32_0 = arith.constant 0 : i32
    %c0_i32_1 = arith.constant 0 : i32
    return %c0_i32, %c0_i32_0 : i32, i32
  }
}

module attributes {stable_mosaic.version = 11 : i64} {
  func.func @_conv_bn_fc_sigmoid_kernel(%arg0: i32, %arg1: memref<576x128xf32, #tpu.memory_space<vmem>>, %arg2: memref<128x576xf32, #tpu.memory_space<vmem>>, %arg3: memref<128x1xf32, #tpu.memory_space<vmem>>, %arg4: memref<128x1xf32, #tpu.memory_space<vmem>>, %arg5: memref<128x1xf32, #tpu.memory_space<vmem>>, %arg6: memref<128x128xf32, #tpu.memory_space<vmem>>, %arg7: memref<128x128xf32, #tpu.memory_space<vmem>>, %arg8: memref<1x1xf32, #tpu.memory_space<vmem>>, %arg9: memref<1x128xf32, #tpu.memory_space<vmem>>) attributes {dimension_semantics = [#tpu.dimension_semantics<arbitrary>], iteration_bounds = array<i64: 1>, scalar_prefetch = 0 : i64, scratch_operands = 0 : i64, tpu.core_type = #tpu.core_type<tc>, window_params = [{pipeline_mode = #tpu.pipeline_mode<synchronous>, transform_indices = @transform_0, window_bounds = array<i64: 576, 128>}, {pipeline_mode = #tpu.pipeline_mode<synchronous>, transform_indices = @transform_1, window_bounds = array<i64: 128, 576>}, {pipeline_mode = #tpu.pipeline_mode<synchronous>, transform_indices = @transform_2, window_bounds = array<i64: 128, 1>}, {pipeline_mode = #tpu.pipeline_mode<synchronous>, transform_indices = @transform_3, window_bounds = array<i64: 128, 1>}, {pipeline_mode = #tpu.pipeline_mode<synchronous>, transform_indices = @transform_4, window_bounds = array<i64: 128, 1>}, {pipeline_mode = #tpu.pipeline_mode<synchronous>, transform_indices = @transform_5, window_bounds = array<i64: 128, 128>}, {pipeline_mode = #tpu.pipeline_mode<synchronous>, transform_indices = @transform_6, window_bounds = array<i64: 128, 128>}, {pipeline_mode = #tpu.pipeline_mode<synchronous>, transform_indices = @transform_7, window_bounds = array<i64: 1, 1>}, {pipeline_mode = #tpu.pipeline_mode<synchronous>, transform_indices = @transform_8, window_bounds = array<i64: 1, 128>}]} {
    %c0 = arith.constant 0 : index
    %c0_0 = arith.constant 0 : index
    %0 = vector.load %arg2[%c0, %c0_0] : memref<128x576xf32, #tpu.memory_space<vmem>>, vector<128x576xf32>
    %c0_1 = arith.constant 0 : index
    %c0_2 = arith.constant 0 : index
    %1 = vector.load %arg1[%c0_1, %c0_2] : memref<576x128xf32, #tpu.memory_space<vmem>>, vector<576x128xf32>
    %cst = arith.constant dense<0.000000e+00> : vector<128x128xf32>
    %2 = tpu.matmul %0, %1, %cst {dimension_numbers = #tpu.dot_dimension_numbers<[1], [0], [0], [1], [0, 0, 1, 1], [], []>} : vector<128x576xf32>, vector<576x128xf32>, vector<128x128xf32> -> vector<128x128xf32>
    %c0_3 = arith.constant 0 : index
    %c0_4 = arith.constant 0 : index
    %3 = vector.load %arg3[%c0_3, %c0_4] : memref<128x1xf32, #tpu.memory_space<vmem>>, vector<128x1xf32>
    %4 = vector.broadcast %3 : vector<128x1xf32> to vector<128x128xf32>
    %5 = arith.addf %2, %4 : vector<128x128xf32>
    %cst_5 = arith.constant dense<0.000000e+00> : vector<128xf32>
    %6 = vector.multi_reduction <add>, %5, %cst_5 [1] : vector<128x128xf32> to vector<128xf32>
    %7 = vector.shape_cast %6 : vector<128xf32> to vector<128x1xf32>
    %cst_6 = arith.constant 7.812500e-03 : f32
    %8 = vector.broadcast %cst_6 : f32 to vector<128x1xf32>
    %9 = arith.mulf %7, %8 : vector<128x1xf32>
    %10 = vector.broadcast %9 : vector<128x1xf32> to vector<128x128xf32>
    %11 = arith.subf %5, %10 : vector<128x128xf32>
    %12 = arith.mulf %11, %11 : vector<128x128xf32>
    %cst_7 = arith.constant dense<0.000000e+00> : vector<128xf32>
    %13 = vector.multi_reduction <add>, %12, %cst_7 [1] : vector<128x128xf32> to vector<128xf32>
    %14 = vector.shape_cast %13 : vector<128xf32> to vector<128x1xf32>
    %cst_8 = arith.constant 7.812500e-03 : f32
    %15 = vector.broadcast %cst_8 : f32 to vector<128x1xf32>
    %16 = arith.mulf %14, %15 : vector<128x1xf32>
    %c0_9 = arith.constant 0 : index
    %c0_10 = arith.constant 0 : index
    %17 = vector.load %arg4[%c0_9, %c0_10] : memref<128x1xf32, #tpu.memory_space<vmem>>, vector<128x1xf32>
    %cst_11 = arith.constant 9.99999974E-6 : f32
    %18 = vector.broadcast %cst_11 : f32 to vector<128x1xf32>
    %19 = arith.addf %16, %18 : vector<128x1xf32>
    %20 = math.rsqrt %19 : vector<128x1xf32>
    %21 = arith.mulf %17, %20 : vector<128x1xf32>
    %22 = vector.broadcast %21 : vector<128x1xf32> to vector<128x128xf32>
    %23 = arith.mulf %11, %22 : vector<128x128xf32>
    %c0_12 = arith.constant 0 : index
    %c0_13 = arith.constant 0 : index
    %24 = vector.load %arg5[%c0_12, %c0_13] : memref<128x1xf32, #tpu.memory_space<vmem>>, vector<128x1xf32>
    %25 = vector.broadcast %24 : vector<128x1xf32> to vector<128x128xf32>
    %26 = arith.addf %23, %25 : vector<128x128xf32>
    %cst_14 = arith.constant 0.000000e+00 : f32
    %27 = vector.broadcast %cst_14 : f32 to vector<128x128xf32>
    %28 = arith.cmpf oge, %26, %27 : vector<128x128xf32>
    %cst_15 = arith.constant 2.000000e-01 : f32
    %29 = vector.broadcast %cst_15 : f32 to vector<128x128xf32>
    %30 = arith.mulf %29, %26 : vector<128x128xf32>
    %31 = arith.select %28, %26, %30 : vector<128x128xi1>, vector<128x128xf32>
    %c0_16 = arith.constant 0 : index
    %c0_17 = arith.constant 0 : index
    %32 = vector.load %arg6[%c0_16, %c0_17] : memref<128x128xf32, #tpu.memory_space<vmem>>, vector<128x128xf32>
    %33 = arith.mulf %31, %32 : vector<128x128xf32>
    %c0_18 = arith.constant 0 : index
    %c0_19 = arith.constant 0 : index
    %34 = vector.load %arg7[%c0_18, %c0_19] : memref<128x128xf32, #tpu.memory_space<vmem>>, vector<128x128xf32>
    %cst_20 = arith.constant dense<0.000000e+00> : vector<128x128xf32>
    %35 = tpu.matmul %33, %34, %cst_20 {dimension_numbers = #tpu.dot_dimension_numbers<[1], [0], [0], [1], [0, 0, 1, 1], [], []>} : vector<128x128xf32>, vector<128x128xf32>, vector<128x128xf32> -> vector<128x128xf32>
    %cst_21 = arith.constant dense<0.000000e+00> : vector<128xf32>
    %36 = vector.multi_reduction <add>, %35, %cst_21 [0] : vector<128x128xf32> to vector<128xf32>
    %37 = vector.shape_cast %36 : vector<128xf32> to vector<1x128xf32>
    %c0_22 = arith.constant 0 : index
    %c0_23 = arith.constant 0 : index
    %38 = vector.load %arg8[%c0_22, %c0_23] : memref<1x1xf32, #tpu.memory_space<vmem>>, vector<1x1xf32>
    %39 = vector.broadcast %38 : vector<1x1xf32> to vector<1x128xf32>
    %40 = arith.addf %37, %39 : vector<1x128xf32>
    %cst_24 = arith.constant 0.000000e+00 : f32
    %41 = vector.broadcast %cst_24 : f32 to vector<1x128xf32>
    %42 = arith.subf %41, %40 : vector<1x128xf32>
    %43 = math.exp %42 : vector<1x128xf32>
    %cst_25 = arith.constant 1.000000e+00 : f32
    %44 = vector.broadcast %cst_25 : f32 to vector<1x128xf32>
    %45 = arith.addf %44, %43 : vector<1x128xf32>
    %cst_26 = arith.constant 1.000000e+00 : f32
    %46 = vector.broadcast %cst_26 : f32 to vector<1x128xf32>
    %47 = arith.divf %46, %45 : vector<1x128xf32>
    %c0_27 = arith.constant 0 : index
    %c0_28 = arith.constant 0 : index
    %48 = vector.load %arg9[%c0_27, %c0_28] : memref<1x128xf32, #tpu.memory_space<vmem>>, vector<1x128xf32>
    tpu.vector_store %arg9[%c0_27, %c0_28], %47 {strides = array<i32>} : memref<1x128xf32, #tpu.memory_space<vmem>>, vector<1x128xf32>,
    return
  }
  func.func @transform_0(%arg0: i32) -> (i32, i32) {
    %c0_i32 = arith.constant 0 : i32
    %c0_i32_0 = arith.constant 0 : i32
    %c0_i32_1 = arith.constant 0 : i32
    return %c0_i32, %c0_i32_0 : i32, i32
  }
  func.func @transform_1(%arg0: i32) -> (i32, i32) {
    %c0_i32 = arith.constant 0 : i32
    %c0_i32_0 = arith.constant 0 : i32
    %c0_i32_1 = arith.constant 0 : i32
    return %c0_i32, %c0_i32_0 : i32, i32
  }
  func.func @transform_2(%arg0: i32) -> (i32, i32) {
    %c0_i32 = arith.constant 0 : i32
    %c0_i32_0 = arith.constant 0 : i32
    %c0_i32_1 = arith.constant 0 : i32
    return %c0_i32, %c0_i32_0 : i32, i32
  }
  func.func @transform_3(%arg0: i32) -> (i32, i32) {
    %c0_i32 = arith.constant 0 : i32
    %c0_i32_0 = arith.constant 0 : i32
    %c0_i32_1 = arith.constant 0 : i32
    return %c0_i32, %c0_i32_0 : i32, i32
  }
  func.func @transform_4(%arg0: i32) -> (i32, i32) {
    %c0_i32 = arith.constant 0 : i32
    %c0_i32_0 = arith.constant 0 : i32
    %c0_i32_1 = arith.constant 0 : i32
    return %c0_i32, %c0_i32_0 : i32, i32
  }
  func.func @transform_5(%arg0: i32) -> (i32, i32) {
    %c0_i32 = arith.constant 0 : i32
    %c0_i32_0 = arith.constant 0 : i32
    %c0_i32_1 = arith.constant 0 : i32
    return %c0_i32, %c0_i32_0 : i32, i32
  }
  func.func @transform_6(%arg0: i32) -> (i32, i32) {
    %c0_i32 = arith.constant 0 : i32
    %c0_i32_0 = arith.constant 0 : i32
    %c0_i32_1 = arith.constant 0 : i32
    return %c0_i32, %c0_i32_0 : i32, i32
  }
  func.func @transform_7(%arg0: i32) -> (i32, i32) {
    %c0_i32 = arith.constant 0 : i32
    %c0_i32_0 = arith.constant 0 : i32
    %c0_i32_1 = arith.constant 0 : i32
    return %c0_i32, %c0_i32_0 : i32, i32
  }
  func.func @transform_8(%arg0: i32) -> (i32, i32) {
    %c0_i32 = arith.constant 0 : i32
    %c0_i32_0 = arith.constant 0 : i32
    %c0_i32_1 = arith.constant 0 : i32
    return %c0_i32, %c0_i32_0 : i32, i32
  }
}

</mosaic_0001>

<bundles_post_ra>
// kernel: discriminator_forward.4
= control target key start
LH: loop header
LB: loop body
LE: loop exit
PB: predicated region body
PF: predicated region fallthrough
CT: control target
= control target key end

     0   :  { %s2700_s12 = smov 0   ;;  %s2702_s13 = smov 0   ;;  %s3607_s0 = inlined_call_operand.vmem [shape: f32[27,8192], index: 0, kind: input, shape index: {}]   ;;  %s3608_s1 = inlined_call_operand.vmem [shape: f32[16,27], index: 1, kind: input, shape index: {}]   ;;  %s3609_s2 = inlined_call_operand.vmem [shape: f32[16,1], index: 2, kind: input, shape index: {}]   ;;  %s3610_s3 = inlined_call_operand.vmem [shape: f32[16,8192], index: 3, kind: output, shape index: {}]  }
   0x1   :  { %s2704_s14 = smov 0  }
   0x2 LB: > { %s2384_s15 = sadd.s32 4294967295, %s2675_s14   ;;  %s2717_s16 = sadd.s32 1, %s2675_s14   ;;  %s2675_s14 = sphi %s2704_s14, %s3616_s14   ;;  %s2671_s13 = sphi %s2702_s13, %s3615_s13   ;;  %s2667_s12 = sphi %s2700_s12, %s3614_s12  }
   0x3   : > { %s17_s17 = ssub.s32 %s2675_s14, %s2717_s16  ;;  %s20_s18 = sadd.s32 1, %s2671_s13 }
   0x4   : > { %p18_p0 = scmp.eq.s32.totalorder %s17_s17, 0  ;;  %p27_p1 = scmp.ne.s32.totalorder %s2671_s13, %s2667_s12 }
   0x5   : > { %p28_p2 = scmp.eq.s32.totalorder %s2675_s14, 0  ;;  %p99_p3 = scmp.eq.s32.totalorder %s2384_s15, 1 }
   0x6   : > { %s2728_s19 = scalar_select %p18_p0, %s2671_s13, %s20_s18  }
   0x7   : > { %p29_p4 = por %p28_p2, %p27_p1  ;;  %p2730_p5 = por %p99_p3, %p27_p1 }
   0x8   : > { %p2387_p6 = scmp.ge.s32.totalorder %s2675_s14, 2 }
   0xa   : > { %127 = sbr.rel (%p2387_p6) target bundleno = 85 (0x55), region = 24 }
  0x11   : > { %130 = sbr.rel (!%p29_p4) target bundleno = 85 (0x55), region = 28  ;;  %s132_s21 = sand.u32 (%p29_p4), 1, %s2671_s13  }
  0x12   : > { %s2463_s22 = sshll.u32 (%p29_p4), %s2675_s14, 8  ;;  %s2388_s23 = sshll.u32 (%p29_p4), %s132_s21, 10 }
  0x13   : > { %s2740_s26 = scalar_lea.vmem (%p29_p4), %s3607_s0, %s2463_s22  ;;  %s2745_s27 = scalar_lea.vmem (%p29_p4), [#allocation2], %s2388_s23 }
  0x14   : > { %v150_v0 = vld [vmem:[%s2740_s26] sm:$0xff] (%p29_p4)  ;;  %v152_v1 = vld [vmem:[%s2740_s26 + $0x8] sm:$0xff] (%p29_p4)  ;;  %v154_v2 = vld [vmem:[%s2740_s26 + $0x10] sm:$0xff] (%p29_p4) }
  0x15   : > { %151 = vst [vmem:[%s2745_s27] sm:$0xff] (%p29_p4), %v150_v0  ;;  %153 = vst [vmem:[%s2745_s27 + $0x8] sm:$0xff] (%p29_p4), %v152_v1  ;;  %v156_v3 = vld [vmem:[%s2740_s26 + $0x18] sm:$0xff] (%p29_p4)  ;;  %v158_v4 = vld [vmem:[%s2740_s26 + $0x20] sm:$0xff] (%p29_p4) }
  0x16   : > { %155 = vst [vmem:[%s2745_s27 + $0x10] sm:$0xff] (%p29_p4), %v154_v2  ;;  %v160_v5 = vld [vmem:[%s2740_s26 + $0x28] sm:$0xff] (%p29_p4)  ;;  %157 = vst [vmem:[%s2745_s27 + $0x18] sm:$0xff] (%p29_p4), %v156_v3  ;;  %v162_v6 = vld [vmem:[%s2740_s26 + $0x30] sm:$0xff] (%p29_p4) }
  0x17   : > { %159 = vst [vmem:[%s2745_s27 + $0x20] sm:$0xff] (%p29_p4), %v158_v4  ;;  %161 = vst [vmem:[%s2745_s27 + $0x28] sm:$0xff] (%p29_p4), %v160_v5  ;;  %v164_v7 = vld [vmem:[%s2740_s26 + $0x38] sm:$0xff] (%p29_p4)  ;;  %v166_v8 = vld [vmem:[%s2740_s26 + $0x40] sm:$0xff] (%p29_p4) }
  0x18   : > { %163 = vst [vmem:[%s2745_s27 + $0x30] sm:$0xff] %v162_v6  ;;  %165 = vst [vmem:[%s2745_s27 + $0x38] sm:$0xff] %v164_v7  ;;  %v168_v9 = vld [vmem:[%s2740_s26 + $0x48] sm:$0xff]  ;;  %v170_v10 = vld [vmem:[%s2740_s26 + $0x50] sm:$0xff] }
  0x19   : > { %167 = vst [vmem:[%s2745_s27 + $0x40] sm:$0xff] %v166_v8  ;;  %v172_v11 = vld [vmem:[%s2740_s26 + $0x58] sm:$0xff]  ;;  %169 = vst [vmem:[%s2745_s27 + $0x48] sm:$0xff] %v168_v9  ;;  %v174_v12 = vld [vmem:[%s2740_s26 + $0x60] sm:$0xff] }
  0x1a   : > { %171 = vst [vmem:[%s2745_s27 + $0x50] sm:$0xff] %v170_v10  ;;  %173 = vst [vmem:[%s2745_s27 + $0x58] sm:$0xff] %v172_v11  ;;  %v176_v13 = vld [vmem:[%s2740_s26 + $0x68] sm:$0xff]  ;;  %v178_v14 = vld [vmem:[%s2740_s26 + $0x70] sm:$0xff] }
  0x1b   : > { %175 = vst [vmem:[%s2745_s27 + $0x60] sm:$0xff] %v174_v12  ;;  %177 = vst [vmem:[%s2745_s27 + $0x68] sm:$0xff] %v176_v13  ;;  %v180_v15 = vld [vmem:[%s2740_s26 + $0x78] sm:$0xff]  ;;  %v182_v16 = vld [vmem:[%s2740_s26 + $0x80] sm:$0xff] }
  0x1c   : > { %179 = vst [vmem:[%s2745_s27 + $0x70] sm:$0xff] %v178_v14  ;;  %v184_v17 = vld [vmem:[%s2740_s26 + $0x88] sm:$0xff]  ;;  %181 = vst [vmem:[%s2745_s27 + $0x78] sm:$0xff] %v180_v15  ;;  %v186_v18 = vld [vmem:[%s2740_s26 + $0x90] sm:$0xff] }
  0x1d   : > { %183 = vst [vmem:[%s2745_s27 + $0x80] sm:$0xff] %v182_v16  ;;  %185 = vst [vmem:[%s2745_s27 + $0x88] sm:$0xff] %v184_v17  ;;  %v188_v19 = vld [vmem:[%s2740_s26 + $0x98] sm:$0xff]  ;;  %v190_v20 = vld [vmem:[%s2740_s26 + $0xa0] sm:$0xff] }
  0x1e   : > { %187 = vst [vmem:[%s2745_s27 + $0x90] sm:$0xff] %v186_v18  ;;  %189 = vst [vmem:[%s2745_s27 + $0x98] sm:$0xff] %v188_v19  ;;  %v192_v21 = vld [vmem:[%s2740_s26 + $0xa8] sm:$0xff]  ;;  %v194_v22 = vld [vmem:[%s2740_s26 + $0xb0] sm:$0xff] }
  0x1f   : > { %191 = vst [vmem:[%s2745_s27 + $0xa0] sm:$0xff] %v190_v20  ;;  %v196_v23 = vld [vmem:[%s2740_s26 + $0xb8] sm:$0xff]  ;;  %193 = vst [vmem:[%s2745_s27 + $0xa8] sm:$0xff] %v192_v21  ;;  %v198_v24 = vld [vmem:[%s2740_s26 + $0xc0] sm:$0xff] }
  0x20   : > { %195 = vst [vmem:[%s2745_s27 + $0xb0] sm:$0xff] %v194_v22  ;;  %197 = vst [vmem:[%s2745_s27 + $0xb8] sm:$0xff] %v196_v23  ;;  %v200_v25 = vld [vmem:[%s2740_s26 + $0xc8] sm:$0xff]  ;;  %v202_v26 = vld [vmem:[%s2740_s26 + $0xd0] sm:$0xff] }
  0x21   : > { %199 = vst [vmem:[%s2745_s27 + $0xc0] sm:$0xff] %v198_v24  ;;  %201 = vst [vmem:[%s2745_s27 + $0xc8] sm:$0xff] %v200_v25  ;;  %v204_v27 = vld [vmem:[%s2740_s26 + $0xd8] sm:$0xff]  ;;  %v206_v28 = vld [vmem:[%s2740_s26 + $0xe0] sm:$0xff] }
  0x22   : > { %203 = vst [vmem:[%s2745_s27 + $0xd0] sm:$0xff] %v202_v26  ;;  %v208_v29 = vld [vmem:[%s2740_s26 + $0xe8] sm:$0xff]  ;;  %205 = vst [vmem:[%s2745_s27 + $0xd8] sm:$0xff] %v204_v27  ;;  %v210_v30 = vld [vmem:[%s2740_s26 + $0xf0] sm:$0xff] }
  0x23   : > { %207 = vst [vmem:[%s2745_s27 + $0xe0] sm:$0xff] %v206_v28  ;;  %209 = vst [vmem:[%s2745_s27 + $0xe8] sm:$0xff] %v208_v29  ;;  %v212_v31 = vld [vmem:[%s2740_s26 + $0xf8] sm:$0xff]  ;;  %v214_v32 = vld [vmem:[%s2740_s26 + $0x200] sm:$0xff] }
  0x24   : > { %211 = vst [vmem:[%s2745_s27 + $0xf0] sm:$0xff] %v210_v30  ;;  %213 = vst [vmem:[%s2745_s27 + $0xf8] sm:$0xff] %v212_v31  ;;  %v216_v33 = vld [vmem:[%s2740_s26 + $0x208] sm:$0xff]  ;;  %v218_v34 = vld [vmem:[%s2740_s26 + $0x210] sm:$0xff] }
  0x25   : > { %215 = vst [vmem:[%s2745_s27 + $0x100] sm:$0xff] %v214_v32  ;;  %v220_v35 = vld [vmem:[%s2740_s26 + $0x218] sm:$0xff]  ;;  %217 = vst [vmem:[%s2745_s27 + $0x108] sm:$0xff] %v216_v33  ;;  %v222_v36 = vld [vmem:[%s2740_s26 + $0x220] sm:$0xff] }
  0x26   : > { %219 = vst [vmem:[%s2745_s27 + $0x110] sm:$0xff] %v218_v34  ;;  %221 = vst [vmem:[%s2745_s27 + $0x118] sm:$0xff] %v220_v35  ;;  %v224_v37 = vld [vmem:[%s2740_s26 + $0x228] sm:$0xff]  ;;  %v226_v38 = vld [vmem:[%s2740_s26 + $0x230] sm:$0xff] }
  0x27   : > { %223 = vst [vmem:[%s2745_s27 + $0x120] sm:$0xff] %v222_v36  ;;  %225 = vst [vmem:[%s2745_s27 + $0x128] sm:$0xff] %v224_v37  ;;  %v228_v39 = vld [vmem:[%s2740_s26 + $0x238] sm:$0xff]  ;;  %v230_v40 = vld [vmem:[%s2740_s26 + $0x240] sm:$0xff] }
  0x28   : > { %227 = vst [vmem:[%s2745_s27 + $0x130] sm:$0xff] %v226_v38  ;;  %v232_v41 = vld [vmem:[%s2740_s26 + $0x248] sm:$0xff]  ;;  %229 = vst [vmem:[%s2745_s27 + $0x138] sm:$0xff] %v228_v39  ;;  %v234_v42 = vld [vmem:[%s2740_s26 + $0x250] sm:$0xff] }
  0x29   : > { %231 = vst [vmem:[%s2745_s27 + $0x140] sm:$0xff] %v230_v40  ;;  %233 = vst [vmem:[%s2745_s27 + $0x148] sm:$0xff] %v232_v41  ;;  %v236_v43 = vld [vmem:[%s2740_s26 + $0x258] sm:$0xff]  ;;  %v238_v44 = vld [vmem:[%s2740_s26 + $0x260] sm:$0xff] }
  0x2a   : > { %235 = vst [vmem:[%s2745_s27 + $0x150] sm:$0xff] %v234_v42  ;;  %237 = vst [vmem:[%s2745_s27 + $0x158] sm:$0xff] %v236_v43  ;;  %v240_v45 = vld [vmem:[%s2740_s26 + $0x268] sm:$0xff]  ;;  %v242_v46 = vld [vmem:[%s2740_s26 + $0x270] sm:$0xff] }
  0x2b   : > { %239 = vst [vmem:[%s2745_s27 + $0x160] sm:$0xff] %v238_v44  ;;  %v244_v47 = vld [vmem:[%s2740_s26 + $0x278] sm:$0xff]  ;;  %241 = vst [vmem:[%s2745_s27 + $0x168] sm:$0xff] %v240_v45  ;;  %v246_v48 = vld [vmem:[%s2740_s26 + $0x280] sm:$0xff] }
  0x2c   : > { %243 = vst [vmem:[%s2745_s27 + $0x170] sm:$0xff] %v242_v46  ;;  %245 = vst [vmem:[%s2745_s27 + $0x178] sm:$0xff] %v244_v47  ;;  %v248_v49 = vld [vmem:[%s2740_s26 + $0x288] sm:$0xff]  ;;  %v250_v50 = vld [vmem:[%s2740_s26 + $0x290] sm:$0xff] }
  0x2d   : > { %247 = vst [vmem:[%s2745_s27 + $0x180] sm:$0xff] %v246_v48  ;;  %249 = vst [vmem:[%s2745_s27 + $0x188] sm:$0xff] %v248_v49  ;;  %v252_v51 = vld [vmem:[%s2740_s26 + $0x298] sm:$0xff]  ;;  %v254_v52 = vld [vmem:[%s2740_s26 + $0x2a0] sm:$0xff] }
  0x2e   : > { %251 = vst [vmem:[%s2745_s27 + $0x190] sm:$0xff] %v250_v50  ;;  %v256_v53 = vld [vmem:[%s2740_s26 + $0x2a8] sm:$0xff]  ;;  %253 = vst [vmem:[%s2745_s27 + $0x198] sm:$0xff] %v252_v51  ;;  %v258_v54 = vld [vmem:[%s2740_s26 + $0x2b0] sm:$0xff] }
  0x2f   : > { %255 = vst [vmem:[%s2745_s27 + $0x1a0] sm:$0xff] %v254_v52  ;;  %257 = vst [vmem:[%s2745_s27 + $0x1a8] sm:$0xff] %v256_v53  ;;  %v260_v55 = vld [vmem:[%s2740_s26 + $0x2b8] sm:$0xff]  ;;  %v262_v56 = vld [vmem:[%s2740_s26 + $0x2c0] sm:$0xff] }
  0x30   : > { %259 = vst [vmem:[%s2745_s27 + $0x1b0] sm:$0xff] %v258_v54  ;;  %261 = vst [vmem:[%s2745_s27 + $0x1b8] sm:$0xff] %v260_v55  ;;  %v264_v57 = vld [vmem:[%s2740_s26 + $0x2c8] sm:$0xff]  ;;  %v266_v58 = vld [vmem:[%s2740_s26 + $0x2d0] sm:$0xff] }
  0x31   : > { %263 = vst [vmem:[%s2745_s27 + $0x1c0] sm:$0xff] %v262_v56  ;;  %v268_v59 = vld [vmem:[%s2740_s26 + $0x2d8] sm:$0xff]  ;;  %265 = vst [vmem:[%s2745_s27 + $0x1c8] sm:$0xff] %v264_v57  ;;  %v270_v60 = vld [vmem:[%s2740_s26 + $0x2e0] sm:$0xff] }
  0x32   : > { %267 = vst [vmem:[%s2745_s27 + $0x1d0] sm:$0xff] %v266_v58  ;;  %269 = vst [vmem:[%s2745_s27 + $0x1d8] sm:$0xff] %v268_v59  ;;  %v272_v61 = vld [vmem:[%s2740_s26 + $0x2e8] sm:$0xff]  ;;  %v274_v62 = vld [vmem:[%s2740_s26 + $0x2f0] sm:$0xff] }
  0x33   : > { %271 = vst [vmem:[%s2745_s27 + $0x1e0] sm:$0xff] %v270_v60  ;;  %273 = vst [vmem:[%s2745_s27 + $0x1e8] sm:$0xff] %v272_v61  ;;  %v276_v63 = vld [vmem:[%s2740_s26 + $0x2f8] sm:$0xff]  ;;  %v278_v0 = vld [vmem:[%s2740_s26 + $0x400] sm:$0xff] }
  0x34   : > { %275 = vst [vmem:[%s2745_s27 + $0x1f0] sm:$0xff] %v274_v62  ;;  %v280_v1 = vld [vmem:[%s2740_s26 + $0x408] sm:$0xff]  ;;  %277 = vst [vmem:[%s2745_s27 + $0x1f8] sm:$0xff] %v276_v63  ;;  %v282_v2 = vld [vmem:[%s2740_s26 + $0x410] sm:$0xff] }
  0x35   : > { %279 = vst [vmem:[%s2745_s27 + $0x200] sm:$0xff] %v278_v0  ;;  %281 = vst [vmem:[%s2745_s27 + $0x208] sm:$0xff] %v280_v1  ;;  %v284_v3 = vld [vmem:[%s2740_s26 + $0x418] sm:$0xff]  ;;  %v286_v4 = vld [vmem:[%s2740_s26 + $0x420] sm:$0xff] }
  0x36   : > { %283 = vst [vmem:[%s2745_s27 + $0x210] sm:$0xff] %v282_v2  ;;  %285 = vst [vmem:[%s2745_s27 + $0x218] sm:$0xff] %v284_v3  ;;  %v288_v5 = vld [vmem:[%s2740_s26 + $0x428] sm:$0xff]  ;;  %v290_v6 = vld [vmem:[%s2740_s26 + $0x430] sm:$0xff] }
  0x37   : > { %287 = vst [vmem:[%s2745_s27 + $0x220] sm:$0xff] %v286_v4  ;;  %v292_v7 = vld [vmem:[%s2740_s26 + $0x438] sm:$0xff]  ;;  %289 = vst [vmem:[%s2745_s27 + $0x228] sm:$0xff] %v288_v5  ;;  %v294_v8 = vld [vmem:[%s2740_s26 + $0x440] sm:$0xff] }
  0x38   : > { %291 = vst [vmem:[%s2745_s27 + $0x230] sm:$0xff] %v290_v6  ;;  %293 = vst [vmem:[%s2745_s27 + $0x238] sm:$0xff] %v292_v7  ;;  %v296_v9 = vld [vmem:[%s2740_s26 + $0x448] sm:$0xff]  ;;  %v298_v10 = vld [vmem:[%s2740_s26 + $0x450] sm:$0xff] }
  0x39   : > { %295 = vst [vmem:[%s2745_s27 + $0x240] sm:$0xff] %v294_v8  ;;  %297 = vst [vmem:[%s2745_s27 + $0x248] sm:$0xff] %v296_v9  ;;  %v300_v11 = vld [vmem:[%s2740_s26 + $0x458] sm:$0xff]  ;;  %v302_v12 = vld [vmem:[%s2740_s26 + $0x460] sm:$0xff] }
  0x3a   : > { %299 = vst [vmem:[%s2745_s27 + $0x250] sm:$0xff] %v298_v10  ;;  %v304_v13 = vld [vmem:[%s2740_s26 + $0x468] sm:$0xff]  ;;  %301 = vst [vmem:[%s2745_s27 + $0x258] sm:$0xff] %v300_v11  ;;  %v306_v14 = vld [vmem:[%s2740_s26 + $0x470] sm:$0xff] }
  0x3b   : > { %303 = vst [vmem:[%s2745_s27 + $0x260] sm:$0xff] %v302_v12  ;;  %305 = vst [vmem:[%s2745_s27 + $0x268] sm:$0xff] %v304_v13  ;;  %v308_v15 = vld [vmem:[%s2740_s26 + $0x478] sm:$0xff]  ;;  %v310_v16 = vld [vmem:[%s2740_s26 + $0x480] sm:$0xff] }
  0x3c   : > { %307 = vst [vmem:[%s2745_s27 + $0x270] sm:$0xff] %v306_v14  ;;  %309 = vst [vmem:[%s2745_s27 + $0x278] sm:$0xff] %v308_v15  ;;  %v312_v17 = vld [vmem:[%s2740_s26 + $0x488] sm:$0xff]  ;;  %v314_v18 = vld [vmem:[%s2740_s26 + $0x490] sm:$0xff] }
  0x3d   : > { %311 = vst [vmem:[%s2745_s27 + $0x280] sm:$0xff] %v310_v16  ;;  %v316_v19 = vld [vmem:[%s2740_s26 + $0x498] sm:$0xff]  ;;  %313 = vst [vmem:[%s2745_s27 + $0x288] sm:$0xff] %v312_v17  ;;  %v318_v20 = vld [vmem:[%s2740_s26 + $0x4a0] sm:$0xff] }
  0x3e   : > { %315 = vst [vmem:[%s2745_s27 + $0x290] sm:$0xff] %v314_v18  ;;  %317 = vst [vmem:[%s2745_s27 + $0x298] sm:$0xff] %v316_v19  ;;  %v320_v21 = vld [vmem:[%s2740_s26 + $0x4a8] sm:$0xff]  ;;  %v322_v22 = vld [vmem:[%s2740_s26 + $0x4b0] sm:$0xff] }
  0x3f   : > { %319 = vst [vmem:[%s2745_s27 + $0x2a0] sm:$0xff] %v318_v20  ;;  %321 = vst [vmem:[%s2745_s27 + $0x2a8] sm:$0xff] %v320_v21  ;;  %v324_v23 = vld [vmem:[%s2740_s26 + $0x4b8] sm:$0xff]  ;;  %v326_v24 = vld [vmem:[%s2740_s26 + $0x4c0] sm:$0xff] }
  0x40   : > { %323 = vst [vmem:[%s2745_s27 + $0x2b0] sm:$0xff] %v322_v22  ;;  %v328_v25 = vld [vmem:[%s2740_s26 + $0x4c8] sm:$0xff]  ;;  %325 = vst [vmem:[%s2745_s27 + $0x2b8] sm:$0xff] %v324_v23  ;;  %v330_v26 = vld [vmem:[%s2740_s26 + $0x4d0] sm:$0xff] }
  0x41   : > { %327 = vst [vmem:[%s2745_s27 + $0x2c0] sm:$0xff] %v326_v24  ;;  %329 = vst [vmem:[%s2745_s27 + $0x2c8] sm:$0xff] %v328_v25  ;;  %v332_v27 = vld [vmem:[%s2740_s26 + $0x4d8] sm:$0xff]  ;;  %v334_v28 = vld [vmem:[%s2740_s26 + $0x4e0] sm:$0xff] }
  0x42   : > { %331 = vst [vmem:[%s2745_s27 + $0x2d0] sm:$0xff] %v330_v26  ;;  %333 = vst [vmem:[%s2745_s27 + $0x2d8] sm:$0xff] %v332_v27  ;;  %v336_v29 = vld [vmem:[%s2740_s26 + $0x4e8] sm:$0xff]  ;;  %v338_v30 = vld [vmem:[%s2740_s26 + $0x4f0] sm:$0xff] }
  0x43   : > { %335 = vst [vmem:[%s2745_s27 + $0x2e0] sm:$0xff] %v334_v28  ;;  %v340_v31 = vld [vmem:[%s2740_s26 + $0x4f8] sm:$0xff]  ;;  %337 = vst [vmem:[%s2745_s27 + $0x2e8] sm:$0xff] %v336_v29  ;;  %v342_v32 = vld [vmem:[%s2740_s26 + $0x600] sm:$0xff] }
  0x44   : > { %339 = vst [vmem:[%s2745_s27 + $0x2f0] sm:$0xff] %v338_v30  ;;  %341 = vst [vmem:[%s2745_s27 + $0x2f8] sm:$0xff] %v340_v31  ;;  %v344_v33 = vld [vmem:[%s2740_s26 + $0x608] sm:$0xff]  ;;  %v346_v34 = vld [vmem:[%s2740_s26 + $0x610] sm:$0xff] }
  0x45   : > { %343 = vst [vmem:[%s2745_s27 + $0x300] sm:$0xff] %v342_v32  ;;  %345 = vst [vmem:[%s2745_s27 + $0x308] sm:$0xff] %v344_v33  ;;  %v348_v35 = vld [vmem:[%s2740_s26 + $0x618] sm:$0xff]  ;;  %v350_v36 = vld [vmem:[%s2740_s26 + $0x620] sm:$0xff] }
  0x46   : > { %347 = vst [vmem:[%s2745_s27 + $0x310] sm:$0xff] %v346_v34  ;;  %v352_v37 = vld [vmem:[%s2740_s26 + $0x628] sm:$0xff]  ;;  %349 = vst [vmem:[%s2745_s27 + $0x318] sm:$0xff] %v348_v35  ;;  %v354_v38 = vld [vmem:[%s2740_s26 + $0x630] sm:$0xff] }
  0x47   : > { %351 = vst [vmem:[%s2745_s27 + $0x320] sm:$0xff] %v350_v36  ;;  %353 = vst [vmem:[%s2745_s27 + $0x328] sm:$0xff] %v352_v37  ;;  %v356_v39 = vld [vmem:[%s2740_s26 + $0x638] sm:$0xff]  ;;  %v358_v40 = vld [vmem:[%s2740_s26 + $0x640] sm:$0xff] }
  0x48   : > { %355 = vst [vmem:[%s2745_s27 + $0x330] sm:$0xff] %v354_v38  ;;  %357 = vst [vmem:[%s2745_s27 + $0x338] sm:$0xff] %v356_v39  ;;  %v360_v41 = vld [vmem:[%s2740_s26 + $0x648] sm:$0xff]  ;;  %v362_v42 = vld [vmem:[%s2740_s26 + $0x650] sm:$0xff] }
  0x49   : > { %359 = vst [vmem:[%s2745_s27 + $0x340] sm:$0xff] %v358_v40  ;;  %v364_v43 = vld [vmem:[%s2740_s26 + $0x658] sm:$0xff]  ;;  %361 = vst [vmem:[%s2745_s27 + $0x348] sm:$0xff] %v360_v41  ;;  %v366_v44 = vld [vmem:[%s2740_s26 + $0x660] sm:$0xff] }
  0x4a   : > { %363 = vst [vmem:[%s2745_s27 + $0x350] sm:$0xff] %v362_v42  ;;  %365 = vst [vmem:[%s2745_s27 + $0x358] sm:$0xff] %v364_v43  ;;  %v368_v45 = vld [vmem:[%s2740_s26 + $0x668] sm:$0xff]  ;;  %v370_v46 = vld [vmem:[%s2740_s26 + $0x670] sm:$0xff] }
  0x4b   : > { %367 = vst [vmem:[%s2745_s27 + $0x360] sm:$0xff] %v366_v44  ;;  %369 = vst [vmem:[%s2745_s27 + $0x368] sm:$0xff] %v368_v45  ;;  %v372_v47 = vld [vmem:[%s2740_s26 + $0x678] sm:$0xff]  ;;  %v374_v48 = vld [vmem:[%s2740_s26 + $0x680] sm:$0xff] }
  0x4c   : > { %371 = vst [vmem:[%s2745_s27 + $0x370] sm:$0xff] %v370_v46  ;;  %v376_v49 = vld [vmem:[%s2740_s26 + $0x688] sm:$0xff]  ;;  %373 = vst [vmem:[%s2745_s27 + $0x378] sm:$0xff] %v372_v47  ;;  %v378_v50 = vld [vmem:[%s2740_s26 + $0x690] sm:$0xff] }
  0x4d   : > { %375 = vst [vmem:[%s2745_s27 + $0x380] sm:$0xff] %v374_v48  ;;  %377 = vst [vmem:[%s2745_s27 + $0x388] sm:$0xff] %v376_v49  ;;  %v380_v51 = vld [vmem:[%s2740_s26 + $0x698] sm:$0xff]  ;;  %v382_v52 = vld [vmem:[%s2740_s26 + $0x6a0] sm:$0xff] }
  0x4e   : > { %379 = vst [vmem:[%s2745_s27 + $0x390] sm:$0xff] %v378_v50  ;;  %381 = vst [vmem:[%s2745_s27 + $0x398] sm:$0xff] %v380_v51  ;;  %v384_v53 = vld [vmem:[%s2740_s26 + $0x6a8] sm:$0xff]  ;;  %v386_v54 = vld [vmem:[%s2740_s26 + $0x6b0] sm:$0xff] }
  0x4f   : > { %383 = vst [vmem:[%s2745_s27 + $0x3a0] sm:$0xff] %v382_v52  ;;  %v388_v55 = vld [vmem:[%s2740_s26 + $0x6b8] sm:$0xff]  ;;  %385 = vst [vmem:[%s2745_s27 + $0x3a8] sm:$0xff] %v384_v53  ;;  %v390_v56 = vld [vmem:[%s2740_s26 + $0x6c0] sm:$0xff] }
  0x50   : > { %387 = vst [vmem:[%s2745_s27 + $0x3b0] sm:$0xff] %v386_v54  ;;  %389 = vst [vmem:[%s2745_s27 + $0x3b8] sm:$0xff] %v388_v55  ;;  %v392_v57 = vld [vmem:[%s2740_s26 + $0x6c8] sm:$0xff]  ;;  %v394_v58 = vld [vmem:[%s2740_s26 + $0x6d0] sm:$0xff] }
  0x51   : > { %391 = vst [vmem:[%s2745_s27 + $0x3c0] sm:$0xff] %v390_v56  ;;  %393 = vst [vmem:[%s2745_s27 + $0x3c8] sm:$0xff] %v392_v57  ;;  %v396_v59 = vld [vmem:[%s2740_s26 + $0x6d8] sm:$0xff]  ;;  %v398_v60 = vld [vmem:[%s2740_s26 + $0x6e0] sm:$0xff] }
  0x52   : > { %395 = vst [vmem:[%s2745_s27 + $0x3d0] sm:$0xff] %v394_v58  ;;  %v400_v61 = vld [vmem:[%s2740_s26 + $0x6e8] sm:$0xff]  ;;  %397 = vst [vmem:[%s2745_s27 + $0x3d8] sm:$0xff] %v396_v59  ;;  %v402_v62 = vld [vmem:[%s2740_s26 + $0x6f0] sm:$0xff] }
  0x53   : > { %399 = vst [vmem:[%s2745_s27 + $0x3e0] sm:$0xff] %v398_v60  ;;  %401 = vst [vmem:[%s2745_s27 + $0x3e8] sm:$0xff] %v400_v61  ;;  %v404_v63 = vld [vmem:[%s2740_s26 + $0x6f8] sm:$0xff] }
  0x54   : > { %403 = vst [vmem:[%s2745_s27 + $0x3f0] sm:$0xff] %v402_v62  ;;  %405 = vst [vmem:[%s2745_s27 + $0x3f8] sm:$0xff] %v404_v63 }
  0x55 PF: > { %p2391_p7 = scmp.ge.s32.totalorder %s2675_s14, 1  ;;  %p410_p8 = scmp.lt.s32.totalorder %s2675_s14, 3 }
  0x57   : > { %p411_p9 = pnand %p2391_p7, %p410_p8 }
  0x58   : > { %s417_s28 = sand.u32 (!%p411_p9), 1, %s2667_s12   ;;  %vm590_vm0 = vcmask (!%p411_p9), 1042432   ;;  %v2677_v0 = vmov (!%p411_p9), 0.0   ;;  %v571_v1 = vld [vmem:[%s3609_s2] sm:$0xff] (!%p411_p9)  ;;  %vm2678_vm1 = vmmov (!%p411_p9), 1   ;;  %v2679_v3 = vmov (!%p411_p9), 0  }
  0x59   : > { %414 = sbr.rel (%p411_p9) target bundleno = 413 (0x19d), region = 51  ;;  %s2392_s29 = sshll.u32 (!%p411_p9), %s417_s28, 10  ;;  %751 = vmatprep.mubr.f32.mxu0 (!%p411_p9), %v2677_v0  ;;  %828 = vmatprep.mubr.f32.mxu1 (!%p411_p9), %v2677_v0  ;;  %vm3010_vm2 = vmpackc.low (!%p411_p9), %vm590_vm0, %vm2678_vm1  ;;  %v572_v7 = vld [vmem:[%s3609_s2 + $0x8] sm:$0xff] (!%p411_p9)  ;;  %v3044_v31 = vld [vmem:[%s3608_s1] sm:$0xff] (!%p411_p9)  ;;  %vm583_vm3 = vcmask (!%p411_p9), 220160  }
  0x5a   : > { %2652 = vset.pattern.permute.xlu0 (!%p411_p9), %v2679_v3  ;;  %s3014_s5 = scalar_lea.vmem (!%p411_p9), [#allocation2], %s2392_s29  ;;  %v3073_v54 = vld [vmem:[%s3608_s1 + $0x8] sm:$0xff] (!%p411_p9)  ;;  %s2393_s17 = sshll.u32 (!%p411_p9), %s417_s28, 9 }
  0x5b   : > { %v444_v4 = vld [vmem:[%s3014_s5 + $0x8] sm:$0xff] (!%p411_p9)  ;;  %v446_v6 = vld [vmem:[%s3014_s5 + $0x18] sm:$0xff] (!%p411_p9)  ;;  %575 = vperm.xlu0 (!%p411_p9), %2652, %v571_v1   ;;  %v443_v10 = vld [vmem:[%s3014_s5] sm:$0xff] (!%p411_p9)  ;;  %s3325_s12 = scalar_lea.vmem (!%p411_p9), [#allocation3], %s2393_s17 }
  0x5c   : > { %v476_v5 = vld [vmem:[%s3014_s5 + $0x108] sm:$0xff] (!%p411_p9)  ;;  %v478_v9 = vld [vmem:[%s3014_s5 + $0x118] sm:$0xff] (!%p411_p9)  ;;  %v475_v11 = vld [vmem:[%s3014_s5 + $0x100] sm:$0xff] (!%p411_p9) }
  0x5d   : > { %v2465_v8 = vpack.c.bf16 (!%p411_p9), %v476_v5, %v444_v4  ;;  %v2475_v12 = vpack.c.bf16 (!%p411_p9), %v478_v9, %v446_v6  ;;  %v2467_v13 = vpack.c.bf16 (!%p411_p9), %v475_v11, %v443_v10  ;;  %v445_v14 = vld [vmem:[%s3014_s5 + $0x10] sm:$0xff] (!%p411_p9)  ;;  %v508_v16 = vld [vmem:[%s3014_s5 + $0x208] sm:$0xff] (!%p411_p9)  ;;  %v510_v19 = vld [vmem:[%s3014_s5 + $0x218] sm:$0xff] (!%p411_p9) }
  0x5e   : > { %v477_v15 = vld [vmem:[%s3014_s5 + $0x110] sm:$0xff] (!%p411_p9)  ;;  %v540_v18 = vld [vmem:[%s3014_s5 + $0x308] sm:$0x7] (!%p411_p9)  ;;  %v542_v20 = vld [vmem:[%s3014_s5 + $0x318] sm:$0x7] (!%p411_p9) }
  0x5f   : > { %2466 = vmatprep.subr.bf16.mxu0 (!%p411_p9), %v2465_v8  ;;  %v2477_v17 = vpack.c.bf16 (!%p411_p9), %v477_v15, %v445_v14  ;;  %2476 = vmatprep.subr.bf16.mxu1 (!%p411_p9), %v2475_v12  ;;  %v2469_v21 = vpack.c.bf16 (!%p411_p9), %v540_v18, %v508_v16  ;;  %v2479_v22 = vpack.c.bf16 (!%p411_p9), %v542_v20, %v510_v19  ;;  %v507_v23 = vld [vmem:[%s3014_s5 + $0x200] sm:$0xff] (!%p411_p9)  ;;  %v509_v25 = vld [vmem:[%s3014_s5 + $0x210] sm:$0xff] (!%p411_p9)  ;;  %v448_v28 = vld [vmem:[%s3014_s5 + $0x28] sm:$0xff] (!%p411_p9) }
  0x60   : > { %2468 = vmatpush1.bf16.msra.mxu0 %v2467_v13  ;;  %v539_v24 = vld [vmem:[%s3014_s5 + $0x300] sm:$0x7]  ;;  %v541_v27 = vld [vmem:[%s3014_s5 + $0x310] sm:$0x7]  ;;  %v480_v29 = vld [vmem:[%s3014_s5 + $0x128] sm:$0xff]  ;;  %580 = vperm.xlu0 %2652, %v572_v7   ;;  %s2464_s18 = sshll.u32 (%p2730_p5), %s2384_s15, 8 }
  0x61   : > { %2478 = vmatpush1.bf16.msra.mxu1 %v2477_v17  ;;  %v2472_v26 = vpack.c.bf16 %v539_v24, %v507_v23  ;;  %2471 = vmatprep.subr.msk.bf16.mxu0 %vm3010_vm2, %v2469_v21  ;;  %v2482_v30 = vpack.c.bf16 %v541_v27, %v509_v25  ;;  %v2485_v32 = vpack.c.bf16 %v480_v29, %v448_v28  ;;  %v450_v33 = vld [vmem:[%s3014_s5 + $0x38] sm:$0xff]  ;;  %v447_v35 = vld [vmem:[%s3014_s5 + $0x20] sm:$0xff]  ;;  %v449_v38 = vld [vmem:[%s3014_s5 + $0x30] sm:$0xff]  ;;  %s3470_s20 = scalar_lea.vmem (%p2730_p5), %s3610_s3, %s2464_s18 }
  0x62   : > { %2481 = vmatprep.subr.msk.bf16.mxu1 %vm3010_vm2, %v2479_v22  ;;  %v482_v34 = vld [vmem:[%s3014_s5 + $0x138] sm:$0xff]  ;;  %v479_v37 = vld [vmem:[%s3014_s5 + $0x120] sm:$0xff]  ;;  %v481_v39 = vld [vmem:[%s3014_s5 + $0x130] sm:$0xff] }
  0x63   : > { %v2495_v36 = vpack.c.bf16 %v482_v34, %v450_v33  ;;  %v2487_v40 = vpack.c.bf16 %v479_v37, %v447_v35  ;;  %v512_v41 = vld [vmem:[%s3014_s5 + $0x228] sm:$0xff]  ;;  %v514_v43 = vld [vmem:[%s3014_s5 + $0x238] sm:$0xff]  ;;  %v2497_v44 = vpack.c.bf16 %v481_v39, %v449_v38  ;;  %v511_v46 = vld [vmem:[%s3014_s5 + $0x220] sm:$0xff] }
  0x64   : > { %2474 = vmatpush1.bf16.msk.msra.mxu0 %vm3010_vm2, %v2472_v26  ;;  %v544_v42 = vld [vmem:[%s3014_s5 + $0x328] sm:$0x7]  ;;  %v546_v45 = vld [vmem:[%s3014_s5 + $0x338] sm:$0x7]  ;;  %v543_v47 = vld [vmem:[%s3014_s5 + $0x320] sm:$0x7] }
  0x65   : > { %2484 = vmatpush1.bf16.msk.msra.mxu1 %vm3010_vm2, %v2482_v30  ;;  %2486 = vmatprep.subr.bf16.mxu0 %v2485_v32  ;;  %v2489_v48 = vpack.c.bf16 %v544_v42, %v512_v41  ;;  %v513_v49 = vld [vmem:[%s3014_s5 + $0x230] sm:$0xff]  ;;  %v2499_v51 = vpack.c.bf16 %v546_v45, %v514_v43  ;;  %v452_v52 = vld [vmem:[%s3014_s5 + $0x48] sm:$0xff]  ;;  %v2492_v55 = vpack.c.bf16 %v543_v47, %v511_v46  ;;  %v454_v56 = vld [vmem:[%s3014_s5 + $0x58] sm:$0xff] }
  0x66   : > { %2496 = vmatprep.subr.bf16.mxu1 %v2495_v36  ;;  %v545_v50 = vld [vmem:[%s3014_s5 + $0x330] sm:$0x7]  ;;  %v484_v53 = vld [vmem:[%s3014_s5 + $0x148] sm:$0xff]  ;;  %v486_v57 = vld [vmem:[%s3014_s5 + $0x158] sm:$0xff] }
  0x67   : > { %2396 = vmatmul.mubr.msk.f32.vlgmr.msra.gmra.mrb[0].mxu0 %vm583_vm3, %v3044_v31  ;;  %v2502_v58 = vpack.c.bf16 %v545_v50, %v513_v49  ;;  %v451_v59 = vld [vmem:[%s3014_s5 + $0x40] sm:$0xff]  ;;  %v2505_v61 = vpack.c.bf16 %v484_v53, %v452_v52  ;;  %v453_v62 = vld [vmem:[%s3014_s5 + $0x50] sm:$0xff]  ;;  %v2515_v1 = vpack.c.bf16 %v486_v57, %v454_v56  ;;  %v516_v3 = vld [vmem:[%s3014_s5 + $0x248] sm:$0xff] }
  0x68   : > { %2400 = vmatmul.mubr.msk.f32.vlgmr.msra.gmra.mrb[0].mxu1 %vm583_vm3, %v3044_v31  ;;  %2488 = vmatpush1.bf16.msra.mxu0 %v2487_v40  ;;  %v483_v60 = vld [vmem:[%s3014_s5 + $0x140] sm:$0xff]  ;;  %v485_v63 = vld [vmem:[%s3014_s5 + $0x150] sm:$0xff]  ;;  %v548_v4 = vld [vmem:[%s3014_s5 + $0x348] sm:$0x7] }
  0x69   : > { %2498 = vmatpush1.bf16.msra.mxu1 %v2497_v44  ;;  %757 = vmatprep.mubr.f32.mxu0 %v2677_v0  ;;  %v2507_v5 = vpack.c.bf16 %v483_v60, %v451_v59  ;;  %v518_v6 = vld [vmem:[%s3014_s5 + $0x258] sm:$0xff]  ;;  %v2517_v8 = vpack.c.bf16 %v485_v63, %v453_v62  ;;  %v515_v9 = vld [vmem:[%s3014_s5 + $0x240] sm:$0xff]  ;;  %v2509_v11 = vpack.c.bf16 %v548_v4, %v516_v3  ;;  %v517_v12 = vld [vmem:[%s3014_s5 + $0x250] sm:$0xff] }
  0x6a   : > { %834 = vmatprep.mubr.f32.mxu1 %v2677_v0  ;;  %2491 = vmatprep.subr.msk.bf16.mxu0 %vm3010_vm2, %v2489_v48  ;;  %v550_v7 = vld [vmem:[%s3014_s5 + $0x358] sm:$0x7]  ;;  %v547_v10 = vld [vmem:[%s3014_s5 + $0x340] sm:$0x7]  ;;  %v549_v13 = vld [vmem:[%s3014_s5 + $0x350] sm:$0x7] }
  0x6b   : > { %2397 = vmatmul.mubr.msk.f32.gmra.mrb[2].mxu0 %vm583_vm3, %v3073_v54  ;;  %2501 = vmatprep.subr.msk.bf16.mxu1 %vm3010_vm2, %v2499_v51  ;;  %v2519_v14 = vpack.c.bf16 %v550_v7, %v518_v6  ;;  %v456_v15 = vld [vmem:[%s3014_s5 + $0x68] sm:$0xff]  ;;  %v2512_v17 = vpack.c.bf16 %v547_v10, %v515_v9  ;;  %v458_v18 = vld [vmem:[%s3014_s5 + $0x78] sm:$0xff]  ;;  %v2522_v20 = vpack.c.bf16 %v549_v13, %v517_v12  ;;  %v455_v21 = vld [vmem:[%s3014_s5 + $0x60] sm:$0xff] }
  0x6c   : > { %2401 = vmatmul.mubr.msk.f32.gmra.mrb[2].mxu1 %vm583_vm3, %v3073_v54  ;;  %2494 = vmatpush1.bf16.msk.msra.mxu0 %vm3010_vm2, %v2492_v55  ;;  %v488_v16 = vld [vmem:[%s3014_s5 + $0x168] sm:$0xff]  ;;  %v490_v19 = vld [vmem:[%s3014_s5 + $0x178] sm:$0xff]  ;;  %v487_v22 = vld [vmem:[%s3014_s5 + $0x160] sm:$0xff] }
  0x6d   : > { %2504 = vmatpush1.bf16.msk.msra.mxu1 %vm3010_vm2, %v2502_v58  ;;  %905 = vmatprep.mubr.f32.mxu0 %v2677_v0  ;;  %v2525_v23 = vpack.c.bf16 %v488_v16, %v456_v15  ;;  %v457_v24 = vld [vmem:[%s3014_s5 + $0x70] sm:$0xff]  ;;  %v2535_v26 = vpack.c.bf16 %v490_v19, %v458_v18  ;;  %v520_v27 = vld [vmem:[%s3014_s5 + $0x268] sm:$0xff]  ;;  %v2527_v29 = vpack.c.bf16 %v487_v22, %v455_v21  ;;  %v522_v30 = vld [vmem:[%s3014_s5 + $0x278] sm:$0xff] }
  0x6e   : > { %982 = vmatprep.mubr.f32.mxu1 %v2677_v0  ;;  %2506 = vmatprep.subr.bf16.mxu0 %v2505_v61  ;;  %v489_v25 = vld [vmem:[%s3014_s5 + $0x170] sm:$0xff]  ;;  %v552_v28 = vld [vmem:[%s3014_s5 + $0x368] sm:$0x7]  ;;  %v554_v32 = vld [vmem:[%s3014_s5 + $0x378] sm:$0x7] }
  0x6f   : > { %2404 = vmatmul.mubr.msk.f32.vlgmr.msra.gmra.mrb[4].mxu0 %vm583_vm3, %v3044_v31  ;;  %2516 = vmatprep.subr.bf16.mxu1 %v2515_v1  ;;  %v2537_v33 = vpack.c.bf16 %v489_v25, %v457_v24  ;;  %v519_v34 = vld [vmem:[%s3014_s5 + $0x260] sm:$0xff]  ;;  %v2529_v36 = vpack.c.bf16 %v552_v28, %v520_v27  ;;  %v521_v37 = vld [vmem:[%s3014_s5 + $0x270] sm:$0xff]  ;;  %v2539_v39 = vpack.c.bf16 %v554_v32, %v522_v30  ;;  %v460_v40 = vld [vmem:[%s3014_s5 + $0x88] sm:$0xff] }
  0x70   : > { %2408 = vmatmul.mubr.msk.f32.vlgmr.msra.gmra.mrb[4].mxu1 %vm583_vm3, %v3044_v31  ;;  %2508 = vmatpush1.bf16.msra.mxu0 %v2507_v5  ;;  %v551_v35 = vld [vmem:[%s3014_s5 + $0x360] sm:$0x7]  ;;  %v553_v38 = vld [vmem:[%s3014_s5 + $0x370] sm:$0x7]  ;;  %v492_v41 = vld [vmem:[%s3014_s5 + $0x188] sm:$0xff] }
  0x71   : > { %2518 = vmatpush1.bf16.msra.mxu1 %v2517_v8  ;;  %911 = vmatprep.mubr.f32.mxu0 %v2677_v0  ;;  %v2532_v42 = vpack.c.bf16 %v551_v35, %v519_v34  ;;  %v462_v43 = vld [vmem:[%s3014_s5 + $0x98] sm:$0xff]  ;;  %v2542_v45 = vpack.c.bf16 %v553_v38, %v521_v37  ;;  %v459_v46 = vld [vmem:[%s3014_s5 + $0x80] sm:$0xff]  ;;  %v2545_v48 = vpack.c.bf16 %v492_v41, %v460_v40  ;;  %v461_v49 = vld [vmem:[%s3014_s5 + $0x90] sm:$0xff] }
  0x72   : > { %988 = vmatprep.mubr.f32.mxu1 %v2677_v0  ;;  %2511 = vmatprep.subr.msk.bf16.mxu0 %vm3010_vm2, %v2509_v11  ;;  %v494_v44 = vld [vmem:[%s3014_s5 + $0x198] sm:$0xff]  ;;  %v491_v47 = vld [vmem:[%s3014_s5 + $0x180] sm:$0xff]  ;;  %v493_v50 = vld [vmem:[%s3014_s5 + $0x190] sm:$0xff] }
  0x73   : > { %2405 = vmatmul.mubr.msk.f32.gmra.mrb[6].mxu0 %vm583_vm3, %v3073_v54  ;;  %2521 = vmatprep.subr.msk.bf16.mxu1 %vm3010_vm2, %v2519_v14  ;;  %v2555_v51 = vpack.c.bf16 %v494_v44, %v462_v43  ;;  %v524_v52 = vld [vmem:[%s3014_s5 + $0x288] sm:$0xff]  ;;  %v2547_v55 = vpack.c.bf16 %v491_v47, %v459_v46  ;;  %v526_v56 = vld [vmem:[%s3014_s5 + $0x298] sm:$0xff]  ;;  %v2557_v58 = vpack.c.bf16 %v493_v50, %v461_v49  ;;  %v523_v59 = vld [vmem:[%s3014_s5 + $0x280] sm:$0xff] }
  0x74   : > { %2409 = vmatmul.mubr.msk.f32.gmra.mrb[6].mxu1 %vm583_vm3, %v3073_v54  ;;  %2514 = vmatpush1.bf16.msk.msra.mxu0 %vm3010_vm2, %v2512_v17  ;;  %v556_v53 = vld [vmem:[%s3014_s5 + $0x388] sm:$0x7]  ;;  %v558_v57 = vld [vmem:[%s3014_s5 + $0x398] sm:$0x7]  ;;  %v555_v60 = vld [vmem:[%s3014_s5 + $0x380] sm:$0x7] }
  0x75   : > { %2524 = vmatpush1.bf16.msk.msra.mxu1 %vm3010_vm2, %v2522_v20  ;;  %1059 = vmatprep.mubr.f32.mxu0 %v2677_v0  ;;  %v2549_v61 = vpack.c.bf16 %v556_v53, %v524_v52  ;;  %v525_v62 = vld [vmem:[%s3014_s5 + $0x290] sm:$0xff]  ;;  %v2559_v1 = vpack.c.bf16 %v558_v57, %v526_v56  ;;  %v464_v3 = vld [vmem:[%s3014_s5 + $0xa8] sm:$0xff]  ;;  %v2552_v5 = vpack.c.bf16 %v555_v60, %v523_v59  ;;  %v466_v6 = vld [vmem:[%s3014_s5 + $0xb8] sm:$0xff] }
  0x76   : > { %1136 = vmatprep.mubr.f32.mxu1 %v2677_v0  ;;  %2526 = vmatprep.subr.bf16.mxu0 %v2525_v23  ;;  %v557_v63 = vld [vmem:[%s3014_s5 + $0x390] sm:$0x7]  ;;  %v496_v4 = vld [vmem:[%s3014_s5 + $0x1a8] sm:$0xff]  ;;  %v498_v7 = vld [vmem:[%s3014_s5 + $0x1b8] sm:$0xff] }
  0x77   : > { %2412 = vmatmul.mubr.msk.f32.vlgmr.msra.gmra.mrb[8].mxu0 %vm583_vm3, %v3044_v31  ;;  %2536 = vmatprep.subr.bf16.mxu1 %v2535_v26  ;;  %v2562_v8 = vpack.c.bf16 %v557_v63, %v525_v62  ;;  %v463_v9 = vld [vmem:[%s3014_s5 + $0xa0] sm:$0xff]  ;;  %v2565_v11 = vpack.c.bf16 %v496_v4, %v464_v3  ;;  %v465_v12 = vld [vmem:[%s3014_s5 + $0xb0] sm:$0xff]  ;;  %v2575_v14 = vpack.c.bf16 %v498_v7, %v466_v6  ;;  %v528_v15 = vld [vmem:[%s3014_s5 + $0x2a8] sm:$0xff] }
  0x78   : > { %2416 = vmatmul.mubr.msk.f32.vlgmr.msra.gmra.mrb[8].mxu1 %vm583_vm3, %v3044_v31  ;;  %2528 = vmatpush1.bf16.msra.mxu0 %v2527_v29  ;;  %v495_v10 = vld [vmem:[%s3014_s5 + $0x1a0] sm:$0xff]  ;;  %v497_v13 = vld [vmem:[%s3014_s5 + $0x1b0] sm:$0xff]  ;;  %v560_v16 = vld [vmem:[%s3014_s5 + $0x3a8] sm:$0x7] }
  0x79   : > { %2538 = vmatpush1.bf16.msra.mxu1 %v2537_v33  ;;  %1065 = vmatprep.mubr.f32.mxu0 %v2677_v0  ;;  %v2567_v17 = vpack.c.bf16 %v495_v10, %v463_v9  ;;  %v530_v18 = vld [vmem:[%s3014_s5 + $0x2b8] sm:$0xff]  ;;  %v2577_v20 = vpack.c.bf16 %v497_v13, %v465_v12  ;;  %v527_v21 = vld [vmem:[%s3014_s5 + $0x2a0] sm:$0xff]  ;;  %v2569_v23 = vpack.c.bf16 %v560_v16, %v528_v15  ;;  %v529_v24 = vld [vmem:[%s3014_s5 + $0x2b0] sm:$0xff] }
  0x7a   : > { %1142 = vmatprep.mubr.f32.mxu1 %v2677_v0  ;;  %2531 = vmatprep.subr.msk.bf16.mxu0 %vm3010_vm2, %v2529_v36  ;;  %v562_v19 = vld [vmem:[%s3014_s5 + $0x3b8] sm:$0x7]  ;;  %v559_v22 = vld [vmem:[%s3014_s5 + $0x3a0] sm:$0x7]  ;;  %v561_v25 = vld [vmem:[%s3014_s5 + $0x3b0] sm:$0x7] }
  0x7b   : > { %2413 = vmatmul.mubr.msk.f32.gmra.mrb[10].mxu0 %vm583_vm3, %v3073_v54  ;;  %2541 = vmatprep.subr.msk.bf16.mxu1 %vm3010_vm2, %v2539_v39  ;;  %v2579_v26 = vpack.c.bf16 %v562_v19, %v530_v18  ;;  %v468_v27 = vld [vmem:[%s3014_s5 + $0xc8] sm:$0xff]  ;;  %v2572_v29 = vpack.c.bf16 %v559_v22, %v527_v21  ;;  %v470_v30 = vld [vmem:[%s3014_s5 + $0xd8] sm:$0xff]  ;;  %v2582_v33 = vpack.c.bf16 %v561_v25, %v529_v24  ;;  %v467_v34 = vld [vmem:[%s3014_s5 + $0xc0] sm:$0xff] }
  0x7c   : > { %2417 = vmatmul.mubr.msk.f32.gmra.mrb[10].mxu1 %vm583_vm3, %v3073_v54  ;;  %2534 = vmatpush1.bf16.msk.msra.mxu0 %vm3010_vm2, %v2532_v42  ;;  %v500_v28 = vld [vmem:[%s3014_s5 + $0x1c8] sm:$0xff]  ;;  %v502_v32 = vld [vmem:[%s3014_s5 + $0x1d8] sm:$0xff]  ;;  %v499_v35 = vld [vmem:[%s3014_s5 + $0x1c0] sm:$0xff] }
  0x7d   : > { %2544 = vmatpush1.bf16.msk.msra.mxu1 %vm3010_vm2, %v2542_v45  ;;  %1213 = vmatprep.mubr.f32.mxu0 %v2677_v0  ;;  %v2585_v36 = vpack.c.bf16 %v500_v28, %v468_v27  ;;  %v469_v37 = vld [vmem:[%s3014_s5 + $0xd0] sm:$0xff]  ;;  %v2595_v39 = vpack.c.bf16 %v502_v32, %v470_v30  ;;  %v532_v40 = vld [vmem:[%s3014_s5 + $0x2c8] sm:$0xff]  ;;  %v2587_v42 = vpack.c.bf16 %v499_v35, %v467_v34  ;;  %v534_v43 = vld [vmem:[%s3014_s5 + $0x2d8] sm:$0xff] }
  0x7e   : > { %1290 = vmatprep.mubr.f32.mxu1 %v2677_v0  ;;  %2546 = vmatprep.subr.bf16.mxu0 %v2545_v48  ;;  %v501_v38 = vld [vmem:[%s3014_s5 + $0x1d0] sm:$0xff]  ;;  %v564_v41 = vld [vmem:[%s3014_s5 + $0x3c8] sm:$0x7]  ;;  %v566_v44 = vld [vmem:[%s3014_s5 + $0x3d8] sm:$0x7] }
  0x7f   : > { %2420 = vmatmul.mubr.msk.f32.vlgmr.msra.gmra.mrb[12].mxu0 %vm583_vm3, %v3044_v31  ;;  %2556 = vmatprep.subr.bf16.mxu1 %v2555_v51  ;;  %v2597_v45 = vpack.c.bf16 %v501_v38, %v469_v37  ;;  %v531_v46 = vld [vmem:[%s3014_s5 + $0x2c0] sm:$0xff]  ;;  %v2589_v48 = vpack.c.bf16 %v564_v41, %v532_v40  ;;  %v533_v49 = vld [vmem:[%s3014_s5 + $0x2d0] sm:$0xff]  ;;  %v2599_v51 = vpack.c.bf16 %v566_v44, %v534_v43  ;;  %v472_v52 = vld [vmem:[%s3014_s5 + $0xe8] sm:$0xff] }
  0x80   : > { %2424 = vmatmul.mubr.msk.f32.vlgmr.msra.gmra.mrb[12].mxu1 %vm583_vm3, %v3044_v31  ;;  %2548 = vmatpush1.bf16.msra.mxu0 %v2547_v55  ;;  %v563_v47 = vld [vmem:[%s3014_s5 + $0x3c0] sm:$0x7]  ;;  %v565_v50 = vld [vmem:[%s3014_s5 + $0x3d0] sm:$0x7]  ;;  %v504_v53 = vld [vmem:[%s3014_s5 + $0x1e8] sm:$0xff] }
  0x81   : > { %2558 = vmatpush1.bf16.msra.mxu1 %v2557_v58  ;;  %1219 = vmatprep.mubr.f32.mxu0 %v2677_v0  ;;  %v2592_v55 = vpack.c.bf16 %v563_v47, %v531_v46  ;;  %v474_v56 = vld [vmem:[%s3014_s5 + $0xf8] sm:$0xff]  ;;  %v2602_v58 = vpack.c.bf16 %v565_v50, %v533_v49  ;;  %v471_v59 = vld [vmem:[%s3014_s5 + $0xe0] sm:$0xff]  ;;  %v473_v62 = vld [vmem:[%s3014_s5 + $0xf0] sm:$0xff] }
  0x82   : > { %1296 = vmatprep.mubr.f32.mxu1 %v2677_v0  ;;  %2551 = vmatprep.subr.msk.bf16.mxu0 %vm3010_vm2, %v2549_v61  ;;  %v506_v57 = vld [vmem:[%s3014_s5 + $0x1f8] sm:$0xff]  ;;  %v503_v60 = vld [vmem:[%s3014_s5 + $0x1e0] sm:$0xff]  ;;  %v2605_v61 = vpack.c.bf16 %v504_v53, %v472_v52  ;;  %v505_v63 = vld [vmem:[%s3014_s5 + $0x1f0] sm:$0xff] }
  0x83   : > { %2421 = vmatmul.mubr.msk.f32.gmra.mrb[14].mxu0 %vm583_vm3, %v3073_v54  ;;  %2561 = vmatprep.subr.msk.bf16.mxu1 %vm3010_vm2, %v2559_v1  ;;  %v2615_v1 = vpack.c.bf16 %v506_v57, %v474_v56  ;;  %v536_v3 = vld [vmem:[%s3014_s5 + $0x2e8] sm:$0xff]  ;;  %v538_v6 = vld [vmem:[%s3014_s5 + $0x2f8] sm:$0xff]  ;;  %v535_v9 = vld [vmem:[%s3014_s5 + $0x2e0] sm:$0xff] }
  0x84   : > { %2425 = vmatmul.mubr.msk.f32.gmra.mrb[14].mxu1 %vm583_vm3, %v3073_v54  ;;  %2554 = vmatpush1.bf16.msk.msra.mxu0 %vm3010_vm2, %v2552_v5  ;;  %v568_v4 = vld [vmem:[%s3014_s5 + $0x3e8] sm:$0x7]  ;;  %v2607_v5 = vpack.c.bf16 %v503_v60, %v471_v59  ;;  %v570_v7 = vld [vmem:[%s3014_s5 + $0x3f8] sm:$0x7]  ;;  %v567_v10 = vld [vmem:[%s3014_s5 + $0x3e0] sm:$0x7] }
  0x85   : > { %2564 = vmatpush1.bf16.msk.msra.mxu1 %vm3010_vm2, %v2562_v8  ;;  %1367 = vmatprep.mubr.f32.mxu0 %v2677_v0  ;;  %v2617_v8 = vpack.c.bf16 %v505_v63, %v473_v62  ;;  %v537_v12 = vld [vmem:[%s3014_s5 + $0x2f0] sm:$0xff]  ;;  %v2612_v15 = vpack.c.bf16 %v567_v10, %v535_v9 }
  0x86   : > { %1444 = vmatprep.mubr.f32.mxu1 %v2677_v0  ;;  %2566 = vmatprep.subr.bf16.mxu0 %v2565_v11  ;;  %v2609_v11 = vpack.c.bf16 %v568_v4, %v536_v3  ;;  %v569_v13 = vld [vmem:[%s3014_s5 + $0x3f0] sm:$0x7] }
  0x87   : > { %2428 = vmatmul.mubr.msk.f32.vlgmr.msra.gmra.mrb[16].mxu0 %vm583_vm3, %v3044_v31  ;;  %2576 = vmatprep.subr.bf16.mxu1 %v2575_v14  ;;  %v2619_v14 = vpack.c.bf16 %v570_v7, %v538_v6  ;;  %v2622_v16 = vpack.c.bf16 %v569_v13, %v537_v12 }
  0x88   : > { %2432 = vmatmul.mubr.msk.f32.vlgmr.msra.gmra.mrb[16].mxu1 %vm583_vm3, %v3044_v31  ;;  %2568 = vmatpush1.bf16.msra.mxu0 %v2567_v17 }
  0x89   : > { %2578 = vmatpush1.bf16.msra.mxu1 %v2577_v20  ;;  %1373 = vmatprep.mubr.f32.mxu0 %v2677_v0 }
  0x8a   : > { %1450 = vmatprep.mubr.f32.mxu1 %v2677_v0  ;;  %2571 = vmatprep.subr.msk.bf16.mxu0 %vm3010_vm2, %v2569_v23 }
  0x8b   : > { %2429 = vmatmul.mubr.msk.f32.gmra.mrb[18].mxu0 %vm583_vm3, %v3073_v54  ;;  %2581 = vmatprep.subr.msk.bf16.mxu1 %vm3010_vm2, %v2579_v26 }
  0x8c   : > { %2433 = vmatmul.mubr.msk.f32.gmra.mrb[18].mxu1 %vm583_vm3, %v3073_v54  ;;  %2574 = vmatpush1.bf16.msk.msra.mxu0 %vm3010_vm2, %v2572_v29 }
  0x8d   : > { %2584 = vmatpush1.bf16.msk.msra.mxu1 %vm3010_vm2, %v2582_v33  ;;  %1521 = vmatprep.mubr.f32.mxu0 %v2677_v0 }
  0x8e   : > { %1598 = vmatprep.mubr.f32.mxu1 %v2677_v0  ;;  %2586 = vmatprep.subr.bf16.mxu0 %v2585_v36 }
  0x8f   : > { %2436 = vmatmul.mubr.msk.f32.vlgmr.msra.gmra.mrb[20].mxu0 %vm583_vm3, %v3044_v31  ;;  %2596 = vmatprep.subr.bf16.mxu1 %v2595_v39 }
  0x90   : > { %2440 = vmatmul.mubr.msk.f32.vlgmr.msra.gmra.mrb[20].mxu1 %vm583_vm3, %v3044_v31  ;;  %2588 = vmatpush1.bf16.msra.mxu0 %v2587_v42 }
  0x91   : > { %2598 = vmatpush1.bf16.msra.mxu1 %v2597_v45  ;;  %1527 = vmatprep.mubr.f32.mxu0 %v2677_v0 }
  0x92   : > { %1604 = vmatprep.mubr.f32.mxu1 %v2677_v0  ;;  %2591 = vmatprep.subr.msk.bf16.mxu0 %vm3010_vm2, %v2589_v48 }
  0x93   : > { %2437 = vmatmul.mubr.msk.f32.gmra.mrb[22].mxu0 %vm583_vm3, %v3073_v54  ;;  %2601 = vmatprep.subr.msk.bf16.mxu1 %vm3010_vm2, %v2599_v51 }
  0x94   : > { %2441 = vmatmul.mubr.msk.f32.gmra.mrb[22].mxu1 %vm583_vm3, %v3073_v54  ;;  %2594 = vmatpush1.bf16.msk.msra.mxu0 %vm3010_vm2, %v2592_v55 }
  0x95   : > { %2604 = vmatpush1.bf16.msk.msra.mxu1 %vm3010_vm2, %v2602_v58  ;;  %1675 = vmatprep.mubr.f32.mxu0 %v2677_v0 }
  0x96   : > { %1752 = vmatprep.mubr.f32.mxu1 %v2677_v0  ;;  %2606 = vmatprep.subr.bf16.mxu0 %v2605_v61 }
  0x97   : > { %2444 = vmatmul.mubr.msk.f32.vlgmr.msra.gmra.mrb[24].mxu0 %vm583_vm3, %v3044_v31  ;;  %2616 = vmatprep.subr.bf16.mxu1 %v2615_v1 }
  0x98   : > { %2448 = vmatmul.mubr.msk.f32.vlgmr.msra.gmra.mrb[24].mxu1 %vm583_vm3, %v3044_v31  ;;  %2608 = vmatpush1.bf16.msra.mxu0 %v2607_v5 }
  0x99   : > { %2618 = vmatpush1.bf16.msra.mxu1 %v2617_v8  ;;  %1681 = vmatprep.mubr.f32.mxu0 %v2677_v0 }
  0x9a   : > { %1758 = vmatprep.mubr.f32.mxu1 %v2677_v0  ;;  %2611 = vmatprep.subr.msk.bf16.mxu0 %vm3010_vm2, %v2609_v11 }
  0x9b   : > { %2445 = vmatmul.mubr.msk.f32.gmra.mrb[26].mxu0 %vm583_vm3, %v3073_v54  ;;  %2621 = vmatprep.subr.msk.bf16.mxu1 %vm3010_vm2, %v2619_v14 }
  0x9c   : > { %2449 = vmatmul.mubr.msk.f32.gmra.mrb[26].mxu1 %vm583_vm3, %v3073_v54  ;;  %2614 = vmatpush1.bf16.msk.msra.mxu0 %vm3010_vm2, %v2612_v15 }
  0x9d   : > { %2624 = vmatpush1.bf16.msk.msra.mxu1 %vm3010_vm2, %v2622_v16  ;;  %1829 = vmatprep.mubr.f32.mxu0 %v2677_v0 }
  0x9e   : > { %1906 = vmatprep.mubr.f32.mxu1 %v2677_v0 }
  0x9f   : > { %2452 = vmatmul.mubr.msk.f32.vlgmr.msra.gmra.mrb[28].mxu0 %vm583_vm3, %v3044_v31 }
  0xa0   : > { %2456 = vmatmul.mubr.msk.f32.vlgmr.msra.gmra.mrb[28].mxu1 %vm583_vm3, %v3044_v31  ;;  %1835 = vmatprep.mubr.f32.mxu0 %v2677_v0 }
  0xa1   : > { %1912 = vmatprep.mubr.f32.mxu1 %v2677_v0 }
  0xa3   : > { %2453 = vmatmul.mubr.msk.f32.gmra.mrb[30].mxu0 %vm583_vm3, %v3073_v54 }
  0xa4   : > { %2457 = vmatmul.mubr.msk.f32.gmra.mrb[30].mxu1 %vm583_vm3, %v3073_v54 }
  0xda   : > { %v3315_v2 = vpop.permute.xlu0 %575 }
  0xdf   : > { %v3323_v24 = vpop.permute.xlu0 %580 }
 0x13a   : > { %v753_v17 = vpop.f32.mrb[0].mxu0 }
 0x13b   : > { %v754_v18 = vadd.f32 %v753_v17, %v3315_v2  ;;  %v830_v19 = vpop.f32.mrb[0].mxu1  ;;  %v755_v20 = vpop.f32.mrb[1].mxu0 }
 0x13c   : > { %v831_v31 = vadd.f32 %v830_v19, %v3315_v2  ;;  %v756_v21 = vadd.f32 %v755_v20, %v3315_v2  ;;  %v832_v0 = vpop.f32.mrb[1].mxu1 }
 0x13d   : > { %vm1919_vm4 = vcmp.ge.f32.partialorder %v754_v18, 0.0  ;;  %v1983_v22 = vmul.f32 0.2, %v754_v18  ;;  %v833_v23 = vadd.f32 %v832_v0, %v3315_v2 }
 0x13e   : > { %vm1921_vm5 = vcmp.ge.f32.partialorder %v831_v31, 0.0  ;;  %v1985_v54 = vmul.f32 0.2, %v831_v31  ;;  %vm1920_vm6 = vcmp.ge.f32.partialorder %v756_v21, 0.0  ;;  %v1984_v25 = vmul.f32 0.2, %v756_v21 }
 0x13f   : > { %v2047_v26 = vsel %vm1919_vm4, %v754_v18, %v1983_v22  ;;  %vm1922_vm7 = vcmp.ge.f32.partialorder %v833_v23, 0.0  ;;  %v1986_v27 = vmul.f32 0.2, %v833_v23  ;;  %v759_v28 = vpop.f32.mrb[2].mxu0  ;;  %v836_v29 = vpop.f32.mrb[2].mxu1 }
 0x140   : > { %2111 = vst [vmem:[%s3325_s12] sm:$0xff] %v2047_v26  ;;  %v2049_v30 = vsel %vm1921_vm5, %v831_v31, %v1985_v54  ;;  %v2048_v32 = vsel %vm1920_vm6, %v756_v21, %v1984_v25  ;;  %v760_v33 = vadd.f32 %v759_v28, %v3323_v24  ;;  %v837_v34 = vadd.f32 %v836_v29, %v3323_v24  ;;  %v761_v35 = vpop.f32.mrb[3].mxu0  ;;  %v838_v36 = vpop.f32.mrb[3].mxu1 }
 0x141   : > { %2113 = vst [vmem:[%s3325_s12 + $0x10] sm:$0xff] %v2049_v30  ;;  %2112 = vst [vmem:[%s3325_s12 + $0x8] sm:$0xff] %v2048_v32  ;;  %v2050_v37 = vsel %vm1922_vm7, %v833_v23, %v1986_v27  ;;  %v762_v38 = vadd.f32 %v761_v35, %v3323_v24  ;;  %v839_v39 = vadd.f32 %v838_v36, %v3323_v24 }
 0x142   : > { %2114 = vst [vmem:[%s3325_s12 + $0x18] sm:$0xff] %v2050_v37  ;;  %vm1951_vm8 = vcmp.ge.f32.partialorder %v760_v33, 0.0  ;;  %v2015_v40 = vmul.f32 0.2, %v760_v33  ;;  %vm1953_vm9 = vcmp.ge.f32.partialorder %v837_v34, 0.0  ;;  %v907_v46 = vpop.f32.mrb[4].mxu0 }
 0x143   : > { %v2017_v41 = vmul.f32 0.2, %v837_v34  ;;  %vm1952_vm10 = vcmp.ge.f32.partialorder %v762_v38, 0.0  ;;  %v2016_v42 = vmul.f32 0.2, %v762_v38  ;;  %vm1954_vm11 = vcmp.ge.f32.partialorder %v839_v39, 0.0 }
 0x144   : > { %v2018_v43 = vmul.f32 0.2, %v839_v39  ;;  %v2079_v44 = vsel %vm1951_vm8, %v760_v33, %v2015_v40  ;;  %v984_v47 = vpop.f32.mrb[4].mxu1  ;;  %v908_v50 = vadd.f32 %v907_v46, %v3315_v2  ;;  %v909_v52 = vpop.f32.mrb[5].mxu0 }
 0x145   : > { %v2081_v45 = vsel %vm1953_vm9, %v837_v34, %v2017_v41  ;;  %2143 = vst [vmem:[%s3325_s12 + $0x100] sm:$0xff] %v2079_v44  ;;  %v2080_v48 = vsel %vm1952_vm10, %v762_v38, %v2016_v42  ;;  %v985_v51 = vadd.f32 %v984_v47, %v3315_v2  ;;  %v986_v53 = vpop.f32.mrb[5].mxu1  ;;  %v910_v55 = vadd.f32 %v909_v52, %v3315_v2 }
 0x146   : > { %2145 = vst [vmem:[%s3325_s12 + $0x110] sm:$0xff] %v2081_v45  ;;  %v2082_v49 = vsel %vm1954_vm11, %v839_v39, %v2018_v43  ;;  %2144 = vst [vmem:[%s3325_s12 + $0x108] sm:$0xff] %v2080_v48  ;;  %v987_v56 = vadd.f32 %v986_v53, %v3315_v2  ;;  %v913_v57 = vpop.f32.mrb[6].mxu0  ;;  %vm1923_vm12 = vcmp.ge.f32.partialorder %v908_v50, 0.0  ;;  %v1987_v58 = vmul.f32 0.2, %v908_v50 }
 0x147   : > { %2146 = vst [vmem:[%s3325_s12 + $0x118] sm:$0xff] %v2082_v49  ;;  %vm1925_vm13 = vcmp.ge.f32.partialorder %v985_v51, 0.0  ;;  %v1989_v59 = vmul.f32 0.2, %v985_v51  ;;  %vm1924_vm14 = vcmp.ge.f32.partialorder %v910_v55, 0.0  ;;  %v914_v1 = vadd.f32 %v913_v57, %v3323_v24  ;;  %v990_v3 = vpop.f32.mrb[6].mxu1 }
 0x148   : > { %v1988_v60 = vmul.f32 0.2, %v910_v55  ;;  %vm1926_vm15 = vcmp.ge.f32.partialorder %v987_v56, 0.0  ;;  %v1990_v61 = vmul.f32 0.2, %v987_v56  ;;  %v2051_v62 = vsel %vm1923_vm12, %v908_v50, %v1987_v58  ;;  %v915_v4 = vpop.f32.mrb[7].mxu0 }
 0x149   : > { %v2053_v63 = vsel %vm1925_vm13, %v985_v51, %v1989_v59  ;;  %2115 = vst [vmem:[%s3325_s12 + $0x20] sm:$0xff] %v2051_v62  ;;  %v991_v7 = vadd.f32 %v990_v3, %v3323_v24  ;;  %v916_v8 = vadd.f32 %v915_v4, %v3323_v24  ;;  %v992_v9 = vpop.f32.mrb[7].mxu1  ;;  %vm1955_vm0 = vcmp.ge.f32.partialorder %v914_v1, 0.0 }
 0x14a   : > { %2117 = vst [vmem:[%s3325_s12 + $0x30] sm:$0xff] %v2053_v63  ;;  %v2052_v5 = vsel %vm1924_vm14, %v910_v55, %v1988_v60  ;;  %v2054_v6 = vsel %vm1926_vm15, %v987_v56, %v1990_v61  ;;  %v1061_v10 = vpop.f32.mrb[8].mxu0  ;;  %v2019_v11 = vmul.f32 0.2, %v914_v1  ;;  %v993_v12 = vadd.f32 %v992_v9, %v3323_v24 }
 0x14b   : > { %2116 = vst [vmem:[%s3325_s12 + $0x28] sm:$0xff] %v2052_v5  ;;  %2118 = vst [vmem:[%s3325_s12 + $0x38] sm:$0xff] %v2054_v6  ;;  %v1062_v13 = vadd.f32 %v1061_v10, %v3315_v2  ;;  %v1138_v14 = vpop.f32.mrb[8].mxu1  ;;  %v1063_v15 = vpop.f32.mrb[9].mxu0  ;;  %vm1957_vm1 = vcmp.ge.f32.partialorder %v991_v7, 0.0  ;;  %vm1956_vm2 = vcmp.ge.f32.partialorder %v916_v8, 0.0 }
 0x14c   : > { %v2021_v16 = vmul.f32 0.2, %v991_v7  ;;  %v2020_v17 = vmul.f32 0.2, %v916_v8  ;;  %v2083_v18 = vsel %vm1955_vm0, %v914_v1, %v2019_v11  ;;  %vm1958_vm3 = vcmp.ge.f32.partialorder %v993_v12, 0.0  ;;  %v1140_v20 = vpop.f32.mrb[9].mxu1 }
 0x14d   : > { %v2022_v19 = vmul.f32 0.2, %v993_v12  ;;  %vm1927_vm4 = vcmp.ge.f32.partialorder %v1062_v13, 0.0  ;;  %2147 = vst [vmem:[%s3325_s12 + $0x120] sm:$0xff] %v2083_v18  ;;  %v1991_v0 = vmul.f32 0.2, %v1062_v13  ;;  %v1139_v22 = vadd.f32 %v1138_v14, %v3315_v2 }
 0x14e   : > { %v2085_v31 = vsel %vm1957_vm1, %v991_v7, %v2021_v16  ;;  %v2084_v21 = vsel %vm1956_vm2, %v916_v8, %v2020_v17  ;;  %v1067_v23 = vpop.f32.mrb[10].mxu0  ;;  %v1064_v25 = vadd.f32 %v1063_v15, %v3315_v2  ;;  %v1141_v26 = vadd.f32 %v1140_v20, %v3315_v2 }
 0x14f   : > { %2149 = vst [vmem:[%s3325_s12 + $0x130] sm:$0xff] %v2085_v31  ;;  %2148 = vst [vmem:[%s3325_s12 + $0x128] sm:$0xff] %v2084_v21  ;;  %v2086_v54 = vsel %vm1958_vm3, %v993_v12, %v2022_v19  ;;  %v1068_v27 = vadd.f32 %v1067_v23, %v3323_v24  ;;  %v1144_v28 = vpop.f32.mrb[10].mxu1  ;;  %v1069_v29 = vpop.f32.mrb[11].mxu0  ;;  %v2055_v30 = vsel %vm1927_vm4, %v1062_v13, %v1991_v0  ;;  %vm1929_vm5 = vcmp.ge.f32.partialorder %v1139_v22, 0.0 }
 0x150   : > { %2150 = vst [vmem:[%s3325_s12 + $0x138] sm:$0xff] %v2086_v54  ;;  %v1993_v32 = vmul.f32 0.2, %v1139_v22  ;;  %v1145_v33 = vadd.f32 %v1144_v28, %v3323_v24  ;;  %v1146_v34 = vpop.f32.mrb[11].mxu1  ;;  %2119 = vst [vmem:[%s3325_s12 + $0x40] sm:$0xff] %v2055_v30  ;;  %vm1928_vm6 = vcmp.ge.f32.partialorder %v1064_v25, 0.0  ;;  %v1070_v43 = vadd.f32 %v1069_v29, %v3323_v24 }
 0x151   : > { %v1992_v35 = vmul.f32 0.2, %v1064_v25  ;;  %vm1930_vm7 = vcmp.ge.f32.partialorder %v1141_v26, 0.0  ;;  %v1994_v36 = vmul.f32 0.2, %v1141_v26  ;;  %vm1959_vm8 = vcmp.ge.f32.partialorder %v1068_v27, 0.0 }
 0x152   : > { %v2057_v37 = vsel %vm1929_vm5, %v1139_v22, %v1993_v32  ;;  %v2023_v38 = vmul.f32 0.2, %v1068_v27  ;;  %vm1961_vm9 = vcmp.ge.f32.partialorder %v1145_v33, 0.0  ;;  %v1215_v39 = vpop.f32.mrb[12].mxu0  ;;  %v2025_v42 = vmul.f32 0.2, %v1145_v33 }
 0x153   : > { %2121 = vst [vmem:[%s3325_s12 + $0x50] sm:$0xff] %v2057_v37  ;;  %v2056_v40 = vsel %vm1928_vm6, %v1064_v25, %v1992_v35  ;;  %v2058_v41 = vsel %vm1930_vm7, %v1141_v26, %v1994_v36  ;;  %v1292_v44 = vpop.f32.mrb[12].mxu1  ;;  %v1217_v45 = vpop.f32.mrb[13].mxu0  ;;  %v1147_v47 = vadd.f32 %v1146_v34, %v3323_v24  ;;  %v1216_v48 = vadd.f32 %v1215_v39, %v3315_v2 }
 0x154   : > { %2120 = vst [vmem:[%s3325_s12 + $0x48] sm:$0xff] %v2056_v40  ;;  %2122 = vst [vmem:[%s3325_s12 + $0x58] sm:$0xff] %v2058_v41  ;;  %v2087_v46 = vsel %vm1959_vm8, %v1068_v27, %v2023_v38  ;;  %v1293_v49 = vadd.f32 %v1292_v44, %v3315_v2  ;;  %v1294_v50 = vpop.f32.mrb[13].mxu1  ;;  %v2089_v51 = vsel %vm1961_vm9, %v1145_v33, %v2025_v42  ;;  %vm1960_vm10 = vcmp.ge.f32.partialorder %v1070_v43, 0.0 }
 0x155   : > { %2151 = vst [vmem:[%s3325_s12 + $0x140] sm:$0xff] %v2087_v46  ;;  %v2024_v52 = vmul.f32 0.2, %v1070_v43  ;;  %v1218_v53 = vadd.f32 %v1217_v45, %v3315_v2  ;;  %2153 = vst [vmem:[%s3325_s12 + $0x150] sm:$0xff] %v2089_v51  ;;  %vm1962_vm11 = vcmp.ge.f32.partialorder %v1147_v47, 0.0  ;;  %vm1931_vm12 = vcmp.ge.f32.partialorder %v1216_v48, 0.0 }
 0x156   : > { %v2026_v55 = vmul.f32 0.2, %v1147_v47  ;;  %v1995_v56 = vmul.f32 0.2, %v1216_v48  ;;  %vm1933_vm13 = vcmp.ge.f32.partialorder %v1293_v49, 0.0  ;;  %v1221_v59 = vpop.f32.mrb[14].mxu0  ;;  %v1295_v1 = vadd.f32 %v1294_v50, %v3315_v2 }
 0x157   : > { %v2088_v57 = vsel %vm1960_vm10, %v1070_v43, %v2024_v52  ;;  %v1997_v58 = vmul.f32 0.2, %v1293_v49  ;;  %vm1932_vm14 = vcmp.ge.f32.partialorder %v1218_v53, 0.0  ;;  %v1298_v60 = vpop.f32.mrb[14].mxu1  ;;  %v1996_v63 = vmul.f32 0.2, %v1218_v53 }
 0x158   : > { %2152 = vst [vmem:[%s3325_s12 + $0x148] sm:$0xff] %v2088_v57  ;;  %v2090_v61 = vsel %vm1962_vm11, %v1147_v47, %v2026_v55  ;;  %v2059_v62 = vsel %vm1931_vm12, %v1216_v48, %v1995_v56  ;;  %v1223_v3 = vpop.f32.mrb[15].mxu0  ;;  %v1300_v4 = vpop.f32.mrb[15].mxu1  ;;  %v1222_v6 = vadd.f32 %v1221_v59, %v3323_v24  ;;  %v1299_v7 = vadd.f32 %v1298_v60, %v3323_v24 }
 0x159   : > { %2154 = vst [vmem:[%s3325_s12 + $0x158] sm:$0xff] %v2090_v61  ;;  %2123 = vst [vmem:[%s3325_s12 + $0x60] sm:$0xff] %v2059_v62  ;;  %v2061_v5 = vsel %vm1933_vm13, %v1293_v49, %v1997_v58  ;;  %v1224_v8 = vadd.f32 %v1223_v3, %v3323_v24  ;;  %v2060_v9 = vsel %vm1932_vm14, %v1218_v53, %v1996_v63  ;;  %vm1934_vm15 = vcmp.ge.f32.partialorder %v1295_v1, 0.0 }
 0x15a   : > { %2125 = vst [vmem:[%s3325_s12 + $0x70] sm:$0xff] %v2061_v5  ;;  %v1998_v10 = vmul.f32 0.2, %v1295_v1  ;;  %v1301_v11 = vadd.f32 %v1300_v4, %v3323_v24  ;;  %v1369_v12 = vpop.f32.mrb[16].mxu0  ;;  %2124 = vst [vmem:[%s3325_s12 + $0x68] sm:$0xff] %v2060_v9  ;;  %vm1963_vm0 = vcmp.ge.f32.partialorder %v1222_v6, 0.0 }
 0x15b   : > { %v2027_v13 = vmul.f32 0.2, %v1222_v6  ;;  %vm1965_vm1 = vcmp.ge.f32.partialorder %v1299_v7, 0.0  ;;  %v2029_v14 = vmul.f32 0.2, %v1299_v7  ;;  %vm1964_vm2 = vcmp.ge.f32.partialorder %v1224_v8, 0.0 }
 0x15c   : > { %v2062_v15 = vsel %vm1934_vm15, %v1295_v1, %v1998_v10  ;;  %v2028_v16 = vmul.f32 0.2, %v1224_v8  ;;  %vm1966_vm3 = vcmp.ge.f32.partialorder %v1301_v11, 0.0  ;;  %v1446_v17 = vpop.f32.mrb[16].mxu1  ;;  %v1371_v18 = vpop.f32.mrb[17].mxu0  ;;  %v1370_v21 = vadd.f32 %v1369_v12, %v3315_v2 }
 0x15d   : > { %2126 = vst [vmem:[%s3325_s12 + $0x78] sm:$0xff] %v2062_v15  ;;  %v2091_v19 = vsel %vm1963_vm0, %v1222_v6, %v2027_v13  ;;  %v2093_v20 = vsel %vm1965_vm1, %v1299_v7, %v2029_v14  ;;  %v2030_v31 = vmul.f32 0.2, %v1301_v11  ;;  %v1448_v0 = vpop.f32.mrb[17].mxu1  ;;  %v1447_v23 = vadd.f32 %v1446_v17, %v3315_v2 }
 0x15e   : > { %2155 = vst [vmem:[%s3325_s12 + $0x160] sm:$0xff] %v2091_v19  ;;  %2157 = vst [vmem:[%s3325_s12 + $0x170] sm:$0xff] %v2093_v20  ;;  %v2092_v22 = vsel %vm1964_vm2, %v1224_v8, %v2028_v16  ;;  %v1372_v54 = vadd.f32 %v1371_v18, %v3315_v2  ;;  %v1449_v25 = vadd.f32 %v1448_v0, %v3315_v2  ;;  %v1375_v26 = vpop.f32.mrb[18].mxu0  ;;  %vm1935_vm4 = vcmp.ge.f32.partialorder %v1370_v21, 0.0 }
 0x15f   : > { %2156 = vst [vmem:[%s3325_s12 + $0x168] sm:$0xff] %v2092_v22  ;;  %v2094_v27 = vsel %vm1966_vm3, %v1301_v11, %v2030_v31  ;;  %v1999_v28 = vmul.f32 0.2, %v1370_v21  ;;  %v1376_v29 = vadd.f32 %v1375_v26, %v3323_v24  ;;  %v1452_v30 = vpop.f32.mrb[18].mxu1  ;;  %v1377_v32 = vpop.f32.mrb[19].mxu0  ;;  %vm1937_vm5 = vcmp.ge.f32.partialorder %v1447_v23, 0.0 }
 0x160   : > { %2158 = vst [vmem:[%s3325_s12 + $0x178] sm:$0xff] %v2094_v27  ;;  %v2001_v33 = vmul.f32 0.2, %v1447_v23  ;;  %vm1936_vm6 = vcmp.ge.f32.partialorder %v1372_v54, 0.0  ;;  %v2000_v34 = vmul.f32 0.2, %v1372_v54  ;;  %v1453_v41 = vadd.f32 %v1452_v30, %v3323_v24 }
 0x161   : > { %v2063_v35 = vsel %vm1935_vm4, %v1370_v21, %v1999_v28  ;;  %vm1938_vm7 = vcmp.ge.f32.partialorder %v1449_v25, 0.0  ;;  %v2002_v36 = vmul.f32 0.2, %v1449_v25  ;;  %vm1967_vm8 = vcmp.ge.f32.partialorder %v1376_v29, 0.0  ;;  %v1454_v37 = vpop.f32.mrb[19].mxu1 }
 0x162   : > { %2127 = vst [vmem:[%s3325_s12 + $0x80] sm:$0xff] %v2063_v35  ;;  %v2065_v38 = vsel %vm1937_vm5, %v1447_v23, %v2001_v33  ;;  %v2064_v39 = vsel %vm1936_vm6, %v1372_v54, %v2000_v34  ;;  %v2031_v40 = vmul.f32 0.2, %v1376_v29  ;;  %v1523_v42 = vpop.f32.mrb[20].mxu0  ;;  %v1378_v44 = vadd.f32 %v1377_v32, %v3323_v24 }
 0x163   : > { %2129 = vst [vmem:[%s3325_s12 + $0x90] sm:$0xff] %v2065_v38  ;;  %2128 = vst [vmem:[%s3325_s12 + $0x88] sm:$0xff] %v2064_v39  ;;  %v2066_v43 = vsel %vm1938_vm7, %v1449_v25, %v2002_v36  ;;  %v1455_v45 = vadd.f32 %v1454_v37, %v3323_v24  ;;  %v1524_v46 = vadd.f32 %v1523_v42, %v3315_v2  ;;  %v1600_v47 = vpop.f32.mrb[20].mxu1  ;;  %v1525_v48 = vpop.f32.mrb[21].mxu0  ;;  %vm1969_vm9 = vcmp.ge.f32.partialorder %v1453_v41, 0.0 }
 0x164   : > { %2130 = vst [vmem:[%s3325_s12 + $0x98] sm:$0xff] %v2066_v43  ;;  %v2095_v49 = vsel %vm1967_vm8, %v1376_v29, %v2031_v40  ;;  %v2033_v50 = vmul.f32 0.2, %v1453_v41  ;;  %v1601_v51 = vadd.f32 %v1600_v47, %v3315_v2  ;;  %v1602_v52 = vpop.f32.mrb[21].mxu1  ;;  %vm1968_vm10 = vcmp.ge.f32.partialorder %v1378_v44, 0.0 }
 0x165   : > { %2159 = vst [vmem:[%s3325_s12 + $0x180] sm:$0xff] %v2095_v49  ;;  %v2032_v53 = vmul.f32 0.2, %v1378_v44  ;;  %vm1970_vm11 = vcmp.ge.f32.partialorder %v1455_v45, 0.0  ;;  %v2034_v55 = vmul.f32 0.2, %v1455_v45  ;;  %v1526_v62 = vadd.f32 %v1525_v48, %v3315_v2 }
 0x166   : > { %v2097_v56 = vsel %vm1969_vm9, %v1453_v41, %v2033_v50  ;;  %vm1939_vm12 = vcmp.ge.f32.partialorder %v1524_v46, 0.0  ;;  %v2003_v57 = vmul.f32 0.2, %v1524_v46  ;;  %vm1941_vm13 = vcmp.ge.f32.partialorder %v1601_v51, 0.0  ;;  %v1529_v58 = vpop.f32.mrb[22].mxu0 }
 0x167   : > { %2161 = vst [vmem:[%s3325_s12 + $0x190] sm:$0xff] %v2097_v56  ;;  %v2096_v59 = vsel %vm1968_vm10, %v1378_v44, %v2032_v53  ;;  %v2098_v60 = vsel %vm1970_vm11, %v1455_v45, %v2034_v55  ;;  %v2005_v61 = vmul.f32 0.2, %v1601_v51  ;;  %v1606_v63 = vpop.f32.mrb[22].mxu1  ;;  %v1531_v1 = vpop.f32.mrb[23].mxu0  ;;  %v1603_v4 = vadd.f32 %v1602_v52, %v3315_v2 }
 0x168   : > { %2160 = vst [vmem:[%s3325_s12 + $0x188] sm:$0xff] %v2096_v59  ;;  %2162 = vst [vmem:[%s3325_s12 + $0x198] sm:$0xff] %v2098_v60  ;;  %v2067_v3 = vsel %vm1939_vm12, %v1524_v46, %v2003_v57  ;;  %v1530_v5 = vadd.f32 %v1529_v58, %v3323_v24  ;;  %v1607_v6 = vadd.f32 %v1606_v63, %v3323_v24  ;;  %v1608_v7 = vpop.f32.mrb[23].mxu1  ;;  %vm1940_vm14 = vcmp.ge.f32.partialorder %v1526_v62, 0.0 }
 0x169   : > { %2131 = vst [vmem:[%s3325_s12 + $0xa0] sm:$0xff] %v2067_v3  ;;  %v2069_v8 = vsel %vm1941_vm13, %v1601_v51, %v2005_v61  ;;  %v2004_v9 = vmul.f32 0.2, %v1526_v62  ;;  %v1532_v10 = vadd.f32 %v1531_v1, %v3323_v24  ;;  %vm1942_vm15 = vcmp.ge.f32.partialorder %v1603_v4, 0.0 }
 0x16a   : > { %2133 = vst [vmem:[%s3325_s12 + $0xb0] sm:$0xff] %v2069_v8  ;;  %v2006_v11 = vmul.f32 0.2, %v1603_v4  ;;  %vm1971_vm0 = vcmp.ge.f32.partialorder %v1530_v5, 0.0  ;;  %v2035_v12 = vmul.f32 0.2, %v1530_v5  ;;  %v1609_v20 = vadd.f32 %v1608_v7, %v3323_v24 }
 0x16b   : > { %v2068_v13 = vsel %vm1940_vm14, %v1526_v62, %v2004_v9  ;;  %vm1973_vm1 = vcmp.ge.f32.partialorder %v1607_v6, 0.0  ;;  %v2037_v14 = vmul.f32 0.2, %v1607_v6  ;;  %vm1972_vm2 = vcmp.ge.f32.partialorder %v1532_v10, 0.0  ;;  %v1677_v15 = vpop.f32.mrb[24].mxu0  ;;  %v1754_v16 = vpop.f32.mrb[24].mxu1 }
 0x16c   : > { %2132 = vst [vmem:[%s3325_s12 + $0xa8] sm:$0xff] %v2068_v13  ;;  %v2070_v17 = vsel %vm1942_vm15, %v1603_v4, %v2006_v11  ;;  %v2099_v18 = vsel %vm1971_vm0, %v1530_v5, %v2035_v12  ;;  %v2036_v19 = vmul.f32 0.2, %v1532_v10  ;;  %v1679_v31 = vpop.f32.mrb[25].mxu0  ;;  %v1756_v21 = vpop.f32.mrb[25].mxu1  ;;  %v1678_v22 = vadd.f32 %v1677_v15, %v3315_v2 }
 0x16d   : > { %2134 = vst [vmem:[%s3325_s12 + $0xb8] sm:$0xff] %v2070_v17  ;;  %2163 = vst [vmem:[%s3325_s12 + $0x1a0] sm:$0xff] %v2099_v18  ;;  %v2101_v0 = vsel %vm1973_vm1, %v1607_v6, %v2037_v14  ;;  %v1755_v23 = vadd.f32 %v1754_v16, %v3315_v2  ;;  %v1680_v54 = vadd.f32 %v1679_v31, %v3315_v2  ;;  %vm1974_vm3 = vcmp.ge.f32.partialorder %v1609_v20, 0.0 }
 0x16e   : > { %2165 = vst [vmem:[%s3325_s12 + $0x1b0] sm:$0xff] %v2101_v0  ;;  %v2100_v25 = vsel %vm1972_vm2, %v1532_v10, %v2036_v19  ;;  %v2038_v26 = vmul.f32 0.2, %v1609_v20  ;;  %v1757_v27 = vadd.f32 %v1756_v21, %v3315_v2  ;;  %v1683_v28 = vpop.f32.mrb[26].mxu0  ;;  %vm1943_vm4 = vcmp.ge.f32.partialorder %v1678_v22, 0.0 }
 0x16f   : > { %2164 = vst [vmem:[%s3325_s12 + $0x1a8] sm:$0xff] %v2100_v25  ;;  %v2007_v29 = vmul.f32 0.2, %v1678_v22  ;;  %vm1945_vm5 = vcmp.ge.f32.partialorder %v1755_v23, 0.0  ;;  %v2009_v30 = vmul.f32 0.2, %v1755_v23  ;;  %v1684_v39 = vadd.f32 %v1683_v28, %v3323_v24 }
 0x170   : > { %v2102_v32 = vsel %vm1974_vm3, %v1609_v20, %v2038_v26  ;;  %vm1944_vm6 = vcmp.ge.f32.partialorder %v1680_v54, 0.0  ;;  %v2008_v33 = vmul.f32 0.2, %v1680_v54  ;;  %vm1946_vm7 = vcmp.ge.f32.partialorder %v1757_v27, 0.0  ;;  %v1760_v34 = vpop.f32.mrb[26].mxu1  ;;  %v1685_v35 = vpop.f32.mrb[27].mxu0 }
 0x171   : > { %2166 = vst [vmem:[%s3325_s12 + $0x1b8] sm:$0xff] %v2102_v32  ;;  %v2071_v36 = vsel %vm1943_vm4, %v1678_v22, %v2007_v29  ;;  %v2073_v37 = vsel %vm1945_vm5, %v1755_v23, %v2009_v30  ;;  %v2010_v38 = vmul.f32 0.2, %v1757_v27  ;;  %v1762_v40 = vpop.f32.mrb[27].mxu1  ;;  %v1761_v42 = vadd.f32 %v1760_v34, %v3323_v24  ;;  %v2199_v22 = vld [vmem:[%s3325_s12 + $0x8] sm:$0xff] (%p2730_p5)  ;;  %v2201_v23 = vld [vmem:[%s3325_s12 + $0x10] sm:$0xff] (%p2730_p5) }
 0x172   : > { %2135 = vst [vmem:[%s3325_s12 + $0xc0] sm:$0xff] %v2071_v36  ;;  %2137 = vst [vmem:[%s3325_s12 + $0xd0] sm:$0xff] %v2073_v37  ;;  %v2072_v41 = vsel %vm1944_vm6, %v1680_v54, %v2008_v33  ;;  %v1686_v43 = vadd.f32 %v1685_v35, %v3323_v24  ;;  %v1763_v44 = vadd.f32 %v1762_v40, %v3323_v24  ;;  %v1831_v45 = vpop.f32.mrb[28].mxu0  ;;  %vm1975_vm8 = vcmp.ge.f32.partialorder %v1684_v39, 0.0  ;;  %v2203_v54 = vld [vmem:[%s3325_s12 + $0x18] sm:$0xff] (%p2730_p5)  ;;  %v2205_v25 = vld [vmem:[%s3325_s12 + $0x20] sm:$0xff] (%p2730_p5) }
 0x173   : > { %2136 = vst [vmem:[%s3325_s12 + $0xc8] sm:$0xff] %v2072_v41  ;;  %v2074_v46 = vsel %vm1946_vm7, %v1757_v27, %v2010_v38  ;;  %v2039_v47 = vmul.f32 0.2, %v1684_v39  ;;  %v1832_v48 = vadd.f32 %v1831_v45, %v3315_v2  ;;  %v1908_v49 = vpop.f32.mrb[28].mxu1  ;;  %v1833_v50 = vpop.f32.mrb[29].mxu0  ;;  %vm1977_vm9 = vcmp.ge.f32.partialorder %v1761_v42, 0.0 }
 0x174   : > { %2138 = vst [vmem:[%s3325_s12 + $0xd8] sm:$0xff] %v2074_v46  ;;  %v2041_v51 = vmul.f32 0.2, %v1761_v42  ;;  %vm1976_vm10 = vcmp.ge.f32.partialorder %v1686_v43, 0.0  ;;  %v2040_v52 = vmul.f32 0.2, %v1686_v43  ;;  %v1909_v60 = vadd.f32 %v1908_v49, %v3315_v2 }
 0x175   : > { %v2103_v53 = vsel %vm1975_vm8, %v1684_v39, %v2039_v47  ;;  %vm1978_vm11 = vcmp.ge.f32.partialorder %v1763_v44, 0.0  ;;  %v2042_v55 = vmul.f32 0.2, %v1763_v44  ;;  %vm1947_vm12 = vcmp.ge.f32.partialorder %v1832_v48, 0.0  ;;  %v1910_v56 = vpop.f32.mrb[29].mxu1  ;;  %v2207_v26 = vld [vmem:[%s3325_s12 + $0x28] sm:$0xff] (%p2730_p5) }
 0x176   : > { %2167 = vst [vmem:[%s3325_s12 + $0x1c0] sm:$0xff] %v2103_v53  ;;  %v2105_v57 = vsel %vm1977_vm9, %v1761_v42, %v2041_v51  ;;  %v2104_v58 = vsel %vm1976_vm10, %v1686_v43, %v2040_v52  ;;  %v2011_v59 = vmul.f32 0.2, %v1832_v48  ;;  %v1837_v61 = vpop.f32.mrb[30].mxu0  ;;  %v1834_v63 = vadd.f32 %v1833_v50, %v3315_v2  ;;  %2200 = vst [vmem:[%s3470_s20 + $0x8] sm:$0xff] (%p2730_p5), %v2199_v22  ;;  %v2209_v27 = vld [vmem:[%s3325_s12 + $0x30] sm:$0xff] (%p2730_p5) }
 0x177   : > { %2169 = vst [vmem:[%s3325_s12 + $0x1d0] sm:$0xff] %v2105_v57  ;;  %2168 = vst [vmem:[%s3325_s12 + $0x1c8] sm:$0xff] %v2104_v58  ;;  %v2106_v62 = vsel %vm1978_vm11, %v1763_v44, %v2042_v55  ;;  %v1911_v1 = vadd.f32 %v1910_v56, %v3315_v2  ;;  %v1838_v3 = vadd.f32 %v1837_v61, %v3323_v24  ;;  %v1914_v4 = vpop.f32.mrb[30].mxu1  ;;  %v1839_v5 = vpop.f32.mrb[31].mxu0  ;;  %vm1949_vm13 = vcmp.ge.f32.partialorder %v1909_v60, 0.0  ;;  %v2211_v28 = vld [vmem:[%s3325_s12 + $0x38] sm:$0xff] (%p2730_p5) }
 0x178   : > { %2170 = vst [vmem:[%s3325_s12 + $0x1d8] sm:$0xff] %v2106_v62  ;;  %v2075_v6 = vsel %vm1947_vm12, %v1832_v48, %v2011_v59  ;;  %v2013_v7 = vmul.f32 0.2, %v1909_v60  ;;  %v1915_v8 = vadd.f32 %v1914_v4, %v3323_v24  ;;  %v1916_v9 = vpop.f32.mrb[31].mxu1  ;;  %vm1948_vm14 = vcmp.ge.f32.partialorder %v1834_v63, 0.0  ;;  %2202 = vst [vmem:[%s3470_s20 + $0x10] sm:$0xff] (%p2730_p5), %v2201_v23 }
 0x179   : > { %2139 = vst [vmem:[%s3325_s12 + $0xe0] sm:$0xff] %v2075_v6  ;;  %v2012_v10 = vmul.f32 0.2, %v1834_v63  ;;  %vm1950_vm15 = vcmp.ge.f32.partialorder %v1911_v1, 0.0  ;;  %v2014_v2 = vmul.f32 0.2, %v1911_v1  ;;  %v1840_v16 = vadd.f32 %v1839_v5, %v3323_v24 }
 0x17a   : > { %v2077_v11 = vsel %vm1949_vm13, %v1909_v60, %v2013_v7  ;;  %vm1979_vm0 = vcmp.ge.f32.partialorder %v1838_v3, 0.0  ;;  %v2043_v12 = vmul.f32 0.2, %v1838_v3  ;;  %vm1981_vm1 = vcmp.ge.f32.partialorder %v1915_v8, 0.0  ;;  %2181 = sbr.rel (!%p2730_p5) target bundleno = 413 (0x19d), region = 59  ;;  %2204 = vst [vmem:[%s3470_s20 + $0x18] sm:$0xff] (%p2730_p5), %v2203_v54 }
 0x17b   : > { %2141 = vst [vmem:[%s3325_s12 + $0xf0] sm:$0xff] %v2077_v11  ;;  %v2076_v13 = vsel %vm1948_vm14, %v1834_v63, %v2012_v10  ;;  %v2078_v14 = vsel %vm1950_vm15, %v1911_v1, %v2014_v2  ;;  %v2045_v15 = vmul.f32 0.2, %v1915_v8  ;;  %v1917_v18 = vadd.f32 %v1916_v9, %v3323_v24  ;;  %v2197_v24 = vld [vmem:[%s3325_s12] sm:$0xff] (%p2730_p5)  ;;  %2206 = vst [vmem:[%s3470_s20 + $0x20] sm:$0xff] (%p2730_p5), %v2205_v25  ;;  %v2215_v30 = vld [vmem:[%s3325_s12 + $0x48] sm:$0xff] (%p2730_p5) }
 0x17c   : > { %2140 = vst [vmem:[%s3325_s12 + $0xe8] sm:$0xff] %v2076_v13  ;;  %2142 = vst [vmem:[%s3325_s12 + $0xf8] sm:$0xff] %v2078_v14  ;;  %v2107_v17 = vsel %vm1979_vm0, %v1838_v3, %v2043_v12  ;;  %vm1980_vm2 = vcmp.ge.f32.partialorder %v1840_v16, 0.0  ;;  %v2044_v20 = vmul.f32 0.2, %v1840_v16  ;;  %v2213_v29 = vld [vmem:[%s3325_s12 + $0x40] sm:$0xff] (%p2730_p5) }
 0x17d   : > { %2171 = vst [vmem:[%s3325_s12 + $0x1e0] sm:$0xff] %v2107_v17  ;;  %v2109_v19 = vsel %vm1981_vm1, %v1915_v8, %v2045_v15  ;;  %vm1982_vm3 = vcmp.ge.f32.partialorder %v1917_v18, 0.0  ;;  %v2046_v31 = vmul.f32 0.2, %v1917_v18  ;;  %2198 = vst [vmem:[%s3470_s20] sm:$0xff] (%p2730_p5), %v2197_v24  ;;  %v2217_v32 = vld [vmem:[%s3325_s12 + $0x50] sm:$0xff] (%p2730_p5)  ;;  %v2219_v33 = vld [vmem:[%s3325_s12 + $0x58] sm:$0xff] (%p2730_p5) }
 0x17e   : > { %2173 = vst [vmem:[%s3325_s12 + $0x1f0] sm:$0xff] %v2109_v19  ;;  %v2108_v21 = vsel %vm1980_vm2, %v1840_v16, %v2044_v20  ;;  %2208 = vst [vmem:[%s3470_s20 + $0x28] sm:$0xff] (%p2730_p5), %v2207_v26  ;;  %v2221_v34 = vld [vmem:[%s3325_s12 + $0x60] sm:$0xff] (%p2730_p5)  ;;  %v2223_v35 = vld [vmem:[%s3325_s12 + $0x68] sm:$0xff] (%p2730_p5) }
 0x17f   : > { %2172 = vst [vmem:[%s3325_s12 + $0x1e8] sm:$0xff] %v2108_v21  ;;  %v2110_v0 = vsel %vm1982_vm3, %v1917_v18, %v2046_v31  ;;  %2210 = vst [vmem:[%s3470_s20 + $0x30] sm:$0xff] (%p2730_p5), %v2209_v27  ;;  %v2225_v36 = vld [vmem:[%s3325_s12 + $0x70] sm:$0xff] (%p2730_p5)  ;;  %v2227_v37 = vld [vmem:[%s3325_s12 + $0x78] sm:$0xff] (%p2730_p5) }
 0x180   : > { %2174 = vst [vmem:[%s3325_s12 + $0x1f8] sm:$0xff] %v2110_v0  ;;  %2212 = vst [vmem:[%s3470_s20 + $0x38] sm:$0xff] (%p2730_p5), %v2211_v28  ;;  %v2229_v38 = vld [vmem:[%s3325_s12 + $0x80] sm:$0xff] (%p2730_p5)  ;;  %v2231_v39 = vld [vmem:[%s3325_s12 + $0x88] sm:$0xff] (%p2730_p5) }
 0x181   : > { %2214 = vst [vmem:[%s3470_s20 + $0x40] sm:$0xff] %v2213_v29  ;;  %2216 = vst [vmem:[%s3470_s20 + $0x48] sm:$0xff] %v2215_v30  ;;  %v2233_v40 = vld [vmem:[%s3325_s12 + $0x90] sm:$0xff]  ;;  %v2235_v41 = vld [vmem:[%s3325_s12 + $0x98] sm:$0xff] }
 0x182   : > { %2218 = vst [vmem:[%s3470_s20 + $0x50] sm:$0xff] %v2217_v32  ;;  %2220 = vst [vmem:[%s3470_s20 + $0x58] sm:$0xff] %v2219_v33  ;;  %v2237_v42 = vld [vmem:[%s3325_s12 + $0xa0] sm:$0xff]  ;;  %v2239_v43 = vld [vmem:[%s3325_s12 + $0xa8] sm:$0xff] }
 0x183   : > { %2222 = vst [vmem:[%s3470_s20 + $0x60] sm:$0xff] %v2221_v34  ;;  %2224 = vst [vmem:[%s3470_s20 + $0x68] sm:$0xff] %v2223_v35  ;;  %v2241_v44 = vld [vmem:[%s3325_s12 + $0xb0] sm:$0xff]  ;;  %v2243_v45 = vld [vmem:[%s3325_s12 + $0xb8] sm:$0xff] }
 0x184   : > { %2226 = vst [vmem:[%s3470_s20 + $0x70] sm:$0xff] %v2225_v36  ;;  %2228 = vst [vmem:[%s3470_s20 + $0x78] sm:$0xff] %v2227_v37  ;;  %v2245_v46 = vld [vmem:[%s3325_s12 + $0xc0] sm:$0xff]  ;;  %v2247_v47 = vld [vmem:[%s3325_s12 + $0xc8] sm:$0xff] }
 0x185   : > { %2230 = vst [vmem:[%s3470_s20 + $0x80] sm:$0xff] %v2229_v38  ;;  %2232 = vst [vmem:[%s3470_s20 + $0x88] sm:$0xff] %v2231_v39  ;;  %v2249_v48 = vld [vmem:[%s3325_s12 + $0xd0] sm:$0xff]  ;;  %v2251_v49 = vld [vmem:[%s3325_s12 + $0xd8] sm:$0xff] }
 0x186   : > { %2234 = vst [vmem:[%s3470_s20 + $0x90] sm:$0xff] %v2233_v40  ;;  %2236 = vst [vmem:[%s3470_s20 + $0x98] sm:$0xff] %v2235_v41  ;;  %v2253_v50 = vld [vmem:[%s3325_s12 + $0xe0] sm:$0xff]  ;;  %v2255_v51 = vld [vmem:[%s3325_s12 + $0xe8] sm:$0xff] }
 0x187   : > { %2238 = vst [vmem:[%s3470_s20 + $0xa0] sm:$0xff] %v2237_v42  ;;  %2240 = vst [vmem:[%s3470_s20 + $0xa8] sm:$0xff] %v2239_v43  ;;  %v2257_v52 = vld [vmem:[%s3325_s12 + $0xf0] sm:$0xff]  ;;  %v2259_v53 = vld [vmem:[%s3325_s12 + $0xf8] sm:$0xff] }
 0x188   : > { %2242 = vst [vmem:[%s3470_s20 + $0xb0] sm:$0xff] %v2241_v44  ;;  %2244 = vst [vmem:[%s3470_s20 + $0xb8] sm:$0xff] %v2243_v45  ;;  %v2261_v55 = vld [vmem:[%s3325_s12 + $0x100] sm:$0xff]  ;;  %v2263_v56 = vld [vmem:[%s3325_s12 + $0x108] sm:$0xff] }
 0x189   : > { %2246 = vst [vmem:[%s3470_s20 + $0xc0] sm:$0xff] %v2245_v46  ;;  %2248 = vst [vmem:[%s3470_s20 + $0xc8] sm:$0xff] %v2247_v47  ;;  %v2265_v57 = vld [vmem:[%s3325_s12 + $0x110] sm:$0xff]  ;;  %v2267_v58 = vld [vmem:[%s3325_s12 + $0x118] sm:$0xff] }
 0x18a   : > { %2250 = vst [vmem:[%s3470_s20 + $0xd0] sm:$0xff] %v2249_v48  ;;  %2252 = vst [vmem:[%s3470_s20 + $0xd8] sm:$0xff] %v2251_v49  ;;  %v2269_v59 = vld [vmem:[%s3325_s12 + $0x120] sm:$0xff]  ;;  %v2271_v60 = vld [vmem:[%s3325_s12 + $0x128] sm:$0xff] }
 0x18b   : > { %2254 = vst [vmem:[%s3470_s20 + $0xe0] sm:$0xff] %v2253_v50  ;;  %2256 = vst [vmem:[%s3470_s20 + $0xe8] sm:$0xff] %v2255_v51  ;;  %v2273_v61 = vld [vmem:[%s3325_s12 + $0x130] sm:$0xff]  ;;  %v2275_v62 = vld [vmem:[%s3325_s12 + $0x138] sm:$0xff] }
 0x18c   : > { %2258 = vst [vmem:[%s3470_s20 + $0xf0] sm:$0xff] %v2257_v52  ;;  %2260 = vst [vmem:[%s3470_s20 + $0xf8] sm:$0xff] %v2259_v53  ;;  %v2277_v63 = vld [vmem:[%s3325_s12 + $0x140] sm:$0xff]  ;;  %v2279_v1 = vld [vmem:[%s3325_s12 + $0x148] sm:$0xff] }
 0x18d   : > { %2262 = vst [vmem:[%s3470_s20 + $0x200] sm:$0xff] %v2261_v55  ;;  %2264 = vst [vmem:[%s3470_s20 + $0x208] sm:$0xff] %v2263_v56  ;;  %v2281_v3 = vld [vmem:[%s3325_s12 + $0x150] sm:$0xff]  ;;  %v2283_v4 = vld [vmem:[%s3325_s12 + $0x158] sm:$0xff] }
 0x18e   : > { %2266 = vst [vmem:[%s3470_s20 + $0x210] sm:$0xff] %v2265_v57  ;;  %2268 = vst [vmem:[%s3470_s20 + $0x218] sm:$0xff] %v2267_v58  ;;  %v2285_v5 = vld [vmem:[%s3325_s12 + $0x160] sm:$0xff]  ;;  %v2287_v6 = vld [vmem:[%s3325_s12 + $0x168] sm:$0xff] }
 0x18f   : > { %2270 = vst [vmem:[%s3470_s20 + $0x220] sm:$0xff] %v2269_v59  ;;  %2272 = vst [vmem:[%s3470_s20 + $0x228] sm:$0xff] %v2271_v60  ;;  %v2289_v7 = vld [vmem:[%s3325_s12 + $0x170] sm:$0xff]  ;;  %v2291_v8 = vld [vmem:[%s3325_s12 + $0x178] sm:$0xff] }
 0x190   : > { %2274 = vst [vmem:[%s3470_s20 + $0x230] sm:$0xff] %v2273_v61  ;;  %2276 = vst [vmem:[%s3470_s20 + $0x238] sm:$0xff] %v2275_v62  ;;  %v2293_v9 = vld [vmem:[%s3325_s12 + $0x180] sm:$0xff]  ;;  %v2295_v10 = vld [vmem:[%s3325_s12 + $0x188] sm:$0xff] }
 0x191   : > { %2278 = vst [vmem:[%s3470_s20 + $0x240] sm:$0xff] %v2277_v63  ;;  %2280 = vst [vmem:[%s3470_s20 + $0x248] sm:$0xff] %v2279_v1  ;;  %v2297_v2 = vld [vmem:[%s3325_s12 + $0x190] sm:$0xff]  ;;  %v2299_v11 = vld [vmem:[%s3325_s12 + $0x198] sm:$0xff] }
 0x192   : > { %2282 = vst [vmem:[%s3470_s20 + $0x250] sm:$0xff] %v2281_v3  ;;  %2284 = vst [vmem:[%s3470_s20 + $0x258] sm:$0xff] %v2283_v4  ;;  %v2301_v12 = vld [vmem:[%s3325_s12 + $0x1a0] sm:$0xff]  ;;  %v2303_v13 = vld [vmem:[%s3325_s12 + $0x1a8] sm:$0xff] }
 0x193   : > { %2286 = vst [vmem:[%s3470_s20 + $0x260] sm:$0xff] %v2285_v5  ;;  %2288 = vst [vmem:[%s3470_s20 + $0x268] sm:$0xff] %v2287_v6  ;;  %v2305_v14 = vld [vmem:[%s3325_s12 + $0x1b0] sm:$0xff]  ;;  %v2307_v15 = vld [vmem:[%s3325_s12 + $0x1b8] sm:$0xff] }
 0x194   : > { %2290 = vst [vmem:[%s3470_s20 + $0x270] sm:$0xff] %v2289_v7  ;;  %2292 = vst [vmem:[%s3470_s20 + $0x278] sm:$0xff] %v2291_v8  ;;  %v2309_v16 = vld [vmem:[%s3325_s12 + $0x1c0] sm:$0xff]  ;;  %v2311_v17 = vld [vmem:[%s3325_s12 + $0x1c8] sm:$0xff] }
 0x195   : > { %2294 = vst [vmem:[%s3470_s20 + $0x280] sm:$0xff] %v2293_v9  ;;  %2296 = vst [vmem:[%s3470_s20 + $0x288] sm:$0xff] %v2295_v10  ;;  %v2313_v18 = vld [vmem:[%s3325_s12 + $0x1d0] sm:$0xff]  ;;  %v2315_v19 = vld [vmem:[%s3325_s12 + $0x1d8] sm:$0xff] }
 0x196   : > { %2298 = vst [vmem:[%s3470_s20 + $0x290] sm:$0xff] %v2297_v2  ;;  %2300 = vst [vmem:[%s3470_s20 + $0x298] sm:$0xff] %v2299_v11  ;;  %v2317_v20 = vld [vmem:[%s3325_s12 + $0x1e0] sm:$0xff]  ;;  %v2319_v31 = vld [vmem:[%s3325_s12 + $0x1e8] sm:$0xff] }
 0x197   : > { %2302 = vst [vmem:[%s3470_s20 + $0x2a0] sm:$0xff] %v2301_v12  ;;  %2304 = vst [vmem:[%s3470_s20 + $0x2a8] sm:$0xff] %v2303_v13  ;;  %v2321_v21 = vld [vmem:[%s3325_s12 + $0x1f0] sm:$0xff]  ;;  %v2323_v0 = vld [vmem:[%s3325_s12 + $0x1f8] sm:$0xff] }
 0x198   : > { %2306 = vst [vmem:[%s3470_s20 + $0x2b0] sm:$0xff] %v2305_v14  ;;  %2308 = vst [vmem:[%s3470_s20 + $0x2b8] sm:$0xff] %v2307_v15 }
 0x199   : > { %2310 = vst [vmem:[%s3470_s20 + $0x2c0] sm:$0xff] %v2309_v16  ;;  %2312 = vst [vmem:[%s3470_s20 + $0x2c8] sm:$0xff] %v2311_v17 }
 0x19a   : > { %2314 = vst [vmem:[%s3470_s20 + $0x2d0] sm:$0xff] %v2313_v18  ;;  %2316 = vst [vmem:[%s3470_s20 + $0x2d8] sm:$0xff] %v2315_v19 }
 0x19b   : > { %2318 = vst [vmem:[%s3470_s20 + $0x2e0] sm:$0xff] %v2317_v20  ;;  %2320 = vst [vmem:[%s3470_s20 + $0x2e8] sm:$0xff] %v2319_v31 }
 0x19c   : > { %2322 = vst [vmem:[%s3470_s20 + $0x2f0] sm:$0xff] %v2321_v21  ;;  %2324 = vst [vmem:[%s3470_s20 + $0x2f8] sm:$0xff] %v2323_v0 }
 0x19d PF: > { %p10_p10 = scmp.ge.s32.totalorder %s2717_s16, 4   ;;  %s3614_s12 = smov %s2671_s13 }
 0x19e   : > { %s3615_s13 = smov %s2728_s19  ;;  %s3616_s14 = smov %s2717_s16 }
 0x19f   :  { %12 = sbr.rel (!%p10_p10) target bundleno = 2 (0x2), region = 113 }

// kernel: discriminator_forward.5
= control target key start
LH: loop header
LB: loop body
LE: loop exit
PB: predicated region body
PF: predicated region fallthrough
CT: control target
= control target key end

     0   :  { %v2116_v3 = vmov 0   ;;  %vm340_vm0 = vcmask 130048   ;;  %s4285_s0 = inlined_call_operand.vmem [shape: f32[144,2048], index: 0, kind: input, shape index: {}]   ;;  %s4286_s1 = inlined_call_operand.vmem [shape: f32[32,144], index: 1, kind: input, shape index: {}]   ;;  %s4287_s2 = inlined_call_operand.vmem [shape: f32[32,1], index: 2, kind: input, shape index: {}]   ;;  %s4288_s4 = inlined_call_operand.vmem [shape: f32[32,1], index: 4, kind: input, shape index: {}]   ;;  %s4289_s3 = inlined_call_operand.vmem [shape: f32[32,1], index: 3, kind: input, shape index: {}]   ;;  %s4290_s5 = inlined_call_operand.vmem [shape: f32[32,2048], index: 5, kind: output, shape index: {}]  }
   0x1   :  { %v29_v0 = vld [vmem:[%s4285_s0 + $0x8] sm:$0xff]  ;;  %v31_v2 = vld [vmem:[%s4285_s0 + $0x18] sm:$0xff]  ;;  %2106 = vset.pattern.permute.xlu0 %v2116_v3  ;;  %2107 = vset.pattern.permute.xlu1 %v2116_v3  ;;  %v28_v6 = vld [vmem:[%s4285_s0] sm:$0xff] }
   0x2   :  { %v45_v1 = vld [vmem:[%s4285_s0 + $0x88] sm:$0xff]  ;;  %v47_v5 = vld [vmem:[%s4285_s0 + $0x98] sm:$0xff]  ;;  %v44_v7 = vld [vmem:[%s4285_s0 + $0x80] sm:$0xff] }
   0x3   :  { %v1817_v4 = vpack.c.bf16 %v45_v1, %v29_v0  ;;  %v1853_v8 = vpack.c.bf16 %v47_v5, %v31_v2  ;;  %v1819_v9 = vpack.c.bf16 %v44_v7, %v28_v6  ;;  %v30_v10 = vld [vmem:[%s4285_s0 + $0x10] sm:$0xff]  ;;  %v61_v12 = vld [vmem:[%s4285_s0 + $0x108] sm:$0xff]  ;;  %v63_v15 = vld [vmem:[%s4285_s0 + $0x118] sm:$0xff] }
   0x4   :  { %v46_v11 = vld [vmem:[%s4285_s0 + $0x90] sm:$0xff]  ;;  %v77_v14 = vld [vmem:[%s4285_s0 + $0x188] sm:$0xff]  ;;  %v79_v16 = vld [vmem:[%s4285_s0 + $0x198] sm:$0xff] }
   0x5   :  { %1818 = vmatprep.subr.bf16.mxu0 %v1817_v4  ;;  %v1855_v13 = vpack.c.bf16 %v46_v11, %v30_v10  ;;  %1854 = vmatprep.subr.bf16.mxu1 %v1853_v8  ;;  %v1821_v17 = vpack.c.bf16 %v77_v14, %v61_v12  ;;  %v1857_v18 = vpack.c.bf16 %v79_v16, %v63_v15  ;;  %v60_v19 = vld [vmem:[%s4285_s0 + $0x100] sm:$0xff]  ;;  %v62_v21 = vld [vmem:[%s4285_s0 + $0x110] sm:$0xff]  ;;  %v93_v24 = vld [vmem:[%s4285_s0 + $0x208] sm:$0xff] }
   0x6   :  { %1820 = vmatpush1.bf16.msra.mxu0 %v1819_v9  ;;  %v76_v20 = vld [vmem:[%s4285_s0 + $0x180] sm:$0xff]  ;;  %v78_v23 = vld [vmem:[%s4285_s0 + $0x190] sm:$0xff]  ;;  %v109_v25 = vld [vmem:[%s4285_s0 + $0x288] sm:$0xff] }
   0x7   :  { %1856 = vmatpush1.bf16.msra.mxu1 %v1855_v13  ;;  %v1823_v22 = vpack.c.bf16 %v76_v20, %v60_v19  ;;  %1822 = vmatprep.subr.bf16.mxu0 %v1821_v17  ;;  %v1859_v26 = vpack.c.bf16 %v78_v23, %v62_v21  ;;  %v1825_v27 = vpack.c.bf16 %v109_v25, %v93_v24  ;;  %v95_v28 = vld [vmem:[%s4285_s0 + $0x218] sm:$0xff]  ;;  %v92_v30 = vld [vmem:[%s4285_s0 + $0x200] sm:$0xff]  ;;  %v94_v33 = vld [vmem:[%s4285_s0 + $0x210] sm:$0xff] }
   0x8   :  { %1858 = vmatprep.subr.bf16.mxu1 %v1857_v18  ;;  %v111_v29 = vld [vmem:[%s4285_s0 + $0x298] sm:$0xff]  ;;  %v108_v32 = vld [vmem:[%s4285_s0 + $0x280] sm:$0xff]  ;;  %v110_v34 = vld [vmem:[%s4285_s0 + $0x290] sm:$0xff] }
   0x9   :  { %v1861_v31 = vpack.c.bf16 %v111_v29, %v95_v28  ;;  %v1827_v35 = vpack.c.bf16 %v108_v32, %v92_v30  ;;  %v125_v36 = vld [vmem:[%s4285_s0 + $0x308] sm:$0xff]  ;;  %v127_v38 = vld [vmem:[%s4285_s0 + $0x318] sm:$0xff]  ;;  %v1863_v39 = vpack.c.bf16 %v110_v34, %v94_v33  ;;  %v124_v42 = vld [vmem:[%s4285_s0 + $0x300] sm:$0xff] }
   0xa   :  { %1824 = vmatpush1.bf16.msra.mxu0 %v1823_v22  ;;  %v141_v37 = vld [vmem:[%s4285_s0 + $0x388] sm:$0xff]  ;;  %v143_v41 = vld [vmem:[%s4285_s0 + $0x398] sm:$0xff]  ;;  %v140_v43 = vld [vmem:[%s4285_s0 + $0x380] sm:$0xff] }
   0xb   :  { %1860 = vmatpush1.bf16.msra.mxu1 %v1859_v26  ;;  %1826 = vmatprep.subr.bf16.mxu0 %v1825_v27  ;;  %v1829_v40 = vpack.c.bf16 %v141_v37, %v125_v36  ;;  %v1865_v44 = vpack.c.bf16 %v143_v41, %v127_v38  ;;  %v126_v45 = vld [vmem:[%s4285_s0 + $0x310] sm:$0xff]  ;;  %v157_v47 = vld [vmem:[%s4285_s0 + $0x408] sm:$0xff]  ;;  %v159_v49 = vld [vmem:[%s4285_s0 + $0x418] sm:$0xff]  ;;  %v1831_v51 = vpack.c.bf16 %v140_v43, %v124_v42 }
   0xc   :  { %1862 = vmatprep.subr.bf16.mxu1 %v1861_v31  ;;  %v142_v46 = vld [vmem:[%s4285_s0 + $0x390] sm:$0xff]  ;;  %v173_v48 = vld [vmem:[%s4285_s0 + $0x488] sm:$0xff]  ;;  %v175_v50 = vld [vmem:[%s4285_s0 + $0x498] sm:$0xff] }
   0xd   :  { %v1867_v52 = vpack.c.bf16 %v142_v46, %v126_v45  ;;  %v1833_v53 = vpack.c.bf16 %v173_v48, %v157_v47  ;;  %v156_v54 = vld [vmem:[%s4285_s0 + $0x400] sm:$0xff]  ;;  %v158_v56 = vld [vmem:[%s4285_s0 + $0x410] sm:$0xff]  ;;  %v1869_v57 = vpack.c.bf16 %v175_v50, %v159_v49  ;;  %v189_v59 = vld [vmem:[%s4285_s0 + $0x508] sm:$0xff] }
   0xe   :  { %1828 = vmatpush1.bf16.msra.mxu0 %v1827_v35  ;;  %v172_v55 = vld [vmem:[%s4285_s0 + $0x480] sm:$0xff]  ;;  %v174_v58 = vld [vmem:[%s4285_s0 + $0x490] sm:$0xff]  ;;  %v205_v60 = vld [vmem:[%s4285_s0 + $0x588] sm:$0xff] }
   0xf   :  { %1864 = vmatpush1.bf16.msra.mxu1 %v1863_v39  ;;  %1830 = vmatprep.subr.bf16.mxu0 %v1829_v40  ;;  %v191_v61 = vld [vmem:[%s4285_s0 + $0x518] sm:$0xff]  ;;  %v1835_v63 = vpack.c.bf16 %v172_v55, %v156_v54  ;;  %v1871_v0 = vpack.c.bf16 %v174_v58, %v158_v56  ;;  %v1837_v1 = vpack.c.bf16 %v205_v60, %v189_v59  ;;  %v188_v2 = vld [vmem:[%s4285_s0 + $0x500] sm:$0xff]  ;;  %v190_v4 = vld [vmem:[%s4285_s0 + $0x510] sm:$0xff] }
  0x10   :  { %1866 = vmatprep.subr.bf16.mxu1 %v1865_v44  ;;  %v207_v62 = vld [vmem:[%s4285_s0 + $0x598] sm:$0xff]  ;;  %v204_v3 = vld [vmem:[%s4285_s0 + $0x580] sm:$0xff]  ;;  %v206_v6 = vld [vmem:[%s4285_s0 + $0x590] sm:$0xff] }
  0x11   :  { %v1873_v5 = vpack.c.bf16 %v207_v62, %v191_v61  ;;  %v221_v7 = vld [vmem:[%s4285_s0 + $0x608] sm:$0xff]  ;;  %v223_v9 = vld [vmem:[%s4285_s0 + $0x618] sm:$0xff]  ;;  %v1839_v11 = vpack.c.bf16 %v204_v3, %v188_v2  ;;  %v1875_v12 = vpack.c.bf16 %v206_v6, %v190_v4  ;;  %v220_v14 = vld [vmem:[%s4285_s0 + $0x600] sm:$0xff] }
  0x12   :  { %1832 = vmatpush1.bf16.msra.mxu0 %v1831_v51  ;;  %v237_v8 = vld [vmem:[%s4285_s0 + $0x688] sm:$0xff]  ;;  %v239_v10 = vld [vmem:[%s4285_s0 + $0x698] sm:$0xff]  ;;  %v236_v15 = vld [vmem:[%s4285_s0 + $0x680] sm:$0xff] }
  0x13   :  { %1868 = vmatpush1.bf16.msra.mxu1 %v1867_v52  ;;  %1834 = vmatprep.subr.bf16.mxu0 %v1833_v53  ;;  %v1841_v13 = vpack.c.bf16 %v237_v8, %v221_v7  ;;  %v222_v16 = vld [vmem:[%s4285_s0 + $0x610] sm:$0xff]  ;;  %v1877_v17 = vpack.c.bf16 %v239_v10, %v223_v9  ;;  %v253_v19 = vld [vmem:[%s4285_s0 + $0x708] sm:$0xff]  ;;  %v255_v21 = vld [vmem:[%s4285_s0 + $0x718] sm:$0xff]  ;;  %v1843_v23 = vpack.c.bf16 %v236_v15, %v220_v14 }
  0x14   :  { %1870 = vmatprep.subr.bf16.mxu1 %v1869_v57  ;;  %v238_v18 = vld [vmem:[%s4285_s0 + $0x690] sm:$0xff]  ;;  %v269_v20 = vld [vmem:[%s4285_s0 + $0x788] sm:$0xff]  ;;  %v271_v22 = vld [vmem:[%s4285_s0 + $0x798] sm:$0xff] }
  0x15   :  { %v2330_v24 = vld [vmem:[%s4286_s1 + $0x8] sm:$0xff]  ;;  %v1879_v25 = vpack.c.bf16 %v238_v18, %v222_v16  ;;  %v1845_v26 = vpack.c.bf16 %v269_v20, %v253_v19  ;;  %v252_v27 = vld [vmem:[%s4285_s0 + $0x700] sm:$0xff]  ;;  %v254_v29 = vld [vmem:[%s4285_s0 + $0x710] sm:$0xff]  ;;  %v1881_v30 = vpack.c.bf16 %v271_v22, %v255_v21 }
  0x16   :  { %1836 = vmatpush1.bf16.msra.mxu0 %v1835_v63  ;;  %v268_v28 = vld [vmem:[%s4285_s0 + $0x780] sm:$0xff]  ;;  %v270_v31 = vld [vmem:[%s4285_s0 + $0x790] sm:$0xff]  ;;  %v285_v32 = vld [vmem:[%s4285_s0 + $0x808] sm:$0xff]  ;;  %1785 = vmatprep.mubr.msk.f32.mxu0 %vm340_vm0, %v2330_v24 }
  0x17   :  { %1872 = vmatpush1.bf16.msra.mxu1 %v1871_v0  ;;  %1838 = vmatprep.subr.bf16.mxu0 %v1837_v1  ;;  %v301_v33 = vld [vmem:[%s4285_s0 + $0x888] sm:$0xff]  ;;  %v287_v34 = vld [vmem:[%s4285_s0 + $0x818] sm:$0xff]  ;;  %v1847_v36 = vpack.c.bf16 %v268_v28, %v252_v27  ;;  %v1883_v37 = vpack.c.bf16 %v270_v31, %v254_v29  ;;  %v284_v39 = vld [vmem:[%s4285_s0 + $0x800] sm:$0xff] }
  0x18   :  { %1874 = vmatprep.subr.bf16.mxu1 %v1873_v5  ;;  %v303_v35 = vld [vmem:[%s4285_s0 + $0x898] sm:$0xff]  ;;  %1789 = vmatprep.mubr.msk.f32.mxu1 %vm340_vm0, %v2330_v24  ;;  %v1849_v38 = vpack.c.bf16 %v301_v33, %v285_v32  ;;  %v300_v40 = vld [vmem:[%s4285_s0 + $0x880] sm:$0xff]  ;;  %v286_v41 = vld [vmem:[%s4285_s0 + $0x810] sm:$0xff] }
  0x19   :  { %v1885_v42 = vpack.c.bf16 %v303_v35, %v287_v34  ;;  %v302_v43 = vld [vmem:[%s4285_s0 + $0x890] sm:$0xff]  ;;  %v33_v44 = vld [vmem:[%s4285_s0 + $0x28] sm:$0xff]  ;;  %v35_v46 = vld [vmem:[%s4285_s0 + $0x38] sm:$0xff]  ;;  %v1851_v48 = vpack.c.bf16 %v300_v40, %v284_v39 }
  0x1a   :  { %1840 = vmatpush1.bf16.msra.mxu0 %v1839_v11  ;;  %v49_v45 = vld [vmem:[%s4285_s0 + $0xa8] sm:$0xff]  ;;  %v51_v47 = vld [vmem:[%s4285_s0 + $0xb8] sm:$0xff]  ;;  %v1887_v49 = vpack.c.bf16 %v302_v43, %v286_v41  ;;  %v32_v51 = vld [vmem:[%s4285_s0 + $0x20] sm:$0xff] }
  0x1b   :  { %1876 = vmatpush1.bf16.msra.mxu1 %v1875_v12  ;;  %1842 = vmatprep.subr.bf16.mxu0 %v1841_v13  ;;  %v1889_v50 = vpack.c.bf16 %v49_v45, %v33_v44  ;;  %v48_v52 = vld [vmem:[%s4285_s0 + $0xa0] sm:$0xff]  ;;  %v34_v53 = vld [vmem:[%s4285_s0 + $0x30] sm:$0xff]  ;;  %v1925_v54 = vpack.c.bf16 %v51_v47, %v35_v46  ;;  %v65_v56 = vld [vmem:[%s4285_s0 + $0x128] sm:$0xff] }
  0x1c   :  { %1878 = vmatprep.subr.bf16.mxu1 %v1877_v17  ;;  %v50_v55 = vld [vmem:[%s4285_s0 + $0xb0] sm:$0xff]  ;;  %v81_v57 = vld [vmem:[%s4285_s0 + $0x1a8] sm:$0xff]  ;;  %v67_v58 = vld [vmem:[%s4285_s0 + $0x138] sm:$0xff]  ;;  %v1891_v61 = vpack.c.bf16 %v48_v52, %v32_v51 }
  0x1d   :  { %v83_v59 = vld [vmem:[%s4285_s0 + $0x1b8] sm:$0xff]  ;;  %v2411_v60 = vld [vmem:[%s4286_s1] sm:$0xff]  ;;  %v1927_v62 = vpack.c.bf16 %v50_v55, %v34_v53  ;;  %v1893_v63 = vpack.c.bf16 %v81_v57, %v65_v56  ;;  %v66_v2 = vld [vmem:[%s4285_s0 + $0x130] sm:$0xff] }
  0x1e   :  { %1844 = vmatpush1.bf16.msra.mxu0 %v1843_v23  ;;  %v64_v0 = vld [vmem:[%s4285_s0 + $0x120] sm:$0xff]  ;;  %v1929_v3 = vpack.c.bf16 %v83_v59, %v67_v58  ;;  %v82_v4 = vld [vmem:[%s4285_s0 + $0x1b0] sm:$0xff]  ;;  %v97_v5 = vld [vmem:[%s4285_s0 + $0x228] sm:$0xff] }
  0x1f   :  { %1880 = vmatpush1.bf16.msra.mxu1 %v1879_v25  ;;  %1846 = vmatprep.subr.bf16.mxu0 %v1845_v26  ;;  %v80_v1 = vld [vmem:[%s4285_s0 + $0x1a0] sm:$0xff]  ;;  %v113_v6 = vld [vmem:[%s4285_s0 + $0x2a8] sm:$0xff]  ;;  %v99_v7 = vld [vmem:[%s4285_s0 + $0x238] sm:$0xff]  ;;  %v1931_v12 = vpack.c.bf16 %v82_v4, %v66_v2 }
  0x20   :  { %1882 = vmatprep.subr.bf16.mxu1 %v1881_v30  ;;  %v115_v8 = vld [vmem:[%s4285_s0 + $0x2b8] sm:$0xff]  ;;  %v1895_v9 = vpack.c.bf16 %v80_v1, %v64_v0  ;;  %v96_v10 = vld [vmem:[%s4285_s0 + $0x220] sm:$0xff]  ;;  %v1897_v13 = vpack.c.bf16 %v113_v6, %v97_v5  ;;  %v98_v15 = vld [vmem:[%s4285_s0 + $0x230] sm:$0xff] }
  0x21   :  { %v2445_v11 = vld [vmem:[%s4286_s1 + $0x18] sm:$0xff]  ;;  %v112_v14 = vld [vmem:[%s4285_s0 + $0x2a0] sm:$0xff]  ;;  %v2456_v16 = vld [vmem:[%s4286_s1 + $0x10] sm:$0xff]  ;;  %v1933_v17 = vpack.c.bf16 %v115_v8, %v99_v7 }
  0x22   :  { %1848 = vmatpush1.bf16.msra.mxu0 %v1847_v36  ;;  %v114_v18 = vld [vmem:[%s4285_s0 + $0x2b0] sm:$0xff]  ;;  %v129_v19 = vld [vmem:[%s4285_s0 + $0x328] sm:$0xff]  ;;  %v131_v21 = vld [vmem:[%s4285_s0 + $0x338] sm:$0xff]  ;;  %v1899_v23 = vpack.c.bf16 %v112_v14, %v96_v10 }
  0x23   :  { %1884 = vmatpush1.bf16.msra.mxu1 %v1883_v37  ;;  %1850 = vmatprep.subr.bf16.mxu0 %v1849_v38  ;;  %v145_v20 = vld [vmem:[%s4285_s0 + $0x3a8] sm:$0xff]  ;;  %v147_v22 = vld [vmem:[%s4285_s0 + $0x3b8] sm:$0xff]  ;;  %v2487_v26 = vld [vmem:[%s4286_s1 + $0x20] sm:$0xff]  ;;  %v1935_v27 = vpack.c.bf16 %v114_v18, %v98_v15 }
  0x24   :  { %1886 = vmatprep.subr.bf16.mxu1 %v1885_v42  ;;  %v2482_v25 = vld [vmem:[%s4286_s1 + $0x28] sm:$0xff]  ;;  %v1901_v28 = vpack.c.bf16 %v145_v20, %v129_v19  ;;  %v128_v29 = vld [vmem:[%s4285_s0 + $0x320] sm:$0xff]  ;;  %v130_v31 = vld [vmem:[%s4285_s0 + $0x330] sm:$0xff]  ;;  %v1937_v32 = vpack.c.bf16 %v147_v22, %v131_v21 }
  0x25   :  { %v144_v30 = vld [vmem:[%s4285_s0 + $0x3a0] sm:$0xff]  ;;  %v146_v33 = vld [vmem:[%s4285_s0 + $0x3b0] sm:$0xff]  ;;  %v161_v34 = vld [vmem:[%s4285_s0 + $0x428] sm:$0xff] }
  0x26   :  { %1852 = vmatpush1.bf16.msra.mxu0 %v1851_v48  ;;  %v177_v35 = vld [vmem:[%s4285_s0 + $0x4a8] sm:$0xff]  ;;  %v163_v36 = vld [vmem:[%s4285_s0 + $0x438] sm:$0xff]  ;;  %v1903_v39 = vpack.c.bf16 %v144_v30, %v128_v29  ;;  %v2527_v40 = vld [vmem:[%s4286_s1 + $0x30] sm:$0xff]  ;;  %v1939_v41 = vpack.c.bf16 %v146_v33, %v130_v31 }
  0x27   :  { %1888 = vmatpush1.bf16.msra.mxu1 %v1887_v49  ;;  %1890 = vmatprep.subr.bf16.mxu0 %v1889_v50  ;;  %v179_v37 = vld [vmem:[%s4285_s0 + $0x4b8] sm:$0xff]  ;;  %v1905_v42 = vpack.c.bf16 %v177_v35, %v161_v34  ;;  %v160_v43 = vld [vmem:[%s4285_s0 + $0x420] sm:$0xff]  ;;  %v162_v45 = vld [vmem:[%s4285_s0 + $0x430] sm:$0xff] }
  0x28   :  { %1926 = vmatprep.subr.bf16.mxu1 %v1925_v54  ;;  %v2521_v38 = vld [vmem:[%s4286_s1 + $0x38] sm:$0xff]  ;;  %v176_v44 = vld [vmem:[%s4285_s0 + $0x4a0] sm:$0xff]  ;;  %v1941_v46 = vpack.c.bf16 %v179_v37, %v163_v36  ;;  %v178_v47 = vld [vmem:[%s4285_s0 + $0x4b0] sm:$0xff] }
  0x29   :  { %418 = vmatmul.mubr.f32.vlgmr.msra.gmra.mrb[0].mxu0 %v2411_v60  ;;  %v193_v48 = vld [vmem:[%s4285_s0 + $0x528] sm:$0xff]  ;;  %v195_v50 = vld [vmem:[%s4285_s0 + $0x538] sm:$0xff]  ;;  %v1907_v52 = vpack.c.bf16 %v176_v44, %v160_v43  ;;  %v1943_v53 = vpack.c.bf16 %v178_v47, %v162_v45  ;;  %v192_v55 = vld [vmem:[%s4285_s0 + $0x520] sm:$0xff] }
  0x2a   :  { %507 = vmatmul.mubr.f32.vlgmr.msra.gmra.mrb[0].mxu1 %v2411_v60  ;;  %1892 = vmatpush1.bf16.msra.mxu0 %v1891_v61  ;;  %v209_v49 = vld [vmem:[%s4285_s0 + $0x5a8] sm:$0xff]  ;;  %v211_v51 = vld [vmem:[%s4285_s0 + $0x5b8] sm:$0xff]  ;;  %v208_v56 = vld [vmem:[%s4285_s0 + $0x5a0] sm:$0xff] }
  0x2b   :  { %1928 = vmatpush1.bf16.msra.mxu1 %v1927_v62  ;;  %1894 = vmatprep.subr.bf16.mxu0 %v1893_v63  ;;  %v1909_v54 = vpack.c.bf16 %v209_v49, %v193_v48  ;;  %v194_v57 = vld [vmem:[%s4285_s0 + $0x530] sm:$0xff]  ;;  %v1945_v58 = vpack.c.bf16 %v211_v51, %v195_v50  ;;  %v225_v61 = vld [vmem:[%s4285_s0 + $0x628] sm:$0xff]  ;;  %v227_v63 = vld [vmem:[%s4285_s0 + $0x638] sm:$0xff]  ;;  %v1911_v1 = vpack.c.bf16 %v208_v56, %v192_v55 }
  0x2c   :  { %1930 = vmatprep.subr.bf16.mxu1 %v1929_v3  ;;  %1786 = vmatprep.mubr.msk.f32.mxu0 %vm340_vm0, %v2445_v11  ;;  %v210_v59 = vld [vmem:[%s4285_s0 + $0x5b0] sm:$0xff]  ;;  %v241_v62 = vld [vmem:[%s4285_s0 + $0x6a8] sm:$0xff]  ;;  %v243_v0 = vld [vmem:[%s4285_s0 + $0x6b8] sm:$0xff] }
  0x2d   :  { %424 = vmatmul.mubr.f32.gmra.mrb[2].mxu0 %v2456_v16  ;;  %1790 = vmatprep.mubr.msk.f32.mxu1 %vm340_vm0, %v2445_v11  ;;  %v1947_v2 = vpack.c.bf16 %v210_v59, %v194_v57  ;;  %v1913_v3 = vpack.c.bf16 %v241_v62, %v225_v61  ;;  %v224_v4 = vld [vmem:[%s4285_s0 + $0x620] sm:$0xff]  ;;  %v226_v6 = vld [vmem:[%s4285_s0 + $0x630] sm:$0xff]  ;;  %v1949_v7 = vpack.c.bf16 %v243_v0, %v227_v63  ;;  %v273_v10 = vld [vmem:[%s4285_s0 + $0x7a8] sm:$0xff] }
  0x2e   :  { %1896 = vmatpush1.bf16.msra.mxu0 %v1895_v9  ;;  %513 = vmatmul.mubr.f32.gmra.mrb[2].mxu1 %v2456_v16  ;;  %v240_v5 = vld [vmem:[%s4285_s0 + $0x6a0] sm:$0xff]  ;;  %v242_v8 = vld [vmem:[%s4285_s0 + $0x6b0] sm:$0xff]  ;;  %v257_v9 = vld [vmem:[%s4285_s0 + $0x728] sm:$0xff] }
  0x2f   :  { %1932 = vmatpush1.bf16.msra.mxu1 %v1931_v12  ;;  %1898 = vmatprep.subr.bf16.mxu0 %v1897_v13  ;;  %v259_v12 = vld [vmem:[%s4285_s0 + $0x738] sm:$0xff]  ;;  %v1915_v14 = vpack.c.bf16 %v240_v5, %v224_v4  ;;  %v1951_v15 = vpack.c.bf16 %v242_v8, %v226_v6  ;;  %v256_v18 = vld [vmem:[%s4285_s0 + $0x720] sm:$0xff]  ;;  %v258_v20 = vld [vmem:[%s4285_s0 + $0x730] sm:$0xff] }
  0x30   :  { %1934 = vmatprep.subr.bf16.mxu1 %v1933_v17  ;;  %1787 = vmatprep.mubr.msk.f32.mxu0 %vm340_vm0, %v2482_v25  ;;  %v275_v13 = vld [vmem:[%s4285_s0 + $0x7b8] sm:$0xff]  ;;  %v1917_v17 = vpack.c.bf16 %v273_v10, %v257_v9  ;;  %v272_v19 = vld [vmem:[%s4285_s0 + $0x7a0] sm:$0xff]  ;;  %v274_v22 = vld [vmem:[%s4285_s0 + $0x7b0] sm:$0xff] }
  0x31   :  { %430 = vmatmul.mubr.f32.gmra.mrb[4].mxu0 %v2487_v26  ;;  %1791 = vmatprep.mubr.msk.f32.mxu1 %vm340_vm0, %v2482_v25  ;;  %v1953_v21 = vpack.c.bf16 %v275_v13, %v259_v12  ;;  %v307_v29 = vld [vmem:[%s4285_s0 + $0x8b8] sm:$0xff]  ;;  %v1919_v30 = vpack.c.bf16 %v272_v19, %v256_v18  ;;  %v1955_v31 = vpack.c.bf16 %v274_v22, %v258_v20  ;;  %v288_v33 = vld [vmem:[%s4285_s0 + $0x820] sm:$0xff]  ;;  %v290_v35 = vld [vmem:[%s4285_s0 + $0x830] sm:$0xff] }
  0x32   :  { %1900 = vmatpush1.bf16.msra.mxu0 %v1899_v23  ;;  %519 = vmatmul.mubr.f32.gmra.mrb[4].mxu1 %v2487_v26  ;;  %v289_v23 = vld [vmem:[%s4285_s0 + $0x828] sm:$0xff]  ;;  %v304_v34 = vld [vmem:[%s4285_s0 + $0x8a0] sm:$0xff]  ;;  %v306_v37 = vld [vmem:[%s4285_s0 + $0x8b0] sm:$0xff] }
  0x33   :  { %1936 = vmatpush1.bf16.msra.mxu1 %v1935_v27  ;;  %1902 = vmatprep.subr.bf16.mxu0 %v1901_v28  ;;  %v305_v27 = vld [vmem:[%s4285_s0 + $0x8a8] sm:$0xff]  ;;  %v291_v28 = vld [vmem:[%s4285_s0 + $0x838] sm:$0xff]  ;;  %v1923_v44 = vpack.c.bf16 %v304_v34, %v288_v33  ;;  %v1959_v45 = vpack.c.bf16 %v306_v37, %v290_v35  ;;  %v36_v47 = vld [vmem:[%s4285_s0 + $0x40] sm:$0xff] }
  0x34   :  { %1938 = vmatprep.subr.bf16.mxu1 %v1937_v32  ;;  %1788 = vmatprep.mubr.msk.f32.mxu0 %vm340_vm0, %v2521_v38  ;;  %v1921_v32 = vpack.c.bf16 %v305_v27, %v289_v23  ;;  %v1957_v36 = vpack.c.bf16 %v307_v29, %v291_v28  ;;  %v55_v43 = vld [vmem:[%s4285_s0 + $0xd8] sm:$0xff]  ;;  %v52_v48 = vld [vmem:[%s4285_s0 + $0xc0] sm:$0xff]  ;;  %v38_v50 = vld [vmem:[%s4285_s0 + $0x50] sm:$0xff] }
  0x35   :  { %436 = vmatmul.mubr.f32.gmra.mrb[6].mxu0 %v2527_v40  ;;  %1792 = vmatprep.mubr.msk.f32.mxu1 %vm340_vm0, %v2521_v38  ;;  %v54_v51 = vld [vmem:[%s4285_s0 + $0xd0] sm:$0xff]  ;;  %v87_v55 = vld [vmem:[%s4285_s0 + $0x1d8] sm:$0xff]  ;;  %v1963_v56 = vpack.c.bf16 %v52_v48, %v36_v47  ;;  %v84_v59 = vld [vmem:[%s4285_s0 + $0x1c0] sm:$0xff] }
  0x36   :  { %1904 = vmatpush1.bf16.msra.mxu0 %v1903_v39  ;;  %525 = vmatmul.mubr.f32.gmra.mrb[6].mxu1 %v2527_v40  ;;  %v37_v39 = vld [vmem:[%s4285_s0 + $0x48] sm:$0xff]  ;;  %v1999_v57 = vpack.c.bf16 %v54_v51, %v38_v50  ;;  %v70_v61 = vld [vmem:[%s4285_s0 + $0x150] sm:$0xff]  ;;  %v119_v4 = vld [vmem:[%s4285_s0 + $0x2d8] sm:$0xff] }
  0x37   :  { %1940 = vmatpush1.bf16.msra.mxu1 %v1939_v41  ;;  %1906 = vmatprep.subr.bf16.mxu0 %v1905_v42  ;;  %v53_v41 = vld [vmem:[%s4285_s0 + $0xc8] sm:$0xff]  ;;  %v39_v42 = vld [vmem:[%s4285_s0 + $0x58] sm:$0xff]  ;;  %v86_v0 = vld [vmem:[%s4285_s0 + $0x1d0] sm:$0xff] }
  0x38   :  { %1942 = vmatprep.subr.bf16.mxu1 %v1941_v46  ;;  %1793 = vmatprep.mubr.msk.f32.mxu0 %vm340_vm0, %v2330_v24  ;;  %v1961_v46 = vpack.c.bf16 %v53_v41, %v37_v39  ;;  %v1997_v49 = vpack.c.bf16 %v55_v43, %v39_v42  ;;  %v2003_v6 = vpack.c.bf16 %v86_v0, %v70_v61  ;;  %v100_v8 = vld [vmem:[%s4285_s0 + $0x240] sm:$0xff]  ;;  %v102_v10 = vld [vmem:[%s4285_s0 + $0x250] sm:$0xff]  ;;  %v151_v18 = vld [vmem:[%s4285_s0 + $0x3d8] sm:$0xff] }
  0x39   :  { %1797 = vmatprep.mubr.msk.f32.mxu1 %vm340_vm0, %v2330_v24  ;;  %v116_v9 = vld [vmem:[%s4285_s0 + $0x2c0] sm:$0xff]  ;;  %v118_v13 = vld [vmem:[%s4285_s0 + $0x2d0] sm:$0xff]  ;;  %v183_v33 = vld [vmem:[%s4285_s0 + $0x4d8] sm:$0xff] }
  0x3a   :  { %1908 = vmatpush1.bf16.msra.mxu0 %v1907_v52  ;;  %v69_v52 = vld [vmem:[%s4285_s0 + $0x148] sm:$0xff]  ;;  %v1971_v19 = vpack.c.bf16 %v116_v9, %v100_v8  ;;  %v2007_v20 = vpack.c.bf16 %v118_v13, %v102_v10  ;;  %v132_v22 = vld [vmem:[%s4285_s0 + $0x340] sm:$0xff]  ;;  %v134_v27 = vld [vmem:[%s4285_s0 + $0x350] sm:$0xff] }
  0x3b   :  { %1944 = vmatpush1.bf16.msra.mxu1 %v1943_v53  ;;  %1910 = vmatprep.subr.bf16.mxu0 %v1909_v54  ;;  %v85_v53 = vld [vmem:[%s4285_s0 + $0x1c8] sm:$0xff]  ;;  %v71_v54 = vld [vmem:[%s4285_s0 + $0x158] sm:$0xff]  ;;  %v148_v23 = vld [vmem:[%s4285_s0 + $0x3c0] sm:$0xff] }
  0x3c   :  { %1946 = vmatprep.subr.bf16.mxu1 %v1945_v58  ;;  %v68_v58 = vld [vmem:[%s4285_s0 + $0x140] sm:$0xff]  ;;  %v1965_v62 = vpack.c.bf16 %v85_v53, %v69_v52  ;;  %v2001_v63 = vpack.c.bf16 %v87_v55, %v71_v54  ;;  %v150_v29 = vld [vmem:[%s4285_s0 + $0x3d0] sm:$0xff]  ;;  %v1975_v34 = vpack.c.bf16 %v148_v23, %v132_v22  ;;  %v215_v47 = vld [vmem:[%s4285_s0 + $0x5d8] sm:$0xff] }
  0x3d   :  { %v1967_v5 = vpack.c.bf16 %v84_v59, %v68_v58  ;;  %v2011_v35 = vpack.c.bf16 %v150_v29, %v134_v27  ;;  %v164_v37 = vld [vmem:[%s4285_s0 + $0x440] sm:$0xff]  ;;  %v166_v41 = vld [vmem:[%s4285_s0 + $0x450] sm:$0xff]  ;;  %v245_v58 = vld [vmem:[%s4285_s0 + $0x6c8] sm:$0xff] }
  0x3e   :  { %1912 = vmatpush1.bf16.msra.mxu0 %v1911_v1  ;;  %v101_v1 = vld [vmem:[%s4285_s0 + $0x248] sm:$0xff]  ;;  %v180_v39 = vld [vmem:[%s4285_s0 + $0x4c0] sm:$0xff]  ;;  %v182_v43 = vld [vmem:[%s4285_s0 + $0x4d0] sm:$0xff] }
  0x3f   :  { %1948 = vmatpush1.bf16.msra.mxu1 %v1947_v2  ;;  %1914 = vmatprep.subr.bf16.mxu0 %v1913_v3  ;;  %v117_v2 = vld [vmem:[%s4285_s0 + $0x2c8] sm:$0xff]  ;;  %v103_v3 = vld [vmem:[%s4285_s0 + $0x258] sm:$0xff]  ;;  %v1979_v48 = vpack.c.bf16 %v180_v39, %v164_v37  ;;  %v2015_v50 = vpack.c.bf16 %v182_v43, %v166_v41  ;;  %v196_v52 = vld [vmem:[%s4285_s0 + $0x540] sm:$0xff] }
  0x40   :  { %1950 = vmatprep.subr.bf16.mxu1 %v1949_v7  ;;  %v1969_v7 = vpack.c.bf16 %v117_v2, %v101_v1  ;;  %v2005_v12 = vpack.c.bf16 %v119_v4, %v103_v3  ;;  %v212_v53 = vld [vmem:[%s4285_s0 + $0x5c0] sm:$0xff]  ;;  %v198_v54 = vld [vmem:[%s4285_s0 + $0x550] sm:$0xff]  ;;  %v231_v59 = vld [vmem:[%s4285_s0 + $0x658] sm:$0xff] }
  0x41   :  { %v247_v61 = vld [vmem:[%s4285_s0 + $0x6d8] sm:$0xff]  ;;  %v228_v1 = vld [vmem:[%s4285_s0 + $0x640] sm:$0xff]  ;;  %v230_v3 = vld [vmem:[%s4285_s0 + $0x650] sm:$0xff] }
  0x42   :  { %1916 = vmatpush1.bf16.msra.mxu0 %v1915_v14  ;;  %v133_v14 = vld [vmem:[%s4285_s0 + $0x348] sm:$0xff]  ;;  %v244_v2 = vld [vmem:[%s4285_s0 + $0x6c0] sm:$0xff]  ;;  %v2021_v4 = vpack.c.bf16 %v247_v61, %v231_v59  ;;  %v263_v8 = vld [vmem:[%s4285_s0 + $0x758] sm:$0xff] }
  0x43   :  { %1952 = vmatpush1.bf16.msra.mxu1 %v1951_v15  ;;  %1918 = vmatprep.subr.bf16.mxu0 %v1917_v17  ;;  %v149_v15 = vld [vmem:[%s4285_s0 + $0x3c8] sm:$0xff]  ;;  %v135_v17 = vld [vmem:[%s4285_s0 + $0x358] sm:$0xff]  ;;  %v1987_v10 = vpack.c.bf16 %v244_v2, %v228_v1  ;;  %v88_v59 = vld [vmem:[%s4285_s0 + $0x1e0] sm:$0xff] }
  0x44   :  { %1954 = vmatprep.subr.bf16.mxu1 %v1953_v21  ;;  %v1973_v21 = vpack.c.bf16 %v149_v15, %v133_v14  ;;  %v2009_v28 = vpack.c.bf16 %v151_v18, %v135_v17  ;;  %v279_v9 = vld [vmem:[%s4285_s0 + $0x7d8] sm:$0xff]  ;;  %v276_v15 = vld [vmem:[%s4285_s0 + $0x7c0] sm:$0xff]  ;;  %v262_v17 = vld [vmem:[%s4285_s0 + $0x750] sm:$0xff] }
  0x45   :  { %v278_v18 = vld [vmem:[%s4285_s0 + $0x7d0] sm:$0xff]  ;;  %v295_v22 = vld [vmem:[%s4285_s0 + $0x858] sm:$0xff]  ;;  %v317_v27 = vld [vmem:[%s4287_s2 + $0x8] sm:$0xff] }
  0x46   :  { %1920 = vmatpush1.bf16.msra.mxu0 %v1919_v30  ;;  %v165_v30 = vld [vmem:[%s4285_s0 + $0x448] sm:$0xff]  ;;  %v311_v23 = vld [vmem:[%s4285_s0 + $0x8d8] sm:$0xff]  ;;  %v74_v61 = vld [vmem:[%s4285_s0 + $0x170] sm:$0xff] }
  0x47   :  { %1956 = vmatpush1.bf16.msra.mxu1 %v1955_v31  ;;  %1922 = vmatprep.subr.bf16.mxu0 %v1921_v32  ;;  %v181_v31 = vld [vmem:[%s4285_s0 + $0x4c8] sm:$0xff]  ;;  %v167_v32 = vld [vmem:[%s4285_s0 + $0x458] sm:$0xff] }
  0x48   :  { %1958 = vmatprep.subr.bf16.mxu1 %v1957_v36  ;;  %v1977_v36 = vpack.c.bf16 %v181_v31, %v165_v30  ;;  %v2013_v42 = vpack.c.bf16 %v183_v33, %v167_v32  ;;  %v2027_v30 = vpack.c.bf16 %v278_v18, %v262_v17  ;;  %v292_v32 = vld [vmem:[%s4285_s0 + $0x840] sm:$0xff]  ;;  %v41_v37 = vld [vmem:[%s4285_s0 + $0x68] sm:$0xff]  ;;  %v43_v41 = vld [vmem:[%s4285_s0 + $0x78] sm:$0xff] }
  0x49   :  { %v308_v33 = vld [vmem:[%s4285_s0 + $0x8c0] sm:$0xff]  ;;  %v57_v39 = vld [vmem:[%s4285_s0 + $0xe8] sm:$0xff]  ;;  %v319_v43 = vld [vmem:[%s4287_s2 + $0x18] sm:$0xff] }
  0x4a   :  { %1924 = vmatpush1.bf16.msra.mxu0 %v1923_v44  ;;  %v197_v44 = vld [vmem:[%s4285_s0 + $0x548] sm:$0xff]  ;;  %v139_v17 = vld [vmem:[%s4285_s0 + $0x378] sm:$0xff] }
  0x4b   :  { %1960 = vmatpush1.bf16.msra.mxu1 %v1959_v45  ;;  %1962 = vmatprep.subr.bf16.mxu0 %v1961_v46  ;;  %v213_v45 = vld [vmem:[%s4285_s0 + $0x5c8] sm:$0xff]  ;;  %v199_v46 = vld [vmem:[%s4285_s0 + $0x558] sm:$0xff] }
  0x4c   :  { %1998 = vmatprep.subr.bf16.mxu1 %v1997_v49  ;;  %v316_v49 = vld [vmem:[%s4287_s2] sm:$0xff]  ;;  %v1981_v51 = vpack.c.bf16 %v213_v45, %v197_v44  ;;  %v2017_v55 = vpack.c.bf16 %v215_v47, %v199_v46  ;;  %v1995_v44 = vpack.c.bf16 %v308_v33, %v292_v32  ;;  %v2033_v46 = vpack.c.bf16 %v57_v39, %v41_v37  ;;  %v105_v1 = vld [vmem:[%s4285_s0 + $0x268] sm:$0xff]  ;;  %v155_v18 = vld [vmem:[%s4285_s0 + $0x3f8] sm:$0xff] }
  0x4d   :  { %596 = vmatmul.mubr.f32.vlgmr.msra.gmra.mrb[8].mxu0 %v2411_v60  ;;  %322 = vperm.xlu0 %2106, %v316_v49   ;;  %v40_v47 = vld [vmem:[%s4285_s0 + $0x60] sm:$0xff]  ;;  %v121_v2 = vld [vmem:[%s4285_s0 + $0x2e8] sm:$0xff]  ;;  %v171_v32 = vld [vmem:[%s4285_s0 + $0x478] sm:$0xff] }
  0x4e   :  { %685 = vmatmul.mubr.f32.vlgmr.msra.gmra.mrb[8].mxu1 %v2411_v60  ;;  %1964 = vmatpush1.bf16.msra.mxu0 %v1963_v56  ;;  %v214_v56 = vld [vmem:[%s4285_s0 + $0x5d0] sm:$0xff]  ;;  %v187_v33 = vld [vmem:[%s4285_s0 + $0x4f8] sm:$0xff]  ;;  %v168_v37 = vld [vmem:[%s4285_s0 + $0x460] sm:$0xff] }
  0x4f   :  { %2000 = vmatpush1.bf16.msra.mxu1 %v1999_v57  ;;  %1794 = vmatprep.mubr.msk.f32.mxu0 %vm340_vm0, %v2445_v11  ;;  %v229_v57 = vld [vmem:[%s4285_s0 + $0x648] sm:$0xff]  ;;  %v184_v39 = vld [vmem:[%s4285_s0 + $0x4e0] sm:$0xff] }
  0x50   :  { %1966 = vmatprep.subr.bf16.mxu0 %v1965_v62  ;;  %2002 = vmatprep.subr.bf16.mxu1 %v2001_v63  ;;  %v1983_v62 = vpack.c.bf16 %v212_v53, %v196_v52  ;;  %v2019_v63 = vpack.c.bf16 %v214_v56, %v198_v54  ;;  %v1985_v0 = vpack.c.bf16 %v245_v58, %v229_v57  ;;  %v73_v52 = vld [vmem:[%s4285_s0 + $0x168] sm:$0xff]  ;;  %v75_v54 = vld [vmem:[%s4285_s0 + $0x178] sm:$0xff]  ;;  %v72_v58 = vld [vmem:[%s4285_s0 + $0x160] sm:$0xff] }
  0x51   :  { %602 = vmatmul.mubr.f32.gmra.mrb[10].mxu0 %v2456_v16  ;;  %1798 = vmatprep.mubr.msk.f32.mxu1 %vm340_vm0, %v2445_v11  ;;  %v89_v53 = vld [vmem:[%s4285_s0 + $0x1e8] sm:$0xff] }
  0x52   :  { %1968 = vmatpush1.bf16.msra.mxu0 %v1967_v5  ;;  %1795 = vmatprep.mubr.msk.f32.mxu0 %vm340_vm0, %v2482_v25  ;;  %v246_v5 = vld [vmem:[%s4285_s0 + $0x6d0] sm:$0xff] }
  0x53   :  { %2004 = vmatpush1.bf16.msra.mxu1 %v2003_v6  ;;  %1970 = vmatprep.subr.bf16.mxu0 %v1969_v7  ;;  %v261_v6 = vld [vmem:[%s4285_s0 + $0x748] sm:$0xff]  ;;  %v2023_v13 = vpack.c.bf16 %v246_v5, %v230_v3  ;;  %v107_v3 = vld [vmem:[%s4285_s0 + $0x278] sm:$0xff]  ;;  %v2039_v5 = vpack.c.bf16 %v88_v59, %v72_v58 }
  0x54   :  { %691 = vmatmul.mubr.f32.gmra.mrb[10].mxu1 %v2456_v16  ;;  %2006 = vmatprep.subr.bf16.mxu1 %v2005_v12  ;;  %v277_v7 = vld [vmem:[%s4285_s0 + $0x7c8] sm:$0xff]  ;;  %v260_v12 = vld [vmem:[%s4285_s0 + $0x740] sm:$0xff]  ;;  %v235_v58 = vld [vmem:[%s4285_s0 + $0x678] sm:$0xff] }
  0x55   :  { %608 = vmatmul.mubr.f32.gmra.mrb[12].mxu0 %v2487_v26  ;;  %1799 = vmatprep.mubr.msk.f32.mxu1 %vm340_vm0, %v2482_v25  ;;  %v1989_v14 = vpack.c.bf16 %v277_v7, %v261_v6  ;;  %v1991_v29 = vpack.c.bf16 %v276_v15, %v260_v12  ;;  %v2041_v7 = vpack.c.bf16 %v121_v2, %v105_v1  ;;  %v153_v15 = vld [vmem:[%s4285_s0 + $0x3e8] sm:$0xff]  ;;  %v251_v59 = vld [vmem:[%s4285_s0 + $0x6f8] sm:$0xff]  ;;  %v248_v1 = vld [vmem:[%s4285_s0 + $0x6e0] sm:$0xff] }
  0x56   :  { %1972 = vmatpush1.bf16.msra.mxu0 %v1971_v19  ;;  %1796 = vmatprep.mubr.msk.f32.mxu0 %vm340_vm0, %v2521_v38  ;;  %v2025_v19 = vpack.c.bf16 %v279_v9, %v263_v8  ;;  %v104_v8 = vld [vmem:[%s4285_s0 + $0x260] sm:$0xff]  ;;  %v234_v2 = vld [vmem:[%s4285_s0 + $0x670] sm:$0xff] }
  0x57   :  { %2008 = vmatpush1.bf16.msra.mxu1 %v2007_v20  ;;  %1974 = vmatprep.subr.bf16.mxu0 %v1973_v21  ;;  %v293_v20 = vld [vmem:[%s4285_s0 + $0x848] sm:$0xff]  ;;  %v120_v9 = vld [vmem:[%s4285_s0 + $0x2e0] sm:$0xff] }
  0x58   :  { %697 = vmatmul.mubr.f32.gmra.mrb[12].mxu1 %v2487_v26  ;;  %2010 = vmatprep.subr.bf16.mxu1 %v2009_v28  ;;  %v309_v21 = vld [vmem:[%s4285_s0 + $0x8c8] sm:$0xff]  ;;  %v318_v28 = vld [vmem:[%s4287_s2 + $0x10] sm:$0xff] }
  0x59   :  { %614 = vmatmul.mubr.f32.gmra.mrb[14].mxu0 %v2527_v40  ;;  %1800 = vmatprep.mubr.msk.f32.mxu1 %vm340_vm0, %v2521_v38  ;;  %v1993_v31 = vpack.c.bf16 %v309_v21, %v293_v20 }
  0x5a   :  { %1976 = vmatpush1.bf16.msra.mxu0 %v1975_v34  ;;  %1801 = vmatprep.mubr.msk.f32.mxu0 %vm340_vm0, %v2330_v24  ;;  %v294_v34 = vld [vmem:[%s4285_s0 + $0x850] sm:$0xff] }
  0x5b   :  { %2012 = vmatpush1.bf16.msra.mxu1 %v2011_v35  ;;  %1978 = vmatprep.subr.bf16.mxu0 %v1977_v36  ;;  %v2029_v35 = vpack.c.bf16 %v311_v23, %v295_v22  ;;  %v310_v36 = vld [vmem:[%s4285_s0 + $0x8d0] sm:$0xff]  ;;  %v136_v22 = vld [vmem:[%s4285_s0 + $0x360] sm:$0xff] }
  0x5c   :  { %703 = vmatmul.mubr.f32.gmra.mrb[14].mxu1 %v2527_v40  ;;  %2014 = vmatprep.subr.bf16.mxu1 %v2013_v42  ;;  %v59_v42 = vld [vmem:[%s4285_s0 + $0xf8] sm:$0xff]  ;;  %v2031_v45 = vpack.c.bf16 %v310_v36, %v294_v34  ;;  %v152_v23 = vld [vmem:[%s4285_s0 + $0x3e0] sm:$0xff] }
  0x5d   :  { %1805 = vmatprep.mubr.msk.f32.mxu1 %vm340_vm0, %v2330_v24  ;;  %327 = vperm.xlu0 %2106, %v317_v27   ;;  %v2069_v49 = vpack.c.bf16 %v59_v42, %v43_v41  ;;  %v138_v27 = vld [vmem:[%s4285_s0 + $0x370] sm:$0xff]  ;;  %v2047_v34 = vpack.c.bf16 %v152_v23, %v136_v22  ;;  %v2085_v42 = vpack.c.bf16 %v187_v33, %v171_v32 }
  0x5e   :  { %1980 = vmatpush1.bf16.msra.mxu0 %v1979_v48  ;;  %332 = vperm.xlu1 %2107, %v318_v28   ;;  %v56_v48 = vld [vmem:[%s4285_s0 + $0xe0] sm:$0xff]  ;;  %v2081_v28 = vpack.c.bf16 %v155_v18, %v139_v17  ;;  %v170_v41 = vld [vmem:[%s4285_s0 + $0x470] sm:$0xff]  ;;  %v297_v18 = vld [vmem:[%s4285_s0 + $0x868] sm:$0xff] }
  0x5f   :  { %2016 = vmatpush1.bf16.msra.mxu1 %v2015_v50  ;;  %1982 = vmatprep.subr.bf16.mxu0 %v1981_v51  ;;  %v42_v50 = vld [vmem:[%s4285_s0 + $0x70] sm:$0xff]  ;;  %v2035_v56 = vpack.c.bf16 %v56_v48, %v40_v47  ;;  %v219_v47 = vld [vmem:[%s4285_s0 + $0x5f8] sm:$0xff]  ;;  %v2051_v48 = vpack.c.bf16 %v184_v39, %v168_v37 }
  0x60   :  { %2018 = vmatprep.subr.bf16.mxu1 %v2017_v55  ;;  %v58_v51 = vld [vmem:[%s4285_s0 + $0xf0] sm:$0xff]  ;;  %v91_v55 = vld [vmem:[%s4285_s0 + $0x1f8] sm:$0xff] }
  0x61   :  { %v2071_v57 = vpack.c.bf16 %v58_v51, %v42_v50  ;;  %v200_v51 = vld [vmem:[%s4285_s0 + $0x560] sm:$0xff]  ;;  %v282_v17 = vld [vmem:[%s4285_s0 + $0x7f0] sm:$0xff] }
  0x62   :  { %1984 = vmatpush1.bf16.msra.mxu0 %v1983_v62  ;;  %337 = vperm.xlu1 %2107, %v319_v43   ;;  %v2037_v62 = vpack.c.bf16 %v89_v53, %v73_v52  ;;  %v186_v43 = vld [vmem:[%s4285_s0 + $0x4f0] sm:$0xff]  ;;  %v216_v52 = vld [vmem:[%s4285_s0 + $0x5e0] sm:$0xff] }
  0x63   :  { %2020 = vmatpush1.bf16.msra.mxu1 %v2019_v63  ;;  %1986 = vmatprep.subr.bf16.mxu0 %v1985_v0  ;;  %v2073_v63 = vpack.c.bf16 %v91_v55, %v75_v54  ;;  %v90_v0 = vld [vmem:[%s4285_s0 + $0x1f0] sm:$0xff] }
  0x64   :  { %2022 = vmatprep.subr.bf16.mxu1 %v2021_v4  ;;  %v123_v4 = vld [vmem:[%s4285_s0 + $0x2f8] sm:$0xff]  ;;  %v2075_v6 = vpack.c.bf16 %v90_v0, %v74_v61  ;;  %v202_v53 = vld [vmem:[%s4285_s0 + $0x570] sm:$0xff]  ;;  %v2055_v61 = vpack.c.bf16 %v216_v52, %v200_v51  ;;  %v232_v0 = vld [vmem:[%s4285_s0 + $0x660] sm:$0xff] }
  0x65   :  { %v2077_v12 = vpack.c.bf16 %v123_v4, %v107_v3  ;;  %v218_v55 = vld [vmem:[%s4285_s0 + $0x5f0] sm:$0xff]  ;;  %v265_v4 = vld [vmem:[%s4285_s0 + $0x768] sm:$0xff] }
  0x66   :  { %1988 = vmatpush1.bf16.msra.mxu0 %v1987_v10  ;;  %v106_v10 = vld [vmem:[%s4285_s0 + $0x270] sm:$0xff] }
  0x67   :  { %2024 = vmatpush1.bf16.msra.mxu1 %v2023_v13  ;;  %1990 = vmatprep.subr.bf16.mxu0 %v1989_v14  ;;  %v122_v13 = vld [vmem:[%s4285_s0 + $0x2f0] sm:$0xff]  ;;  %v137_v14 = vld [vmem:[%s4285_s0 + $0x368] sm:$0xff] }
  0x68   :  { %2026 = vmatprep.subr.bf16.mxu1 %v2025_v19  ;;  %v2043_v19 = vpack.c.bf16 %v120_v9, %v104_v8  ;;  %v2079_v20 = vpack.c.bf16 %v122_v13, %v106_v10  ;;  %v2045_v21 = vpack.c.bf16 %v153_v15, %v137_v14  ;;  %v250_v3 = vld [vmem:[%s4285_s0 + $0x6f0] sm:$0xff]  ;;  %v2059_v8 = vpack.c.bf16 %v248_v1, %v232_v0  ;;  %v280_v13 = vld [vmem:[%s4285_s0 + $0x7e0] sm:$0xff] }
  0x69   :  { %v2095_v9 = vpack.c.bf16 %v250_v3, %v234_v2  ;;  %v266_v14 = vld [vmem:[%s4285_s0 + $0x770] sm:$0xff] }
  0x6a   :  { %1992 = vmatpush1.bf16.msra.mxu0 %v1991_v29  ;;  %v154_v29 = vld [vmem:[%s4285_s0 + $0x3f0] sm:$0xff]  ;;  %v2099_v23 = vpack.c.bf16 %v282_v17, %v266_v14 }
  0x6b   :  { %2028 = vmatpush1.bf16.msra.mxu1 %v2027_v30  ;;  %1994 = vmatprep.subr.bf16.mxu0 %v1993_v31  ;;  %v169_v30 = vld [vmem:[%s4285_s0 + $0x468] sm:$0xff]  ;;  %v314_v32 = vld [vmem:[%s4285_s0 + $0x8f0] sm:$0xff] }
  0x6c   :  { %2030 = vmatprep.subr.bf16.mxu1 %v2029_v35  ;;  %v185_v31 = vld [vmem:[%s4285_s0 + $0x4e8] sm:$0xff]  ;;  %v2083_v35 = vpack.c.bf16 %v154_v29, %v138_v27  ;;  %v312_v29 = vld [vmem:[%s4285_s0 + $0x8e0] sm:$0xff] }
  0x6d   :  { %v2049_v36 = vpack.c.bf16 %v185_v31, %v169_v30  ;;  %v298_v31 = vld [vmem:[%s4285_s0 + $0x870] sm:$0xff] }
  0x6e   :  { %1996 = vmatpush1.bf16.msra.mxu0 %v1995_v44  ;;  %v201_v44 = vld [vmem:[%s4285_s0 + $0x568] sm:$0xff] }
  0x6f   :  { %2032 = vmatpush1.bf16.msra.mxu1 %v2031_v45  ;;  %2034 = vmatprep.subr.bf16.mxu0 %v2033_v46  ;;  %v217_v45 = vld [vmem:[%s4285_s0 + $0x5e8] sm:$0xff]  ;;  %v203_v46 = vld [vmem:[%s4285_s0 + $0x578] sm:$0xff] }
  0x70   :  { %2070 = vmatprep.subr.bf16.mxu1 %v2069_v49  ;;  %v2087_v49 = vpack.c.bf16 %v186_v43, %v170_v41  ;;  %v2053_v50 = vpack.c.bf16 %v217_v45, %v201_v44  ;;  %v2089_v54 = vpack.c.bf16 %v219_v47, %v203_v46 }
  0x71   :  { %774 = vmatmul.mubr.f32.vlgmr.msra.gmra.mrb[16].mxu0 %v2411_v60 }
  0x72   :  { %863 = vmatmul.mubr.f32.vlgmr.msra.gmra.mrb[16].mxu1 %v2411_v60  ;;  %2036 = vmatpush1.bf16.msra.mxu0 %v2035_v56  ;;  %v233_v56 = vld [vmem:[%s4285_s0 + $0x668] sm:$0xff] }
  0x73   :  { %2072 = vmatpush1.bf16.msra.mxu1 %v2071_v57  ;;  %1802 = vmatprep.mubr.msk.f32.mxu0 %vm340_vm0, %v2445_v11  ;;  %v249_v57 = vld [vmem:[%s4285_s0 + $0x6e8] sm:$0xff] }
  0x74   :  { %2038 = vmatprep.subr.bf16.mxu0 %v2037_v62  ;;  %2074 = vmatprep.subr.bf16.mxu1 %v2073_v63  ;;  %v2091_v62 = vpack.c.bf16 %v218_v55, %v202_v53  ;;  %v2057_v63 = vpack.c.bf16 %v249_v57, %v233_v56 }
  0x75   :  { %780 = vmatmul.mubr.f32.gmra.mrb[18].mxu0 %v2456_v16  ;;  %1806 = vmatprep.mubr.msk.f32.mxu1 %vm340_vm0, %v2445_v11 }
  0x76   :  { %2040 = vmatpush1.bf16.msra.mxu0 %v2039_v5  ;;  %1803 = vmatprep.mubr.msk.f32.mxu0 %vm340_vm0, %v2482_v25  ;;  %v281_v5 = vld [vmem:[%s4285_s0 + $0x7e8] sm:$0xff] }
  0x77   :  { %2076 = vmatpush1.bf16.msra.mxu1 %v2075_v6  ;;  %2042 = vmatprep.subr.bf16.mxu0 %v2041_v7  ;;  %v267_v6 = vld [vmem:[%s4285_s0 + $0x778] sm:$0xff]  ;;  %v2061_v10 = vpack.c.bf16 %v281_v5, %v265_v4 }
  0x78   :  { %869 = vmatmul.mubr.f32.gmra.mrb[18].mxu1 %v2456_v16  ;;  %2078 = vmatprep.subr.bf16.mxu1 %v2077_v12  ;;  %v283_v7 = vld [vmem:[%s4285_s0 + $0x7f8] sm:$0xff]  ;;  %v264_v12 = vld [vmem:[%s4285_s0 + $0x760] sm:$0xff] }
  0x79   :  { %786 = vmatmul.mubr.f32.gmra.mrb[20].mxu0 %v2487_v26  ;;  %1807 = vmatprep.mubr.msk.f32.mxu1 %vm340_vm0, %v2482_v25  ;;  %v2097_v15 = vpack.c.bf16 %v283_v7, %v267_v6  ;;  %v2063_v22 = vpack.c.bf16 %v280_v13, %v264_v12 }
  0x7a   :  { %2044 = vmatpush1.bf16.msra.mxu0 %v2043_v19  ;;  %1804 = vmatprep.mubr.msk.f32.mxu0 %vm340_vm0, %v2521_v38  ;;  %v313_v19 = vld [vmem:[%s4285_s0 + $0x8e8] sm:$0xff] }
  0x7b   :  { %2080 = vmatpush1.bf16.msra.mxu1 %v2079_v20  ;;  %2046 = vmatprep.subr.bf16.mxu0 %v2045_v21  ;;  %v299_v20 = vld [vmem:[%s4285_s0 + $0x878] sm:$0xff]  ;;  %v2065_v27 = vpack.c.bf16 %v313_v19, %v297_v18 }
  0x7c   :  { %875 = vmatmul.mubr.f32.gmra.mrb[20].mxu1 %v2487_v26  ;;  %2082 = vmatprep.subr.bf16.mxu1 %v2081_v28  ;;  %v315_v21 = vld [vmem:[%s4285_s0 + $0x8f8] sm:$0xff]  ;;  %v296_v28 = vld [vmem:[%s4285_s0 + $0x860] sm:$0xff] }
  0x7d   :  { %792 = vmatmul.mubr.f32.gmra.mrb[22].mxu0 %v2527_v40  ;;  %1808 = vmatprep.mubr.msk.f32.mxu1 %vm340_vm0, %v2521_v38  ;;  %v2101_v30 = vpack.c.bf16 %v315_v21, %v299_v20  ;;  %v2067_v33 = vpack.c.bf16 %v312_v29, %v296_v28 }
  0x7e   :  { %2048 = vmatpush1.bf16.msra.mxu0 %v2047_v34  ;;  %1809 = vmatprep.mubr.msk.f32.mxu0 %vm340_vm0, %v2330_v24  ;;  %v2103_v34 = vpack.c.bf16 %v314_v32, %v298_v31 }
  0x7f   :  { %2084 = vmatpush1.bf16.msra.mxu1 %v2083_v35  ;;  %2050 = vmatprep.subr.bf16.mxu0 %v2049_v36 }
  0x80   :  { %881 = vmatmul.mubr.f32.gmra.mrb[22].mxu1 %v2527_v40  ;;  %2086 = vmatprep.subr.bf16.mxu1 %v2085_v42 }
  0x81   :  { %1813 = vmatprep.mubr.msk.f32.mxu1 %vm340_vm0, %v2330_v24  ;;  %v2093_v24 = vpack.c.bf16 %v251_v59, %v235_v58 }
  0x82   :  { %2052 = vmatpush1.bf16.msra.mxu0 %v2051_v48 }
  0x83   :  { %2088 = vmatpush1.bf16.msra.mxu1 %v2087_v49  ;;  %2054 = vmatprep.subr.bf16.mxu0 %v2053_v50 }
  0x84   :  { %2090 = vmatprep.subr.bf16.mxu1 %v2089_v54 }
  0x86   :  { %2056 = vmatpush1.bf16.msra.mxu0 %v2055_v61 }
  0x87   :  { %2092 = vmatpush1.bf16.msra.mxu1 %v2091_v62  ;;  %2058 = vmatprep.subr.bf16.mxu0 %v2057_v63 }
  0x88   :  { %2094 = vmatprep.subr.bf16.mxu1 %v2093_v24 }
  0x8a   :  { %2060 = vmatpush1.bf16.msra.mxu0 %v2059_v8 }
  0x8b   :  { %2096 = vmatpush1.bf16.msra.mxu1 %v2095_v9  ;;  %2062 = vmatprep.subr.bf16.mxu0 %v2061_v10 }
  0x8c   :  { %2098 = vmatprep.subr.bf16.mxu1 %v2097_v15 }
  0x8e   :  { %2064 = vmatpush1.bf16.msra.mxu0 %v2063_v22 }
  0x8f   :  { %2100 = vmatpush1.bf16.msra.mxu1 %v2099_v23  ;;  %2066 = vmatprep.subr.bf16.mxu0 %v2065_v27 }
  0x90   :  { %2102 = vmatprep.subr.bf16.mxu1 %v2101_v30 }
  0x92   :  { %2068 = vmatpush1.bf16.msra.mxu0 %v2067_v33 }
  0x93   :  { %2104 = vmatpush1.bf16.msra.mxu1 %v2103_v34 }
  0x95   :  { %952 = vmatmul.mubr.f32.vlgmr.msra.gmra.mrb[24].mxu0 %v2411_v60 }
  0x96   :  { %1041 = vmatmul.mubr.f32.vlgmr.msra.gmra.mrb[24].mxu1 %v2411_v60  ;;  %1810 = vmatprep.mubr.msk.f32.mxu0 %vm340_vm0, %v2445_v11 }
  0x97   :  { %1814 = vmatprep.mubr.msk.f32.mxu1 %vm340_vm0, %v2445_v11 }
  0x99   :  { %958 = vmatmul.mubr.f32.gmra.mrb[26].mxu0 %v2456_v16 }
  0x9a   :  { %1047 = vmatmul.mubr.f32.gmra.mrb[26].mxu1 %v2456_v16  ;;  %1811 = vmatprep.mubr.msk.f32.mxu0 %vm340_vm0, %v2482_v25 }
  0x9b   :  { %1815 = vmatprep.mubr.msk.f32.mxu1 %vm340_vm0, %v2482_v25 }
  0x9d   :  { %964 = vmatmul.mubr.f32.gmra.mrb[28].mxu0 %v2487_v26 }
  0x9e   :  { %1053 = vmatmul.mubr.f32.gmra.mrb[28].mxu1 %v2487_v26  ;;  %1812 = vmatprep.mubr.msk.f32.mxu0 %vm340_vm0, %v2521_v38 }
  0x9f   :  { %1816 = vmatprep.mubr.msk.f32.mxu1 %vm340_vm0, %v2521_v38 }
  0xa1   :  { %970 = vmatmul.mubr.f32.gmra.mrb[30].mxu0 %v2527_v40 }
  0xa2   :  { %1059 = vmatmul.mubr.f32.gmra.mrb[30].mxu1 %v2527_v40 }
  0xcc   :  { %v3183_v63 = vpop.permute.xlu0 %322 }
  0xdc   :  { %v3191_v2 = vpop.permute.xlu0 %327 }
  0xdd   :  { %v3193_v24 = vpop.permute.xlu1 %332 }
  0xe1   :  { %v3227_v20 = vpop.permute.xlu1 %337 }
  0xfc   :  { %v419_v60 = vpop.f32.mrb[0].mxu0 }
  0xfd   :  { %v421_v11 = vpop.f32.mrb[1].mxu0  ;;  %v508_v16 = vpop.f32.mrb[0].mxu1  ;;  %v3186_v0 = vadd.f32 %v419_v60, %v3183_v63 }
  0xfe   :  { %v510_v35 = vpop.f32.mrb[1].mxu1  ;;  %v3189_v1 = vadd.f32 %v421_v11, %v3183_v63  ;;  %v3198_v5 = vadd.f32 %v508_v16, %v3183_v63 }
  0xff   :  { %v3220_v17 = vadd.f32 %v510_v35, %v3183_v63 }
 0x100   :  { %v425_v36 = vpop.f32.mrb[2].mxu0  ;;  %v1065_v4 = vadd.f32 %v3189_v1, %v3186_v0 }
 0x101   :  { %v427_v25 = vpop.f32.mrb[3].mxu0  ;;  %v514_v37 = vpop.f32.mrb[2].mxu1  ;;  %v3201_v6 = vadd.f32 %v425_v36, %v3191_v2 }
 0x102   :  { %v516_v39 = vpop.f32.mrb[3].mxu1  ;;  %v3204_v7 = vadd.f32 %v427_v25, %v3191_v2  ;;  %v1066_v15 = vadd.f32 %v1065_v4, %v3198_v5  ;;  %v3225_v19 = vadd.f32 %v514_v37, %v3191_v2 }
 0x103   :  { %v3252_v60 = vadd.f32 %v516_v39, %v3191_v2 }
 0x104   :  { %v431_v41 = vpop.f32.mrb[4].mxu0  ;;  %v1082_v18 = vadd.f32 %v3204_v7, %v3201_v6  ;;  %v1067_v33 = vadd.f32 %v1066_v15, %v3220_v17 }
 0x105   :  { %v433_v26 = vpop.f32.mrb[5].mxu0  ;;  %v520_v42 = vpop.f32.mrb[4].mxu1  ;;  %v3213_v12 = vadd.f32 %v431_v41, %v3193_v24 }
 0x106   :  { %v522_v43 = vpop.f32.mrb[5].mxu1  ;;  %v3216_v13 = vadd.f32 %v433_v26, %v3193_v24  ;;  %v3239_v28 = vadd.f32 %v520_v42, %v3193_v24  ;;  %v1083_v34 = vadd.f32 %v1082_v18, %v3225_v19 }
 0x107   :  { %v3265_v26 = vadd.f32 %v522_v43, %v3193_v24 }
 0x108   :  { %v437_v44 = vpop.f32.mrb[6].mxu0  ;;  %v1099_v27 = vadd.f32 %v3216_v13, %v3213_v12 }
 0x109   :  { %v439_v45 = vpop.f32.mrb[7].mxu0  ;;  %v526_v46 = vpop.f32.mrb[6].mxu1  ;;  %v3242_v29 = vadd.f32 %v437_v44, %v3227_v20 }
 0x10a   :  { %v3159_v38 = vpop.f32.mrb[7].mxu1  ;;  %v3245_v30 = vadd.f32 %v439_v45, %v3227_v20  ;;  %v1100_v37 = vadd.f32 %v1099_v27, %v3239_v28  ;;  %v3268_v39 = vadd.f32 %v526_v46, %v3227_v20  ;;  %v1084_v45 = vadd.f32 %v1083_v34, %v3252_v60 }
 0x10c   :  { %v1116_v41 = vadd.f32 %v3245_v30, %v3242_v29  ;;  %4327 = vst [vmem:[#allocation2_spill] sm:$0xff] %v3268_v39  ;;  %v1101_v18 = vadd.f32 %v1100_v37, %v3265_v26 }
 0x10e   :  { %v1117_v27 = vadd.f32 %v1116_v41, %v3268_v39 }
 0x120   :  { %v597_v47 = vpop.f32.mrb[8].mxu0 }
 0x121   :  { %v599_v48 = vpop.f32.mrb[9].mxu0  ;;  %v3161_v40 = vpop.f32.mrb[8].mxu1  ;;  %v3232_v22 = vadd.f32 %v597_v47, %v3183_v63 }
 0x122   :  { %v3163_v49 = vpop.f32.mrb[9].mxu1  ;;  %v3256_v35 = vadd.f32 %v599_v48, %v3183_v63  ;;  %v3280_v43 = vadd.f32 %v3161_v40, %v3183_v63 }
 0x123   :  { %v1068_v16 = vadd.f32 %v1067_v33, %v3232_v22  ;;  %v3305_v37 = vadd.f32 %v3163_v49, %v3183_v63 }
 0x124   :  { %v603_v50 = vpop.f32.mrb[10].mxu0 }
 0x125   :  { %v605_v51 = vpop.f32.mrb[11].mxu0  ;;  %v3259_v36 = vadd.f32 %v603_v50, %v3191_v2  ;;  %v1069_v50 = vadd.f32 %v1068_v16, %v3256_v35 }
 0x126   :  { %v3283_v46 = vadd.f32 %v605_v51, %v3191_v2 }
 0x127   :  { %v3165_v52 = vpop.f32.mrb[10].mxu1  ;;  %v1085_v4 = vadd.f32 %v1084_v45, %v3259_v36  ;;  %v1070_v16 = vadd.f32 %v1069_v50, %v3280_v43 }
 0x128   :  { %v609_v53 = vpop.f32.mrb[12].mxu0  ;;  %v3167_v54 = vpop.f32.mrb[11].mxu1  ;;  %v3310_v41 = vadd.f32 %v3165_v52, %v3191_v2 }
 0x129   :  { %v3169_v55 = vpop.f32.mrb[13].mxu0  ;;  %v3274_v48 = vadd.f32 %v609_v53, %v3193_v24  ;;  %v3289_v53 = vadd.f32 %v3159_v38, %v3227_v20  ;;  %v1086_v38 = vadd.f32 %v1085_v4, %v3283_v46  ;;  %v1071_v52 = vadd.f32 %v1070_v16, %v3305_v37 }
 0x12a   :  { %v3296_v40 = vadd.f32 %v3169_v55, %v3193_v24 }
 0x12b   :  { %v3171_v56 = vpop.f32.mrb[12].mxu1  ;;  %4328 = vst [vmem:[#allocation3_spill] sm:$0xff] %v3289_v53  ;;  %v1102_v34 = vadd.f32 %v1101_v18, %v3274_v48  ;;  %v1118_v45 = vadd.f32 %v1117_v27, %v3289_v53  ;;  %v1087_v4 = vadd.f32 %v1086_v38, %v3310_v41 }
 0x12c   :  { %v3173_v57 = vpop.f32.mrb[14].mxu0  ;;  %v3175_v58 = vpop.f32.mrb[13].mxu1  ;;  %v3320_v50 = vadd.f32 %v3171_v56, %v3193_v24 }
 0x12d   :  { %v3177_v59 = vpop.f32.mrb[15].mxu0  ;;  %v3300_v51 = vadd.f32 %v3173_v57, %v3227_v20  ;;  %v1103_v57 = vadd.f32 %v1102_v34, %v3296_v40  ;;  %v3344_v16 = vadd.f32 %v3175_v58, %v3193_v24 }
 0x12e   :  { %v3324_v49 = vadd.f32 %v3177_v59, %v3227_v20 }
 0x12f   :  { %v3179_v61 = vpop.f32.mrb[14].mxu1  ;;  %4329 = vst [vmem:[#allocation4_spill] sm:$0xff] %v3300_v51  ;;  %v1119_v18 = vadd.f32 %v1118_v45, %v3300_v51  ;;  %v1104_v59 = vadd.f32 %v1103_v57, %v3320_v50 }
 0x130   :  { %v3181_v62 = vpop.f32.mrb[15].mxu1  ;;  %4330 = vst [vmem:[#allocation5_spill] sm:$0xff] %v3324_v49 }
 0x131   :  { %v1120_v45 = vadd.f32 %v1119_v18, %v3324_v49 }
 0x144   :  { %v775_v3 = vpop.f32.mrb[16].mxu0 }
 0x145   :  { %v3206_v8 = vpop.f32.mrb[17].mxu0  ;;  %v3208_v9 = vpop.f32.mrb[16].mxu1  ;;  %v3314_v55 = vadd.f32 %v775_v3, %v3183_v63  ;;  %v3330_v3 = vadd.f32 %v3167_v54, %v3191_v2  ;;  %v3348_v54 = vadd.f32 %v3179_v61, %v3227_v20  ;;  %v1105_v61 = vadd.f32 %v1104_v59, %v3344_v16 }
 0x146   :  { %v3210_v10 = vpop.f32.mrb[17].mxu1  ;;  %v3335_v34 = vadd.f32 %v3206_v8, %v3183_v63  ;;  %v3358_v57 = vadd.f32 %v3208_v9, %v3183_v63 }
 0x147   :  { %v1072_v27 = vadd.f32 %v1071_v52, %v3314_v55  ;;  %4331 = vst [vmem:[#allocation6_spill] sm:$0xff] %v3348_v54  ;;  %v1088_v38 = vadd.f32 %v1087_v4, %v3330_v3  ;;  %v1121_v18 = vadd.f32 %v1120_v45, %v3348_v54 }
 0x148   :  { %v781_v14 = vpop.f32.mrb[18].mxu0 }
 0x149   :  { %v3229_v21 = vpop.f32.mrb[19].mxu0  ;;  %v3338_v56 = vadd.f32 %v781_v14, %v3191_v2  ;;  %v1073_v14 = vadd.f32 %v1072_v27, %v3335_v34 }
 0x14a   :  { %v3362_v58 = vadd.f32 %v3229_v21, %v3191_v2  ;;  %v3380_v21 = vadd.f32 %v3210_v10, %v3183_v63 }
 0x14b   :  { %v3234_v23 = vpop.f32.mrb[18].mxu1  ;;  %v1089_v52 = vadd.f32 %v1088_v38, %v3338_v56  ;;  %v1074_v38 = vadd.f32 %v1073_v14, %v3358_v57 }
 0x14c   :  { %v787_v31 = vpop.f32.mrb[20].mxu0  ;;  %v3247_v32 = vpop.f32.mrb[19].mxu1 }
 0x14d   :  { %v789_v11 = vpop.f32.mrb[21].mxu0  ;;  %v3352_v8 = vadd.f32 %v787_v31, %v3193_v24  ;;  %v3368_v31 = vadd.f32 %v3181_v62, %v3227_v20  ;;  %v1090_v59 = vadd.f32 %v1089_v52, %v3362_v58  ;;  %v3385_v62 = vadd.f32 %v3234_v23, %v3191_v2 }
 0x14e   :  { %v3372_v27 = vadd.f32 %v789_v11, %v3193_v24  ;;  %v1075_v54 = vadd.f32 %v1074_v38, %v3380_v21  ;;  %v3400_v23 = vadd.f32 %v3247_v32, %v3191_v2 }
 0x14f   :  { %v876_v25 = vpop.f32.mrb[20].mxu1  ;;  %4332 = vst [vmem:[#allocation7_spill] sm:$0xff] %v3352_v8  ;;  %4333 = vst [vmem:[#allocation8_spill] sm:$0xff] %v3368_v31  ;;  %v1106_v4 = vadd.f32 %v1105_v61, %v3352_v8  ;;  %v1122_v45 = vadd.f32 %v1121_v18, %v3368_v31  ;;  %v1091_v52 = vadd.f32 %v1090_v59, %v3385_v62 }
 0x150   :  { %v793_v42 = vpop.f32.mrb[22].mxu0  ;;  %v3270_v44 = vpop.f32.mrb[21].mxu1  ;;  %4334 = vst [vmem:[#allocation9_spill] sm:$0xff] %v3372_v27 }
 0x151   :  { %v795_v47 = vpop.f32.mrb[23].mxu0  ;;  %v3375_v9 = vadd.f32 %v793_v42, %v3227_v20  ;;  %v1107_v11 = vadd.f32 %v1106_v4, %v3372_v27  ;;  %v3391_v42 = vadd.f32 %v876_v25, %v3193_v24  ;;  %v3413_v59 = vadd.f32 %v3270_v44, %v3193_v24 }
 0x152   :  { %v3394_v14 = vadd.f32 %v795_v47, %v3227_v20  ;;  %v1092_v49 = vadd.f32 %v1091_v52, %v3400_v23 }
 0x153   :  { %v882_v15 = vpop.f32.mrb[22].mxu1  ;;  %4335 = vst [vmem:[#allocation10_spill] sm:$0xff] %v3375_v9  ;;  %v1123_v61 = vadd.f32 %v1122_v45, %v3375_v9  ;;  %4336 = vst [vmem:[#allocation11_spill] sm:$0xff] %v3391_v42  ;;  %v1108_v31 = vadd.f32 %v1107_v11, %v3391_v42 }
 0x154   :  { %v3291_v33 = vpop.f32.mrb[23].mxu1  ;;  %4337 = vst [vmem:[#allocation12_spill] sm:$0xff] %v3394_v14  ;;  %4338 = vst [vmem:[#allocation13_spill] sm:$0xff] %v3413_v59  ;;  %v3416_v32 = vadd.f32 %v882_v15, %v3227_v20 }
 0x155   :  { %v1124_v38 = vadd.f32 %v1123_v61, %v3394_v14 }
 0x156   :  { %4339 = vst [vmem:[#allocation14_spill] sm:$0xff] %v3416_v32 }
 0x168   :  { %v953_v10 = vpop.f32.mrb[24].mxu0 }
 0x169   :  { %v3403_v18 = vadd.f32 %v953_v10, %v3183_v63  ;;  %v1042_v4 = vpop.f32.mrb[24].mxu1  ;;  %v955_v45 = vpop.f32.mrb[25].mxu0 }
 0x16a   :  { %v3406_v25 = vadd.f32 %v955_v45, %v3183_v63  ;;  %v1044_v9 = vpop.f32.mrb[25].mxu1  ;;  %v3420_v45 = vadd.f32 %v1042_v4, %v3183_v63  ;;  %v1109_v4 = vadd.f32 %v1108_v31, %v3413_v59 }
 0x16b   :  { %v1076_v47 = vadd.f32 %v1075_v54, %v3403_v18  ;;  %v3430_v15 = vadd.f32 %v1044_v9, %v3183_v63 }
 0x16c   :  { %v959_v10 = vpop.f32.mrb[26].mxu0 }
 0x16d   :  { %v1077_v51 = vadd.f32 %v1076_v47, %v3406_v25  ;;  %v3424_v54 = vadd.f32 %v959_v10, %v3191_v2  ;;  %v1048_v11 = vpop.f32.mrb[26].mxu1  ;;  %v961_v61 = vpop.f32.mrb[27].mxu0  ;;  %v1125_v47 = vadd.f32 %v1124_v38, %v3416_v32  ;;  %v3438_v10 = vadd.f32 %v3291_v33, %v3227_v20 }
 0x16e   :  { %v3427_v14 = vadd.f32 %v961_v61, %v3191_v2  ;;  %v1050_v44 = vpop.f32.mrb[27].mxu1  ;;  %v3441_v61 = vadd.f32 %v1048_v11, %v3191_v2 }
 0x16f   :  { %v1093_v42 = vadd.f32 %v1092_v49, %v3424_v54  ;;  %v1078_v52 = vadd.f32 %v1077_v51, %v3420_v45  ;;  %v3452_v33 = vadd.f32 %v1050_v44, %v3191_v2 }
 0x170   :  { %v965_v53 = vpop.f32.mrb[28].mxu0 }
 0x171   :  { %v1094_v27 = vadd.f32 %v1093_v42, %v3427_v14  ;;  %v3445_v63 = vadd.f32 %v965_v53, %v3193_v24  ;;  %v1054_v49 = vpop.f32.mrb[28].mxu1  ;;  %v967_v9 = vpop.f32.mrb[29].mxu0  ;;  %v1079_v51 = vadd.f32 %v1078_v52, %v3430_v15  ;;  %v1126_v42 = vadd.f32 %v1125_v47, %v3438_v10 }
 0x172   :  { %v3449_v31 = vadd.f32 %v967_v9, %v3193_v24  ;;  %v1056_v38 = vpop.f32.mrb[29].mxu1  ;;  %v3458_v59 = vadd.f32 %v1054_v49, %v3193_v24 }
 0x173   :  { %v1110_v32 = vadd.f32 %v1109_v4, %v3445_v63  ;;  %1080 = vadd.xlane.f32.xlu0 %v1079_v51  ;;  %v1095_v11 = vadd.f32 %v1094_v27, %v3441_v61  ;;  %v3469_v27 = vadd.f32 %v1056_v38, %v3193_v24 }
 0x174   :  { %v971_v53 = vpop.f32.mrb[30].mxu0 }
 0x175   :  { %v1111_v52 = vadd.f32 %v1110_v32, %v3449_v31  ;;  %v3462_v9 = vadd.f32 %v971_v53, %v3227_v20  ;;  %v1060_v39 = vpop.f32.mrb[30].mxu1  ;;  %v973_v8 = vpop.f32.mrb[31].mxu0  ;;  %v1096_v2 = vadd.f32 %v1095_v11, %v3452_v33 }
 0x176   :  { %v3466_v44 = vadd.f32 %v973_v8, %v3227_v20  ;;  %v1062_v4 = vpop.f32.mrb[31].mxu1  ;;  %v3474_v32 = vadd.f32 %v1060_v39, %v3227_v20 }
 0x177   :  { %v1127_v47 = vadd.f32 %v1126_v42, %v3462_v9  ;;  %1097 = vadd.xlane.f32.xlu1 %v1096_v2  ;;  %v1112_v49 = vadd.f32 %v1111_v52, %v3458_v59  ;;  %v3479_v11 = vadd.f32 %v1062_v4, %v3227_v20 }
 0x179   :  { %v1128_v51 = vadd.f32 %v1127_v47, %v3466_v44  ;;  %v1113_v53 = vadd.f32 %v1112_v49, %v3469_v27 }
 0x17b   :  { %1114 = vadd.xlane.f32.xlu0 %v1113_v53  ;;  %v1129_v8 = vadd.f32 %v1128_v51, %v3474_v32 }
 0x17d   :  { %v1130_v24 = vadd.f32 %v1129_v8, %v3479_v11 }
 0x17f   :  { %1131 = vadd.xlane.f32.xlu0 %v1130_v24 }
 0x200   :  { %v1081_v38 = vpop.xlane.xlu0 %1080 }
 0x201   :  { %v1133_v42 = vmul.f32 0.00048828125, %v1081_v38 }
 0x203   :  { %v3484_v52 = vsub.f32 %v3186_v0, %v1133_v42  ;;  %v3487_v39 = vsub.f32 %v3189_v1, %v1133_v42  ;;  %v3490_v47 = vsub.f32 %v3198_v5, %v1133_v42  ;;  %v3499_v51 = vsub.f32 %v3220_v17, %v1133_v42 }
 0x204   :  { %v1098_v2 = vpop.xlane.xlu1 %1097  ;;  %v3502_v0 = vsub.f32 %v3232_v22, %v1133_v42  ;;  %v3507_v5 = vsub.f32 %v3256_v35, %v1133_v42  ;;  %v3520_v22 = vsub.f32 %v3280_v43, %v1133_v42 }
 0x205   :  { %v1201_v20 = vmul.f32 %v3484_v52, %v3484_v52  ;;  %v1202_v4 = vmul.f32 %v3487_v39, %v3487_v39  ;;  %v3496_v49 = vmul.f32 0.00048828125, %v1098_v2  ;;  %v1203_v1 = vmul.f32 %v3490_v47, %v3490_v47 }
 0x206   :  { %v1204_v8 = vmul.f32 %v3499_v51, %v3499_v51  ;;  %4342 = vst [vmem:[#allocation17_spill] sm:$0xff] %v3520_v22  ;;  %v1205_v2 = vmul.f32 %v3502_v0, %v3502_v0 }
 0x207   :  { %v1265_v53 = vadd.f32 %v1202_v4, %v1201_v20  ;;  %v3513_v38 = vsub.f32 %v3201_v6, %v3496_v49  ;;  %v3517_v17 = vsub.f32 %v3204_v7, %v3496_v49  ;;  %v3525_v20 = vsub.f32 %v3305_v37, %v1133_v42 }
 0x208   :  { %v1206_v4 = vmul.f32 %v3507_v5, %v3507_v5  ;;  %v1207_v37 = vmul.f32 %v3520_v22, %v3520_v22  ;;  %v3558_v22 = vsub.f32 %v3259_v36, %v3496_v49  ;;  %v3575_v36 = vsub.f32 %v3283_v46, %v3496_v49 }
 0x209   :  { %v1266_v24 = vadd.f32 %v1265_v53, %v1203_v1  ;;  %4340 = vst [vmem:[#allocation15_spill] sm:$0xff] %v3513_v38  ;;  %4341 = vst [vmem:[#allocation16_spill] sm:$0xff] %v3517_v17  ;;  %v1115_v1 = vpop.xlane.xlu0 %1114  ;;  %v3531_v53 = vsub.f32 %v3225_v19, %v3496_v49  ;;  %v1217_v7 = vmul.f32 %v3513_v38, %v3513_v38 }
 0x20a   :  { %v1218_v43 = vmul.f32 %v3517_v17, %v3517_v17  ;;  %v3549_v19 = vsub.f32 %v3335_v34, %v1133_v42  ;;  %v3552_v38 = vsub.f32 %v3358_v57, %v1133_v42  ;;  %4343 = vst [vmem:[#allocation18_spill] sm:$0xff] %v3558_v22  ;;  %v3566_v34 = vsub.f32 %v3403_v18, %v1133_v42 }
 0x20b   :  { %v1267_v35 = vadd.f32 %v1266_v24, %v1204_v8  ;;  %v3538_v8 = vsub.f32 %v3314_v55, %v1133_v42  ;;  %v1208_v55 = vmul.f32 %v3525_v20, %v3525_v20  ;;  %v3569_v57 = vsub.f32 %v3406_v25, %v1133_v42  ;;  %4344 = vst [vmem:[#allocation19_spill] sm:$0xff] %v3575_v36 }
 0x20c   :  { %v1210_v18 = vmul.f32 %v3549_v19, %v3549_v19 }
 0x20d   :  { %v1268_v6 = vadd.f32 %v1267_v35, %v1205_v2  ;;  %v3544_v2 = vsub.f32 %v3252_v60, %v3496_v49  ;;  %v3546_v35 = vmul.f32 0.00048828125, %v1115_v1  ;;  %v1219_v60 = vmul.f32 %v3531_v53, %v3531_v53 }
 0x20e   :  { %v3563_v1 = vsub.f32 %v3380_v21, %v1133_v42  ;;  %v3580_v21 = vsub.f32 %v3420_v45, %v1133_v42  ;;  %v1221_v45 = vmul.f32 %v3558_v22, %v3558_v22 }
 0x20f   :  { %v1269_v24 = vadd.f32 %v1268_v6, %v1206_v4  ;;  %v1282_v4 = vadd.f32 %v1218_v43, %v1217_v7  ;;  %v1209_v6 = vmul.f32 %v3538_v8, %v3538_v8  ;;  %v1220_v7 = vmul.f32 %v3544_v2, %v3544_v2 }
 0x210   :  { %v3586_v25 = vsub.f32 %v3213_v12, %v3546_v35  ;;  %v1211_v12 = vmul.f32 %v3552_v38, %v3552_v38 }
 0x211   :  { %v1270_v17 = vadd.f32 %v1269_v24, %v1207_v37  ;;  %v1283_v43 = vadd.f32 %v1282_v4, %v1219_v60  ;;  %v3594_v24 = vsub.f32 %v3310_v41, %v3496_v49  ;;  %v3599_v60 = vsub.f32 %v3430_v15, %v1133_v42 }
 0x212   :  { %4345 = vst [vmem:[#allocation20_spill] sm:$0xff] %v3586_v25  ;;  %v1212_v4 = vmul.f32 %v3563_v1, %v3563_v1  ;;  %v3609_v41 = vsub.f32 %v3330_v3, %v3496_v49  ;;  %v1214_v42 = vmul.f32 %v3569_v57, %v3569_v57  ;;  %v1233_v22 = vmul.f32 %v3586_v25, %v3586_v25 }
 0x213   :  { %v1271_v37 = vadd.f32 %v1270_v17, %v1208_v55  ;;  %v3590_v17 = vsub.f32 %v3216_v13, %v3546_v35  ;;  %v1284_v55 = vadd.f32 %v1283_v43, %v1220_v7  ;;  %v1213_v13 = vmul.f32 %v3566_v34, %v3566_v34 }
 0x214   :  { %v1222_v7 = vmul.f32 %v3575_v36, %v3575_v36  ;;  %v3617_v43 = vsub.f32 %v3239_v28, %v3546_v35  ;;  %v3625_v3 = vsub.f32 %v3338_v56, %v3496_v49  ;;  %v1215_v28 = vmul.f32 %v3580_v21, %v3580_v21 }
 0x215   :  { %4346 = vst [vmem:[#allocation21_spill] sm:$0xff] %v3590_v17  ;;  %v1272_v46 = vadd.f32 %v1271_v37, %v1209_v6  ;;  %v1132_v6 = vpop.xlane.xlu0 %1131  ;;  %v1285_v15 = vadd.f32 %v1284_v55, %v1221_v45  ;;  %v1223_v45 = vmul.f32 %v3594_v24, %v3594_v24  ;;  %v1216_v25 = vmul.f32 %v3599_v60, %v3599_v60 }
 0x216   :  { %v3629_v36 = vmul.f32 0.00048828125, %v1132_v6  ;;  %v3641_v56 = vsub.f32 %v3362_v58, %v3496_v49  ;;  %v3657_v58 = vsub.f32 %v3400_v23, %v3496_v49 }
 0x217   :  { %v1273_v37 = vadd.f32 %v1272_v46, %v1210_v18  ;;  %v1234_v18 = vmul.f32 %v3590_v17, %v3590_v17  ;;  %v1286_v55 = vadd.f32 %v1285_v15, %v1222_v7  ;;  %v3637_v17 = vsub.f32 %v3265_v26, %v3546_v35 }
 0x218   :  { %v3647_v7 = vsub.f32 %v3385_v62, %v3496_v49  ;;  %v3651_v15 = vsub.f32 %v3274_v48, %v3546_v35  ;;  %v1235_v26 = vmul.f32 %v3617_v43, %v3617_v43  ;;  %v3663_v62 = vsub.f32 %v3424_v54, %v3496_v49 }
 0x219   :  { %v1274_v46 = vadd.f32 %v1273_v37, %v1211_v12  ;;  %v1224_v37 = vmul.f32 %v3609_v41, %v3609_v41  ;;  %v1287_v6 = vadd.f32 %v1286_v55, %v1223_v45  ;;  %v1225_v45 = vmul.f32 %v3625_v3, %v3625_v3 }
 0x21a   :  { %4347 = vst [vmem:[#allocation22_spill] sm:$0xff] %v3651_v15  ;;  %v3667_v48 = vsub.f32 %v3296_v40, %v3546_v35  ;;  %v1226_v23 = vmul.f32 %v3641_v56, %v3641_v56  ;;  %v1237_v54 = vmul.f32 %v3651_v15, %v3651_v15  ;;  %v3681_v40 = vsub.f32 %v3242_v29, %v3629_v36 }
 0x21b   :  { %v1275_v12 = vadd.f32 %v1274_v46, %v1212_v4  ;;  %v1299_v4 = vadd.f32 %v1234_v18, %v1233_v22  ;;  %v1288_v55 = vadd.f32 %v1287_v6, %v1224_v37  ;;  %v1236_v22 = vmul.f32 %v3637_v17, %v3637_v17 }
 0x21c   :  { %v3675_v37 = vsub.f32 %v3320_v50, %v3546_v35  ;;  %4348 = vst [vmem:[#allocation23_spill] sm:$0xff] %v3681_v40  ;;  %v1227_v50 = vmul.f32 %v3647_v7, %v3647_v7  ;;  %v3697_v29 = vsub.f32 %v3344_v16, %v3546_v35  ;;  %v1249_v16 = vmul.f32 %v3681_v40, %v3681_v40 }
 0x21d   :  { %v1276_v46 = vadd.f32 %v1275_v12, %v1213_v13  ;;  %v1300_v13 = vadd.f32 %v1299_v4, %v1235_v26  ;;  %v1289_v12 = vadd.f32 %v1288_v55, %v1225_v45  ;;  %v3685_v26 = vsub.f32 %v3245_v30, %v3629_v36 }
 0x21e   :  { %v3689_v4 = vsub.f32 %v3427_v14, %v3496_v49  ;;  %v1228_v45 = vmul.f32 %v3657_v58, %v3657_v58  ;;  %v1238_v30 = vmul.f32 %v3667_v48, %v3667_v48  ;;  %v4350_v14 = vld [vmem:[#allocation7_spill] sm:$0xff] }
 0x21f   :  { %v1277_v18 = vadd.f32 %v1276_v46, %v1214_v42  ;;  %v1301_v6 = vadd.f32 %v1300_v13, %v1236_v22  ;;  %4349 = vst [vmem:[#allocation24_spill] sm:$0xff] %v3685_v26  ;;  %v1290_v46 = vadd.f32 %v1289_v12, %v1226_v23  ;;  %v3703_v13 = vsub.f32 %v4350_v14, %v3546_v35  ;;  %v4352_v12 = vld [vmem:[#allocation2_spill] sm:$0xff]  ;;  %v4355_v14 = vld [vmem:[#allocation3_spill] sm:$0xff] }
 0x220   :  { %v3709_v15 = vsub.f32 %v4352_v12, %v3629_v36  ;;  %v1230_v12 = vmul.f32 %v3689_v4, %v3689_v4 }
 0x221   :  { %v1278_v42 = vadd.f32 %v1277_v18, %v1215_v28  ;;  %v1302_v55 = vadd.f32 %v1301_v6, %v1237_v54  ;;  %v1291_v22 = vadd.f32 %v1290_v46, %v1227_v50  ;;  %4351 = vst [vmem:[#allocation7_spill] sm:$0xff] %v3703_v13  ;;  %v1239_v18 = vmul.f32 %v3675_v37, %v3675_v37  ;;  %v4354_v50 = vld [vmem:[#allocation9_spill] sm:$0xff] }
 0x222   :  { %4353 = vst [vmem:[#allocation2_spill] sm:$0xff] %v3709_v15  ;;  %v1250_v54 = vmul.f32 %v3685_v26, %v3685_v26  ;;  %v1229_v6 = vmul.f32 %v3663_v62, %v3663_v62  ;;  %v3723_v46 = vsub.f32 %v4354_v50, %v3546_v35  ;;  %v4359_v26 = vld [vmem:[#allocation4_spill] sm:$0xff] }
 0x223   :  { %v1279_v28 = vadd.f32 %v1278_v42, %v1216_v25  ;;  %v1303_v23 = vadd.f32 %v1302_v55, %v1238_v30  ;;  %v3717_v25 = vsub.f32 %v3441_v61, %v3496_v49  ;;  %v1292_v42 = vadd.f32 %v1291_v22, %v1228_v45  ;;  %v4357_v22 = vld [vmem:[#allocation11_spill] sm:$0xff] }
 0x224   :  { %v3727_v30 = vsub.f32 %v3452_v33, %v3496_v49  ;;  %v1240_v55 = vmul.f32 %v3697_v29, %v3697_v29  ;;  %v3733_v61 = vsub.f32 %v4355_v14, %v3629_v36  ;;  %v3739_v50 = vsub.f32 %v4357_v22, %v3546_v35 }
 0x225   :  { %1280 = vadd.xlane.f32.xlu1 %v1279_v28  ;;  %v1304_v28 = vadd.f32 %v1303_v23, %v1239_v18  ;;  %v1293_v45 = vadd.f32 %v1292_v42, %v1229_v6  ;;  %v1241_v33 = vmul.f32 %v3703_v13, %v3703_v13  ;;  %v3745_v40 = vsub.f32 %v4359_v26, %v3629_v36  ;;  %v4360_v42 = vld [vmem:[#allocation13_spill] sm:$0xff] }
 0x226   :  { %4356 = vst [vmem:[#allocation9_spill] sm:$0xff] %v3733_v61  ;;  %4358 = vst [vmem:[#allocation3_spill] sm:$0xff] %v3739_v50  ;;  %v1251_v18 = vmul.f32 %v3709_v15, %v3709_v15  ;;  %v1316_v23 = vadd.f32 %v1250_v54, %v1249_v16  ;;  %v1231_v14 = vmul.f32 %v3717_v25, %v3717_v25 }
 0x227   :  { %v1305_v49 = vadd.f32 %v1304_v28, %v1240_v55  ;;  %v1294_v6 = vadd.f32 %v1293_v45, %v1230_v12  ;;  %v3753_v22 = vsub.f32 %v4360_v42, %v3546_v35  ;;  %v1242_v13 = vmul.f32 %v3723_v46, %v3723_v46  ;;  %v4361_v28 = vld [vmem:[#allocation5_spill] sm:$0xff] }
 0x228   :  { %v3759_v26 = vsub.f32 %v4361_v28, %v3629_v36  ;;  %v1252_v15 = vmul.f32 %v3733_v61, %v3733_v61  ;;  %v1317_v16 = vadd.f32 %v1316_v23, %v1251_v18  ;;  %v1232_v54 = vmul.f32 %v3727_v30, %v3727_v30 }
 0x229   :  { %v1306_v55 = vadd.f32 %v1305_v49, %v1241_v33  ;;  %v1295_v12 = vadd.f32 %v1294_v6, %v1231_v14  ;;  %v3767_v45 = vsub.f32 %v3445_v63, %v3546_v35  ;;  %v1243_v42 = vmul.f32 %v3739_v50, %v3739_v50  ;;  %v4362_v49 = vld [vmem:[#allocation6_spill] sm:$0xff]  ;;  %v4363_v50 = vld [vmem:[#allocation8_spill] sm:$0xff] }
 0x22a   :  { %v3773_v28 = vsub.f32 %v4362_v49, %v3629_v36  ;;  %v1253_v61 = vmul.f32 %v3745_v40, %v3745_v40  ;;  %v1318_v18 = vadd.f32 %v1317_v16, %v1252_v15  ;;  %v3779_v14 = vsub.f32 %v3449_v31, %v3546_v35 }
 0x22b   :  { %v1307_v33 = vadd.f32 %v1306_v55, %v1242_v13  ;;  %v1296_v23 = vadd.f32 %v1295_v12, %v1232_v54  ;;  %v1244_v63 = vmul.f32 %v3753_v22, %v3753_v22  ;;  %v3785_v13 = vsub.f32 %v4363_v50, %v3629_v36  ;;  %v4365_v54 = vld [vmem:[#allocation10_spill] sm:$0xff] }
 0x22c   :  { %v1254_v55 = vmul.f32 %v3759_v26, %v3759_v26  ;;  %v1319_v49 = vadd.f32 %v1318_v18, %v1253_v61  ;;  %v3791_v15 = vsub.f32 %v3458_v59, %v3546_v35  ;;  %v1245_v31 = vmul.f32 %v3767_v45, %v3767_v45  ;;  %v4367_v18 = vld [vmem:[#allocation12_spill] sm:$0xff] }
 0x22d   :  { %v1308_v6 = vadd.f32 %v1307_v33, %v1243_v42  ;;  %4364 = vst [vmem:[#allocation11_spill] sm:$0xff] %v3785_v13  ;;  %1297 = vadd.xlane.f32.xlu0 %v1296_v23  ;;  %v3797_v12 = vsub.f32 %v4365_v54, %v3629_v36  ;;  %v1255_v50 = vmul.f32 %v3773_v28, %v3773_v28 }
 0x22e   :  { %v1320_v42 = vadd.f32 %v1319_v49, %v1254_v55  ;;  %v3803_v61 = vsub.f32 %v3469_v27, %v3546_v35  ;;  %v1246_v59 = vmul.f32 %v3779_v14, %v3779_v14  ;;  %v3809_v23 = vsub.f32 %v4367_v18, %v3629_v36  ;;  %v4369_v49 = vld [vmem:[#allocation14_spill] sm:$0xff] }
 0x22f   :  { %v1309_v16 = vadd.f32 %v1308_v6, %v1244_v63  ;;  %4366 = vst [vmem:[#allocation4_spill] sm:$0xff] %v3797_v12  ;;  %v1256_v63 = vmul.f32 %v3785_v13, %v3785_v13  ;;  %v1247_v54 = vmul.f32 %v3791_v15, %v3791_v15  ;;  %v3817_v27 = vsub.f32 %v4369_v49, %v3629_v36 }
 0x230   :  { %4368 = vst [vmem:[#allocation13_spill] sm:$0xff] %v3809_v23  ;;  %v1321_v6 = vadd.f32 %v1320_v42, %v1255_v50  ;;  %v1257_v35 = vmul.f32 %v3797_v12, %v3797_v12  ;;  %v3825_v13 = vsub.f32 %v3438_v10, %v3629_v36  ;;  %v1258_v50 = vmul.f32 %v3809_v23, %v3809_v23 }
 0x231   :  { %v1310_v33 = vadd.f32 %v1309_v16, %v1245_v31  ;;  %4370 = vst [vmem:[#allocation5_spill] sm:$0xff] %v3817_v27  ;;  %v1248_v16 = vmul.f32 %v3803_v61, %v3803_v61  ;;  %v3843_v49 = vsub.f32 %v3474_v32, %v3629_v36 }
 0x232   :  { %v1322_v31 = vadd.f32 %v1321_v6, %v1256_v63  ;;  %4371 = vst [vmem:[#allocation6_spill] sm:$0xff] %v3825_v13  ;;  %v1259_v63 = vmul.f32 %v3817_v27, %v3817_v27  ;;  %v1260_v10 = vmul.f32 %v3825_v13, %v3825_v13 }
 0x233   :  { %v1311_v55 = vadd.f32 %v1310_v33, %v1246_v59  ;;  %v3831_v33 = vsub.f32 %v3462_v9, %v3629_v36  ;;  %4374 = vst [vmem:[#allocation12_spill] sm:$0xff] %v3843_v49 }
 0x234   :  { %v1323_v42 = vadd.f32 %v1322_v31, %v1257_v35  ;;  %v3849_v31 = vsub.f32 %v3479_v11, %v3629_v36  ;;  %v1437_v11 = vld [vmem:[%s4288_s4] sm:$0xff] }
 0x235   :  { %v1312_v18 = vadd.f32 %v1311_v55, %v1247_v54  ;;  %4372 = vst [vmem:[#allocation8_spill] sm:$0xff] %v3831_v33  ;;  %v3837_v54 = vsub.f32 %v3466_v44, %v3629_v36  ;;  %v1261_v9 = vmul.f32 %v3831_v33, %v3831_v33 }
 0x236   :  { %v1324_v6 = vadd.f32 %v1323_v42, %v1258_v50  ;;  %4375 = vst [vmem:[#allocation14_spill] sm:$0xff] %v3849_v31  ;;  %v1264_v32 = vmul.f32 %v3849_v31, %v3849_v31 }
 0x237   :  { %v1313_v59 = vadd.f32 %v1312_v18, %v1248_v16  ;;  %4373 = vst [vmem:[#allocation10_spill] sm:$0xff] %v3837_v54  ;;  %v1262_v44 = vmul.f32 %v3837_v54, %v3837_v54  ;;  %v1263_v18 = vmul.f32 %v3843_v49, %v3843_v49 }
 0x238   :  { %v1325_v55 = vadd.f32 %v1324_v6, %v1259_v63  ;;  %v1438_v63 = vld [vmem:[%s4288_s4 + $0x8] sm:$0xff] }
 0x239   :  { %1314 = vadd.xlane.f32.xlu1 %v1313_v59 }
 0x23a   :  { %v1326_v35 = vadd.f32 %v1325_v55, %v1260_v10 }
 0x23c   :  { %v1327_v16 = vadd.f32 %v1326_v35, %v1261_v9 }
 0x23e   :  { %v1328_v50 = vadd.f32 %v1327_v16, %v1262_v44  ;;  %v1337_v44 = vld [vmem:[%s4289_s3] sm:$0xff] }
 0x240   :  { %v1329_v42 = vadd.f32 %v1328_v50, %v1263_v18 }
 0x242   :  { %v1330_v59 = vadd.f32 %v1329_v42, %v1264_v32  ;;  %v1338_v42 = vld [vmem:[%s4289_s3 + $0x8] sm:$0xff] }
 0x244   :  { %1331 = vadd.xlane.f32.xlu0 %v1330_v59 }
 0x24a   :  { %1448 = vperm.xlu1 %2107, %v1438_v63  }
 0x25a   :  { %1443 = vperm.xlu0 %2106, %v1437_v11  }
 0x2b2   :  { %v1281_v36 = vpop.xlane.xlu1 %1280 }
 0x2b3   :  { %v1333_v6 = vmul.f32 0.00048828125, %v1281_v36  ;;  %v1439_v36 = vld [vmem:[%s4288_s4 + $0x10] sm:$0xff] }
 0x2b5   :  { %v1341_v10 = vadd.f32 1e-05, %v1333_v6 }
 0x2b7   :  { %2108 = vrsqrt.f32 %v1341_v10 }
 0x2ba   :  { %v1298_v55 = vpop.xlane.xlu0 %1297 }
 0x2bb   :  { %v1334_v9 = vmul.f32 0.00048828125, %v1298_v55  ;;  %v1339_v55 = vld [vmem:[%s4289_s3 + $0x10] sm:$0xff] }
 0x2bd   :  { %v1342_v35 = vadd.f32 1e-05, %v1334_v9 }
 0x2bf   :  { %2110 = vrsqrt.f32 %v1342_v35 }
 0x2c1   :  { %v2109_v16 = vpop.eup %2108 }
 0x2c2   :  { %v1349_v18 = vmul.f32 %v2109_v16, %v1337_v44  ;;  %v1340_v16 = vld [vmem:[%s4289_s3 + $0x18] sm:$0xff] }
 0x2c4   :  { %1355 = vperm.xlu1 %2107, %v1349_v18  }
 0x2c6   :  { %v1315_v50 = vpop.xlane.xlu1 %1314 }
 0x2c7   :  { %v1335_v32 = vmul.f32 0.00048828125, %v1315_v50 }
 0x2c9   :  { %v1343_v59 = vadd.f32 1e-05, %v1335_v32  ;;  %v2111_v63 = vpop.eup %2110  ;;  %v1440_v32 = vld [vmem:[%s4288_s4 + $0x18] sm:$0xff] }
 0x2ca   :  { %v1350_v11 = vmul.f32 %v2111_v63, %v1338_v42  ;;  %v3881_v42 = vpop.permute.xlu1 %1448 }
 0x2cb   :  { %2112 = vrsqrt.f32 %v1343_v59 }
 0x2cc   :  { %1360 = vperm.xlu0 %2106, %v1350_v11  }
 0x2d0   :  { %1453 = vperm.xlu0 %2106, %v1439_v36  }
 0x2d1   :  { %v1332_v6 = vpop.xlane.xlu0 %1331 }
 0x2d2   :  { %v1336_v10 = vmul.f32 0.00048828125, %v1332_v6 }
 0x2d4   :  { %v1344_v35 = vadd.f32 1e-05, %v1336_v10 }
 0x2d5   :  { %v2113_v9 = vpop.eup %2112 }
 0x2d6   :  { %v1351_v44 = vmul.f32 %v2113_v9, %v1339_v55  ;;  %2114 = vrsqrt.f32 %v1344_v35  ;;  %v4376_v9 = vld [vmem:[#allocation17_spill] sm:$0xff] }
 0x2d8   :  { %1365 = vperm.xlu1 %2107, %v1351_v44  }
 0x2e0   :  { %v2115_v18 = vpop.eup %2114 }
 0x2e1   :  { %v1352_v50 = vmul.f32 %v2115_v18, %v1340_v16 }
 0x2e3   :  { %1370 = vperm.xlu1 %2107, %v1352_v50   ;;  %v1444_v50 = vpop.permute.xlu0 %1443 }
 0x2e7   :  { %1458 = vperm.xlu1 %2107, %v1440_v32  }
 0x343   :  { %v1356_v59 = vpop.permute.xlu1 %1355 }
 0x344   :  { %v1373_v63 = vmul.f32 %v1356_v59, %v3484_v52  ;;  %v1374_v11 = vmul.f32 %v1356_v59, %v3487_v39  ;;  %v1375_v36 = vmul.f32 %v1356_v59, %v3490_v47  ;;  %v1376_v6 = vmul.f32 %v1356_v59, %v3499_v51 }
 0x345   :  { %v1377_v10 = vmul.f32 %v1356_v59, %v3502_v0  ;;  %v1378_v55 = vmul.f32 %v1356_v59, %v3507_v5  ;;  %v1379_v35 = vmul.f32 %v1356_v59, %v4376_v9  ;;  %v1380_v44 = vmul.f32 %v1356_v59, %v3525_v20 }
 0x346   :  { %v1381_v16 = vmul.f32 %v1356_v59, %v3538_v8  ;;  %v1382_v18 = vmul.f32 %v1356_v59, %v3549_v19  ;;  %v1383_v52 = vmul.f32 %v1356_v59, %v3552_v38  ;;  %v1384_v39 = vmul.f32 %v1356_v59, %v3563_v1 }
 0x347   :  { %v1385_v47 = vmul.f32 %v1356_v59, %v3566_v34  ;;  %v1386_v51 = vmul.f32 %v1356_v59, %v3569_v57  ;;  %v1387_v0 = vmul.f32 %v1356_v59, %v3580_v21  ;;  %v1388_v5 = vmul.f32 %v1356_v59, %v3599_v60 }
 0x348   :  { %v1461_v32 = vadd.f32 %v1444_v50, %v1373_v63  ;;  %v1462_v9 = vadd.f32 %v1444_v50, %v1374_v11  ;;  %v1463_v20 = vadd.f32 %v1444_v50, %v1375_v36  ;;  %v1464_v31 = vadd.f32 %v1444_v50, %v1376_v6  ;;  %v4377_v11 = vld [vmem:[#allocation15_spill] sm:$0xff] }
 0x349   :  { %v1465_v8 = vadd.f32 %v1444_v50, %v1377_v10  ;;  %v1466_v49 = vadd.f32 %v1444_v50, %v1378_v55  ;;  %v1467_v19 = vadd.f32 %v1444_v50, %v1379_v35  ;;  %v1468_v54 = vadd.f32 %v1444_v50, %v1380_v44  ;;  %v4378_v35 = vld [vmem:[#allocation16_spill] sm:$0xff] }
 0x34a   :  { %v1469_v38 = vadd.f32 %v1444_v50, %v1381_v16  ;;  %v1470_v33 = vadd.f32 %v1444_v50, %v1382_v18  ;;  %v1471_v1 = vadd.f32 %v1444_v50, %v1383_v52  ;;  %v1472_v13 = vadd.f32 %v1444_v50, %v1384_v39 }
 0x34b   :  { %v1473_v27 = vadd.f32 %v1444_v50, %v1385_v47  ;;  %v1474_v34 = vadd.f32 %v1444_v50, %v1386_v51  ;;  %v3899_v23 = vadd.f32 %v1444_v50, %v1387_v0  ;;  %v3901_v57 = vadd.f32 %v1444_v50, %v1388_v5  ;;  %v3903_v21 = vpop.permute.xlu0 %1360 }
 0x34c   :  { %vm1525_vm1 = vcmp.ge.f32.partialorder %v1461_v32, 0.0  ;;  %vm1526_vm2 = vcmp.ge.f32.partialorder %v1462_v9, 0.0  ;;  %vm1527_vm3 = vcmp.ge.f32.partialorder %v1463_v20, 0.0  ;;  %vm1528_vm4 = vcmp.ge.f32.partialorder %v1464_v31, 0.0 }
 0x34d   :  { %vm1529_vm5 = vcmp.ge.f32.partialorder %v1465_v8, 0.0  ;;  %vm1530_vm6 = vcmp.ge.f32.partialorder %v1466_v49, 0.0  ;;  %vm1531_vm7 = vcmp.ge.f32.partialorder %v1467_v19, 0.0  ;;  %vm1532_vm8 = vcmp.ge.f32.partialorder %v1468_v54, 0.0 }
 0x34e   :  { %vm1533_vm9 = vcmp.ge.f32.partialorder %v1469_v38, 0.0  ;;  %vm1534_vm10 = vcmp.ge.f32.partialorder %v1470_v33, 0.0  ;;  %vm1535_vm11 = vcmp.ge.f32.partialorder %v1471_v1, 0.0  ;;  %vm1536_vm12 = vcmp.ge.f32.partialorder %v1472_v13, 0.0 }
 0x34f   :  { %vm1537_vm13 = vcmp.ge.f32.partialorder %v1473_v27, 0.0  ;;  %vm1538_vm14 = vcmp.ge.f32.partialorder %v1474_v34, 0.0  ;;  %vm1539_vm15 = vcmp.ge.f32.partialorder %v3899_v23, 0.0  ;;  %vm1540_vm0 = vcmp.ge.f32.partialorder %v3901_v57, 0.0 }
 0x350   :  { %v1589_v60 = vmul.f32 0.2, %v1461_v32  ;;  %v1590_v59 = vmul.f32 0.2, %v1462_v9  ;;  %v1591_v63 = vmul.f32 0.2, %v1463_v20  ;;  %v1389_v36 = vmul.f32 %v3903_v21, %v4377_v11 }
 0x351   :  { %v1592_v6 = vmul.f32 0.2, %v1464_v31  ;;  %v1593_v10 = vmul.f32 0.2, %v1465_v8  ;;  %v1594_v55 = vmul.f32 0.2, %v1466_v49  ;;  %v1390_v44 = vmul.f32 %v3903_v21, %v4378_v35 }
 0x352   :  { %v1595_v16 = vmul.f32 0.2, %v1467_v19  ;;  %v1596_v18 = vmul.f32 0.2, %v1468_v54  ;;  %v1597_v52 = vmul.f32 0.2, %v1469_v38  ;;  %v1653_v39 = vsel %vm1525_vm1, %v1461_v32, %v1589_v60 }
 0x353   :  { %v1598_v50 = vmul.f32 0.2, %v1470_v33  ;;  %v1599_v47 = vmul.f32 0.2, %v1471_v1  ;;  %v1600_v51 = vmul.f32 0.2, %v1472_v13  ;;  %v1654_v0 = vsel %vm1526_vm2, %v1462_v9, %v1590_v59  ;;  %1717 = vst [vmem:[%s4290_s5] sm:$0xff] %v1653_v39 }
 0x354   :  { %v1601_v5 = vmul.f32 0.2, %v1473_v27  ;;  %v1602_v11 = vmul.f32 0.2, %v1474_v34  ;;  %v1603_v12 = vmul.f32 0.2, %v3899_v23  ;;  %v1655_v35 = vsel %vm1527_vm3, %v1463_v20, %v1591_v63 }
 0x355   :  { %1718 = vst [vmem:[%s4290_s5 + $0x8] sm:$0xff] %v1654_v0  ;;  %v1604_v32 = vmul.f32 0.2, %v3901_v57  ;;  %v1656_v60 = vsel %vm1528_vm4, %v1464_v31, %v1592_v6  ;;  %v1657_v9 = vsel %vm1529_vm5, %v1465_v8, %v1593_v10  ;;  %v1658_v59 = vsel %vm1530_vm6, %v1466_v49, %v1594_v55  ;;  %1719 = vst [vmem:[%s4290_s5 + $0x10] sm:$0xff] %v1655_v35  ;;  %v4379_v8 = vld [vmem:[#allocation18_spill] sm:$0xff] }
 0x356   :  { %v1659_v39 = vsel %vm1531_vm7, %v1467_v19, %v1595_v16  ;;  %v1660_v20 = vsel %vm1532_vm8, %v1468_v54, %v1596_v18  ;;  %v1661_v63 = vsel %vm1533_vm9, %v1469_v38, %v1597_v52  ;;  %v1662_v0 = vsel %vm1534_vm10, %v1470_v33, %v1598_v50  ;;  %1720 = vst [vmem:[%s4290_s5 + $0x18] sm:$0xff] %v1656_v60  ;;  %v4380_v38 = vld [vmem:[#allocation19_spill] sm:$0xff] }
 0x357   :  { %1721 = vst [vmem:[%s4290_s5 + $0x20] sm:$0xff] %v1657_v9  ;;  %1722 = vst [vmem:[%s4290_s5 + $0x28] sm:$0xff] %v1658_v59  ;;  %v1663_v49 = vsel %vm1535_vm11, %v1471_v1, %v1599_v47  ;;  %v1664_v54 = vsel %vm1536_vm12, %v1472_v13, %v1600_v51  ;;  %v1665_v31 = vsel %vm1537_vm13, %v1473_v27, %v1601_v5  ;;  %v4025_v5 = vpop.permute.xlu1 %1365 }
 0x358   :  { %v1666_v33 = vsel %vm1538_vm14, %v1474_v34, %v1602_v11  ;;  %1723 = vst [vmem:[%s4290_s5 + $0x30] sm:$0xff] %v1659_v39  ;;  %1724 = vst [vmem:[%s4290_s5 + $0x38] sm:$0xff] %v1660_v20  ;;  %v1667_v13 = vsel %vm1539_vm15, %v3899_v23, %v1603_v12  ;;  %v1668_v27 = vsel %vm1540_vm0, %v3901_v57, %v1604_v32  ;;  %v4381_v32 = vld [vmem:[#allocation20_spill] sm:$0xff]  ;;  %v4382_v20 = vld [vmem:[#allocation21_spill] sm:$0xff] }
 0x359   :  { %1725 = vst [vmem:[%s4290_s5 + $0x40] sm:$0xff] %v1661_v63  ;;  %1726 = vst [vmem:[%s4290_s5 + $0x48] sm:$0xff] %v1662_v0  ;;  %v1391_v12 = vmul.f32 %v3903_v21, %v3531_v53  ;;  %v1392_v23 = vmul.f32 %v3903_v21, %v3544_v2  ;;  %v1393_v19 = vmul.f32 %v3903_v21, %v4379_v8 }
 0x35a   :  { %1727 = vst [vmem:[%s4290_s5 + $0x50] sm:$0xff] %v1663_v49  ;;  %1728 = vst [vmem:[%s4290_s5 + $0x58] sm:$0xff] %v1664_v54  ;;  %v1394_v1 = vmul.f32 %v3903_v21, %v4380_v38  ;;  %v1395_v53 = vmul.f32 %v3903_v21, %v3594_v24  ;;  %v1396_v2 = vmul.f32 %v3903_v21, %v3609_v41 }
 0x35b   :  { %1729 = vst [vmem:[%s4290_s5 + $0x60] sm:$0xff] %v1665_v31  ;;  %1730 = vst [vmem:[%s4290_s5 + $0x68] sm:$0xff] %v1666_v33  ;;  %v1397_v34 = vmul.f32 %v3903_v21, %v3625_v3  ;;  %v1398_v57 = vmul.f32 %v3903_v21, %v3641_v56  ;;  %v1399_v6 = vmul.f32 %v3903_v21, %v3647_v7 }
 0x35c   :  { %1731 = vst [vmem:[%s4290_s5 + $0x70] sm:$0xff] %v1667_v13  ;;  %1732 = vst [vmem:[%s4290_s5 + $0x78] sm:$0xff] %v1668_v27  ;;  %v1400_v10 = vmul.f32 %v3903_v21, %v3657_v58  ;;  %v1401_v55 = vmul.f32 %v3903_v21, %v3663_v62  ;;  %v1402_v24 = vmul.f32 %v3903_v21, %v3689_v4 }
 0x35d   :  { %v1403_v41 = vmul.f32 %v3903_v21, %v3717_v25  ;;  %v1404_v3 = vmul.f32 %v3903_v21, %v3727_v30  ;;  %v1477_v56 = vadd.f32 %v3881_v42, %v1389_v36  ;;  %v1478_v16 = vadd.f32 %v3881_v42, %v1390_v44 }
 0x35e   :  { %v1479_v7 = vadd.f32 %v3881_v42, %v1391_v12  ;;  %v1480_v58 = vadd.f32 %v3881_v42, %v1392_v23  ;;  %v1481_v18 = vadd.f32 %v3881_v42, %v1393_v19  ;;  %v1482_v62 = vadd.f32 %v3881_v42, %v1394_v1 }
 0x35f   :  { %v1483_v4 = vadd.f32 %v3881_v42, %v1395_v53  ;;  %v1484_v52 = vadd.f32 %v3881_v42, %v1396_v2  ;;  %v1485_v25 = vadd.f32 %v3881_v42, %v1397_v34  ;;  %v1486_v30 = vadd.f32 %v3881_v42, %v1398_v57 }
 0x360   :  { %v1487_v21 = vadd.f32 %v3881_v42, %v1399_v6  ;;  %v1488_v36 = vadd.f32 %v3881_v42, %v1400_v10  ;;  %v1489_v44 = vadd.f32 %v3881_v42, %v1401_v55  ;;  %v1490_v50 = vadd.f32 %v3881_v42, %v1402_v24 }
 0x361   :  { %v1491_v47 = vadd.f32 %v3881_v42, %v1403_v41  ;;  %v1492_v51 = vadd.f32 %v3881_v42, %v1404_v3  ;;  %vm1541_vm1 = vcmp.ge.f32.partialorder %v1477_v56, 0.0  ;;  %vm1542_vm2 = vcmp.ge.f32.partialorder %v1478_v16, 0.0 }
 0x362   :  { %vm1543_vm3 = vcmp.ge.f32.partialorder %v1479_v7, 0.0  ;;  %vm1544_vm4 = vcmp.ge.f32.partialorder %v1480_v58, 0.0  ;;  %vm1545_vm5 = vcmp.ge.f32.partialorder %v1481_v18, 0.0  ;;  %vm1546_vm6 = vcmp.ge.f32.partialorder %v1482_v62, 0.0 }
 0x363   :  { %vm1547_vm7 = vcmp.ge.f32.partialorder %v1483_v4, 0.0  ;;  %vm1548_vm8 = vcmp.ge.f32.partialorder %v1484_v52, 0.0  ;;  %vm1549_vm9 = vcmp.ge.f32.partialorder %v1485_v25, 0.0  ;;  %vm1550_vm10 = vcmp.ge.f32.partialorder %v1486_v30, 0.0 }
 0x364   :  { %vm1551_vm11 = vcmp.ge.f32.partialorder %v1487_v21, 0.0  ;;  %vm1552_vm12 = vcmp.ge.f32.partialorder %v1488_v36, 0.0  ;;  %vm1553_vm13 = vcmp.ge.f32.partialorder %v1489_v44, 0.0  ;;  %vm1554_vm14 = vcmp.ge.f32.partialorder %v1490_v50, 0.0 }
 0x365   :  { %vm1555_vm15 = vcmp.ge.f32.partialorder %v1491_v47, 0.0  ;;  %vm1556_vm0 = vcmp.ge.f32.partialorder %v1492_v51, 0.0  ;;  %v1605_v11 = vmul.f32 0.2, %v1477_v56  ;;  %v1606_v42 = vmul.f32 0.2, %v1478_v16 }
 0x366   :  { %v1607_v35 = vmul.f32 0.2, %v1479_v7  ;;  %v1405_v60 = vmul.f32 %v4025_v5, %v4381_v32  ;;  %v1608_v9 = vmul.f32 0.2, %v1480_v58  ;;  %v1609_v59 = vmul.f32 0.2, %v1481_v18 }
 0x367   :  { %v1610_v39 = vmul.f32 0.2, %v1482_v62  ;;  %v1406_v63 = vmul.f32 %v4025_v5, %v4382_v20  ;;  %v1611_v0 = vmul.f32 0.2, %v1483_v4  ;;  %v1612_v49 = vmul.f32 0.2, %v1484_v52 }
 0x368   :  { %v1613_v54 = vmul.f32 0.2, %v1485_v25  ;;  %v1669_v31 = vsel %vm1541_vm1, %v1477_v56, %v1605_v11  ;;  %v1614_v33 = vmul.f32 0.2, %v1486_v30  ;;  %v1615_v13 = vmul.f32 0.2, %v1487_v21 }
 0x369   :  { %v1616_v27 = vmul.f32 0.2, %v1488_v36  ;;  %v1670_v12 = vsel %vm1542_vm2, %v1478_v16, %v1606_v42  ;;  %1733 = vst [vmem:[%s4290_s5 + $0x80] sm:$0xff] %v1669_v31  ;;  %v1617_v23 = vmul.f32 0.2, %v1489_v44  ;;  %v1671_v38 = vsel %vm1543_vm3, %v1479_v7, %v1607_v35  ;;  %v4386_v31 = vld [vmem:[#allocation23_spill] sm:$0xff] }
 0x36a   :  { %v1618_v8 = vmul.f32 0.2, %v1490_v50  ;;  %v1619_v19 = vmul.f32 0.2, %v1491_v47  ;;  %1734 = vst [vmem:[%s4290_s5 + $0x88] sm:$0xff] %v1670_v12  ;;  %v1672_v53 = vsel %vm1544_vm4, %v1480_v58, %v1608_v9  ;;  %v1673_v2 = vsel %vm1545_vm5, %v1481_v18, %v1609_v59  ;;  %1735 = vst [vmem:[%s4290_s5 + $0x90] sm:$0xff] %v1671_v38 }
 0x36b   :  { %v1620_v1 = vmul.f32 0.2, %v1492_v51  ;;  %v1674_v34 = vsel %vm1546_vm6, %v1482_v62, %v1610_v39  ;;  %v1675_v57 = vsel %vm1547_vm7, %v1483_v4, %v1611_v0  ;;  %v1676_v6 = vsel %vm1548_vm8, %v1484_v52, %v1612_v49  ;;  %1736 = vst [vmem:[%s4290_s5 + $0x98] sm:$0xff] %v1672_v53  ;;  %1737 = vst [vmem:[%s4290_s5 + $0xa0] sm:$0xff] %v1673_v2  ;;  %v4383_v62 = vld [vmem:[#allocation22_spill] sm:$0xff] }
 0x36c   :  { %v1677_v10 = vsel %vm1549_vm9, %v1485_v25, %v1613_v54  ;;  %v1678_v55 = vsel %vm1550_vm10, %v1486_v30, %v1614_v33  ;;  %1738 = vst [vmem:[%s4290_s5 + $0xa8] sm:$0xff] %v1674_v34  ;;  %v1679_v24 = vsel %vm1551_vm11, %v1487_v21, %v1615_v13  ;;  %v1680_v41 = vsel %vm1552_vm12, %v1488_v36, %v1616_v27  ;;  %v4384_v25 = vld [vmem:[#allocation7_spill] sm:$0xff] }
 0x36d   :  { %v1681_v3 = vsel %vm1553_vm13, %v1489_v44, %v1617_v23  ;;  %v1682_v56 = vsel %vm1554_vm14, %v1490_v50, %v1618_v8  ;;  %1739 = vst [vmem:[%s4290_s5 + $0xb0] sm:$0xff] %v1675_v57  ;;  %1740 = vst [vmem:[%s4290_s5 + $0xb8] sm:$0xff] %v1676_v6  ;;  %v1683_v16 = vsel %vm1555_vm15, %v1491_v47, %v1619_v19  ;;  %v4385_v36 = vld [vmem:[#allocation3_spill] sm:$0xff]  ;;  %v4387_v23 = vld [vmem:[#allocation24_spill] sm:$0xff] }
 0x36e   :  { %1741 = vst [vmem:[%s4290_s5 + $0xc0] sm:$0xff] %v1677_v10  ;;  %1742 = vst [vmem:[%s4290_s5 + $0xc8] sm:$0xff] %v1678_v55  ;;  %v1684_v7 = vsel %vm1556_vm0, %v1492_v51, %v1620_v1  ;;  %v1407_v58 = vmul.f32 %v4025_v5, %v3617_v43  ;;  %v1408_v18 = vmul.f32 %v4025_v5, %v3637_v17  ;;  %v1454_v51 = vpop.permute.xlu0 %1453 }
 0x36f   :  { %1743 = vst [vmem:[%s4290_s5 + $0xd0] sm:$0xff] %v1679_v24  ;;  %1744 = vst [vmem:[%s4290_s5 + $0xd8] sm:$0xff] %v1680_v41  ;;  %v1409_v4 = vmul.f32 %v4025_v5, %v4383_v62  ;;  %v1410_v52 = vmul.f32 %v4025_v5, %v3667_v48  ;;  %v1411_v43 = vmul.f32 %v4025_v5, %v3675_v37 }
 0x370   :  { %1745 = vst [vmem:[%s4290_s5 + $0xe0] sm:$0xff] %v1681_v3  ;;  %1746 = vst [vmem:[%s4290_s5 + $0xe8] sm:$0xff] %v1682_v56  ;;  %v1412_v17 = vmul.f32 %v4025_v5, %v3697_v29  ;;  %v1413_v30 = vmul.f32 %v4025_v5, %v4384_v25  ;;  %v1414_v21 = vmul.f32 %v4025_v5, %v3723_v46 }
 0x371   :  { %1747 = vst [vmem:[%s4290_s5 + $0xf0] sm:$0xff] %v1683_v16  ;;  %1748 = vst [vmem:[%s4290_s5 + $0xf8] sm:$0xff] %v1684_v7  ;;  %v1415_v44 = vmul.f32 %v4025_v5, %v4385_v36  ;;  %v1416_v50 = vmul.f32 %v4025_v5, %v3753_v22  ;;  %v1417_v48 = vmul.f32 %v4025_v5, %v3767_v45  ;;  %v4388_v36 = vld [vmem:[#allocation2_spill] sm:$0xff] }
 0x372   :  { %v1418_v37 = vmul.f32 %v4025_v5, %v3779_v14  ;;  %v1419_v29 = vmul.f32 %v4025_v5, %v3791_v15  ;;  %v1420_v47 = vmul.f32 %v4025_v5, %v3803_v61  ;;  %v1493_v46 = vadd.f32 %v1454_v51, %v1405_v60  ;;  %v4123_v61 = vpop.permute.xlu1 %1370 }
 0x373   :  { %v1494_v11 = vadd.f32 %v1454_v51, %v1406_v63  ;;  %v1495_v42 = vadd.f32 %v1454_v51, %v1407_v58  ;;  %v1496_v35 = vadd.f32 %v1454_v51, %v1408_v18  ;;  %v1497_v32 = vadd.f32 %v1454_v51, %v1409_v4 }
 0x374   :  { %v1498_v9 = vadd.f32 %v1454_v51, %v1410_v52  ;;  %v1499_v22 = vadd.f32 %v1454_v51, %v1411_v43  ;;  %v1500_v59 = vadd.f32 %v1454_v51, %v1412_v17  ;;  %v1501_v39 = vadd.f32 %v1454_v51, %v1413_v30 }
 0x375   :  { %v1502_v45 = vadd.f32 %v1454_v51, %v1414_v21  ;;  %v1503_v20 = vadd.f32 %v1454_v51, %v1415_v44  ;;  %v1504_v0 = vadd.f32 %v1454_v51, %v1416_v50  ;;  %v1505_v14 = vadd.f32 %v1454_v51, %v1417_v48  ;;  %v4389_v50 = vld [vmem:[#allocation9_spill] sm:$0xff] }
 0x376   :  { %v1506_v49 = vadd.f32 %v1454_v51, %v1418_v37  ;;  %v1507_v54 = vadd.f32 %v1454_v51, %v1419_v29  ;;  %v1508_v15 = vadd.f32 %v1454_v51, %v1420_v47  ;;  %vm1557_vm1 = vcmp.ge.f32.partialorder %v1493_v46, 0.0  ;;  %v4390_v51 = vld [vmem:[#allocation11_spill] sm:$0xff] }
 0x377   :  { %vm1558_vm2 = vcmp.ge.f32.partialorder %v1494_v11, 0.0  ;;  %vm1559_vm3 = vcmp.ge.f32.partialorder %v1495_v42, 0.0  ;;  %vm1560_vm4 = vcmp.ge.f32.partialorder %v1496_v35, 0.0  ;;  %vm1561_vm5 = vcmp.ge.f32.partialorder %v1497_v32, 0.0 }
 0x378   :  { %vm1562_vm6 = vcmp.ge.f32.partialorder %v1498_v9, 0.0  ;;  %vm1563_vm7 = vcmp.ge.f32.partialorder %v1499_v22, 0.0  ;;  %vm1564_vm8 = vcmp.ge.f32.partialorder %v1500_v59, 0.0  ;;  %vm1565_vm9 = vcmp.ge.f32.partialorder %v1501_v39, 0.0 }
 0x379   :  { %vm1566_vm10 = vcmp.ge.f32.partialorder %v1502_v45, 0.0  ;;  %vm1567_vm11 = vcmp.ge.f32.partialorder %v1503_v20, 0.0  ;;  %vm1568_vm12 = vcmp.ge.f32.partialorder %v1504_v0, 0.0  ;;  %vm1569_vm13 = vcmp.ge.f32.partialorder %v1505_v14, 0.0 }
 0x37a   :  { %vm1570_vm14 = vcmp.ge.f32.partialorder %v1506_v49, 0.0  ;;  %vm1571_vm15 = vcmp.ge.f32.partialorder %v1507_v54, 0.0  ;;  %vm1572_vm0 = vcmp.ge.f32.partialorder %v1508_v15, 0.0  ;;  %v1621_v5 = vmul.f32 0.2, %v1493_v46 }
 0x37b   :  { %v1622_v60 = vmul.f32 0.2, %v1494_v11  ;;  %v1623_v63 = vmul.f32 0.2, %v1495_v42  ;;  %v1421_v33 = vmul.f32 %v4123_v61, %v4386_v31  ;;  %v1624_v13 = vmul.f32 0.2, %v1496_v35 }
 0x37c   :  { %v1625_v27 = vmul.f32 0.2, %v1497_v32  ;;  %v1626_v12 = vmul.f32 0.2, %v1498_v9  ;;  %v1422_v8 = vmul.f32 %v4123_v61, %v4387_v23  ;;  %v1627_v19 = vmul.f32 0.2, %v1499_v22 }
 0x37d   :  { %v1628_v38 = vmul.f32 0.2, %v1500_v59  ;;  %v1629_v1 = vmul.f32 0.2, %v1501_v39  ;;  %v1685_v53 = vsel %vm1557_vm1, %v1493_v46, %v1621_v5  ;;  %v1630_v2 = vmul.f32 0.2, %v1502_v45 }
 0x37e   :  { %v1631_v34 = vmul.f32 0.2, %v1503_v20  ;;  %v1632_v57 = vmul.f32 0.2, %v1504_v0  ;;  %v1686_v6 = vsel %vm1558_vm2, %v1494_v11, %v1622_v60  ;;  %1749 = vst [vmem:[%s4290_s5 + $0x100] sm:$0xff] %v1685_v53  ;;  %v1687_v41 = vsel %vm1559_vm3, %v1495_v42, %v1623_v63  ;;  %v1459_v11 = vpop.permute.xlu1 %1458  ;;  %v4391_v42 = vld [vmem:[#allocation4_spill] sm:$0xff] }
 0x37f   :  { %v1633_v10 = vmul.f32 0.2, %v1505_v14  ;;  %v1634_v55 = vmul.f32 0.2, %v1506_v49  ;;  %v1635_v24 = vmul.f32 0.2, %v1507_v54  ;;  %v1688_v56 = vsel %vm1560_vm4, %v1496_v35, %v1624_v13 }
 0x380   :  { %1750 = vst [vmem:[%s4290_s5 + $0x108] sm:$0xff] %v1686_v6  ;;  %v1636_v3 = vmul.f32 0.2, %v1508_v15  ;;  %v1689_v16 = vsel %vm1561_vm5, %v1497_v32, %v1625_v27  ;;  %v1690_v7 = vsel %vm1562_vm6, %v1498_v9, %v1626_v12  ;;  %1751 = vst [vmem:[%s4290_s5 + $0x110] sm:$0xff] %v1687_v41  ;;  %v1691_v58 = vsel %vm1563_vm7, %v1499_v22, %v1627_v19  ;;  %v4392_v32 = vld [vmem:[#allocation13_spill] sm:$0xff] }
 0x381   :  { %v1692_v18 = vsel %vm1564_vm8, %v1500_v59, %v1628_v38  ;;  %v1693_v62 = vsel %vm1565_vm9, %v1501_v39, %v1629_v1  ;;  %v1694_v4 = vsel %vm1566_vm10, %v1502_v45, %v1630_v2  ;;  %1752 = vst [vmem:[%s4290_s5 + $0x118] sm:$0xff] %v1688_v56  ;;  %1753 = vst [vmem:[%s4290_s5 + $0x120] sm:$0xff] %v1689_v16  ;;  %v4393_v22 = vld [vmem:[#allocation5_spill] sm:$0xff] }
 0x382   :  { %1754 = vst [vmem:[%s4290_s5 + $0x128] sm:$0xff] %v1690_v7  ;;  %v1695_v52 = vsel %vm1567_vm11, %v1503_v20, %v1631_v34  ;;  %v1696_v43 = vsel %vm1568_vm12, %v1504_v0, %v1632_v57  ;;  %v1697_v17 = vsel %vm1569_vm13, %v1505_v14, %v1633_v10  ;;  %v1698_v25 = vsel %vm1570_vm14, %v1506_v49, %v1634_v55  ;;  %v4397_v0 = vld [vmem:[#allocation12_spill] sm:$0xff]  ;;  %v4398_v49 = vld [vmem:[#allocation14_spill] sm:$0xff] }
 0x383   :  { %1755 = vst [vmem:[%s4290_s5 + $0x130] sm:$0xff] %v1691_v58  ;;  %1756 = vst [vmem:[%s4290_s5 + $0x138] sm:$0xff] %v1692_v18  ;;  %v1699_v30 = vsel %vm1571_vm15, %v1507_v54, %v1635_v24  ;;  %v1700_v21 = vsel %vm1572_vm0, %v1508_v15, %v1636_v3  ;;  %v1423_v44 = vmul.f32 %v4123_v61, %v4388_v36 }
 0x384   :  { %1757 = vst [vmem:[%s4290_s5 + $0x140] sm:$0xff] %v1693_v62  ;;  %1758 = vst [vmem:[%s4290_s5 + $0x148] sm:$0xff] %v1694_v4  ;;  %v1424_v48 = vmul.f32 %v4123_v61, %v4389_v50  ;;  %v1425_v37 = vmul.f32 %v4123_v61, %v3745_v40  ;;  %v1426_v29 = vmul.f32 %v4123_v61, %v3759_v26  ;;  %v4394_v40 = vld [vmem:[#allocation6_spill] sm:$0xff]  ;;  %v4395_v26 = vld [vmem:[#allocation8_spill] sm:$0xff] }
 0x385   :  { %1759 = vst [vmem:[%s4290_s5 + $0x150] sm:$0xff] %v1695_v52  ;;  %1760 = vst [vmem:[%s4290_s5 + $0x158] sm:$0xff] %v1696_v43  ;;  %v1427_v47 = vmul.f32 %v4123_v61, %v3773_v28  ;;  %v1428_v46 = vmul.f32 %v4123_v61, %v4390_v51  ;;  %v1429_v35 = vmul.f32 %v4123_v61, %v4391_v42  ;;  %v4396_v28 = vld [vmem:[#allocation10_spill] sm:$0xff] }
 0x386   :  { %1761 = vst [vmem:[%s4290_s5 + $0x160] sm:$0xff] %v1697_v17  ;;  %1762 = vst [vmem:[%s4290_s5 + $0x168] sm:$0xff] %v1698_v25  ;;  %v1430_v9 = vmul.f32 %v4123_v61, %v4392_v32  ;;  %v1431_v59 = vmul.f32 %v4123_v61, %v4393_v22  ;;  %v1432_v39 = vmul.f32 %v4123_v61, %v4394_v40 }
 0x387   :  { %1763 = vst [vmem:[%s4290_s5 + $0x170] sm:$0xff] %v1699_v30  ;;  %1764 = vst [vmem:[%s4290_s5 + $0x178] sm:$0xff] %v1700_v21  ;;  %v1433_v45 = vmul.f32 %v4123_v61, %v4395_v26  ;;  %v1434_v20 = vmul.f32 %v4123_v61, %v4396_v28  ;;  %v1435_v14 = vmul.f32 %v4123_v61, %v4397_v0 }
 0x388   :  { %v1436_v54 = vmul.f32 %v4123_v61, %v4398_v49  ;;  %v1509_v15 = vadd.f32 %v1459_v11, %v1421_v33  ;;  %v1510_v5 = vadd.f32 %v1459_v11, %v1422_v8  ;;  %v1511_v60 = vadd.f32 %v1459_v11, %v1423_v44 }
 0x389   :  { %v1512_v63 = vadd.f32 %v1459_v11, %v1424_v48  ;;  %v1513_v31 = vadd.f32 %v1459_v11, %v1425_v37  ;;  %v1514_v13 = vadd.f32 %v1459_v11, %v1426_v29  ;;  %v1515_v27 = vadd.f32 %v1459_v11, %v1427_v47 }
 0x38a   :  { %v1516_v12 = vadd.f32 %v1459_v11, %v1428_v46  ;;  %v1517_v23 = vadd.f32 %v1459_v11, %v1429_v35  ;;  %v1518_v19 = vadd.f32 %v1459_v11, %v1430_v9  ;;  %v1519_v38 = vadd.f32 %v1459_v11, %v1431_v59 }
 0x38b   :  { %v1520_v1 = vadd.f32 %v1459_v11, %v1432_v39  ;;  %v1521_v53 = vadd.f32 %v1459_v11, %v1433_v45  ;;  %v1522_v2 = vadd.f32 %v1459_v11, %v1434_v20  ;;  %v1523_v34 = vadd.f32 %v1459_v11, %v1435_v14 }
 0x38c   :  { %v1524_v57 = vadd.f32 %v1459_v11, %v1436_v54  ;;  %vm1573_vm1 = vcmp.ge.f32.partialorder %v1509_v15, 0.0  ;;  %vm1574_vm2 = vcmp.ge.f32.partialorder %v1510_v5, 0.0  ;;  %vm1575_vm3 = vcmp.ge.f32.partialorder %v1511_v60, 0.0 }
 0x38d   :  { %vm1576_vm4 = vcmp.ge.f32.partialorder %v1512_v63, 0.0  ;;  %vm1577_vm5 = vcmp.ge.f32.partialorder %v1513_v31, 0.0  ;;  %vm1578_vm6 = vcmp.ge.f32.partialorder %v1514_v13, 0.0  ;;  %vm1579_vm7 = vcmp.ge.f32.partialorder %v1515_v27, 0.0 }
 0x38e   :  { %vm1580_vm8 = vcmp.ge.f32.partialorder %v1516_v12, 0.0  ;;  %vm1581_vm9 = vcmp.ge.f32.partialorder %v1517_v23, 0.0  ;;  %vm1582_vm10 = vcmp.ge.f32.partialorder %v1518_v19, 0.0  ;;  %vm1583_vm11 = vcmp.ge.f32.partialorder %v1519_v38, 0.0 }
 0x38f   :  { %vm1584_vm12 = vcmp.ge.f32.partialorder %v1520_v1, 0.0  ;;  %vm1585_vm13 = vcmp.ge.f32.partialorder %v1521_v53, 0.0  ;;  %vm1586_vm14 = vcmp.ge.f32.partialorder %v1522_v2, 0.0  ;;  %vm1587_vm15 = vcmp.ge.f32.partialorder %v1523_v34, 0.0 }
 0x390   :  { %vm1588_vm0 = vcmp.ge.f32.partialorder %v1524_v57, 0.0  ;;  %v1637_v61 = vmul.f32 0.2, %v1509_v15  ;;  %v1638_v33 = vmul.f32 0.2, %v1510_v5 }
 0x391   :  { %v1639_v8 = vmul.f32 0.2, %v1511_v60  ;;  %v1640_v6 = vmul.f32 0.2, %v1512_v63  ;;  %v1641_v10 = vmul.f32 0.2, %v1513_v31 }
 0x392   :  { %v1642_v55 = vmul.f32 0.2, %v1514_v13  ;;  %v1643_v24 = vmul.f32 0.2, %v1515_v27  ;;  %v1644_v41 = vmul.f32 0.2, %v1516_v12  ;;  %v1701_v56 = vsel %vm1573_vm1, %v1509_v15, %v1637_v61 }
 0x393   :  { %v1645_v3 = vmul.f32 0.2, %v1517_v23  ;;  %v1646_v16 = vmul.f32 0.2, %v1518_v19  ;;  %v1647_v7 = vmul.f32 0.2, %v1519_v38  ;;  %v1702_v18 = vsel %vm1574_vm2, %v1510_v5, %v1638_v33 }
 0x394   :  { %v1648_v58 = vmul.f32 0.2, %v1520_v1  ;;  %1765 = vst [vmem:[%s4290_s5 + $0x180] sm:$0xff] %v1701_v56  ;;  %v1649_v62 = vmul.f32 0.2, %v1521_v53  ;;  %v1703_v43 = vsel %vm1575_vm3, %v1511_v60, %v1639_v8  ;;  %1766 = vst [vmem:[%s4290_s5 + $0x188] sm:$0xff] %v1702_v18  ;;  %v1704_v25 = vsel %vm1576_vm4, %v1512_v63, %v1640_v6 }
 0x395   :  { %v1650_v4 = vmul.f32 0.2, %v1522_v2  ;;  %v1651_v52 = vmul.f32 0.2, %v1523_v34  ;;  %v1652_v17 = vmul.f32 0.2, %v1524_v57  ;;  %v1705_v30 = vsel %vm1577_vm5, %v1513_v31, %v1641_v10 }
 0x396   :  { %v1706_v21 = vsel %vm1578_vm6, %v1514_v13, %v1642_v55  ;;  %1767 = vst [vmem:[%s4290_s5 + $0x190] sm:$0xff] %v1703_v43  ;;  %v1707_v36 = vsel %vm1579_vm7, %v1515_v27, %v1643_v24  ;;  %v1708_v44 = vsel %vm1580_vm8, %v1516_v12, %v1644_v41  ;;  %v1709_v50 = vsel %vm1581_vm9, %v1517_v23, %v1645_v3 }
 0x397   :  { %v1710_v48 = vsel %vm1582_vm10, %v1518_v19, %v1646_v16  ;;  %1768 = vst [vmem:[%s4290_s5 + $0x198] sm:$0xff] %v1704_v25  ;;  %1769 = vst [vmem:[%s4290_s5 + $0x1a0] sm:$0xff] %v1705_v30  ;;  %v1711_v37 = vsel %vm1583_vm11, %v1519_v38, %v1647_v7  ;;  %v1712_v29 = vsel %vm1584_vm12, %v1520_v1, %v1648_v58 }
 0x398   :  { %1770 = vst [vmem:[%s4290_s5 + $0x1a8] sm:$0xff] %v1706_v21  ;;  %v1713_v47 = vsel %vm1585_vm13, %v1521_v53, %v1649_v62  ;;  %v1714_v51 = vsel %vm1586_vm14, %v1522_v2, %v1650_v4  ;;  %1771 = vst [vmem:[%s4290_s5 + $0x1b0] sm:$0xff] %v1707_v36  ;;  %v1715_v46 = vsel %vm1587_vm15, %v1523_v34, %v1651_v52 }
 0x399   :  { %1772 = vst [vmem:[%s4290_s5 + $0x1b8] sm:$0xff] %v1708_v44  ;;  %1773 = vst [vmem:[%s4290_s5 + $0x1c0] sm:$0xff] %v1709_v50  ;;  %v1716_v11 = vsel %vm1588_vm0, %v1524_v57, %v1652_v17 }
 0x39a   :  { %1774 = vst [vmem:[%s4290_s5 + $0x1c8] sm:$0xff] %v1710_v48  ;;  %1775 = vst [vmem:[%s4290_s5 + $0x1d0] sm:$0xff] %v1711_v37 }
 0x39b   :  { %1776 = vst [vmem:[%s4290_s5 + $0x1d8] sm:$0xff] %v1712_v29  ;;  %1777 = vst [vmem:[%s4290_s5 + $0x1e0] sm:$0xff] %v1713_v47 }
 0x39c   :  { %1778 = vst [vmem:[%s4290_s5 + $0x1e8] sm:$0xff] %v1714_v51  ;;  %1779 = vst [vmem:[%s4290_s5 + $0x1f0] sm:$0xff] %v1715_v46 }
 0x39d   :  { %1780 = vst [vmem:[%s4290_s5 + $0x1f8] sm:$0xff] %v1716_v11 }

// kernel: discriminator_forward.6
= control target key start
LH: loop header
LB: loop body
LE: loop exit
PB: predicated region body
PF: predicated region fallthrough
CT: control target
= control target key end

     0   :  { %v1433_v7 = vmov 0   ;;  %vm236_vm0 = vcmask 261120   ;;  %s2465_s0 = inlined_call_operand.vmem [shape: f32[288,512], index: 0, kind: input, shape index: {}]   ;;  %s2466_s1 = inlined_call_operand.vmem [shape: f32[64,288], index: 1, kind: input, shape index: {}]   ;;  %s2467_s2 = inlined_call_operand.vmem [shape: f32[64,1], index: 2, kind: input, shape index: {}]   ;;  %s2468_s4 = inlined_call_operand.vmem [shape: f32[64,1], index: 4, kind: input, shape index: {}]   ;;  %s2469_s3 = inlined_call_operand.vmem [shape: f32[64,1], index: 3, kind: input, shape index: {}]   ;;  %s2470_s5 = inlined_call_operand.vmem [shape: f32[64,512], index: 5, kind: output, shape index: {}]  }
   0x1   :  { %v45_v0 = vld [vmem:[%s2465_s0 + $0x8] sm:$0xff]  ;;  %v47_v2 = vld [vmem:[%s2465_s0 + $0x18] sm:$0xff]  ;;  %v44_v5 = vld [vmem:[%s2465_s0] sm:$0xff]  ;;  %1415 = vset.pattern.permute.xlu0 %v1433_v7  ;;  %1416 = vset.pattern.permute.xlu1 %v1433_v7 }
   0x2   :  { %v49_v1 = vld [vmem:[%s2465_s0 + $0x28] sm:$0xff]  ;;  %v51_v4 = vld [vmem:[%s2465_s0 + $0x38] sm:$0xff]  ;;  %v48_v6 = vld [vmem:[%s2465_s0 + $0x20] sm:$0xff] }
   0x3   :  { %v1205_v3 = vpack.c.bf16 %v49_v1, %v45_v0  ;;  %v1277_v8 = vpack.c.bf16 %v51_v4, %v47_v2  ;;  %v1207_v9 = vpack.c.bf16 %v48_v6, %v44_v5  ;;  %v46_v10 = vld [vmem:[%s2465_s0 + $0x10] sm:$0xff]  ;;  %v53_v12 = vld [vmem:[%s2465_s0 + $0x48] sm:$0xff]  ;;  %v55_v15 = vld [vmem:[%s2465_s0 + $0x58] sm:$0xff] }
   0x4   :  { %v50_v11 = vld [vmem:[%s2465_s0 + $0x30] sm:$0xff]  ;;  %v57_v14 = vld [vmem:[%s2465_s0 + $0x68] sm:$0xff]  ;;  %v59_v16 = vld [vmem:[%s2465_s0 + $0x78] sm:$0xff] }
   0x5   :  { %1206 = vmatprep.subr.bf16.mxu0 %v1205_v3  ;;  %v1279_v13 = vpack.c.bf16 %v50_v11, %v46_v10  ;;  %1278 = vmatprep.subr.bf16.mxu1 %v1277_v8  ;;  %v1209_v17 = vpack.c.bf16 %v57_v14, %v53_v12  ;;  %v1281_v18 = vpack.c.bf16 %v59_v16, %v55_v15  ;;  %v52_v19 = vld [vmem:[%s2465_s0 + $0x40] sm:$0xff]  ;;  %v54_v21 = vld [vmem:[%s2465_s0 + $0x50] sm:$0xff]  ;;  %v61_v24 = vld [vmem:[%s2465_s0 + $0x88] sm:$0xff] }
   0x6   :  { %1208 = vmatpush1.bf16.msra.mxu0 %v1207_v9  ;;  %v56_v20 = vld [vmem:[%s2465_s0 + $0x60] sm:$0xff]  ;;  %v58_v23 = vld [vmem:[%s2465_s0 + $0x70] sm:$0xff]  ;;  %v65_v25 = vld [vmem:[%s2465_s0 + $0xa8] sm:$0xff] }
   0x7   :  { %1280 = vmatpush1.bf16.msra.mxu1 %v1279_v13  ;;  %v1211_v22 = vpack.c.bf16 %v56_v20, %v52_v19  ;;  %1210 = vmatprep.subr.bf16.mxu0 %v1209_v17  ;;  %v1283_v26 = vpack.c.bf16 %v58_v23, %v54_v21  ;;  %v1213_v27 = vpack.c.bf16 %v65_v25, %v61_v24  ;;  %v63_v28 = vld [vmem:[%s2465_s0 + $0x98] sm:$0xff]  ;;  %v60_v30 = vld [vmem:[%s2465_s0 + $0x80] sm:$0xff]  ;;  %v62_v33 = vld [vmem:[%s2465_s0 + $0x90] sm:$0xff] }
   0x8   :  { %1282 = vmatprep.subr.bf16.mxu1 %v1281_v18  ;;  %v67_v29 = vld [vmem:[%s2465_s0 + $0xb8] sm:$0xff]  ;;  %v64_v32 = vld [vmem:[%s2465_s0 + $0xa0] sm:$0xff]  ;;  %v66_v34 = vld [vmem:[%s2465_s0 + $0xb0] sm:$0xff] }
   0x9   :  { %v1285_v31 = vpack.c.bf16 %v67_v29, %v63_v28  ;;  %v1215_v35 = vpack.c.bf16 %v64_v32, %v60_v30  ;;  %v69_v36 = vld [vmem:[%s2465_s0 + $0xc8] sm:$0xff]  ;;  %v71_v38 = vld [vmem:[%s2465_s0 + $0xd8] sm:$0xff]  ;;  %v1287_v39 = vpack.c.bf16 %v66_v34, %v62_v33  ;;  %v68_v42 = vld [vmem:[%s2465_s0 + $0xc0] sm:$0xff] }
   0xa   :  { %1212 = vmatpush1.bf16.msra.mxu0 %v1211_v22  ;;  %v73_v37 = vld [vmem:[%s2465_s0 + $0xe8] sm:$0xff]  ;;  %v75_v41 = vld [vmem:[%s2465_s0 + $0xf8] sm:$0xff]  ;;  %v72_v43 = vld [vmem:[%s2465_s0 + $0xe0] sm:$0xff] }
   0xb   :  { %1284 = vmatpush1.bf16.msra.mxu1 %v1283_v26  ;;  %1214 = vmatprep.subr.bf16.mxu0 %v1213_v27  ;;  %v1217_v40 = vpack.c.bf16 %v73_v37, %v69_v36  ;;  %v1289_v44 = vpack.c.bf16 %v75_v41, %v71_v38  ;;  %v70_v45 = vld [vmem:[%s2465_s0 + $0xd0] sm:$0xff]  ;;  %v77_v47 = vld [vmem:[%s2465_s0 + $0x108] sm:$0xff]  ;;  %v79_v49 = vld [vmem:[%s2465_s0 + $0x118] sm:$0xff]  ;;  %v1219_v51 = vpack.c.bf16 %v72_v43, %v68_v42 }
   0xc   :  { %1286 = vmatprep.subr.bf16.mxu1 %v1285_v31  ;;  %v74_v46 = vld [vmem:[%s2465_s0 + $0xf0] sm:$0xff]  ;;  %v81_v48 = vld [vmem:[%s2465_s0 + $0x128] sm:$0xff]  ;;  %v83_v50 = vld [vmem:[%s2465_s0 + $0x138] sm:$0xff] }
   0xd   :  { %v1291_v52 = vpack.c.bf16 %v74_v46, %v70_v45  ;;  %v1221_v53 = vpack.c.bf16 %v81_v48, %v77_v47  ;;  %v76_v54 = vld [vmem:[%s2465_s0 + $0x100] sm:$0xff]  ;;  %v78_v56 = vld [vmem:[%s2465_s0 + $0x110] sm:$0xff]  ;;  %v1293_v57 = vpack.c.bf16 %v83_v50, %v79_v49  ;;  %v85_v59 = vld [vmem:[%s2465_s0 + $0x148] sm:$0xff] }
   0xe   :  { %1216 = vmatpush1.bf16.msra.mxu0 %v1215_v35  ;;  %v80_v55 = vld [vmem:[%s2465_s0 + $0x120] sm:$0xff]  ;;  %v82_v58 = vld [vmem:[%s2465_s0 + $0x130] sm:$0xff]  ;;  %v89_v60 = vld [vmem:[%s2465_s0 + $0x168] sm:$0xff] }
   0xf   :  { %1288 = vmatpush1.bf16.msra.mxu1 %v1287_v39  ;;  %1218 = vmatprep.subr.bf16.mxu0 %v1217_v40  ;;  %v87_v61 = vld [vmem:[%s2465_s0 + $0x158] sm:$0xff]  ;;  %v1223_v63 = vpack.c.bf16 %v80_v55, %v76_v54  ;;  %v1295_v0 = vpack.c.bf16 %v82_v58, %v78_v56  ;;  %v1225_v1 = vpack.c.bf16 %v89_v60, %v85_v59  ;;  %v84_v2 = vld [vmem:[%s2465_s0 + $0x140] sm:$0xff]  ;;  %v86_v4 = vld [vmem:[%s2465_s0 + $0x150] sm:$0xff] }
  0x10   :  { %1290 = vmatprep.subr.bf16.mxu1 %v1289_v44  ;;  %v91_v62 = vld [vmem:[%s2465_s0 + $0x178] sm:$0xff]  ;;  %v88_v3 = vld [vmem:[%s2465_s0 + $0x160] sm:$0xff]  ;;  %v90_v6 = vld [vmem:[%s2465_s0 + $0x170] sm:$0xff] }
  0x11   :  { %v1297_v5 = vpack.c.bf16 %v91_v62, %v87_v61  ;;  %v93_v7 = vld [vmem:[%s2465_s0 + $0x188] sm:$0xff]  ;;  %v95_v9 = vld [vmem:[%s2465_s0 + $0x198] sm:$0xff]  ;;  %v1227_v11 = vpack.c.bf16 %v88_v3, %v84_v2  ;;  %v1299_v12 = vpack.c.bf16 %v90_v6, %v86_v4  ;;  %v92_v14 = vld [vmem:[%s2465_s0 + $0x180] sm:$0xff] }
  0x12   :  { %1220 = vmatpush1.bf16.msra.mxu0 %v1219_v51  ;;  %v97_v8 = vld [vmem:[%s2465_s0 + $0x1a8] sm:$0xff]  ;;  %v99_v10 = vld [vmem:[%s2465_s0 + $0x1b8] sm:$0xff]  ;;  %v96_v15 = vld [vmem:[%s2465_s0 + $0x1a0] sm:$0xff] }
  0x13   :  { %1292 = vmatpush1.bf16.msra.mxu1 %v1291_v52  ;;  %1222 = vmatprep.subr.bf16.mxu0 %v1221_v53  ;;  %v1229_v13 = vpack.c.bf16 %v97_v8, %v93_v7  ;;  %v94_v16 = vld [vmem:[%s2465_s0 + $0x190] sm:$0xff]  ;;  %v1301_v17 = vpack.c.bf16 %v99_v10, %v95_v9  ;;  %v101_v19 = vld [vmem:[%s2465_s0 + $0x1c8] sm:$0xff]  ;;  %v103_v21 = vld [vmem:[%s2465_s0 + $0x1d8] sm:$0xff]  ;;  %v1231_v23 = vpack.c.bf16 %v96_v15, %v92_v14 }
  0x14   :  { %1294 = vmatprep.subr.bf16.mxu1 %v1293_v57  ;;  %v98_v18 = vld [vmem:[%s2465_s0 + $0x1b0] sm:$0xff]  ;;  %v105_v20 = vld [vmem:[%s2465_s0 + $0x1e8] sm:$0xff]  ;;  %v107_v22 = vld [vmem:[%s2465_s0 + $0x1f8] sm:$0xff] }
  0x15   :  { %v1303_v24 = vpack.c.bf16 %v98_v18, %v94_v16  ;;  %v1233_v25 = vpack.c.bf16 %v105_v20, %v101_v19  ;;  %v100_v26 = vld [vmem:[%s2465_s0 + $0x1c0] sm:$0xff]  ;;  %v102_v28 = vld [vmem:[%s2465_s0 + $0x1d0] sm:$0xff]  ;;  %v1305_v29 = vpack.c.bf16 %v107_v22, %v103_v21  ;;  %v109_v31 = vld [vmem:[%s2465_s0 + $0x208] sm:$0xff] }
  0x16   :  { %1224 = vmatpush1.bf16.msra.mxu0 %v1223_v63  ;;  %v104_v27 = vld [vmem:[%s2465_s0 + $0x1e0] sm:$0xff]  ;;  %v106_v30 = vld [vmem:[%s2465_s0 + $0x1f0] sm:$0xff]  ;;  %v113_v32 = vld [vmem:[%s2465_s0 + $0x228] sm:$0xff] }
  0x17   :  { %1296 = vmatpush1.bf16.msra.mxu1 %v1295_v0  ;;  %1226 = vmatprep.subr.bf16.mxu0 %v1225_v1  ;;  %v111_v33 = vld [vmem:[%s2465_s0 + $0x218] sm:$0xff]  ;;  %v1235_v35 = vpack.c.bf16 %v104_v27, %v100_v26  ;;  %v1307_v36 = vpack.c.bf16 %v106_v30, %v102_v28  ;;  %v1237_v37 = vpack.c.bf16 %v113_v32, %v109_v31  ;;  %v108_v38 = vld [vmem:[%s2465_s0 + $0x200] sm:$0xff]  ;;  %v110_v40 = vld [vmem:[%s2465_s0 + $0x210] sm:$0xff] }
  0x18   :  { %1298 = vmatprep.subr.bf16.mxu1 %v1297_v5  ;;  %v115_v34 = vld [vmem:[%s2465_s0 + $0x238] sm:$0xff]  ;;  %v112_v39 = vld [vmem:[%s2465_s0 + $0x220] sm:$0xff]  ;;  %v114_v42 = vld [vmem:[%s2465_s0 + $0x230] sm:$0xff] }
  0x19   :  { %v1309_v41 = vpack.c.bf16 %v115_v34, %v111_v33  ;;  %v117_v43 = vld [vmem:[%s2465_s0 + $0x248] sm:$0xff]  ;;  %v119_v45 = vld [vmem:[%s2465_s0 + $0x258] sm:$0xff]  ;;  %v1239_v47 = vpack.c.bf16 %v112_v39, %v108_v38  ;;  %v1311_v48 = vpack.c.bf16 %v114_v42, %v110_v40  ;;  %v116_v50 = vld [vmem:[%s2465_s0 + $0x240] sm:$0xff] }
  0x1a   :  { %1228 = vmatpush1.bf16.msra.mxu0 %v1227_v11  ;;  %v121_v44 = vld [vmem:[%s2465_s0 + $0x268] sm:$0xff]  ;;  %v123_v46 = vld [vmem:[%s2465_s0 + $0x278] sm:$0xff]  ;;  %v120_v51 = vld [vmem:[%s2465_s0 + $0x260] sm:$0xff] }
  0x1b   :  { %1300 = vmatpush1.bf16.msra.mxu1 %v1299_v12  ;;  %1230 = vmatprep.subr.bf16.mxu0 %v1229_v13  ;;  %v1241_v49 = vpack.c.bf16 %v121_v44, %v117_v43  ;;  %v118_v52 = vld [vmem:[%s2465_s0 + $0x250] sm:$0xff]  ;;  %v1313_v53 = vpack.c.bf16 %v123_v46, %v119_v45  ;;  %v125_v55 = vld [vmem:[%s2465_s0 + $0x288] sm:$0xff]  ;;  %v127_v57 = vld [vmem:[%s2465_s0 + $0x298] sm:$0xff]  ;;  %v1243_v59 = vpack.c.bf16 %v120_v51, %v116_v50 }
  0x1c   :  { %1302 = vmatprep.subr.bf16.mxu1 %v1301_v17  ;;  %v122_v54 = vld [vmem:[%s2465_s0 + $0x270] sm:$0xff]  ;;  %v129_v56 = vld [vmem:[%s2465_s0 + $0x2a8] sm:$0xff]  ;;  %v131_v58 = vld [vmem:[%s2465_s0 + $0x2b8] sm:$0xff] }
  0x1d   :  { %v1315_v60 = vpack.c.bf16 %v122_v54, %v118_v52  ;;  %v1245_v61 = vpack.c.bf16 %v129_v56, %v125_v55  ;;  %v124_v62 = vld [vmem:[%s2465_s0 + $0x280] sm:$0xff]  ;;  %v126_v0 = vld [vmem:[%s2465_s0 + $0x290] sm:$0xff]  ;;  %v1317_v1 = vpack.c.bf16 %v131_v58, %v127_v57  ;;  %v133_v3 = vld [vmem:[%s2465_s0 + $0x2c8] sm:$0xff] }
  0x1e   :  { %1232 = vmatpush1.bf16.msra.mxu0 %v1231_v23  ;;  %v128_v63 = vld [vmem:[%s2465_s0 + $0x2a0] sm:$0xff]  ;;  %v130_v2 = vld [vmem:[%s2465_s0 + $0x2b0] sm:$0xff]  ;;  %v137_v4 = vld [vmem:[%s2465_s0 + $0x2e8] sm:$0xff] }
  0x1f   :  { %1304 = vmatpush1.bf16.msra.mxu1 %v1303_v24  ;;  %1234 = vmatprep.subr.bf16.mxu0 %v1233_v25  ;;  %v135_v5 = vld [vmem:[%s2465_s0 + $0x2d8] sm:$0xff]  ;;  %v1247_v7 = vpack.c.bf16 %v128_v63, %v124_v62  ;;  %v132_v8 = vld [vmem:[%s2465_s0 + $0x2c0] sm:$0xff]  ;;  %v1319_v9 = vpack.c.bf16 %v130_v2, %v126_v0  ;;  %v1249_v10 = vpack.c.bf16 %v137_v4, %v133_v3  ;;  %v134_v12 = vld [vmem:[%s2465_s0 + $0x2d0] sm:$0xff] }
  0x20   :  { %1306 = vmatprep.subr.bf16.mxu1 %v1305_v29  ;;  %v139_v6 = vld [vmem:[%s2465_s0 + $0x2f8] sm:$0xff]  ;;  %v136_v11 = vld [vmem:[%s2465_s0 + $0x2e0] sm:$0xff]  ;;  %v138_v13 = vld [vmem:[%s2465_s0 + $0x2f0] sm:$0xff] }
  0x21   :  { %v1321_v14 = vpack.c.bf16 %v139_v6, %v135_v5  ;;  %v141_v15 = vld [vmem:[%s2465_s0 + $0x308] sm:$0xff]  ;;  %v143_v18 = vld [vmem:[%s2465_s0 + $0x318] sm:$0xff]  ;;  %v1251_v20 = vpack.c.bf16 %v136_v11, %v132_v8  ;;  %v1323_v21 = vpack.c.bf16 %v138_v13, %v134_v12  ;;  %v140_v23 = vld [vmem:[%s2465_s0 + $0x300] sm:$0xff] }
  0x22   :  { %1236 = vmatpush1.bf16.msra.mxu0 %v1235_v35  ;;  %v145_v16 = vld [vmem:[%s2465_s0 + $0x328] sm:$0xff]  ;;  %v147_v19 = vld [vmem:[%s2465_s0 + $0x338] sm:$0xff]  ;;  %v144_v24 = vld [vmem:[%s2465_s0 + $0x320] sm:$0xff] }
  0x23   :  { %1308 = vmatpush1.bf16.msra.mxu1 %v1307_v36  ;;  %1238 = vmatprep.subr.bf16.mxu0 %v1237_v37  ;;  %v21_v17 = vld [vmem:[%s2466_s1 + $0x8] sm:$0xff]  ;;  %v1253_v22 = vpack.c.bf16 %v145_v16, %v141_v15  ;;  %v142_v25 = vld [vmem:[%s2465_s0 + $0x310] sm:$0xff]  ;;  %v1325_v26 = vpack.c.bf16 %v147_v19, %v143_v18  ;;  %v151_v30 = vld [vmem:[%s2465_s0 + $0x358] sm:$0xff]  ;;  %v1255_v32 = vpack.c.bf16 %v144_v24, %v140_v23 }
  0x24   :  { %1310 = vmatprep.subr.bf16.mxu1 %v1309_v41  ;;  %325 = vmatprep.mubr.f32.mxu0 %v21_v17  ;;  %v146_v27 = vld [vmem:[%s2465_s0 + $0x330] sm:$0xff]  ;;  %v149_v28 = vld [vmem:[%s2465_s0 + $0x348] sm:$0xff]  ;;  %v155_v31 = vld [vmem:[%s2465_s0 + $0x378] sm:$0xff] }
  0x25   :  { %551 = vmatprep.mubr.f32.mxu1 %v21_v17  ;;  %v153_v29 = vld [vmem:[%s2465_s0 + $0x368] sm:$0xff]  ;;  %v1327_v33 = vpack.c.bf16 %v146_v27, %v142_v25  ;;  %v148_v35 = vld [vmem:[%s2465_s0 + $0x340] sm:$0xff]  ;;  %v150_v37 = vld [vmem:[%s2465_s0 + $0x350] sm:$0xff]  ;;  %v1329_v38 = vpack.c.bf16 %v155_v31, %v151_v30 }
  0x26   :  { %1240 = vmatpush1.bf16.msra.mxu0 %v1239_v47  ;;  %v1257_v34 = vpack.c.bf16 %v153_v29, %v149_v28  ;;  %v152_v36 = vld [vmem:[%s2465_s0 + $0x360] sm:$0xff]  ;;  %v154_v39 = vld [vmem:[%s2465_s0 + $0x370] sm:$0xff]  ;;  %v157_v40 = vld [vmem:[%s2465_s0 + $0x388] sm:$0xff] }
  0x27   :  { %1312 = vmatpush1.bf16.msra.mxu1 %v1311_v48  ;;  %1242 = vmatprep.subr.bf16.mxu0 %v1241_v49  ;;  %v161_v41 = vld [vmem:[%s2465_s0 + $0x3a8] sm:$0xff]  ;;  %v159_v42 = vld [vmem:[%s2465_s0 + $0x398] sm:$0xff]  ;;  %v1259_v44 = vpack.c.bf16 %v152_v36, %v148_v35  ;;  %v1331_v45 = vpack.c.bf16 %v154_v39, %v150_v37  ;;  %v156_v47 = vld [vmem:[%s2465_s0 + $0x380] sm:$0xff] }
  0x28   :  { %1314 = vmatprep.subr.bf16.mxu1 %v1313_v53  ;;  %v163_v43 = vld [vmem:[%s2465_s0 + $0x3b8] sm:$0xff]  ;;  %v1261_v46 = vpack.c.bf16 %v161_v41, %v157_v40  ;;  %v160_v48 = vld [vmem:[%s2465_s0 + $0x3a0] sm:$0xff]  ;;  %v158_v49 = vld [vmem:[%s2465_s0 + $0x390] sm:$0xff] }
  0x29   :  { %v1333_v50 = vpack.c.bf16 %v163_v43, %v159_v42  ;;  %v162_v51 = vld [vmem:[%s2465_s0 + $0x3b0] sm:$0xff]  ;;  %v165_v52 = vld [vmem:[%s2465_s0 + $0x3c8] sm:$0xff]  ;;  %v167_v54 = vld [vmem:[%s2465_s0 + $0x3d8] sm:$0xff]  ;;  %v1263_v56 = vpack.c.bf16 %v160_v48, %v156_v47 }
  0x2a   :  { %1244 = vmatpush1.bf16.msra.mxu0 %v1243_v59  ;;  %v169_v53 = vld [vmem:[%s2465_s0 + $0x3e8] sm:$0xff]  ;;  %v171_v55 = vld [vmem:[%s2465_s0 + $0x3f8] sm:$0xff]  ;;  %v188_v57 = vld [vmem:[%s2467_s2] sm:$0xff]  ;;  %v1335_v59 = vpack.c.bf16 %v162_v51, %v158_v49  ;;  %v1434_v49 = vmov 0.0  }
  0x2b   :  { %1316 = vmatpush1.bf16.msra.mxu1 %v1315_v60  ;;  %1246 = vmatprep.subr.bf16.mxu0 %v1245_v61  ;;  %v190_v58 = vld [vmem:[%s2467_s2 + $0x10] sm:$0xff]  ;;  %v1265_v60 = vpack.c.bf16 %v169_v53, %v165_v52  ;;  %v164_v61 = vld [vmem:[%s2465_s0 + $0x3c0] sm:$0xff]  ;;  %v1337_v0 = vpack.c.bf16 %v171_v55, %v167_v54  ;;  %v173_v2 = vld [vmem:[%s2465_s0 + $0x408] sm:$0xff] }
  0x2c   :  { %1318 = vmatprep.subr.bf16.mxu1 %v1317_v1  ;;  %v168_v62 = vld [vmem:[%s2465_s0 + $0x3e0] sm:$0xff]  ;;  %v166_v63 = vld [vmem:[%s2465_s0 + $0x3d0] sm:$0xff]  ;;  %v177_v3 = vld [vmem:[%s2465_s0 + $0x428] sm:$0xff]  ;;  %198 = vperm.xlu0 %1415, %v188_v57  }
  0x2d   :  { %v170_v1 = vld [vmem:[%s2465_s0 + $0x3f0] sm:$0xff]  ;;  %v175_v4 = vld [vmem:[%s2465_s0 + $0x418] sm:$0xff]  ;;  %v189_v6 = vld [vmem:[%s2467_s2 + $0x8] sm:$0xff]  ;;  %208 = vperm.xlu1 %1416, %v190_v58  }
  0x2e   :  { %1248 = vmatpush1.bf16.msra.mxu0 %v1247_v7  ;;  %v179_v5 = vld [vmem:[%s2465_s0 + $0x438] sm:$0xff]  ;;  %v1267_v7 = vpack.c.bf16 %v168_v62, %v164_v61  ;;  %v172_v11 = vld [vmem:[%s2465_s0 + $0x400] sm:$0xff]  ;;  %v174_v15 = vld [vmem:[%s2465_s0 + $0x410] sm:$0xff] }
  0x2f   :  { %1320 = vmatpush1.bf16.msra.mxu1 %v1319_v9  ;;  %1250 = vmatprep.subr.bf16.mxu0 %v1249_v10  ;;  %v191_v8 = vld [vmem:[%s2467_s2 + $0x18] sm:$0xff]  ;;  %v1339_v9 = vpack.c.bf16 %v170_v1, %v166_v63  ;;  %v1269_v10 = vpack.c.bf16 %v177_v3, %v173_v2  ;;  %v176_v12 = vld [vmem:[%s2465_s0 + $0x420] sm:$0xff]  ;;  %v178_v16 = vld [vmem:[%s2465_s0 + $0x430] sm:$0xff] }
  0x30   :  { %1322 = vmatprep.subr.bf16.mxu1 %v1321_v14  ;;  %v20_v13 = vld [vmem:[%s2466_s1] sm:$0xff]  ;;  %v1341_v14 = vpack.c.bf16 %v179_v5, %v175_v4  ;;  %203 = vperm.xlu0 %1415, %v189_v6   ;;  %v181_v17 = vld [vmem:[%s2465_s0 + $0x448] sm:$0xff]  ;;  %v1343_v25 = vpack.c.bf16 %v178_v16, %v174_v15  ;;  %v182_v30 = vld [vmem:[%s2465_s0 + $0x450] sm:$0xff] }
  0x31   :  { %v185_v18 = vld [vmem:[%s2465_s0 + $0x468] sm:$0xff]  ;;  %213 = vperm.xlu1 %1416, %v191_v8   ;;  %v192_v19 = vld [vmem:[%s2467_s2 + $0x20] sm:$0xff]  ;;  %v186_v31 = vld [vmem:[%s2465_s0 + $0x470] sm:$0xff] }
  0x32   :  { %1252 = vmatpush1.bf16.msra.mxu0 %v1251_v20  ;;  %v1271_v20 = vpack.c.bf16 %v176_v12, %v172_v11  ;;  %v193_v23 = vld [vmem:[%s2467_s2 + $0x28] sm:$0xff]  ;;  %v24_v24 = vld [vmem:[%s2466_s1 + $0x20] sm:$0xff]  ;;  %v1347_v35 = vpack.c.bf16 %v186_v31, %v182_v30  ;;  %v194_v36 = vld [vmem:[%s2467_s2 + $0x30] sm:$0xff] }
  0x33   :  { %1324 = vmatpush1.bf16.msra.mxu1 %v1323_v21  ;;  %1254 = vmatprep.subr.bf16.mxu0 %v1253_v22  ;;  %v183_v21 = vld [vmem:[%s2465_s0 + $0x458] sm:$0xff]  ;;  %v180_v27 = vld [vmem:[%s2465_s0 + $0x440] sm:$0xff]  ;;  %v26_v37 = vld [vmem:[%s2466_s1 + $0x30] sm:$0xff] }
  0x34   :  { %1326 = vmatprep.subr.bf16.mxu1 %v1325_v26  ;;  %v187_v22 = vld [vmem:[%s2465_s0 + $0x478] sm:$0xff]  ;;  %v1273_v26 = vpack.c.bf16 %v185_v18, %v181_v17  ;;  %v184_v28 = vld [vmem:[%s2465_s0 + $0x460] sm:$0xff]  ;;  %218 = vperm.xlu0 %1415, %v192_v19   ;;  %v30_v39 = vld [vmem:[%s2466_s1 + $0x50] sm:$0xff] }
  0x35   :  { %v1345_v29 = vpack.c.bf16 %v187_v22, %v183_v21  ;;  %223 = vperm.xlu1 %1416, %v193_v23   ;;  %v29_v40 = vld [vmem:[%s2466_s1 + $0x48] sm:$0xff]  ;;  %v32_v42 = vld [vmem:[%s2466_s1 + $0x60] sm:$0xff]  ;;  %v42_v47 = vld [vmem:[%s2466_s1 + $0xb0] sm:$0xff] }
  0x36   :  { %1256 = vmatpush1.bf16.msra.mxu0 %v1255_v32  ;;  %v23_v32 = vld [vmem:[%s2466_s1 + $0x18] sm:$0xff]  ;;  %v33_v41 = vld [vmem:[%s2466_s1 + $0x68] sm:$0xff]  ;;  %v36_v43 = vld [vmem:[%s2466_s1 + $0x80] sm:$0xff] }
  0x37   :  { %1328 = vmatpush1.bf16.msra.mxu1 %v1327_v33  ;;  %1258 = vmatprep.subr.bf16.mxu0 %v1257_v34  ;;  %v27_v33 = vld [vmem:[%s2466_s1 + $0x38] sm:$0xff]  ;;  %v1275_v34 = vpack.c.bf16 %v184_v28, %v180_v27  ;;  %v41_v48 = vld [vmem:[%s2466_s1 + $0xa8] sm:$0xff]  ;;  %v28_v52 = vld [vmem:[%s2466_s1 + $0x40] sm:$0xff] }
  0x38   :  { %1330 = vmatprep.subr.bf16.mxu1 %v1329_v38  ;;  %v195_v38 = vld [vmem:[%s2467_s2 + $0x38] sm:$0xff]  ;;  %228 = vperm.xlu0 %1415, %v194_v36   ;;  %v25_v51 = vld [vmem:[%s2466_s1 + $0x28] sm:$0xff]  ;;  %v34_v54 = vld [vmem:[%s2466_s1 + $0x70] sm:$0xff] }
  0x39   :  { %233 = vperm.xlu1 %1416, %v195_v38   ;;  %v31_v53 = vld [vmem:[%s2466_s1 + $0x58] sm:$0xff]  ;;  %v37_v55 = vld [vmem:[%s2466_s1 + $0x88] sm:$0xff] }
  0x3a   :  { %1260 = vmatpush1.bf16.msra.mxu0 %v1259_v44  ;;  %v35_v44 = vld [vmem:[%s2466_s1 + $0x78] sm:$0xff] }
  0x3b   :  { %1332 = vmatpush1.bf16.msra.mxu1 %v1331_v45  ;;  %1262 = vmatprep.subr.bf16.mxu0 %v1261_v46  ;;  %v39_v45 = vld [vmem:[%s2466_s1 + $0x98] sm:$0xff]  ;;  %v38_v46 = vld [vmem:[%s2466_s1 + $0x90] sm:$0xff] }
  0x3c   :  { %1334 = vmatprep.subr.bf16.mxu1 %v1333_v50  ;;  %v22_v50 = vld [vmem:[%s2466_s1 + $0x10] sm:$0xff]  ;;  %v43_v57 = vld [vmem:[%s2466_s1 + $0xb8] sm:$0xff] }
  0x3e   :  { %1264 = vmatpush1.bf16.msra.mxu0 %v1263_v56  ;;  %v40_v56 = vld [vmem:[%s2466_s1 + $0xa0] sm:$0xff] }
  0x3f   :  { %1336 = vmatpush1.bf16.msra.mxu1 %v1335_v59  ;;  %1266 = vmatprep.subr.bf16.mxu0 %v1265_v60 }
  0x40   :  { %1338 = vmatprep.subr.bf16.mxu1 %v1337_v0 }
  0x42   :  { %1268 = vmatpush1.bf16.msra.mxu0 %v1267_v7 }
  0x43   :  { %1340 = vmatpush1.bf16.msra.mxu1 %v1339_v9  ;;  %1270 = vmatprep.subr.bf16.mxu0 %v1269_v10 }
  0x44   :  { %1342 = vmatprep.subr.bf16.mxu1 %v1341_v14 }
  0x45   :  { %326 = vmatmul.mubr.f32.vlgmr.msra.gmra.mrb[0].mxu0 %v20_v13 }
  0x46   :  { %552 = vmatmul.mubr.f32.vlgmr.msra.gmra.mrb[0].mxu1 %v20_v13  ;;  %1272 = vmatpush1.bf16.msra.mxu0 %v1271_v20 }
  0x47   :  { %331 = vmatprep.mubr.f32.mxu0 %v24_v24  ;;  %557 = vmatprep.mubr.f32.mxu1 %v24_v24 }
  0x48   :  { %1344 = vmatpush1.bf16.msra.mxu1 %v1343_v25  ;;  %1274 = vmatprep.subr.bf16.mxu0 %v1273_v26 }
  0x49   :  { %332 = vmatmul.mubr.f32.gmra.mrb[2].mxu0 %v23_v32  ;;  %1346 = vmatprep.subr.bf16.mxu1 %v1345_v29 }
  0x4a   :  { %558 = vmatmul.mubr.f32.gmra.mrb[2].mxu1 %v23_v32  ;;  %337 = vmatprep.mubr.f32.mxu0 %v27_v33 }
  0x4b   :  { %563 = vmatprep.mubr.f32.mxu1 %v27_v33  ;;  %1276 = vmatpush1.bf16.msra.mxu0 %v1275_v34 }
  0x4c   :  { %1348 = vmatpush1.bf16.msra.mxu1 %v1347_v35 }
  0x4d   :  { %338 = vmatmul.mubr.f32.gmra.mrb[4].mxu0 %v26_v37 }
  0x4e   :  { %564 = vmatmul.mubr.f32.gmra.mrb[4].mxu1 %v26_v37  ;;  %343 = vmatprep.mubr.f32.mxu0 %v30_v39 }
  0x4f   :  { %569 = vmatprep.mubr.f32.mxu1 %v30_v39 }
  0x51   :  { %344 = vmatmul.mubr.f32.gmra.mrb[6].mxu0 %v29_v40 }
  0x52   :  { %570 = vmatmul.mubr.f32.gmra.mrb[6].mxu1 %v29_v40  ;;  %349 = vmatprep.mubr.f32.mxu0 %v33_v41 }
  0x53   :  { %575 = vmatprep.mubr.f32.mxu1 %v33_v41 }
  0x55   :  { %350 = vmatmul.mubr.f32.gmra.mrb[8].mxu0 %v32_v42 }
  0x56   :  { %576 = vmatmul.mubr.f32.gmra.mrb[8].mxu1 %v32_v42  ;;  %355 = vmatprep.mubr.f32.mxu0 %v36_v43 }
  0x57   :  { %581 = vmatprep.mubr.f32.mxu1 %v36_v43 }
  0x59   :  { %356 = vmatmul.mubr.f32.gmra.mrb[10].mxu0 %v35_v44 }
  0x5a   :  { %582 = vmatmul.mubr.f32.gmra.mrb[10].mxu1 %v35_v44  ;;  %361 = vmatprep.mubr.f32.mxu0 %v39_v45 }
  0x5b   :  { %587 = vmatprep.mubr.f32.mxu1 %v39_v45 }
  0x5d   :  { %362 = vmatmul.mubr.f32.gmra.mrb[12].mxu0 %v38_v46 }
  0x5e   :  { %588 = vmatmul.mubr.f32.gmra.mrb[12].mxu1 %v38_v46  ;;  %367 = vmatprep.mubr.f32.mxu0 %v42_v47 }
  0x5f   :  { %593 = vmatprep.mubr.f32.mxu1 %v42_v47 }
  0x61   :  { %368 = vmatmul.mubr.f32.gmra.mrb[14].mxu0 %v41_v48 }
  0x62   :  { %594 = vmatmul.mubr.f32.gmra.mrb[14].mxu1 %v41_v48  ;;  %438 = vmatprep.mubr.f32.mxu0 %v1434_v49 }
  0x63   :  { %664 = vmatprep.mubr.f32.mxu1 %v1434_v49 }
  0x65   :  { %1189 = vmatmul.mubr.msk.f32.vlgmr.msra.gmra.mrb[0].mxu0 %vm236_vm0, %v22_v50 }
  0x66   :  { %1197 = vmatmul.mubr.msk.f32.vlgmr.msra.gmra.mrb[0].mxu1 %vm236_vm0, %v22_v50  ;;  %444 = vmatprep.mubr.f32.mxu0 %v1434_v49 }
  0x67   :  { %670 = vmatprep.mubr.f32.mxu1 %v1434_v49 }
  0x69   :  { %1190 = vmatmul.mubr.msk.f32.gmra.mrb[2].mxu0 %vm236_vm0, %v25_v51 }
  0x6a   :  { %1198 = vmatmul.mubr.msk.f32.gmra.mrb[2].mxu1 %vm236_vm0, %v25_v51  ;;  %450 = vmatprep.mubr.f32.mxu0 %v1434_v49 }
  0x6b   :  { %676 = vmatprep.mubr.f32.mxu1 %v1434_v49 }
  0x6d   :  { %1191 = vmatmul.mubr.msk.f32.gmra.mrb[4].mxu0 %vm236_vm0, %v28_v52 }
  0x6e   :  { %1199 = vmatmul.mubr.msk.f32.gmra.mrb[4].mxu1 %vm236_vm0, %v28_v52  ;;  %456 = vmatprep.mubr.f32.mxu0 %v1434_v49 }
  0x6f   :  { %682 = vmatprep.mubr.f32.mxu1 %v1434_v49 }
  0x71   :  { %1192 = vmatmul.mubr.msk.f32.gmra.mrb[6].mxu0 %vm236_vm0, %v31_v53 }
  0x72   :  { %1200 = vmatmul.mubr.msk.f32.gmra.mrb[6].mxu1 %vm236_vm0, %v31_v53  ;;  %462 = vmatprep.mubr.f32.mxu0 %v1434_v49 }
  0x73   :  { %688 = vmatprep.mubr.f32.mxu1 %v1434_v49 }
  0x75   :  { %1193 = vmatmul.mubr.msk.f32.gmra.mrb[8].mxu0 %vm236_vm0, %v34_v54 }
  0x76   :  { %1201 = vmatmul.mubr.msk.f32.gmra.mrb[8].mxu1 %vm236_vm0, %v34_v54  ;;  %468 = vmatprep.mubr.f32.mxu0 %v1434_v49 }
  0x77   :  { %694 = vmatprep.mubr.f32.mxu1 %v1434_v49 }
  0x79   :  { %1194 = vmatmul.mubr.msk.f32.gmra.mrb[10].mxu0 %vm236_vm0, %v37_v55 }
  0x7a   :  { %1202 = vmatmul.mubr.msk.f32.gmra.mrb[10].mxu1 %vm236_vm0, %v37_v55  ;;  %474 = vmatprep.mubr.f32.mxu0 %v1434_v49 }
  0x7b   :  { %700 = vmatprep.mubr.f32.mxu1 %v1434_v49 }
  0x7d   :  { %1195 = vmatmul.mubr.msk.f32.gmra.mrb[12].mxu0 %vm236_vm0, %v40_v56 }
  0x7e   :  { %1203 = vmatmul.mubr.msk.f32.gmra.mrb[12].mxu1 %vm236_vm0, %v40_v56  ;;  %480 = vmatprep.mubr.f32.mxu0 %v1434_v49 }
  0x7f   :  { %706 = vmatprep.mubr.f32.mxu1 %v1434_v49 }
  0x81   :  { %1196 = vmatmul.mubr.msk.f32.gmra.mrb[14].mxu0 %vm236_vm0, %v43_v57 }
  0x82   :  { %1204 = vmatmul.mubr.msk.f32.gmra.mrb[14].mxu1 %vm236_vm0, %v43_v57 }
  0xab   :  { %v199_v58 = vpop.permute.xlu0 %198 }
  0xac   :  { %v209_v11 = vpop.permute.xlu1 %208 }
  0xaf   :  { %v204_v1 = vpop.permute.xlu0 %203 }
  0xb0   :  { %v214_v26 = vpop.permute.xlu1 %213 }
  0xb3   :  { %v219_v36 = vpop.permute.xlu0 %218 }
  0xb4   :  { %v224_v48 = vpop.permute.xlu1 %223 }
 0x138   :  { %v440_v59 = vpop.f32.mrb[0].mxu0 }
 0x139   :  { %v2009_v60 = vadd.f32 %v440_v59, %v199_v58  ;;  %v666_v61 = vpop.f32.mrb[0].mxu1  ;;  %v442_v62 = vpop.f32.mrb[1].mxu0 }
 0x13a   :  { %v2011_v63 = vadd.f32 %v442_v62, %v199_v58  ;;  %v668_v0 = vpop.f32.mrb[1].mxu1  ;;  %v2013_v2 = vadd.f32 %v666_v61, %v199_v58  ;;  %v229_v61 = vpop.permute.xlu0 %228 }
 0x13b   :  { %v2019_v8 = vadd.f32 %v668_v0, %v199_v58 }
 0x13c   :  { %v713_v3 = vadd.f32 %v2011_v63, %v2009_v60  ;;  %v446_v4 = vpop.f32.mrb[2].mxu0 }
 0x13d   :  { %v2017_v5 = vadd.f32 %v446_v4, %v204_v1  ;;  %v672_v6 = vpop.f32.mrb[2].mxu1  ;;  %v448_v7 = vpop.f32.mrb[3].mxu0 }
 0x13e   :  { %v2021_v9 = vadd.f32 %v448_v7, %v204_v1  ;;  %v674_v10 = vpop.f32.mrb[3].mxu1  ;;  %v714_v12 = vadd.f32 %v2013_v2, %v713_v3  ;;  %v2024_v13 = vadd.f32 %v672_v6, %v204_v1 }
 0x13f   :  { %v2031_v20 = vadd.f32 %v674_v10, %v204_v1 }
 0x140   :  { %v718_v14 = vadd.f32 %v2021_v9, %v2017_v5  ;;  %v452_v15 = vpop.f32.mrb[4].mxu0  ;;  %v715_v16 = vadd.f32 %v2019_v8, %v714_v12 }
 0x141   :  { %v2029_v17 = vadd.f32 %v452_v15, %v209_v11  ;;  %v678_v18 = vpop.f32.mrb[4].mxu1  ;;  %v454_v19 = vpop.f32.mrb[5].mxu0 }
 0x142   :  { %v2033_v21 = vadd.f32 %v454_v19, %v209_v11  ;;  %v680_v22 = vpop.f32.mrb[5].mxu1  ;;  %716 = vadd.xlane.f32.xlu0 %v715_v16  ;;  %v719_v23 = vadd.f32 %v2024_v13, %v718_v14  ;;  %v2036_v24 = vadd.f32 %v678_v18, %v209_v11  ;;  %v234_v15 = vpop.permute.xlu1 %233 }
 0x143   :  { %v2043_v32 = vadd.f32 %v680_v22, %v209_v11 }
 0x144   :  { %v723_v25 = vadd.f32 %v2033_v21, %v2029_v17  ;;  %v458_v27 = vpop.f32.mrb[6].mxu0  ;;  %v720_v28 = vadd.f32 %v2031_v20, %v719_v23 }
 0x145   :  { %v2041_v29 = vadd.f32 %v458_v27, %v214_v26  ;;  %v684_v30 = vpop.f32.mrb[6].mxu1  ;;  %v460_v31 = vpop.f32.mrb[7].mxu0 }
 0x146   :  { %v2045_v33 = vadd.f32 %v460_v31, %v214_v26  ;;  %v686_v34 = vpop.f32.mrb[7].mxu1  ;;  %721 = vadd.xlane.f32.xlu1 %v720_v28  ;;  %v724_v35 = vadd.f32 %v2036_v24, %v723_v25  ;;  %v2048_v37 = vadd.f32 %v684_v30, %v214_v26 }
 0x147   :  { %v2055_v44 = vadd.f32 %v686_v34, %v214_v26 }
 0x148   :  { %v728_v38 = vadd.f32 %v2045_v33, %v2041_v29  ;;  %v464_v39 = vpop.f32.mrb[8].mxu0  ;;  %v725_v40 = vadd.f32 %v2043_v32, %v724_v35 }
 0x149   :  { %v2053_v41 = vadd.f32 %v464_v39, %v219_v36  ;;  %v690_v42 = vpop.f32.mrb[8].mxu1  ;;  %v466_v43 = vpop.f32.mrb[9].mxu0 }
 0x14a   :  { %v2057_v45 = vadd.f32 %v466_v43, %v219_v36  ;;  %v692_v46 = vpop.f32.mrb[9].mxu1  ;;  %726 = vadd.xlane.f32.xlu0 %v725_v40  ;;  %v729_v47 = vadd.f32 %v2048_v37, %v728_v38  ;;  %v2060_v49 = vadd.f32 %v690_v42, %v219_v36 }
 0x14b   :  { %v2067_v56 = vadd.f32 %v692_v46, %v219_v36 }
 0x14c   :  { %v733_v50 = vadd.f32 %v2057_v45, %v2053_v41  ;;  %v470_v51 = vpop.f32.mrb[10].mxu0  ;;  %v730_v52 = vadd.f32 %v2055_v44, %v729_v47 }
 0x14d   :  { %v2065_v53 = vadd.f32 %v470_v51, %v224_v48  ;;  %v696_v54 = vpop.f32.mrb[10].mxu1  ;;  %v472_v55 = vpop.f32.mrb[11].mxu0 }
 0x14e   :  { %v2069_v57 = vadd.f32 %v472_v55, %v224_v48  ;;  %v698_v58 = vpop.f32.mrb[11].mxu1  ;;  %731 = vadd.xlane.f32.xlu0 %v730_v52  ;;  %v734_v59 = vadd.f32 %v2060_v49, %v733_v50  ;;  %v2072_v62 = vadd.f32 %v696_v54, %v224_v48 }
 0x14f   :  { %v2079_v10 = vadd.f32 %v698_v58, %v224_v48 }
 0x150   :  { %v738_v0 = vadd.f32 %v2069_v57, %v2065_v53  ;;  %v476_v1 = vpop.f32.mrb[12].mxu0  ;;  %v735_v3 = vadd.f32 %v2067_v56, %v734_v59 }
 0x151   :  { %v2077_v4 = vadd.f32 %v476_v1, %v229_v61  ;;  %v702_v6 = vpop.f32.mrb[12].mxu1  ;;  %v478_v7 = vpop.f32.mrb[13].mxu0 }
 0x152   :  { %v2081_v11 = vadd.f32 %v478_v7, %v229_v61  ;;  %v704_v12 = vpop.f32.mrb[13].mxu1  ;;  %736 = vadd.xlane.f32.xlu1 %v735_v3  ;;  %v739_v14 = vadd.f32 %v2072_v62, %v738_v0  ;;  %v2084_v16 = vadd.f32 %v702_v6, %v229_v61 }
 0x153   :  { %v2091_v27 = vadd.f32 %v704_v12, %v229_v61 }
 0x154   :  { %v743_v18 = vadd.f32 %v2081_v11, %v2077_v4  ;;  %v482_v19 = vpop.f32.mrb[14].mxu0  ;;  %v740_v22 = vadd.f32 %v2079_v10, %v739_v14 }
 0x155   :  { %v2089_v23 = vadd.f32 %v482_v19, %v234_v15  ;;  %v708_v25 = vpop.f32.mrb[14].mxu1  ;;  %v484_v26 = vpop.f32.mrb[15].mxu0 }
 0x156   :  { %v2093_v28 = vadd.f32 %v484_v26, %v234_v15  ;;  %v710_v30 = vpop.f32.mrb[15].mxu1  ;;  %741 = vadd.xlane.f32.xlu0 %v740_v22  ;;  %v744_v31 = vadd.f32 %v2084_v16, %v743_v18  ;;  %v2096_v34 = vadd.f32 %v708_v25, %v234_v15 }
 0x157   :  { %v2101_v38 = vadd.f32 %v710_v30, %v234_v15 }
 0x158   :  { %v748_v35 = vadd.f32 %v2093_v28, %v2089_v23  ;;  %v745_v36 = vadd.f32 %v2091_v27, %v744_v31 }
 0x15a   :  { %746 = vadd.xlane.f32.xlu1 %v745_v36  ;;  %v749_v39 = vadd.f32 %v2096_v34, %v748_v35 }
 0x15c   :  { %v750_v40 = vadd.f32 %v2101_v38, %v749_v39 }
 0x15e   :  { %751 = vadd.xlane.f32.xlu0 %v750_v40 }
 0x1cf   :  { %v717_v42 = vpop.xlane.xlu0 %716 }
 0x1d0   :  { %v753_v43 = vmul.f32 0.001953125, %v717_v42 }
 0x1d2   :  { %v2106_v46 = vsub.f32 %v2009_v60, %v753_v43  ;;  %v2109_v47 = vsub.f32 %v2011_v63, %v753_v43  ;;  %v2112_v48 = vsub.f32 %v2013_v2, %v753_v43  ;;  %v2115_v51 = vsub.f32 %v2019_v8, %v753_v43 }
 0x1d3   :  { %v722_v50 = vpop.xlane.xlu1 %721 }
 0x1d4   :  { %v754_v52 = vmul.f32 0.001953125, %v722_v50  ;;  %v793_v54 = vmul.f32 %v2106_v46, %v2106_v46  ;;  %v794_v55 = vmul.f32 %v2109_v47, %v2109_v47  ;;  %v795_v60 = vmul.f32 %v2112_v48, %v2112_v48 }
 0x1d5   :  { %v796_v61 = vmul.f32 %v2115_v51, %v2115_v51 }
 0x1d6   :  { %v2124_v63 = vsub.f32 %v2017_v5, %v754_v52  ;;  %v2127_v2 = vsub.f32 %v2021_v9, %v754_v52  ;;  %v825_v58 = vadd.f32 %v794_v55, %v793_v54  ;;  %v2130_v8 = vsub.f32 %v2024_v13, %v754_v52 }
 0x1d7   :  { %v727_v59 = vpop.xlane.xlu0 %726  ;;  %v2135_v0 = vsub.f32 %v2031_v20, %v754_v52 }
 0x1d8   :  { %v755_v1 = vmul.f32 0.001953125, %v727_v59  ;;  %v826_v3 = vadd.f32 %v825_v58, %v795_v60  ;;  %v797_v5 = vmul.f32 %v2124_v63, %v2124_v63  ;;  %v798_v9 = vmul.f32 %v2127_v2, %v2127_v2 }
 0x1d9   :  { %v799_v6 = vmul.f32 %v2130_v8, %v2130_v8  ;;  %v800_v15 = vmul.f32 %v2135_v0, %v2135_v0 }
 0x1da   :  { %v2144_v13 = vsub.f32 %v2029_v17, %v755_v1  ;;  %v2147_v7 = vsub.f32 %v2033_v21, %v755_v1  ;;  %v827_v12 = vadd.f32 %v826_v3, %v796_v61  ;;  %v830_v20 = vadd.f32 %v798_v9, %v797_v5 }
 0x1db   :  { %v732_v14 = vpop.xlane.xlu0 %731  ;;  %v2152_v18 = vsub.f32 %v2036_v24, %v755_v1  ;;  %v2155_v19 = vsub.f32 %v2043_v32, %v755_v1 }
 0x1dc   :  { %v756_v22 = vmul.f32 0.001953125, %v732_v14  ;;  %828 = vadd.xlane.f32.xlu1 %v827_v12  ;;  %v831_v25 = vadd.f32 %v830_v20, %v799_v6  ;;  %v801_v17 = vmul.f32 %v2144_v13, %v2144_v13  ;;  %v802_v21 = vmul.f32 %v2147_v7, %v2147_v7 }
 0x1dd   :  { %v803_v26 = vmul.f32 %v2152_v18, %v2152_v18  ;;  %v804_v36 = vmul.f32 %v2155_v19, %v2155_v19 }
 0x1de   :  { %v2164_v30 = vsub.f32 %v2041_v29, %v756_v22  ;;  %v2167_v24 = vsub.f32 %v2045_v33, %v756_v22  ;;  %v832_v32 = vadd.f32 %v831_v25, %v800_v15  ;;  %v835_v31 = vadd.f32 %v802_v21, %v801_v17 }
 0x1df   :  { %v737_v35 = vpop.xlane.xlu1 %736  ;;  %v2172_v39 = vsub.f32 %v2048_v37, %v756_v22  ;;  %v2175_v40 = vsub.f32 %v2055_v44, %v756_v22 }
 0x1e0   :  { %v757_v42 = vmul.f32 0.001953125, %v737_v35  ;;  %833 = vadd.xlane.f32.xlu0 %v832_v32  ;;  %v836_v43 = vadd.f32 %v835_v31, %v803_v26  ;;  %v805_v29 = vmul.f32 %v2164_v30, %v2164_v30  ;;  %v806_v33 = vmul.f32 %v2167_v24, %v2167_v24 }
 0x1e1   :  { %v807_v50 = vmul.f32 %v2172_v39, %v2172_v39  ;;  %v808_v60 = vmul.f32 %v2175_v40, %v2175_v40 }
 0x1e2   :  { %v2184_v52 = vsub.f32 %v2053_v41, %v757_v42  ;;  %v2187_v37 = vsub.f32 %v2057_v45, %v757_v42  ;;  %v837_v44 = vadd.f32 %v836_v43, %v804_v36  ;;  %v840_v54 = vadd.f32 %v806_v33, %v805_v29 }
 0x1e3   :  { %v742_v55 = vpop.xlane.xlu0 %741  ;;  %v2192_v58 = vsub.f32 %v2060_v49, %v757_v42  ;;  %v2195_v59 = vsub.f32 %v2067_v56, %v757_v42 }
 0x1e4   :  { %v758_v61 = vmul.f32 0.001953125, %v742_v55  ;;  %838 = vadd.xlane.f32.xlu1 %v837_v44  ;;  %v841_v1 = vadd.f32 %v840_v54, %v807_v50  ;;  %v809_v41 = vmul.f32 %v2184_v52, %v2184_v52  ;;  %v810_v45 = vmul.f32 %v2187_v37, %v2187_v37 }
 0x1e5   :  { %v811_v3 = vmul.f32 %v2192_v58, %v2192_v58  ;;  %v812_v12 = vmul.f32 %v2195_v59, %v2195_v59 }
 0x1e6   :  { %v2204_v5 = vsub.f32 %v2065_v53, %v758_v61  ;;  %v2207_v49 = vsub.f32 %v2069_v57, %v758_v61  ;;  %v842_v56 = vadd.f32 %v841_v1, %v808_v60  ;;  %v845_v9 = vadd.f32 %v810_v45, %v809_v41 }
 0x1e7   :  { %v747_v6 = vpop.xlane.xlu1 %746  ;;  %v2212_v20 = vsub.f32 %v2072_v62, %v758_v61  ;;  %v2215_v14 = vsub.f32 %v2079_v10, %v758_v61 }
 0x1e8   :  { %v759_v15 = vmul.f32 0.001953125, %v747_v6  ;;  %843 = vadd.xlane.f32.xlu0 %v842_v56  ;;  %v846_v22 = vadd.f32 %v845_v9, %v811_v3  ;;  %v813_v53 = vmul.f32 %v2204_v5, %v2204_v5  ;;  %v814_v57 = vmul.f32 %v2207_v49, %v2207_v49  ;;  %v980_v3 = vld [vmem:[%s2468_s4 + $0x18] sm:$0xff]  ;;  %v982_v56 = vld [vmem:[%s2468_s4 + $0x28] sm:$0xff]  ;;  %v977_v9 = vld [vmem:[%s2468_s4] sm:$0xff] }
 0x1e9   :  { %v815_v25 = vmul.f32 %v2212_v20, %v2212_v20  ;;  %v816_v32 = vmul.f32 %v2215_v14, %v2215_v14  ;;  %v979_v6 = vld [vmem:[%s2468_s4 + $0x10] sm:$0xff] }
 0x1ea   :  { %v2224_v17 = vsub.f32 %v2077_v4, %v759_v15  ;;  %v2227_v62 = vsub.f32 %v2081_v11, %v759_v15  ;;  %v847_v10 = vadd.f32 %v846_v22, %v812_v12  ;;  %v850_v21 = vadd.f32 %v814_v57, %v813_v53  ;;  %v981_v12 = vld [vmem:[%s2468_s4 + $0x20] sm:$0xff] }
 0x1eb   :  { %v752_v26 = vpop.xlane.xlu0 %751  ;;  %v2232_v31 = vsub.f32 %v2084_v16, %v759_v15  ;;  %v2235_v35 = vsub.f32 %v2091_v27, %v759_v15 }
 0x1ec   :  { %v760_v36 = vmul.f32 0.001953125, %v752_v26  ;;  %848 = vadd.xlane.f32.xlu1 %v847_v10  ;;  %v851_v42 = vadd.f32 %v850_v21, %v815_v25  ;;  %v817_v4 = vmul.f32 %v2224_v17, %v2224_v17  ;;  %v818_v11 = vmul.f32 %v2227_v62, %v2227_v62 }
 0x1ed   :  { %v819_v43 = vmul.f32 %v2232_v31, %v2232_v31  ;;  %v820_v50 = vmul.f32 %v2235_v35, %v2235_v35 }
 0x1ee   :  { %v2244_v29 = vsub.f32 %v2089_v23, %v760_v36  ;;  %v2247_v16 = vsub.f32 %v2093_v28, %v760_v36  ;;  %v852_v27 = vadd.f32 %v851_v42, %v816_v32  ;;  %v855_v33 = vadd.f32 %v818_v11, %v817_v4  ;;  %v873_v4 = vld [vmem:[%s2469_s3] sm:$0xff] }
 0x1ef   :  { %v2252_v44 = vsub.f32 %v2096_v34, %v760_v36  ;;  %v2255_v55 = vsub.f32 %v2101_v38, %v760_v36  ;;  %v978_v38 = vld [vmem:[%s2468_s4 + $0x8] sm:$0xff] }
 0x1f0   :  { %853 = vadd.xlane.f32.xlu0 %v852_v27  ;;  %v856_v54 = vadd.f32 %v855_v33, %v819_v43  ;;  %v821_v23 = vmul.f32 %v2244_v29, %v2244_v29  ;;  %v822_v28 = vmul.f32 %v2247_v16, %v2247_v16 }
 0x1f1   :  { %v823_v61 = vmul.f32 %v2252_v44, %v2252_v44  ;;  %v824_v34 = vmul.f32 %v2255_v55, %v2255_v55 }
 0x1f2   :  { %v857_v60 = vadd.f32 %v856_v54, %v820_v50  ;;  %v860_v1 = vadd.f32 %v822_v28, %v821_v23  ;;  %v874_v54 = vld [vmem:[%s2469_s3 + $0x8] sm:$0xff] }
 0x1f4   :  { %858 = vadd.xlane.f32.xlu1 %v857_v60  ;;  %v861_v41 = vadd.f32 %v860_v1, %v823_v61 }
 0x1f6   :  { %v862_v45 = vadd.f32 %v861_v41, %v824_v34  ;;  %v875_v34 = vld [vmem:[%s2469_s3 + $0x10] sm:$0xff] }
 0x1f8   :  { %863 = vadd.xlane.f32.xlu0 %v862_v45 }
 0x205   :  { %992 = vperm.xlu1 %1416, %v978_v38  }
 0x209   :  { %1002 = vperm.xlu1 %1416, %v980_v3  }
 0x20d   :  { %1012 = vperm.xlu1 %1416, %v982_v56  }
 0x20e   :  { %987 = vperm.xlu0 %1415, %v977_v9   ;;  %v876_v9 = vld [vmem:[%s2469_s3 + $0x18] sm:$0xff] }
 0x212   :  { %997 = vperm.xlu0 %1415, %v979_v6  }
 0x216   :  { %1007 = vperm.xlu0 %1415, %v981_v12  }
 0x269   :  { %v829_v15 = vpop.xlane.xlu1 %828 }
 0x26a   :  { %v865_v22 = vmul.f32 0.001953125, %v829_v15 }
 0x26c   :  { %v881_v53 = vadd.f32 1e-05, %v865_v22 }
 0x26d   :  { %v834_v57 = vpop.xlane.xlu0 %833 }
 0x26e   :  { %1417 = vrsqrt.f32 %v881_v53  ;;  %v866_v25 = vmul.f32 0.001953125, %v834_v57  ;;  %v877_v57 = vld [vmem:[%s2469_s3 + $0x20] sm:$0xff] }
 0x270   :  { %v882_v10 = vadd.f32 1e-05, %v866_v25 }
 0x271   :  { %v839_v21 = vpop.xlane.xlu1 %838 }
 0x272   :  { %1419 = vrsqrt.f32 %v882_v10  ;;  %v867_v26 = vmul.f32 0.001953125, %v839_v21 }
 0x274   :  { %v883_v32 = vadd.f32 1e-05, %v867_v26  ;;  %v878_v26 = vld [vmem:[%s2469_s3 + $0x28] sm:$0xff] }
 0x275   :  { %v844_v36 = vpop.xlane.xlu0 %843 }
 0x276   :  { %1421 = vrsqrt.f32 %v883_v32  ;;  %v868_v42 = vmul.f32 0.001953125, %v844_v36 }
 0x278   :  { %v1418_v11 = vpop.eup %1417  ;;  %v884_v43 = vadd.f32 1e-05, %v868_v42  ;;  %v879_v42 = vld [vmem:[%s2469_s3 + $0x30] sm:$0xff] }
 0x279   :  { %v849_v27 = vpop.xlane.xlu1 %848  ;;  %v897_v33 = vmul.f32 %v1418_v11, %v873_v4 }
 0x27a   :  { %1423 = vrsqrt.f32 %v884_v43  ;;  %v869_v50 = vmul.f32 0.001953125, %v849_v27  ;;  %v880_v43 = vld [vmem:[%s2469_s3 + $0x38] sm:$0xff] }
 0x27b   :  { %907 = vperm.xlu1 %1416, %v897_v33   ;;  %v983_v33 = vld [vmem:[%s2468_s4 + $0x30] sm:$0xff] }
 0x27c   :  { %v1420_v23 = vpop.eup %1419  ;;  %v885_v28 = vadd.f32 1e-05, %v869_v50 }
 0x27d   :  { %v854_v60 = vpop.xlane.xlu0 %853  ;;  %v898_v61 = vmul.f32 %v1420_v23, %v874_v54  ;;  %v984_v54 = vld [vmem:[%s2468_s4 + $0x38] sm:$0xff] }
 0x27e   :  { %1425 = vrsqrt.f32 %v885_v28  ;;  %v870_v1 = vmul.f32 0.001953125, %v854_v60 }
 0x27f   :  { %912 = vperm.xlu0 %1415, %v898_v61  }
 0x280   :  { %v1422_v41 = vpop.eup %1421  ;;  %v886_v45 = vadd.f32 1e-05, %v870_v1 }
 0x281   :  { %v859_v38 = vpop.xlane.xlu1 %858  ;;  %v899_v3 = vmul.f32 %v1422_v41, %v875_v34 }
 0x282   :  { %1427 = vrsqrt.f32 %v886_v45  ;;  %v871_v56 = vmul.f32 0.001953125, %v859_v38 }
 0x283   :  { %917 = vperm.xlu1 %1416, %v899_v3  }
 0x284   :  { %v1424_v6 = vpop.eup %1423  ;;  %v887_v12 = vadd.f32 1e-05, %v871_v56 }
 0x285   :  { %v864_v15 = vpop.xlane.xlu0 %863  ;;  %v900_v22 = vmul.f32 %v1424_v6, %v876_v9  ;;  %v993_v23 = vpop.permute.xlu1 %992 }
 0x286   :  { %1429 = vrsqrt.f32 %v887_v12  ;;  %v872_v53 = vmul.f32 0.001953125, %v864_v15 }
 0x287   :  { %922 = vperm.xlu1 %1416, %v900_v22  }
 0x288   :  { %v1426_v25 = vpop.eup %1425  ;;  %v888_v10 = vadd.f32 1e-05, %v872_v53 }
 0x289   :  { %v901_v21 = vmul.f32 %v1426_v25, %v877_v57  ;;  %v2313_v60 = vpop.permute.xlu1 %1002 }
 0x28a   :  { %1431 = vrsqrt.f32 %v888_v10 }
 0x28b   :  { %927 = vperm.xlu0 %1415, %v901_v21  }
 0x28c   :  { %v1428_v32 = vpop.eup %1427 }
 0x28d   :  { %v902_v36 = vmul.f32 %v1428_v32, %v878_v26  ;;  %v988_v28 = vpop.permute.xlu0 %987  ;;  %v2317_v1 = vpop.permute.xlu1 %1012 }
 0x28f   :  { %932 = vperm.xlu1 %1416, %v902_v36  }
 0x290   :  { %v1430_v4 = vpop.eup %1429 }
 0x291   :  { %v903_v11 = vmul.f32 %v1430_v4, %v879_v42  ;;  %v2315_v61 = vpop.permute.xlu0 %997 }
 0x293   :  { %937 = vperm.xlu0 %1415, %v903_v11  }
 0x294   :  { %v1432_v27 = vpop.eup %1431 }
 0x295   :  { %v904_v50 = vmul.f32 %v1432_v27, %v880_v43  ;;  %v2319_v34 = vpop.permute.xlu0 %1007 }
 0x297   :  { %1017 = vperm.xlu0 %1415, %v983_v33   ;;  %942 = vperm.xlu1 %1416, %v904_v50  }
 0x29b   :  { %1022 = vperm.xlu1 %1416, %v984_v54  }
 0x2fa   :  { %v908_v41 = vpop.permute.xlu1 %907 }
 0x2fb   :  { %v945_v45 = vmul.f32 %v908_v41, %v2106_v46  ;;  %v946_v38 = vmul.f32 %v908_v41, %v2109_v47  ;;  %v947_v3 = vmul.f32 %v908_v41, %v2112_v48  ;;  %v948_v56 = vmul.f32 %v908_v41, %v2115_v51 }
 0x2fd   :  { %v1025_v9 = vadd.f32 %v988_v28, %v945_v45  ;;  %v1026_v6 = vadd.f32 %v988_v28, %v946_v38  ;;  %v1027_v12 = vadd.f32 %v988_v28, %v947_v3  ;;  %v1028_v15 = vadd.f32 %v988_v28, %v948_v56 }
 0x2fe   :  { %v913_v22 = vpop.permute.xlu0 %912 }
 0x2ff   :  { %vm1057_vm1 = vcmp.ge.f32.partialorder %v1025_v9, 0.0  ;;  %vm1058_vm2 = vcmp.ge.f32.partialorder %v1026_v6, 0.0  ;;  %vm1059_vm3 = vcmp.ge.f32.partialorder %v1027_v12, 0.0  ;;  %vm1060_vm4 = vcmp.ge.f32.partialorder %v1028_v15, 0.0 }
 0x300   :  { %v1089_v53 = vmul.f32 0.2, %v1025_v9  ;;  %v1090_v57 = vmul.f32 0.2, %v1026_v6  ;;  %v1091_v25 = vmul.f32 0.2, %v1027_v12  ;;  %v949_v46 = vmul.f32 %v913_v22, %v2124_v63 }
 0x301   :  { %v1092_v10 = vmul.f32 0.2, %v1028_v15  ;;  %v950_v47 = vmul.f32 %v913_v22, %v2127_v2  ;;  %v951_v48 = vmul.f32 %v913_v22, %v2130_v8  ;;  %v952_v51 = vmul.f32 %v913_v22, %v2135_v0 }
 0x302   :  { %v1121_v21 = vsel %vm1057_vm1, %v1025_v9, %v1089_v53  ;;  %v1122_v26 = vsel %vm1058_vm2, %v1026_v6, %v1090_v57  ;;  %v1123_v32 = vsel %vm1059_vm3, %v1027_v12, %v1091_v25  ;;  %v1029_v36 = vadd.f32 %v993_v23, %v949_v46  ;;  %v918_v42 = vpop.permute.xlu1 %917 }
 0x303   :  { %v1124_v4 = vsel %vm1060_vm4, %v1028_v15, %v1092_v10  ;;  %1153 = vst [vmem:[%s2470_s5] sm:$0xff] %v1121_v21  ;;  %1154 = vst [vmem:[%s2470_s5 + $0x8] sm:$0xff] %v1122_v26  ;;  %v1030_v63 = vadd.f32 %v993_v23, %v950_v47  ;;  %v1031_v2 = vadd.f32 %v993_v23, %v951_v48 }
 0x304   :  { %1155 = vst [vmem:[%s2470_s5 + $0x10] sm:$0xff] %v1123_v32  ;;  %v1032_v8 = vadd.f32 %v993_v23, %v952_v51  ;;  %1156 = vst [vmem:[%s2470_s5 + $0x18] sm:$0xff] %v1124_v4  ;;  %vm1061_vm5 = vcmp.ge.f32.partialorder %v1029_v36, 0.0  ;;  %v1093_v0 = vmul.f32 0.2, %v1029_v36  ;;  %v953_v11 = vmul.f32 %v918_v42, %v2144_v13 }
 0x305   :  { %v954_v43 = vmul.f32 %v918_v42, %v2147_v7  ;;  %vm1062_vm6 = vcmp.ge.f32.partialorder %v1030_v63, 0.0  ;;  %vm1063_vm7 = vcmp.ge.f32.partialorder %v1031_v2, 0.0  ;;  %v1094_v27 = vmul.f32 0.2, %v1030_v63 }
 0x306   :  { %vm1064_vm8 = vcmp.ge.f32.partialorder %v1032_v8, 0.0  ;;  %v1095_v33 = vmul.f32 0.2, %v1031_v2  ;;  %v1096_v50 = vmul.f32 0.2, %v1032_v8  ;;  %v1125_v54 = vsel %vm1061_vm5, %v1029_v36, %v1093_v0  ;;  %v923_v23 = vpop.permute.xlu1 %922 }
 0x307   :  { %v955_v28 = vmul.f32 %v918_v42, %v2152_v18  ;;  %v1126_v41 = vsel %vm1062_vm6, %v1030_v63, %v1094_v27  ;;  %1157 = vst [vmem:[%s2470_s5 + $0x20] sm:$0xff] %v1125_v54  ;;  %v956_v45 = vmul.f32 %v918_v42, %v2155_v19  ;;  %v1033_v13 = vadd.f32 %v2315_v61, %v953_v11 }
 0x308   :  { %v1034_v7 = vadd.f32 %v2315_v61, %v954_v43  ;;  %v1127_v38 = vsel %vm1063_vm7, %v1031_v2, %v1095_v33  ;;  %v1128_v3 = vsel %vm1064_vm8, %v1032_v8, %v1096_v50  ;;  %1158 = vst [vmem:[%s2470_s5 + $0x28] sm:$0xff] %v1126_v41  ;;  %v957_v56 = vmul.f32 %v923_v23, %v2164_v30 }
 0x309   :  { %v1035_v18 = vadd.f32 %v2315_v61, %v955_v28  ;;  %1159 = vst [vmem:[%s2470_s5 + $0x30] sm:$0xff] %v1127_v38  ;;  %1160 = vst [vmem:[%s2470_s5 + $0x38] sm:$0xff] %v1128_v3  ;;  %v1036_v19 = vadd.f32 %v2315_v61, %v956_v45  ;;  %vm1065_vm9 = vcmp.ge.f32.partialorder %v1033_v13, 0.0  ;;  %v1097_v9 = vmul.f32 0.2, %v1033_v13 }
 0x30a   :  { %vm1066_vm10 = vcmp.ge.f32.partialorder %v1034_v7, 0.0  ;;  %v1098_v6 = vmul.f32 0.2, %v1034_v7  ;;  %v958_v15 = vmul.f32 %v923_v23, %v2167_v24  ;;  %v928_v22 = vpop.permute.xlu0 %927  ;;  %v959_v57 = vmul.f32 %v923_v23, %v2172_v39 }
 0x30b   :  { %vm1067_vm11 = vcmp.ge.f32.partialorder %v1035_v18, 0.0  ;;  %v1099_v12 = vmul.f32 0.2, %v1035_v18  ;;  %vm1068_vm12 = vcmp.ge.f32.partialorder %v1036_v19, 0.0  ;;  %v1100_v30 = vmul.f32 0.2, %v1036_v19 }
 0x30c   :  { %v1129_v53 = vsel %vm1065_vm9, %v1033_v13, %v1097_v9  ;;  %v1130_v25 = vsel %vm1066_vm10, %v1034_v7, %v1098_v6  ;;  %v960_v61 = vmul.f32 %v923_v23, %v2175_v40  ;;  %v1037_v10 = vadd.f32 %v2313_v60, %v957_v56 }
 0x30d   :  { %v1131_v46 = vsel %vm1067_vm11, %v1035_v18, %v1099_v12  ;;  %1161 = vst [vmem:[%s2470_s5 + $0x40] sm:$0xff] %v1129_v53  ;;  %v1132_v47 = vsel %vm1068_vm12, %v1036_v19, %v1100_v30  ;;  %1162 = vst [vmem:[%s2470_s5 + $0x48] sm:$0xff] %v1130_v25  ;;  %v1038_v24 = vadd.f32 %v2313_v60, %v958_v15 }
 0x30e   :  { %1163 = vst [vmem:[%s2470_s5 + $0x50] sm:$0xff] %v1131_v46  ;;  %v1039_v39 = vadd.f32 %v2313_v60, %v959_v57  ;;  %v961_v48 = vmul.f32 %v928_v22, %v2184_v52  ;;  %1164 = vst [vmem:[%s2470_s5 + $0x58] sm:$0xff] %v1132_v47  ;;  %v1040_v40 = vadd.f32 %v2313_v60, %v960_v61  ;;  %vm1069_vm13 = vcmp.ge.f32.partialorder %v1037_v10, 0.0  ;;  %v933_v36 = vpop.permute.xlu1 %932 }
 0x30f   :  { %v1101_v51 = vmul.f32 0.2, %v1037_v10  ;;  %v962_v21 = vmul.f32 %v928_v22, %v2187_v37  ;;  %vm1070_vm14 = vcmp.ge.f32.partialorder %v1038_v24, 0.0  ;;  %v1102_v26 = vmul.f32 0.2, %v1038_v24 }
 0x310   :  { %vm1071_vm15 = vcmp.ge.f32.partialorder %v1039_v39, 0.0  ;;  %v1103_v32 = vmul.f32 0.2, %v1039_v39  ;;  %vm1072_vm0 = vcmp.ge.f32.partialorder %v1040_v40, 0.0  ;;  %v1104_v42 = vmul.f32 0.2, %v1040_v40 }
 0x311   :  { %v1133_v4 = vsel %vm1069_vm13, %v1037_v10, %v1101_v51  ;;  %v963_v52 = vmul.f32 %v928_v22, %v2192_v58  ;;  %v1134_v63 = vsel %vm1070_vm14, %v1038_v24, %v1102_v26  ;;  %v964_v60 = vmul.f32 %v928_v22, %v2195_v59 }
 0x312   :  { %v1135_v2 = vsel %vm1071_vm15, %v1039_v39, %v1103_v32  ;;  %1165 = vst [vmem:[%s2470_s5 + $0x60] sm:$0xff] %v1133_v4  ;;  %v1041_v37 = vadd.f32 %v2319_v34, %v961_v48  ;;  %v1136_v8 = vsel %vm1072_vm0, %v1040_v40, %v1104_v42  ;;  %1166 = vst [vmem:[%s2470_s5 + $0x68] sm:$0xff] %v1134_v63  ;;  %v938_v43 = vpop.permute.xlu0 %937 }
 0x313   :  { %1167 = vst [vmem:[%s2470_s5 + $0x70] sm:$0xff] %v1135_v2  ;;  %v1042_v58 = vadd.f32 %v2319_v34, %v962_v21  ;;  %v1043_v0 = vadd.f32 %v2319_v34, %v963_v52  ;;  %v965_v11 = vmul.f32 %v933_v36, %v2204_v5  ;;  %1168 = vst [vmem:[%s2470_s5 + $0x78] sm:$0xff] %v1136_v8 }
 0x314   :  { %v1044_v59 = vadd.f32 %v2319_v34, %v964_v60  ;;  %vm1073_vm1 = vcmp.ge.f32.partialorder %v1041_v37, 0.0  ;;  %v1105_v27 = vmul.f32 0.2, %v1041_v37  ;;  %v966_v33 = vmul.f32 %v933_v36, %v2207_v49 }
 0x315   :  { %vm1074_vm2 = vcmp.ge.f32.partialorder %v1042_v58, 0.0  ;;  %vm1075_vm3 = vcmp.ge.f32.partialorder %v1043_v0, 0.0  ;;  %v1106_v50 = vmul.f32 0.2, %v1042_v58  ;;  %v1107_v54 = vmul.f32 0.2, %v1043_v0 }
 0x316   :  { %vm1076_vm4 = vcmp.ge.f32.partialorder %v1044_v59, 0.0  ;;  %v1108_v28 = vmul.f32 0.2, %v1044_v59  ;;  %v1137_v23 = vsel %vm1073_vm1, %v1041_v37, %v1105_v27  ;;  %v967_v5 = vmul.f32 %v933_v36, %v2212_v20  ;;  %v943_v38 = vpop.permute.xlu1 %942  ;;  %v1018_v19 = vpop.permute.xlu0 %1017 }
 0x317   :  { %v1138_v41 = vsel %vm1074_vm2, %v1042_v58, %v1106_v50  ;;  %v1139_v45 = vsel %vm1075_vm3, %v1043_v0, %v1107_v54  ;;  %1169 = vst [vmem:[%s2470_s5 + $0x80] sm:$0xff] %v1137_v23  ;;  %v968_v34 = vmul.f32 %v933_v36, %v2215_v14  ;;  %v1045_v13 = vadd.f32 %v2317_v1, %v965_v11 }
 0x318   :  { %v1140_v49 = vsel %vm1076_vm4, %v1044_v59, %v1108_v28  ;;  %1170 = vst [vmem:[%s2470_s5 + $0x88] sm:$0xff] %v1138_v41  ;;  %1171 = vst [vmem:[%s2470_s5 + $0x90] sm:$0xff] %v1139_v45  ;;  %v1046_v20 = vadd.f32 %v2317_v1, %v966_v33  ;;  %v1047_v7 = vadd.f32 %v2317_v1, %v967_v5 }
 0x319   :  { %v969_v3 = vmul.f32 %v938_v43, %v2224_v17  ;;  %1172 = vst [vmem:[%s2470_s5 + $0x98] sm:$0xff] %v1140_v49  ;;  %v1048_v14 = vadd.f32 %v2317_v1, %v968_v34  ;;  %vm1077_vm5 = vcmp.ge.f32.partialorder %v1045_v13, 0.0  ;;  %v1109_v18 = vmul.f32 0.2, %v1045_v13 }
 0x31a   :  { %v970_v56 = vmul.f32 %v938_v43, %v2227_v62  ;;  %vm1078_vm6 = vcmp.ge.f32.partialorder %v1046_v20, 0.0  ;;  %vm1079_vm7 = vcmp.ge.f32.partialorder %v1047_v7, 0.0  ;;  %v1110_v9 = vmul.f32 0.2, %v1046_v20  ;;  %v1023_v10 = vpop.permute.xlu1 %1022 }
 0x31b   :  { %v1111_v6 = vmul.f32 0.2, %v1047_v7  ;;  %vm1080_vm8 = vcmp.ge.f32.partialorder %v1048_v14, 0.0  ;;  %v1112_v12 = vmul.f32 0.2, %v1048_v14  ;;  %v1141_v15 = vsel %vm1077_vm5, %v1045_v13, %v1109_v18 }
 0x31c   :  { %v971_v17 = vmul.f32 %v938_v43, %v2232_v31  ;;  %v1142_v22 = vsel %vm1078_vm6, %v1046_v20, %v1110_v9  ;;  %1173 = vst [vmem:[%s2470_s5 + $0xa0] sm:$0xff] %v1141_v15  ;;  %v972_v1 = vmul.f32 %v938_v43, %v2235_v35  ;;  %v1049_v53 = vadd.f32 %v1018_v19, %v969_v3 }
 0x31d   :  { %v1143_v30 = vsel %vm1079_vm7, %v1047_v7, %v1111_v6  ;;  %v1144_v62 = vsel %vm1080_vm8, %v1048_v14, %v1112_v12  ;;  %1174 = vst [vmem:[%s2470_s5 + $0xa8] sm:$0xff] %v1142_v22  ;;  %v1050_v57 = vadd.f32 %v1018_v19, %v970_v56  ;;  %v973_v25 = vmul.f32 %v943_v38, %v2244_v29 }
 0x31e   :  { %1175 = vst [vmem:[%s2470_s5 + $0xb0] sm:$0xff] %v1143_v30  ;;  %v1051_v31 = vadd.f32 %v1018_v19, %v971_v17  ;;  %1176 = vst [vmem:[%s2470_s5 + $0xb8] sm:$0xff] %v1144_v62  ;;  %v1052_v46 = vadd.f32 %v1018_v19, %v972_v1  ;;  %vm1081_vm9 = vcmp.ge.f32.partialorder %v1049_v53, 0.0  ;;  %v1113_v35 = vmul.f32 0.2, %v1049_v53 }
 0x31f   :  { %v974_v61 = vmul.f32 %v943_v38, %v2247_v16  ;;  %vm1082_vm10 = vcmp.ge.f32.partialorder %v1050_v57, 0.0  ;;  %v1114_v47 = vmul.f32 0.2, %v1050_v57  ;;  %v975_v40 = vmul.f32 %v943_v38, %v2252_v44 }
 0x320   :  { %vm1083_vm11 = vcmp.ge.f32.partialorder %v1051_v31, 0.0  ;;  %v1115_v24 = vmul.f32 0.2, %v1051_v31  ;;  %vm1084_vm12 = vcmp.ge.f32.partialorder %v1052_v46, 0.0  ;;  %v1116_v39 = vmul.f32 0.2, %v1052_v46 }
 0x321   :  { %v1145_v48 = vsel %vm1081_vm9, %v1049_v53, %v1113_v35  ;;  %v1146_v29 = vsel %vm1082_vm10, %v1050_v57, %v1114_v47  ;;  %v976_v21 = vmul.f32 %v943_v38, %v2255_v55  ;;  %v1053_v26 = vadd.f32 %v1023_v10, %v973_v25 }
 0x322   :  { %v1147_v51 = vsel %vm1083_vm11, %v1051_v31, %v1115_v24  ;;  %1177 = vst [vmem:[%s2470_s5 + $0xc0] sm:$0xff] %v1145_v48  ;;  %v1148_v16 = vsel %vm1084_vm12, %v1052_v46, %v1116_v39  ;;  %1178 = vst [vmem:[%s2470_s5 + $0xc8] sm:$0xff] %v1146_v29  ;;  %v1054_v32 = vadd.f32 %v1023_v10, %v974_v61 }
 0x323   :  { %1179 = vst [vmem:[%s2470_s5 + $0xd0] sm:$0xff] %v1147_v51  ;;  %v1055_v44 = vadd.f32 %v1023_v10, %v975_v40  ;;  %1180 = vst [vmem:[%s2470_s5 + $0xd8] sm:$0xff] %v1148_v16  ;;  %v1056_v36 = vadd.f32 %v1023_v10, %v976_v21  ;;  %vm1085_vm13 = vcmp.ge.f32.partialorder %v1053_v26, 0.0  ;;  %v1117_v42 = vmul.f32 0.2, %v1053_v26 }
 0x324   :  { %vm1086_vm14 = vcmp.ge.f32.partialorder %v1054_v32, 0.0  ;;  %v1118_v55 = vmul.f32 0.2, %v1054_v32 }
 0x325   :  { %vm1087_vm15 = vcmp.ge.f32.partialorder %v1055_v44, 0.0  ;;  %v1119_v4 = vmul.f32 0.2, %v1055_v44  ;;  %vm1088_vm0 = vcmp.ge.f32.partialorder %v1056_v36, 0.0  ;;  %v1120_v52 = vmul.f32 0.2, %v1056_v36 }
 0x326   :  { %v1149_v63 = vsel %vm1085_vm13, %v1053_v26, %v1117_v42  ;;  %v1150_v2 = vsel %vm1086_vm14, %v1054_v32, %v1118_v55 }
 0x327   :  { %v1151_v60 = vsel %vm1087_vm15, %v1055_v44, %v1119_v4  ;;  %1181 = vst [vmem:[%s2470_s5 + $0xe0] sm:$0xff] %v1149_v63  ;;  %v1152_v37 = vsel %vm1088_vm0, %v1056_v36, %v1120_v52  ;;  %1182 = vst [vmem:[%s2470_s5 + $0xe8] sm:$0xff] %v1150_v2 }
 0x328   :  { %1183 = vst [vmem:[%s2470_s5 + $0xf0] sm:$0xff] %v1151_v60  ;;  %1184 = vst [vmem:[%s2470_s5 + $0xf8] sm:$0xff] %v1152_v37 }

// kernel: discriminator_forward.7
= control target key start
LH: loop header
LB: loop body
LE: loop exit
PB: predicated region body
PF: predicated region fallthrough
CT: control target
= control target key end

     0   :  { %v1926_v3 = vmov 0   ;;  %vm279_vm0 = vcmask 523264   ;;  %s2860_s0 = inlined_call_operand.vmem [shape: f32[576,128], index: 0, kind: input, shape index: {}]   ;;  %s2861_s1 = inlined_call_operand.vmem [shape: f32[128,576], index: 1, kind: input, shape index: {}]   ;;  %s2862_s2 = inlined_call_operand.vmem [shape: f32[128,1], index: 2, kind: input, shape index: {}]   ;;  %s2863_s4 = inlined_call_operand.vmem [shape: f32[128,1], index: 4, kind: input, shape index: {}]   ;;  %s2864_s7 = inlined_call_operand.<no memory space> [shape: f32[1,1], index: 7, kind: input, shape index: {}]   ;;  %s2865_s6 = inlined_call_operand.vmem [shape: f32[128,128], index: 6, kind: input, shape index: {}]   ;;  %s2866_s3 = inlined_call_operand.vmem [shape: f32[128,1], index: 3, kind: input, shape index: {}]   ;;  %s2867_s5 = inlined_call_operand.vmem [shape: f32[128,128], index: 5, kind: input, shape index: {}]   ;;  %s2868_s8 = inlined_call_operand.vmem [shape: f32[1,128], index: 8, kind: output, shape index: {}]  }
   0x1   :  { %v127_v0 = vld [vmem:[%s2860_s0 + $0x80] sm:$0xff]  ;;  %v128_v1 = vld [vmem:[%s2860_s0 + $0x88] sm:$0xff]  ;;  %1888 = vset.pattern.permute.xlu0 %v1926_v3  ;;  %1889 = vset.pattern.permute.xlu1 %v1926_v3  ;;  %v129_v12 = vld [vmem:[%s2860_s0 + $0x90] sm:$0xff] }
   0x2   :  { %v111_v2 = vld [vmem:[%s2860_s0] sm:$0xff]  ;;  %v1775_v4 = vpack.c.bf16 %v128_v1, %v127_v0  ;;  %v112_v5 = vld [vmem:[%s2860_s0 + $0x8] sm:$0xff]  ;;  %v130_v14 = vld [vmem:[%s2860_s0 + $0x98] sm:$0xff] }
   0x3   :  { %v159_v6 = vld [vmem:[%s2860_s0 + $0x180] sm:$0xff]  ;;  %v160_v7 = vld [vmem:[%s2860_s0 + $0x188] sm:$0xff]  ;;  %v1777_v8 = vpack.c.bf16 %v112_v5, %v111_v2  ;;  %v113_v15 = vld [vmem:[%s2860_s0 + $0x10] sm:$0xff]  ;;  %v1779_v17 = vpack.c.bf16 %v130_v14, %v129_v12 }
   0x4   :  { %v1807_v9 = vpack.c.bf16 %v160_v7, %v159_v6  ;;  %v143_v10 = vld [vmem:[%s2860_s0 + $0x100] sm:$0xff]  ;;  %v144_v11 = vld [vmem:[%s2860_s0 + $0x108] sm:$0xff]  ;;  %1776 = vmatprep.subr.bf16.mxu0 %v1775_v4  ;;  %v114_v16 = vld [vmem:[%s2860_s0 + $0x18] sm:$0xff] }
   0x5   :  { %v1809_v13 = vpack.c.bf16 %v144_v11, %v143_v10  ;;  %1778 = vmatpush3.bf16.msra.mxu0 %v1777_v8  ;;  %v1781_v18 = vpack.c.bf16 %v114_v16, %v113_v15  ;;  %v161_v19 = vld [vmem:[%s2860_s0 + $0x190] sm:$0xff]  ;;  %v162_v20 = vld [vmem:[%s2860_s0 + $0x198] sm:$0xff]  ;;  %v131_v24 = vld [vmem:[%s2860_s0 + $0xa0] sm:$0xff] }
   0x6   :  { %1808 = vmatprep.subr.bf16.mxu1 %v1807_v9  ;;  %v145_v21 = vld [vmem:[%s2860_s0 + $0x110] sm:$0xff]  ;;  %v1811_v22 = vpack.c.bf16 %v162_v20, %v161_v19  ;;  %v146_v23 = vld [vmem:[%s2860_s0 + $0x118] sm:$0xff]  ;;  %v132_v25 = vld [vmem:[%s2860_s0 + $0xa8] sm:$0xff]  ;;  %1780 = vmatprep.subr.bf16.mxu0 %v1779_v17 }
   0x7   :  { %1810 = vmatpush3.bf16.msra.mxu1 %v1809_v13  ;;  %v1813_v26 = vpack.c.bf16 %v146_v23, %v145_v21  ;;  %v1783_v27 = vpack.c.bf16 %v132_v25, %v131_v24  ;;  %v115_v28 = vld [vmem:[%s2860_s0 + $0x20] sm:$0xff]  ;;  %v116_v29 = vld [vmem:[%s2860_s0 + $0x28] sm:$0xff]  ;;  %v133_v36 = vld [vmem:[%s2860_s0 + $0xb0] sm:$0xff] }
   0x8   :  { %v163_v30 = vld [vmem:[%s2860_s0 + $0x1a0] sm:$0xff]  ;;  %1812 = vmatprep.subr.bf16.mxu1 %v1811_v22  ;;  %v164_v31 = vld [vmem:[%s2860_s0 + $0x1a8] sm:$0xff]  ;;  %v1785_v34 = vpack.c.bf16 %v116_v29, %v115_v28  ;;  %v134_v37 = vld [vmem:[%s2860_s0 + $0xb8] sm:$0xff] }
   0x9   :  { %v147_v32 = vld [vmem:[%s2860_s0 + $0x120] sm:$0xff]  ;;  %v148_v33 = vld [vmem:[%s2860_s0 + $0x128] sm:$0xff]  ;;  %1782 = vmatpush3.bf16.msra.mxu0 %v1781_v18  ;;  %v1815_v35 = vpack.c.bf16 %v164_v31, %v163_v30  ;;  %v117_v38 = vld [vmem:[%s2860_s0 + $0x30] sm:$0xff]  ;;  %v1787_v40 = vpack.c.bf16 %v134_v37, %v133_v36 }
   0xa   :  { %1784 = vmatprep.subr.bf16.mxu0 %v1783_v27  ;;  %v1817_v39 = vpack.c.bf16 %v148_v33, %v147_v32  ;;  %v118_v41 = vld [vmem:[%s2860_s0 + $0x38] sm:$0xff]  ;;  %v165_v42 = vld [vmem:[%s2860_s0 + $0x1b0] sm:$0xff]  ;;  %v135_v47 = vld [vmem:[%s2860_s0 + $0xc0] sm:$0xff] }
   0xb   :  { %1814 = vmatpush3.bf16.msra.mxu1 %v1813_v26  ;;  %v166_v43 = vld [vmem:[%s2860_s0 + $0x1b8] sm:$0xff]  ;;  %v149_v45 = vld [vmem:[%s2860_s0 + $0x130] sm:$0xff]  ;;  %v136_v48 = vld [vmem:[%s2860_s0 + $0xc8] sm:$0xff]  ;;  %v1789_v49 = vpack.c.bf16 %v118_v41, %v117_v38 }
   0xc   :  { %1816 = vmatprep.subr.bf16.mxu1 %v1815_v35  ;;  %v1819_v44 = vpack.c.bf16 %v166_v43, %v165_v42  ;;  %v150_v46 = vld [vmem:[%s2860_s0 + $0x138] sm:$0xff]  ;;  %v167_v50 = vld [vmem:[%s2860_s0 + $0x1c0] sm:$0xff]  ;;  %v168_v51 = vld [vmem:[%s2860_s0 + $0x1c8] sm:$0xff]  ;;  %v1791_v53 = vpack.c.bf16 %v136_v48, %v135_v47 }
   0xd   :  { %1786 = vmatpush3.bf16.msra.mxu0 %v1785_v34  ;;  %v1821_v52 = vpack.c.bf16 %v150_v46, %v149_v45  ;;  %v119_v54 = vld [vmem:[%s2860_s0 + $0x40] sm:$0xff]  ;;  %v120_v55 = vld [vmem:[%s2860_s0 + $0x48] sm:$0xff]  ;;  %v1823_v57 = vpack.c.bf16 %v168_v51, %v167_v50  ;;  %v137_v59 = vld [vmem:[%s2860_s0 + $0xd0] sm:$0xff] }
   0xe   :  { %1788 = vmatprep.subr.bf16.mxu0 %v1787_v40  ;;  %v151_v56 = vld [vmem:[%s2860_s0 + $0x140] sm:$0xff]  ;;  %v152_v58 = vld [vmem:[%s2860_s0 + $0x148] sm:$0xff]  ;;  %v138_v60 = vld [vmem:[%s2860_s0 + $0xd8] sm:$0xff]  ;;  %v1793_v63 = vpack.c.bf16 %v120_v55, %v119_v54 }
   0xf   :  { %1818 = vmatpush3.bf16.msra.mxu1 %v1817_v39  ;;  %v169_v61 = vld [vmem:[%s2860_s0 + $0x1d0] sm:$0xff]  ;;  %v170_v62 = vld [vmem:[%s2860_s0 + $0x1d8] sm:$0xff]  ;;  %v1825_v0 = vpack.c.bf16 %v152_v58, %v151_v56  ;;  %v1795_v1 = vpack.c.bf16 %v138_v60, %v137_v59  ;;  %v139_v7 = vld [vmem:[%s2860_s0 + $0xe0] sm:$0xff] }
  0x10   :  { %1820 = vmatprep.subr.bf16.mxu1 %v1819_v44  ;;  %v121_v2 = vld [vmem:[%s2860_s0 + $0x50] sm:$0xff]  ;;  %v122_v3 = vld [vmem:[%s2860_s0 + $0x58] sm:$0xff]  ;;  %v1827_v5 = vpack.c.bf16 %v170_v62, %v169_v61  ;;  %v140_v8 = vld [vmem:[%s2860_s0 + $0xe8] sm:$0xff] }
  0x11   :  { %1790 = vmatpush3.bf16.msra.mxu0 %v1789_v49  ;;  %v153_v4 = vld [vmem:[%s2860_s0 + $0x150] sm:$0xff]  ;;  %v154_v6 = vld [vmem:[%s2860_s0 + $0x158] sm:$0xff]  ;;  %v171_v9 = vld [vmem:[%s2860_s0 + $0x1e0] sm:$0xff]  ;;  %v1797_v11 = vpack.c.bf16 %v122_v3, %v121_v2  ;;  %v1799_v15 = vpack.c.bf16 %v140_v8, %v139_v7 }
  0x12   :  { %1792 = vmatprep.subr.bf16.mxu0 %v1791_v53  ;;  %v172_v10 = vld [vmem:[%s2860_s0 + $0x1e8] sm:$0xff]  ;;  %v123_v12 = vld [vmem:[%s2860_s0 + $0x60] sm:$0xff]  ;;  %v1829_v14 = vpack.c.bf16 %v154_v6, %v153_v4  ;;  %v141_v20 = vld [vmem:[%s2860_s0 + $0xf0] sm:$0xff] }
  0x13   :  { %1822 = vmatpush3.bf16.msra.mxu1 %v1821_v52  ;;  %v32_v13 = vld [vmem:[%s2861_s1 + $0x8] sm:$0xff]  ;;  %v155_v17 = vld [vmem:[%s2860_s0 + $0x160] sm:$0xff]  ;;  %v1831_v19 = vpack.c.bf16 %v172_v10, %v171_v9  ;;  %v142_v21 = vld [vmem:[%s2860_s0 + $0xf8] sm:$0xff] }
  0x14   :  { %1824 = vmatprep.subr.bf16.mxu1 %v1823_v57  ;;  %v124_v16 = vld [vmem:[%s2860_s0 + $0x68] sm:$0xff]  ;;  %392 = vmatprep.mubr.f32.mxu0 %v32_v13  ;;  %v34_v22 = vld [vmem:[%s2861_s1 + $0x18] sm:$0xff]  ;;  %v173_v23 = vld [vmem:[%s2860_s0 + $0x1f0] sm:$0xff]  ;;  %v1803_v27 = vpack.c.bf16 %v142_v21, %v141_v20 }
  0x15   :  { %1794 = vmatpush3.bf16.msra.mxu0 %v1793_v63  ;;  %v156_v18 = vld [vmem:[%s2860_s0 + $0x168] sm:$0xff]  ;;  %v174_v24 = vld [vmem:[%s2860_s0 + $0x1f8] sm:$0xff]  ;;  %537 = vmatprep.mubr.f32.mxu1 %v34_v22  ;;  %v1801_v25 = vpack.c.bf16 %v124_v16, %v123_v12  ;;  %v125_v28 = vld [vmem:[%s2860_s0 + $0x70] sm:$0xff] }
  0x16   :  { %1796 = vmatprep.subr.bf16.mxu0 %v1795_v1  ;;  %v1833_v26 = vpack.c.bf16 %v156_v18, %v155_v17  ;;  %v126_v29 = vld [vmem:[%s2860_s0 + $0x78] sm:$0xff]  ;;  %v157_v30 = vld [vmem:[%s2860_s0 + $0x170] sm:$0xff]  ;;  %v1835_v31 = vpack.c.bf16 %v174_v24, %v173_v23  ;;  %v175_v33 = vld [vmem:[%s2860_s0 + $0x200] sm:$0xff] }
  0x17   :  { %1826 = vmatpush3.bf16.msra.mxu1 %v1825_v0  ;;  %v158_v32 = vld [vmem:[%s2860_s0 + $0x178] sm:$0xff]  ;;  %v176_v34 = vld [vmem:[%s2860_s0 + $0x208] sm:$0xff]  ;;  %v1805_v35 = vpack.c.bf16 %v126_v29, %v125_v28  ;;  %v177_v38 = vld [vmem:[%s2860_s0 + $0x210] sm:$0xff] }
  0x18   :  { %1828 = vmatprep.subr.bf16.mxu1 %v1827_v5  ;;  %v1837_v36 = vpack.c.bf16 %v158_v32, %v157_v30  ;;  %v1839_v37 = vpack.c.bf16 %v176_v34, %v175_v33  ;;  %v178_v39 = vld [vmem:[%s2860_s0 + $0x218] sm:$0xff]  ;;  %v31_v40 = vld [vmem:[%s2861_s1] sm:$0xff]  ;;  %v33_v41 = vld [vmem:[%s2861_s1 + $0x10] sm:$0xff] }
  0x19   :  { %1798 = vmatpush3.bf16.msra.mxu0 %v1797_v11  ;;  %v37_v42 = vld [vmem:[%s2861_s1 + $0x30] sm:$0xff]  ;;  %v39_v43 = vld [vmem:[%s2861_s1 + $0x40] sm:$0xff]  ;;  %v1843_v44 = vpack.c.bf16 %v178_v39, %v177_v38  ;;  %v180_v46 = vld [vmem:[%s2860_s0 + $0x228] sm:$0xff] }
  0x1a   :  { %1800 = vmatprep.subr.bf16.mxu0 %v1799_v15  ;;  %v179_v45 = vld [vmem:[%s2860_s0 + $0x220] sm:$0xff]  ;;  %v36_v47 = vld [vmem:[%s2861_s1 + $0x28] sm:$0xff]  ;;  %v38_v48 = vld [vmem:[%s2861_s1 + $0x38] sm:$0xff] }
  0x1b   :  { %1830 = vmatpush3.bf16.msra.mxu1 %v1829_v14  ;;  %v42_v49 = vld [vmem:[%s2861_s1 + $0x58] sm:$0xff]  ;;  %v44_v50 = vld [vmem:[%s2861_s1 + $0x68] sm:$0xff]  ;;  %v1847_v51 = vpack.c.bf16 %v180_v46, %v179_v45  ;;  %v41_v52 = vld [vmem:[%s2861_s1 + $0x50] sm:$0xff] }
  0x1c   :  { %1832 = vmatprep.subr.bf16.mxu1 %v1831_v19  ;;  %v181_v53 = vld [vmem:[%s2860_s0 + $0x230] sm:$0xff]  ;;  %v182_v54 = vld [vmem:[%s2860_s0 + $0x238] sm:$0xff]  ;;  %v43_v55 = vld [vmem:[%s2861_s1 + $0x60] sm:$0xff] }
  0x1d   :  { %1802 = vmatpush3.bf16.msra.mxu0 %v1801_v25  ;;  %v47_v56 = vld [vmem:[%s2861_s1 + $0x80] sm:$0xff]  ;;  %v49_v57 = vld [vmem:[%s2861_s1 + $0x90] sm:$0xff]  ;;  %v1851_v58 = vpack.c.bf16 %v182_v54, %v181_v53  ;;  %v46_v59 = vld [vmem:[%s2861_s1 + $0x78] sm:$0xff] }
  0x1e   :  { %1804 = vmatprep.subr.bf16.mxu0 %v1803_v27  ;;  %v48_v60 = vld [vmem:[%s2861_s1 + $0x88] sm:$0xff]  ;;  %v54_v62 = vld [vmem:[%s2861_s1 + $0xb8] sm:$0xff]  ;;  %v51_v63 = vld [vmem:[%s2861_s1 + $0xa0] sm:$0xff] }
  0x1f   :  { %1834 = vmatpush3.bf16.msra.mxu1 %v1833_v26  ;;  %v52_v61 = vld [vmem:[%s2861_s1 + $0xa8] sm:$0xff]  ;;  %v53_v0 = vld [vmem:[%s2861_s1 + $0xb0] sm:$0xff]  ;;  %v183_v2 = vld [vmem:[%s2862_s2] sm:$0xff] }
  0x20   :  { %1836 = vmatprep.subr.bf16.mxu1 %v1835_v31  ;;  %v57_v1 = vld [vmem:[%s2861_s1 + $0xd0] sm:$0xff]  ;;  %v59_v3 = vld [vmem:[%s2861_s1 + $0xe0] sm:$0xff]  ;;  %201 = vperm.xlu0 %1888, %v183_v2   ;;  %v184_v4 = vld [vmem:[%s2862_s2 + $0x8] sm:$0xff] }
  0x21   :  { %1806 = vmatpush3.bf16.msra.mxu0 %v1805_v35  ;;  %v185_v5 = vld [vmem:[%s2862_s2 + $0x10] sm:$0xff]  ;;  %v56_v6 = vld [vmem:[%s2861_s1 + $0xc8] sm:$0xff]  ;;  %v58_v7 = vld [vmem:[%s2861_s1 + $0xd8] sm:$0xff] }
  0x22   :  { %1840 = vmatprep.subr.bf16.mxu0 %v1839_v37  ;;  %v62_v8 = vld [vmem:[%s2861_s1 + $0xf8] sm:$0xff]  ;;  %211 = vperm.xlu1 %1889, %v185_v5   ;;  %v64_v9 = vld [vmem:[%s2861_s1 + $0x108] sm:$0xff]  ;;  %v187_v11 = vld [vmem:[%s2862_s2 + $0x20] sm:$0xff] }
  0x23   :  { %1838 = vmatpush3.bf16.msra.mxu1 %v1837_v36  ;;  %v186_v10 = vld [vmem:[%s2862_s2 + $0x18] sm:$0xff]  ;;  %v61_v12 = vld [vmem:[%s2861_s1 + $0xf0] sm:$0xff]  ;;  %v63_v13 = vld [vmem:[%s2861_s1 + $0x100] sm:$0xff] }
  0x24   :  { %393 = vmatmul.mubr.f32.vlgmr.msra.gmra.mrb[0].mxu0 %v31_v40  ;;  %206 = vperm.xlu0 %1888, %v184_v4   ;;  %v67_v14 = vld [vmem:[%s2861_s1 + $0x120] sm:$0xff]  ;;  %v69_v15 = vld [vmem:[%s2861_s1 + $0x130] sm:$0xff]  ;;  %v188_v16 = vld [vmem:[%s2862_s2 + $0x28] sm:$0xff] }
  0x25   :  { %1842 = vmatpush3.bf16.msra.mxu0 %v1839_v37  ;;  %397 = vmatprep.mubr.f32.mxu0 %v37_v42  ;;  %v189_v17 = vld [vmem:[%s2862_s2 + $0x30] sm:$0xff]  ;;  %v66_v18 = vld [vmem:[%s2861_s1 + $0x118] sm:$0xff]  ;;  %v68_v19 = vld [vmem:[%s2861_s1 + $0x128] sm:$0xff] }
  0x26   :  { %538 = vmatmul.mubr.f32.vlgmr.msra.gmra.mrb[0].mxu1 %v33_v41  ;;  %1844 = vmatprep.subr.bf16.mxu0 %v1843_v44  ;;  %v72_v20 = vld [vmem:[%s2861_s1 + $0x148] sm:$0xff]  ;;  %v74_v21 = vld [vmem:[%s2861_s1 + $0x158] sm:$0xff]  ;;  %v191_v23 = vld [vmem:[%s2862_s2 + $0x40] sm:$0xff] }
  0x27   :  { %542 = vmatprep.mubr.f32.mxu1 %v39_v43  ;;  %216 = vperm.xlu1 %1889, %v186_v10   ;;  %v190_v22 = vld [vmem:[%s2862_s2 + $0x38] sm:$0xff]  ;;  %v71_v24 = vld [vmem:[%s2861_s1 + $0x140] sm:$0xff]  ;;  %v73_v25 = vld [vmem:[%s2861_s1 + $0x150] sm:$0xff] }
  0x28   :  { %398 = vmatmul.mubr.f32.gmra.mrb[2].mxu0 %v36_v47  ;;  %221 = vperm.xlu0 %1888, %v187_v11   ;;  %v77_v26 = vld [vmem:[%s2861_s1 + $0x170] sm:$0xff]  ;;  %v79_v27 = vld [vmem:[%s2861_s1 + $0x180] sm:$0xff]  ;;  %v192_v28 = vld [vmem:[%s2862_s2 + $0x48] sm:$0xff] }
  0x29   :  { %402 = vmatprep.mubr.f32.mxu0 %v42_v49  ;;  %1846 = vmatpush3.bf16.msra.mxu0 %v1843_v44  ;;  %v193_v29 = vld [vmem:[%s2862_s2 + $0x50] sm:$0xff]  ;;  %v76_v30 = vld [vmem:[%s2861_s1 + $0x168] sm:$0xff]  ;;  %v78_v31 = vld [vmem:[%s2861_s1 + $0x178] sm:$0xff] }
  0x2a   :  { %543 = vmatmul.mubr.f32.gmra.mrb[2].mxu1 %v38_v48  ;;  %1848 = vmatprep.subr.bf16.mxu0 %v1847_v51  ;;  %v82_v32 = vld [vmem:[%s2861_s1 + $0x198] sm:$0xff]  ;;  %v84_v33 = vld [vmem:[%s2861_s1 + $0x1a8] sm:$0xff]  ;;  %v195_v35 = vld [vmem:[%s2862_s2 + $0x60] sm:$0xff] }
  0x2b   :  { %547 = vmatprep.mubr.f32.mxu1 %v44_v50  ;;  %226 = vperm.xlu1 %1889, %v188_v16   ;;  %v194_v34 = vld [vmem:[%s2862_s2 + $0x58] sm:$0xff]  ;;  %v81_v36 = vld [vmem:[%s2861_s1 + $0x190] sm:$0xff]  ;;  %v83_v37 = vld [vmem:[%s2861_s1 + $0x1a0] sm:$0xff] }
  0x2c   :  { %403 = vmatmul.mubr.f32.gmra.mrb[4].mxu0 %v41_v52  ;;  %231 = vperm.xlu0 %1888, %v189_v17   ;;  %v87_v38 = vld [vmem:[%s2861_s1 + $0x1c0] sm:$0xff]  ;;  %v89_v39 = vld [vmem:[%s2861_s1 + $0x1d0] sm:$0xff]  ;;  %v196_v40 = vld [vmem:[%s2862_s2 + $0x68] sm:$0xff] }
  0x2d   :  { %407 = vmatprep.mubr.f32.mxu0 %v47_v56  ;;  %1850 = vmatpush3.bf16.msra.mxu0 %v1847_v51  ;;  %v197_v41 = vld [vmem:[%s2862_s2 + $0x70] sm:$0xff]  ;;  %v86_v42 = vld [vmem:[%s2861_s1 + $0x1b8] sm:$0xff]  ;;  %v88_v43 = vld [vmem:[%s2861_s1 + $0x1c8] sm:$0xff] }
  0x2e   :  { %548 = vmatmul.mubr.f32.gmra.mrb[4].mxu1 %v43_v55  ;;  %1852 = vmatprep.subr.bf16.mxu0 %v1851_v58  ;;  %v92_v44 = vld [vmem:[%s2861_s1 + $0x1e8] sm:$0xff]  ;;  %v94_v45 = vld [vmem:[%s2861_s1 + $0x1f8] sm:$0xff]  ;;  %v91_v47 = vld [vmem:[%s2861_s1 + $0x1e0] sm:$0xff] }
  0x2f   :  { %552 = vmatprep.mubr.f32.mxu1 %v49_v57  ;;  %236 = vperm.xlu1 %1889, %v190_v22   ;;  %v198_v46 = vld [vmem:[%s2862_s2 + $0x78] sm:$0xff]  ;;  %v93_v48 = vld [vmem:[%s2861_s1 + $0x1f0] sm:$0xff]  ;;  %v99_v50 = vld [vmem:[%s2861_s1 + $0x220] sm:$0xff] }
  0x30   :  { %408 = vmatmul.mubr.f32.gmra.mrb[6].mxu0 %v46_v59  ;;  %241 = vperm.xlu0 %1888, %v191_v23   ;;  %v97_v49 = vld [vmem:[%s2861_s1 + $0x210] sm:$0xff]  ;;  %v96_v51 = vld [vmem:[%s2861_s1 + $0x208] sm:$0xff]  ;;  %v98_v52 = vld [vmem:[%s2861_s1 + $0x218] sm:$0xff] }
  0x31   :  { %412 = vmatprep.mubr.f32.mxu0 %v52_v61  ;;  %1854 = vmatpush3.bf16.msra.mxu0 %v1851_v58  ;;  %v102_v53 = vld [vmem:[%s2861_s1 + $0x238] sm:$0xff]  ;;  %v104_v54 = vld [vmem:[%s2861_s1 + $0x248] sm:$0xff]  ;;  %v101_v55 = vld [vmem:[%s2861_s1 + $0x230] sm:$0xff] }
  0x32   :  { %553 = vmatmul.mubr.f32.gmra.mrb[6].mxu1 %v48_v60  ;;  %v103_v56 = vld [vmem:[%s2861_s1 + $0x240] sm:$0xff]  ;;  %v109_v58 = vld [vmem:[%s2861_s1 + $0x270] sm:$0xff]  ;;  %v106_v59 = vld [vmem:[%s2861_s1 + $0x258] sm:$0xff] }
  0x33   :  { %557 = vmatprep.mubr.f32.mxu1 %v54_v62  ;;  %246 = vperm.xlu1 %1889, %v192_v28   ;;  %v107_v57 = vld [vmem:[%s2861_s1 + $0x260] sm:$0xff]  ;;  %v108_v60 = vld [vmem:[%s2861_s1 + $0x268] sm:$0xff]  ;;  %v70_v4 = vld [vmem:[%s2861_s1 + $0x138] sm:$0xff] }
  0x34   :  { %413 = vmatmul.mubr.f32.gmra.mrb[8].mxu0 %v51_v63  ;;  %251 = vperm.xlu0 %1888, %v193_v29   ;;  %v35_v61 = vld [vmem:[%s2861_s1 + $0x20] sm:$0xff]  ;;  %v40_v62 = vld [vmem:[%s2861_s1 + $0x48] sm:$0xff]  ;;  %v45_v63 = vld [vmem:[%s2861_s1 + $0x70] sm:$0xff] }
  0x35   :  { %417 = vmatprep.mubr.f32.mxu0 %v57_v1  ;;  %v55_v1 = vld [vmem:[%s2861_s1 + $0xc0] sm:$0xff]  ;;  %v60_v2 = vld [vmem:[%s2861_s1 + $0xe8] sm:$0xff]  ;;  %v105_v11 = vld [vmem:[%s2861_s1 + $0x250] sm:$0xff] }
  0x36   :  { %558 = vmatmul.mubr.f32.gmra.mrb[8].mxu1 %v53_v0  ;;  %v50_v0 = vld [vmem:[%s2861_s1 + $0x98] sm:$0xff]  ;;  %v75_v5 = vld [vmem:[%s2861_s1 + $0x160] sm:$0xff]  ;;  %v100_v10 = vld [vmem:[%s2861_s1 + $0x228] sm:$0xff] }
  0x37   :  { %562 = vmatprep.mubr.f32.mxu1 %v59_v3  ;;  %256 = vperm.xlu1 %1889, %v194_v34   ;;  %v65_v3 = vld [vmem:[%s2861_s1 + $0x110] sm:$0xff] }
  0x38   :  { %418 = vmatmul.mubr.f32.gmra.mrb[10].mxu0 %v56_v6  ;;  %261 = vperm.xlu0 %1888, %v195_v35   ;;  %v80_v6 = vld [vmem:[%s2861_s1 + $0x188] sm:$0xff] }
  0x39   :  { %422 = vmatprep.mubr.f32.mxu0 %v62_v8  ;;  %v90_v8 = vld [vmem:[%s2861_s1 + $0x1d8] sm:$0xff] }
  0x3a   :  { %563 = vmatmul.mubr.f32.gmra.mrb[10].mxu1 %v58_v7  ;;  %v85_v7 = vld [vmem:[%s2861_s1 + $0x1b0] sm:$0xff] }
  0x3b   :  { %567 = vmatprep.mubr.f32.mxu1 %v64_v9  ;;  %266 = vperm.xlu1 %1889, %v196_v40   ;;  %v95_v9 = vld [vmem:[%s2861_s1 + $0x200] sm:$0xff] }
  0x3c   :  { %423 = vmatmul.mubr.f32.gmra.mrb[12].mxu0 %v61_v12  ;;  %271 = vperm.xlu0 %1888, %v197_v41   ;;  %v110_v12 = vld [vmem:[%s2861_s1 + $0x278] sm:$0xff] }
  0x3d   :  { %427 = vmatprep.mubr.f32.mxu0 %v67_v14 }
  0x3e   :  { %568 = vmatmul.mubr.f32.gmra.mrb[12].mxu1 %v63_v13 }
  0x3f   :  { %572 = vmatprep.mubr.f32.mxu1 %v69_v15  ;;  %276 = vperm.xlu1 %1889, %v198_v46  }
  0x40   :  { %428 = vmatmul.mubr.f32.gmra.mrb[14].mxu0 %v66_v18 }
  0x41   :  { %432 = vmatprep.mubr.f32.mxu0 %v72_v20 }
  0x42   :  { %573 = vmatmul.mubr.f32.gmra.mrb[14].mxu1 %v68_v19 }
  0x43   :  { %577 = vmatprep.mubr.f32.mxu1 %v74_v21 }
  0x44   :  { %433 = vmatmul.mubr.f32.gmra.mrb[16].mxu0 %v71_v24 }
  0x45   :  { %437 = vmatprep.mubr.f32.mxu0 %v77_v26 }
  0x46   :  { %578 = vmatmul.mubr.f32.gmra.mrb[16].mxu1 %v73_v25 }
  0x47   :  { %582 = vmatprep.mubr.f32.mxu1 %v79_v27 }
  0x48   :  { %438 = vmatmul.mubr.f32.gmra.mrb[18].mxu0 %v76_v30 }
  0x49   :  { %442 = vmatprep.mubr.f32.mxu0 %v82_v32 }
  0x4a   :  { %583 = vmatmul.mubr.f32.gmra.mrb[18].mxu1 %v78_v31 }
  0x4b   :  { %587 = vmatprep.mubr.f32.mxu1 %v84_v33 }
  0x4c   :  { %443 = vmatmul.mubr.f32.gmra.mrb[20].mxu0 %v81_v36 }
  0x4d   :  { %447 = vmatprep.mubr.f32.mxu0 %v87_v38 }
  0x4e   :  { %588 = vmatmul.mubr.f32.gmra.mrb[20].mxu1 %v83_v37 }
  0x4f   :  { %592 = vmatprep.mubr.f32.mxu1 %v89_v39 }
  0x50   :  { %448 = vmatmul.mubr.f32.gmra.mrb[22].mxu0 %v86_v42 }
  0x51   :  { %452 = vmatprep.mubr.f32.mxu0 %v92_v44 }
  0x52   :  { %593 = vmatmul.mubr.f32.gmra.mrb[22].mxu1 %v88_v43 }
  0x53   :  { %597 = vmatprep.mubr.f32.mxu1 %v94_v45 }
  0x54   :  { %453 = vmatmul.mubr.f32.gmra.mrb[24].mxu0 %v91_v47 }
  0x55   :  { %457 = vmatprep.mubr.f32.mxu0 %v97_v49 }
  0x56   :  { %598 = vmatmul.mubr.f32.gmra.mrb[24].mxu1 %v93_v48 }
  0x57   :  { %602 = vmatprep.mubr.f32.mxu1 %v99_v50 }
  0x58   :  { %458 = vmatmul.mubr.f32.gmra.mrb[26].mxu0 %v96_v51 }
  0x59   :  { %462 = vmatprep.mubr.f32.mxu0 %v102_v53 }
  0x5a   :  { %603 = vmatmul.mubr.f32.gmra.mrb[26].mxu1 %v98_v52 }
  0x5b   :  { %607 = vmatprep.mubr.f32.mxu1 %v104_v54 }
  0x5c   :  { %463 = vmatmul.mubr.f32.gmra.mrb[28].mxu0 %v101_v55 }
  0x5d   :  { %467 = vmatprep.mubr.f32.mxu0 %v107_v57 }
  0x5e   :  { %608 = vmatmul.mubr.f32.gmra.mrb[28].mxu1 %v103_v56 }
  0x5f   :  { %612 = vmatprep.mubr.f32.mxu1 %v109_v58 }
  0x60   :  { %468 = vmatmul.mubr.f32.gmra.mrb[30].mxu0 %v106_v59 }
  0x61   :  { %1695 = vmatprep.mubr.msk.f32.mxu0 %vm279_vm0, %v35_v61 }
  0x62   :  { %613 = vmatmul.mubr.f32.gmra.mrb[30].mxu1 %v108_v60 }
  0x64   :  { %1696 = vmatmul.mubr.msk.f32.vlgmr.msra.gmra.mrb[32].mxu0 %vm279_vm0, %v40_v62 }
  0x65   :  { %1698 = vmatprep.mubr.msk.f32.mxu0 %vm279_vm0, %v45_v63 }
  0x68   :  { %1699 = vmatmul.mubr.msk.f32.gmra.mrb[34].mxu0 %vm279_vm0, %v50_v0 }
  0x69   :  { %1701 = vmatprep.mubr.msk.f32.mxu0 %vm279_vm0, %v55_v1 }
  0x6c   :  { %1702 = vmatmul.mubr.msk.f32.gmra.mrb[36].mxu0 %vm279_vm0, %v60_v2 }
  0x6d   :  { %1704 = vmatprep.mubr.msk.f32.mxu0 %vm279_vm0, %v65_v3 }
  0x70   :  { %1705 = vmatmul.mubr.msk.f32.gmra.mrb[38].mxu0 %vm279_vm0, %v70_v4 }
  0x71   :  { %1707 = vmatprep.mubr.msk.f32.mxu0 %vm279_vm0, %v75_v5 }
  0x74   :  { %1708 = vmatmul.mubr.msk.f32.gmra.mrb[40].mxu0 %vm279_vm0, %v80_v6 }
  0x75   :  { %1710 = vmatprep.mubr.msk.f32.mxu0 %vm279_vm0, %v85_v7 }
  0x78   :  { %1711 = vmatmul.mubr.msk.f32.gmra.mrb[42].mxu0 %vm279_vm0, %v90_v8 }
  0x79   :  { %1713 = vmatprep.mubr.msk.f32.mxu0 %vm279_vm0, %v95_v9 }
  0x7c   :  { %1714 = vmatmul.mubr.msk.f32.gmra.mrb[44].mxu0 %vm279_vm0, %v100_v10 }
  0x7d   :  { %1716 = vmatprep.mubr.msk.f32.mxu0 %vm279_vm0, %v105_v11 }
  0x80   :  { %1717 = vmatmul.mubr.msk.f32.gmra.mrb[46].mxu0 %vm279_vm0, %v110_v12 }
  0x9f   :  { %v202_v13 = vpop.permute.xlu0 %201 }
  0xa1   :  { %v212_v27 = vpop.permute.xlu1 %211 }
  0xa3   :  { %v207_v22 = vpop.permute.xlu0 %206 }
  0xa6   :  { %v217_v40 = vpop.permute.xlu1 %216 }
  0xa7   :  { %v222_v49 = vpop.permute.xlu0 %221 }
  0xaa   :  { %v227_v58 = vpop.permute.xlu1 %226 }
  0xab   :  { %v232_v3 = vpop.permute.xlu0 %231 }
  0xae   :  { %v237_v12 = vpop.permute.xlu1 %236 }
  0xf7   :  { %v1495_v14 = vpop.f32.mrb[0].mxu0 }
  0xf8   :  { %v1496_v15 = vpop.f32.mrb[1].mxu0 }
  0xf9   :  { %v1575_v16 = vpop.f32.mrb[0].mxu1  ;;  %v1497_v17 = vadd.f32 %v1496_v15, %v1495_v14 }
  0xfa   :  { %v1576_v18 = vpop.f32.mrb[1].mxu1 }
  0xfb   :  { %v1577_v19 = vadd.f32 %v1576_v18, %v1575_v16  ;;  %v395_v20 = vadd.f32 %v1497_v17, %v202_v13  ;;  %v1498_v21 = vpop.f32.mrb[2].mxu0 }
  0xfc   :  { %v1499_v23 = vpop.f32.mrb[3].mxu0 }
  0xfd   :  { %v1578_v24 = vpop.f32.mrb[2].mxu1  ;;  %v1500_v25 = vadd.f32 %v1499_v23, %v1498_v21  ;;  %v2492_v28 = vadd.f32 %v1577_v19, %v395_v20  ;;  %v242_v21 = vpop.permute.xlu0 %241 }
  0xfe   :  { %v1579_v26 = vpop.f32.mrb[3].mxu1 }
  0xff   :  { %v1580_v29 = vadd.f32 %v1579_v26, %v1578_v24  ;;  %v400_v30 = vadd.f32 %v1500_v25, %v207_v22  ;;  %v1501_v31 = vpop.f32.mrb[4].mxu0 }
 0x100   :  { %v1502_v32 = vpop.f32.mrb[5].mxu0 }
 0x101   :  { %v1581_v33 = vpop.f32.mrb[4].mxu1  ;;  %v1503_v34 = vadd.f32 %v1502_v32, %v1501_v31  ;;  %v2494_v36 = vadd.f32 %v1580_v29, %v400_v30  ;;  %v247_v31 = vpop.permute.xlu1 %246 }
 0x102   :  { %v1582_v35 = vpop.f32.mrb[5].mxu1 }
 0x103   :  { %v1583_v37 = vadd.f32 %v1582_v35, %v1581_v33  ;;  %v405_v38 = vadd.f32 %v1503_v34, %v212_v27  ;;  %v1504_v39 = vpop.f32.mrb[6].mxu0 }
 0x104   :  { %v1505_v41 = vpop.f32.mrb[7].mxu0 }
 0x105   :  { %v1584_v42 = vpop.f32.mrb[6].mxu1  ;;  %v1506_v43 = vadd.f32 %v1505_v41, %v1504_v39  ;;  %v2496_v45 = vadd.f32 %v1583_v37, %v405_v38  ;;  %v252_v41 = vpop.permute.xlu0 %251 }
 0x106   :  { %v1585_v44 = vpop.f32.mrb[7].mxu1 }
 0x107   :  { %v1586_v46 = vadd.f32 %v1585_v44, %v1584_v42  ;;  %v410_v47 = vadd.f32 %v1506_v43, %v217_v40  ;;  %v1507_v48 = vpop.f32.mrb[8].mxu0 }
 0x108   :  { %v1508_v50 = vpop.f32.mrb[9].mxu0 }
 0x109   :  { %v1587_v51 = vpop.f32.mrb[8].mxu1  ;;  %v1509_v52 = vadd.f32 %v1508_v50, %v1507_v48  ;;  %v2498_v54 = vadd.f32 %v1586_v46, %v410_v47 }
 0x10a   :  { %v1588_v53 = vpop.f32.mrb[9].mxu1 }
 0x10b   :  { %v1589_v55 = vadd.f32 %v1588_v53, %v1587_v51  ;;  %v415_v56 = vadd.f32 %v1509_v52, %v222_v49  ;;  %v1510_v57 = vpop.f32.mrb[10].mxu0  ;;  %v257_v51 = vpop.permute.xlu1 %256 }
 0x10c   :  { %v1511_v59 = vpop.f32.mrb[11].mxu0 }
 0x10d   :  { %v1590_v60 = vpop.f32.mrb[10].mxu1  ;;  %v1512_v61 = vadd.f32 %v1511_v59, %v1510_v57  ;;  %v2500_v63 = vadd.f32 %v1589_v55, %v415_v56 }
 0x10e   :  { %v1591_v62 = vpop.f32.mrb[11].mxu1 }
 0x10f   :  { %v1592_v0 = vadd.f32 %v1591_v62, %v1590_v60  ;;  %v420_v1 = vadd.f32 %v1512_v61, %v227_v58  ;;  %v1513_v2 = vpop.f32.mrb[12].mxu0  ;;  %v262_v61 = vpop.permute.xlu0 %261 }
 0x110   :  { %v1514_v4 = vpop.f32.mrb[13].mxu0 }
 0x111   :  { %v1593_v5 = vpop.f32.mrb[12].mxu1  ;;  %v1515_v6 = vadd.f32 %v1514_v4, %v1513_v2  ;;  %v2502_v8 = vadd.f32 %v1592_v0, %v420_v1 }
 0x112   :  { %v1594_v7 = vpop.f32.mrb[13].mxu1 }
 0x113   :  { %v1595_v9 = vadd.f32 %v1594_v7, %v1593_v5  ;;  %v425_v10 = vadd.f32 %v1515_v6, %v232_v3  ;;  %v1516_v11 = vpop.f32.mrb[14].mxu0  ;;  %v267_v7 = vpop.permute.xlu1 %266 }
 0x114   :  { %v1517_v13 = vpop.f32.mrb[15].mxu0 }
 0x115   :  { %v1596_v14 = vpop.f32.mrb[14].mxu1  ;;  %v1518_v15 = vadd.f32 %v1517_v13, %v1516_v11  ;;  %v2504_v17 = vadd.f32 %v1595_v9, %v425_v10 }
 0x116   :  { %v1597_v16 = vpop.f32.mrb[15].mxu1 }
 0x117   :  { %v1598_v18 = vadd.f32 %v1597_v16, %v1596_v14  ;;  %v430_v19 = vadd.f32 %v1518_v15, %v237_v12  ;;  %v1519_v20 = vpop.f32.mrb[16].mxu0 }
 0x118   :  { %v1520_v22 = vpop.f32.mrb[17].mxu0 }
 0x119   :  { %v1599_v23 = vpop.f32.mrb[16].mxu1  ;;  %v1521_v24 = vadd.f32 %v1520_v22, %v1519_v20  ;;  %v2506_v26 = vadd.f32 %v1598_v18, %v430_v19  ;;  %v272_v18 = vpop.permute.xlu0 %271 }
 0x11a   :  { %v1600_v25 = vpop.f32.mrb[17].mxu1 }
 0x11b   :  { %v1601_v27 = vadd.f32 %v1600_v25, %v1599_v23  ;;  %v435_v29 = vadd.f32 %v1521_v24, %v242_v21  ;;  %v1522_v30 = vpop.f32.mrb[18].mxu0 }
 0x11c   :  { %v1523_v32 = vpop.f32.mrb[19].mxu0 }
 0x11d   :  { %v1602_v33 = vpop.f32.mrb[18].mxu1  ;;  %v1524_v34 = vadd.f32 %v1523_v32, %v1522_v30  ;;  %v2508_v37 = vadd.f32 %v1601_v27, %v435_v29  ;;  %v277_v29 = vpop.permute.xlu1 %276 }
 0x11e   :  { %v1603_v35 = vpop.f32.mrb[19].mxu1 }
 0x11f   :  { %v1604_v38 = vadd.f32 %v1603_v35, %v1602_v33  ;;  %v440_v39 = vadd.f32 %v1524_v34, %v247_v31  ;;  %v1525_v40 = vpop.f32.mrb[20].mxu0 }
 0x120   :  { %v1526_v42 = vpop.f32.mrb[21].mxu0 }
 0x121   :  { %v1605_v43 = vpop.f32.mrb[20].mxu1  ;;  %v1527_v44 = vadd.f32 %v1526_v42, %v1525_v40  ;;  %v2510_v47 = vadd.f32 %v1604_v38, %v440_v39 }
 0x122   :  { %v1606_v46 = vpop.f32.mrb[21].mxu1 }
 0x123   :  { %v1607_v48 = vadd.f32 %v1606_v46, %v1605_v43  ;;  %v445_v49 = vadd.f32 %v1527_v44, %v252_v41  ;;  %v1528_v50 = vpop.f32.mrb[22].mxu0 }
 0x124   :  { %v1529_v52 = vpop.f32.mrb[23].mxu0 }
 0x125   :  { %v1608_v53 = vpop.f32.mrb[22].mxu1  ;;  %v1530_v55 = vadd.f32 %v1529_v52, %v1528_v50  ;;  %v2512_v57 = vadd.f32 %v1607_v48, %v445_v49 }
 0x126   :  { %v1609_v56 = vpop.f32.mrb[23].mxu1 }
 0x127   :  { %v1610_v58 = vadd.f32 %v1609_v56, %v1608_v53  ;;  %v450_v59 = vadd.f32 %v1530_v55, %v257_v51  ;;  %v1531_v60 = vpop.f32.mrb[24].mxu0 }
 0x128   :  { %v1532_v62 = vpop.f32.mrb[25].mxu0 }
 0x129   :  { %v1611_v0 = vpop.f32.mrb[24].mxu1  ;;  %v1533_v1 = vadd.f32 %v1532_v62, %v1531_v60  ;;  %v595_v3 = vadd.f32 %v1610_v58, %v450_v59 }
 0x12a   :  { %v1612_v2 = vpop.f32.mrb[25].mxu1 }
 0x12b   :  { %v1613_v4 = vadd.f32 %v1612_v2, %v1611_v0  ;;  %v455_v5 = vadd.f32 %v1533_v1, %v262_v61  ;;  %v1534_v6 = vpop.f32.mrb[26].mxu0 }
 0x12c   :  { %v1535_v9 = vpop.f32.mrb[27].mxu0 }
 0x12d   :  { %v1614_v10 = vpop.f32.mrb[26].mxu1  ;;  %v1536_v11 = vadd.f32 %v1535_v9, %v1534_v6  ;;  %v600_v13 = vadd.f32 %v1613_v4, %v455_v5 }
 0x12e   :  { %v1615_v12 = vpop.f32.mrb[27].mxu1 }
 0x12f   :  { %v1616_v14 = vadd.f32 %v1615_v12, %v1614_v10  ;;  %v460_v15 = vadd.f32 %v1536_v11, %v267_v7  ;;  %v1537_v16 = vpop.f32.mrb[28].mxu0 }
 0x130   :  { %v1538_v19 = vpop.f32.mrb[29].mxu0 }
 0x131   :  { %v1617_v20 = vpop.f32.mrb[28].mxu1  ;;  %v1539_v21 = vadd.f32 %v1538_v19, %v1537_v16  ;;  %v605_v23 = vadd.f32 %v1616_v14, %v460_v15 }
 0x132   :  { %v1618_v22 = vpop.f32.mrb[29].mxu1 }
 0x133   :  { %v1619_v24 = vadd.f32 %v1618_v22, %v1617_v20  ;;  %v465_v25 = vadd.f32 %v1539_v21, %v272_v18  ;;  %v1540_v27 = vpop.f32.mrb[30].mxu0 }
 0x134   :  { %v1541_v30 = vpop.f32.mrb[31].mxu0 }
 0x135   :  { %v1620_v31 = vpop.f32.mrb[30].mxu1  ;;  %v1542_v32 = vadd.f32 %v1541_v30, %v1540_v27  ;;  %v610_v34 = vadd.f32 %v1619_v24, %v465_v25 }
 0x136   :  { %v1621_v33 = vpop.f32.mrb[31].mxu1 }
 0x137   :  { %v1622_v35 = vadd.f32 %v1621_v33, %v1620_v31  ;;  %v470_v38 = vadd.f32 %v1542_v32, %v277_v29  ;;  %v1697_v39 = vpop.f32.mrb[32].mxu0 }
 0x138   :  { %v690_v40 = vadd.f32 %v1697_v39, %v2494_v36  ;;  %v684_v41 = vpop.f32.mrb[33].mxu0 }
 0x139   :  { %v685_v42 = vadd.f32 %v684_v41, %v2492_v28  ;;  %v615_v43 = vadd.f32 %v1622_v35, %v470_v38 }
 0x13a   :  { %765 = vadd.xlane.f32.xlu1 %v690_v40 }
 0x13b   :  { %v1700_v44 = vpop.f32.mrb[34].mxu0  ;;  %763 = vadd.xlane.f32.xlu0 %v685_v42 }
 0x13c   :  { %v700_v46 = vadd.f32 %v1700_v44, %v2498_v54  ;;  %v694_v48 = vpop.f32.mrb[35].mxu0 }
 0x13d   :  { %v695_v49 = vadd.f32 %v694_v48, %v2496_v45 }
 0x13f   :  { %v1703_v50 = vpop.f32.mrb[36].mxu0  ;;  %767 = vadd.xlane.f32.xlu0 %v695_v49 }
 0x140   :  { %v2519_v51 = vadd.f32 %v1703_v50, %v2502_v8  ;;  %v704_v52 = vpop.f32.mrb[37].mxu0 }
 0x141   :  { %v705_v36 = vadd.f32 %v704_v52, %v2500_v63 }
 0x143   :  { %v1706_v53 = vpop.f32.mrb[38].mxu0  ;;  %771 = vadd.xlane.f32.xlu1 %v705_v36  ;;  %769 = vadd.xlane.f32.xlu0 %v700_v46 }
 0x144   :  { %v2523_v28 = vadd.f32 %v1706_v53, %v2506_v26  ;;  %v714_v55 = vpop.f32.mrb[39].mxu0 }
 0x145   :  { %v715_v54 = vadd.f32 %v714_v55, %v2504_v17 }
 0x147   :  { %v1709_v56 = vpop.f32.mrb[40].mxu0  ;;  %775 = vadd.xlane.f32.xlu1 %v715_v54  ;;  %773 = vadd.xlane.f32.xlu0 %v2519_v51 }
 0x148   :  { %v2528_v45 = vadd.f32 %v1709_v56, %v2510_v47  ;;  %v724_v8 = vpop.f32.mrb[41].mxu0 }
 0x149   :  { %v725_v58 = vadd.f32 %v724_v8, %v2508_v37 }
 0x14b   :  { %v1712_v63 = vpop.f32.mrb[42].mxu0  ;;  %779 = vadd.xlane.f32.xlu1 %v725_v58  ;;  %777 = vadd.xlane.f32.xlu0 %v2523_v28 }
 0x14c   :  { %v2532_v59 = vadd.f32 %v1712_v63, %v595_v3  ;;  %v734_v26 = vpop.f32.mrb[43].mxu0 }
 0x14d   :  { %v2535_v60 = vadd.f32 %v734_v26, %v2512_v57 }
 0x14f   :  { %v1715_v17 = vpop.f32.mrb[44].mxu0  ;;  %783 = vadd.xlane.f32.xlu1 %v2535_v60  ;;  %781 = vadd.xlane.f32.xlu0 %v2528_v45 }
 0x150   :  { %v2539_v47 = vadd.f32 %v1715_v17, %v605_v23  ;;  %v744_v61 = vpop.f32.mrb[45].mxu0 }
 0x151   :  { %v2541_v62 = vadd.f32 %v744_v61, %v600_v13 }
 0x153   :  { %v1718_v37 = vpop.f32.mrb[46].mxu0  ;;  %787 = vadd.xlane.f32.xlu1 %v2541_v62  ;;  %785 = vadd.xlane.f32.xlu0 %v2532_v59 }
 0x154   :  { %v2545_v0 = vadd.f32 %v1718_v37, %v615_v43  ;;  %v754_v1 = vpop.f32.mrb[47].mxu0 }
 0x155   :  { %v2547_v57 = vadd.f32 %v754_v1, %v610_v34  ;;  %v1052_v1 = vld [vmem:[%s2863_s4 + $0x8] sm:$0xff] }
 0x157   :  { %791 = vadd.xlane.f32.xlu1 %v2547_v57  ;;  %789 = vadd.xlane.f32.xlu0 %v2539_v47 }
 0x15b   :  { %793 = vadd.xlane.f32.xlu0 %v2545_v0 }
 0x1c7   :  { %v766_v2 = vpop.xlane.xlu1 %765 }
 0x1c8   :  { %v796_v3 = vmul.f32 0.0078125, %v766_v2  ;;  %v764_v4 = vpop.xlane.xlu0 %763  ;;  %v1055_v2 = vld [vmem:[%s2863_s4 + $0x20] sm:$0xff] }
 0x1c9   :  { %v795_v5 = vmul.f32 0.0078125, %v764_v4  ;;  %v1059_v4 = vld [vmem:[%s2863_s4 + $0x40] sm:$0xff] }
 0x1ca   :  { %v2552_v6 = vsub.f32 %v690_v40, %v796_v3  ;;  %v1057_v3 = vld [vmem:[%s2863_s4 + $0x30] sm:$0xff] }
 0x1cb   :  { %v2554_v7 = vsub.f32 %v685_v42, %v795_v5  ;;  %v1061_v5 = vld [vmem:[%s2863_s4 + $0x50] sm:$0xff] }
 0x1cc   :  { %v768_v9 = vpop.xlane.xlu0 %767  ;;  %v828_v10 = vmul.f32 %v2552_v6, %v2552_v6 }
 0x1cd   :  { %v797_v11 = vmul.f32 0.0078125, %v768_v9  ;;  %v827_v12 = vmul.f32 %v2554_v7, %v2554_v7 }
 0x1ce   :  { %845 = vadd.xlane.f32.xlu0 %v828_v10 }
 0x1cf   :  { %v2560_v13 = vsub.f32 %v695_v49, %v797_v11  ;;  %843 = vadd.xlane.f32.xlu1 %v827_v12  ;;  %v1063_v11 = vld [vmem:[%s2863_s4 + $0x60] sm:$0xff] }
 0x1d0   :  { %v772_v14 = vpop.xlane.xlu1 %771  ;;  %v770_v15 = vpop.xlane.xlu0 %769 }
 0x1d1   :  { %v799_v16 = vmul.f32 0.0078125, %v772_v14  ;;  %v798_v18 = vmul.f32 0.0078125, %v770_v15  ;;  %v829_v19 = vmul.f32 %v2560_v13, %v2560_v13  ;;  %v1054_v15 = vld [vmem:[%s2863_s4 + $0x18] sm:$0xff] }
 0x1d3   :  { %v2564_v20 = vsub.f32 %v705_v36, %v799_v16  ;;  %v2566_v21 = vsub.f32 %v700_v46, %v798_v18  ;;  %847 = vadd.xlane.f32.xlu1 %v829_v19  ;;  %v1056_v16 = vld [vmem:[%s2863_s4 + $0x28] sm:$0xff]  ;;  %v1058_v18 = vld [vmem:[%s2863_s4 + $0x38] sm:$0xff] }
 0x1d4   :  { %v776_v22 = vpop.xlane.xlu1 %775  ;;  %v774_v23 = vpop.xlane.xlu0 %773  ;;  %v1062_v19 = vld [vmem:[%s2863_s4 + $0x58] sm:$0xff] }
 0x1d5   :  { %v801_v24 = vmul.f32 0.0078125, %v776_v22  ;;  %v800_v25 = vmul.f32 0.0078125, %v774_v23  ;;  %v831_v27 = vmul.f32 %v2564_v20, %v2564_v20  ;;  %v830_v29 = vmul.f32 %v2566_v21, %v2566_v21  ;;  %v1064_v23 = vld [vmem:[%s2863_s4 + $0x68] sm:$0xff] }
 0x1d6   :  { %v13_v22 = vstv %s2864_s7 }
 0x1d7   :  { %v2572_v30 = vsub.f32 %v715_v54, %v801_v24  ;;  %v2575_v31 = vsub.f32 %v2519_v51, %v800_v25  ;;  %851 = vadd.xlane.f32.xlu1 %v831_v27  ;;  %849 = vadd.xlane.f32.xlu0 %v830_v29  ;;  %14 = vst [vmem:[#allocation2] sm:$0x1] %v13_v22  ;;  %v1243_v24 = vld [vmem:[%s2865_s6] sm:$0xff]  ;;  %v1244_v25 = vld [vmem:[%s2865_s6 + $0x8] sm:$0xff]  ;;  %v1245_v27 = vld [vmem:[%s2865_s6 + $0x10] sm:$0xff] }
 0x1d8   :  { %v780_v32 = vpop.xlane.xlu1 %779  ;;  %v778_v33 = vpop.xlane.xlu0 %777  ;;  %v1855_v29 = vpack.c.bf16 %v1244_v25, %v1243_v24  ;;  %v893_v25 = vld [vmem:[%s2866_s3 + $0x10] sm:$0xff] }
 0x1d9   :  { %v803_v34 = vmul.f32 0.0078125, %v780_v32  ;;  %v802_v35 = vmul.f32 0.0078125, %v778_v33  ;;  %v833_v38 = vmul.f32 %v2572_v30, %v2572_v30  ;;  %v832_v39 = vmul.f32 %v2575_v31, %v2575_v31  ;;  %v1246_v32 = vld [vmem:[%s2865_s6 + $0x18] sm:$0xff] }
 0x1da   :  { %v1859_v33 = vpack.c.bf16 %v1246_v32, %v1245_v27  ;;  %1856 = vmatprep.subr.bf16.mxu1 %v1855_v29  ;;  %v1255_v27 = vld [vmem:[%s2865_s6 + $0x60] sm:$0xff] }
 0x1db   :  { %v2581_v40 = vsub.f32 %v725_v58, %v803_v34  ;;  %v2584_v41 = vsub.f32 %v2523_v28, %v802_v35  ;;  %855 = vadd.xlane.f32.xlu1 %v833_v38  ;;  %853 = vadd.xlane.f32.xlu0 %v832_v39  ;;  %v1247_v34 = vld [vmem:[%s2865_s6 + $0x20] sm:$0xff]  ;;  %v1248_v35 = vld [vmem:[%s2865_s6 + $0x28] sm:$0xff]  ;;  %v1249_v39 = vld [vmem:[%s2865_s6 + $0x30] sm:$0xff] }
 0x1dc   :  { %v784_v42 = vpop.xlane.xlu1 %783  ;;  %v782_v43 = vpop.xlane.xlu0 %781  ;;  %1858 = vmatpush3.bf16.msra.mxu1 %v1855_v29  ;;  %v1863_v38 = vpack.c.bf16 %v1248_v35, %v1247_v34  ;;  %v1256_v29 = vld [vmem:[%s2865_s6 + $0x68] sm:$0xff] }
 0x1dd   :  { %v805_v44 = vmul.f32 0.0078125, %v784_v42  ;;  %v804_v46 = vmul.f32 0.0078125, %v782_v43  ;;  %v835_v48 = vmul.f32 %v2581_v40, %v2581_v40  ;;  %v834_v49 = vmul.f32 %v2584_v41, %v2584_v41  ;;  %1860 = vmatprep.subr.bf16.mxu1 %v1859_v33  ;;  %v1250_v42 = vld [vmem:[%s2865_s6 + $0x38] sm:$0xff] }
 0x1de   :  { %v1867_v43 = vpack.c.bf16 %v1250_v42, %v1249_v39  ;;  %v1879_v35 = vpack.c.bf16 %v1256_v29, %v1255_v27 }
 0x1df   :  { %v2591_v50 = vsub.f32 %v2535_v60, %v805_v44  ;;  %v2594_v51 = vsub.f32 %v2528_v45, %v804_v46  ;;  %859 = vadd.xlane.f32.xlu1 %v835_v48  ;;  %857 = vadd.xlane.f32.xlu0 %v834_v49  ;;  %v1251_v44 = vld [vmem:[%s2865_s6 + $0x40] sm:$0xff]  ;;  %v1252_v46 = vld [vmem:[%s2865_s6 + $0x48] sm:$0xff]  ;;  %v1253_v49 = vld [vmem:[%s2865_s6 + $0x50] sm:$0xff] }
 0x1e0   :  { %v788_v52 = vpop.xlane.xlu1 %787  ;;  %v786_v36 = vpop.xlane.xlu0 %785  ;;  %1862 = vmatpush3.bf16.msra.mxu1 %v1859_v33  ;;  %v1871_v48 = vpack.c.bf16 %v1252_v46, %v1251_v44  ;;  %v895_v46 = vld [vmem:[%s2866_s3 + $0x20] sm:$0xff] }
 0x1e1   :  { %v807_v53 = vmul.f32 0.0078125, %v788_v52  ;;  %v806_v28 = vmul.f32 0.0078125, %v786_v36  ;;  %v837_v55 = vmul.f32 %v2591_v50, %v2591_v50  ;;  %v836_v54 = vmul.f32 %v2594_v51, %v2594_v51  ;;  %1864 = vmatprep.subr.bf16.mxu1 %v1863_v38  ;;  %v1254_v52 = vld [vmem:[%s2865_s6 + $0x58] sm:$0xff] }
 0x1e2   :  { %v1875_v36 = vpack.c.bf16 %v1254_v52, %v1253_v49  ;;  %v1257_v49 = vld [vmem:[%s2865_s6 + $0x70] sm:$0xff]  ;;  %v1258_v52 = vld [vmem:[%s2865_s6 + $0x78] sm:$0xff] }
 0x1e3   :  { %v2601_v56 = vsub.f32 %v2541_v62, %v807_v53  ;;  %v2604_v8 = vsub.f32 %v2532_v59, %v806_v28  ;;  %863 = vadd.xlane.f32.xlu1 %v837_v55  ;;  %861 = vadd.xlane.f32.xlu0 %v836_v54 }
 0x1e4   :  { %v790_v45 = vpop.xlane.xlu0 %789  ;;  %v792_v9 = vpop.xlane.xlu1 %791  ;;  %1866 = vmatpush3.bf16.msra.mxu1 %v1863_v38 }
 0x1e5   :  { %v808_v58 = vmul.f32 0.0078125, %v790_v45  ;;  %v839_v63 = vmul.f32 %v2601_v56, %v2601_v56  ;;  %v838_v26 = vmul.f32 %v2604_v8, %v2604_v8  ;;  %v809_v10 = vmul.f32 0.0078125, %v792_v9  ;;  %1868 = vmatprep.subr.bf16.mxu1 %v1867_v43 }
 0x1e7   :  { %v2611_v60 = vsub.f32 %v2539_v47, %v808_v58  ;;  %867 = vadd.xlane.f32.xlu1 %v839_v63  ;;  %865 = vadd.xlane.f32.xlu0 %v838_v26  ;;  %v1051_v47 = vld [vmem:[%s2863_s4] sm:$0xff]  ;;  %v2645_v12 = vsub.f32 %v2547_v57, %v809_v10  ;;  %v1060_v57 = vld [vmem:[%s2863_s4 + $0x48] sm:$0xff] }
 0x1e8   :  { %v794_v17 = vpop.xlane.xlu0 %793  ;;  %1870 = vmatpush3.bf16.msra.mxu1 %v1867_v43  ;;  %v891_v10 = vld [vmem:[%s2866_s3] sm:$0xff] }
 0x1e9   :  { %v810_v61 = vmul.f32 0.0078125, %v794_v17  ;;  %v840_v59 = vmul.f32 %v2611_v60, %v2611_v60  ;;  %v841_v14 = vmul.f32 %v2645_v12, %v2645_v12  ;;  %1872 = vmatprep.subr.bf16.mxu1 %v1871_v48 }
 0x1eb   :  { %v2616_v62 = vsub.f32 %v2545_v0, %v810_v61  ;;  %869 = vadd.xlane.f32.xlu0 %v840_v59  ;;  %v1053_v0 = vld [vmem:[%s2863_s4 + $0x10] sm:$0xff] }
 0x1ec   :  { %1874 = vmatpush3.bf16.msra.mxu1 %v1871_v48  ;;  %v894_v48 = vld [vmem:[%s2866_s3 + $0x18] sm:$0xff] }
 0x1ed   :  { %v842_v37 = vmul.f32 %v2616_v62, %v2616_v62  ;;  %1876 = vmatprep.subr.bf16.mxu1 %v1875_v36 }
 0x1ef   :  { %873 = vadd.xlane.f32.xlu0 %v842_v37 }
 0x1f0   :  { %1878 = vmatpush3.bf16.msra.mxu1 %v1875_v36 }
 0x1f1   :  { %1880 = vmatprep.subr.bf16.mxu1 %v1879_v35 }
 0x1f4   :  { %1882 = vmatpush3.bf16.msra.mxu1 %v1879_v35  ;;  %v902_v35 = vld [vmem:[%s2866_s3 + $0x58] sm:$0xff] }
 0x1f8   :  { %1069 = vperm.xlu1 %1889, %v1051_v47  }
 0x1fc   :  { %1074 = vperm.xlu1 %1889, %v1052_v1  }
 0x205   :  { %1079 = vperm.xlu0 %1888, %v1053_v0  }
 0x209   :  { %1089 = vperm.xlu0 %1888, %v1055_v2  }
 0x20d   :  { %1099 = vperm.xlu0 %1888, %v1057_v3  }
 0x211   :  { %1109 = vperm.xlu0 %1888, %v1059_v4   ;;  %v892_v4 = vld [vmem:[%s2866_s3 + $0x8] sm:$0xff] }
 0x215   :  { %1119 = vperm.xlu0 %1888, %v1061_v5  }
 0x219   :  { %1129 = vperm.xlu0 %1888, %v1063_v11  }
 0x220   :  { %871 = vadd.xlane.f32.xlu1 %v841_v14 }
 0x231   :  { %1084 = vperm.xlu1 %1889, %v1054_v15  }
 0x235   :  { %1094 = vperm.xlu1 %1889, %v1056_v16  }
 0x239   :  { %1104 = vperm.xlu1 %1889, %v1058_v18  }
 0x23d   :  { %1114 = vperm.xlu1 %1889, %v1060_v57  }
 0x241   :  { %1124 = vperm.xlu1 %1889, %v1062_v19  }
 0x245   :  { %1134 = vperm.xlu1 %1889, %v1064_v23  }
 0x25b   :  { %v846_v53 = vpop.xlane.xlu0 %845 }
 0x25c   :  { %v876_v28 = vmul.f32 0.0078125, %v846_v53  ;;  %v844_v55 = vpop.xlane.xlu1 %843 }
 0x25d   :  { %v875_v54 = vmul.f32 0.0078125, %v844_v55  ;;  %v1883_v55 = vpack.c.bf16 %v1258_v52, %v1257_v49  ;;  %v906_v49 = vld [vmem:[%s2866_s3 + $0x78] sm:$0xff] }
 0x25e   :  { %v908_v45 = vadd.f32 1e-05, %v876_v28 }
 0x25f   :  { %v907_v58 = vadd.f32 1e-05, %v875_v54  ;;  %1884 = vmatprep.subr.bf16.mxu1 %v1883_v55 }
 0x260   :  { %1890 = vrsqrt.f32 %v908_v45  ;;  %v848_v63 = vpop.xlane.xlu1 %847  ;;  %1886 = vmatpush3.bf16.msra.mxu1 %v1883_v55 }
 0x261   :  { %1892 = vrsqrt.f32 %v907_v58  ;;  %v877_v26 = vmul.f32 0.0078125, %v848_v63 }
 0x263   :  { %v909_v17 = vadd.f32 1e-05, %v877_v26 }
 0x264   :  { %v852_v61 = vpop.xlane.xlu1 %851  ;;  %v850_v59 = vpop.xlane.xlu0 %849 }
 0x265   :  { %1894 = vrsqrt.f32 %v909_v17  ;;  %v879_v37 = vmul.f32 0.0078125, %v852_v61  ;;  %v878_v47 = vmul.f32 0.0078125, %v850_v59  ;;  %v897_v59 = vld [vmem:[%s2866_s3 + $0x30] sm:$0xff] }
 0x267   :  { %v911_v1 = vadd.f32 1e-05, %v879_v37  ;;  %v910_v0 = vadd.f32 1e-05, %v878_v47  ;;  %v896_v37 = vld [vmem:[%s2866_s3 + $0x28] sm:$0xff] }
 0x268   :  { %v856_v2 = vpop.xlane.xlu1 %855  ;;  %v854_v3 = vpop.xlane.xlu0 %853 }
 0x269   :  { %1896 = vrsqrt.f32 %v911_v1  ;;  %v881_v5 = vmul.f32 0.0078125, %v856_v2  ;;  %v880_v9 = vmul.f32 0.0078125, %v854_v3 }
 0x26a   :  { %v1891_v11 = vpop.eup %1890  ;;  %1898 = vrsqrt.f32 %v910_v0 }
 0x26b   :  { %v1893_v14 = vpop.eup %1892  ;;  %v913_v15 = vadd.f32 1e-05, %v881_v5  ;;  %v912_v16 = vadd.f32 1e-05, %v880_v9  ;;  %v940_v18 = vmul.f32 %v1891_v11, %v892_v4  ;;  %v898_v11 = vld [vmem:[%s2866_s3 + $0x38] sm:$0xff] }
 0x26c   :  { %v860_v57 = vpop.xlane.xlu1 %859  ;;  %v858_v19 = vpop.xlane.xlu0 %857  ;;  %v939_v22 = vmul.f32 %v1893_v14, %v891_v10  ;;  %v899_v10 = vld [vmem:[%s2866_s3 + $0x40] sm:$0xff] }
 0x26d   :  { %1900 = vrsqrt.f32 %v913_v15  ;;  %v883_v23 = vmul.f32 0.0078125, %v860_v57  ;;  %v882_v24 = vmul.f32 0.0078125, %v858_v19  ;;  %962 = vperm.xlu0 %1888, %v940_v18  }
 0x26e   :  { %1902 = vrsqrt.f32 %v912_v16  ;;  %957 = vperm.xlu1 %1889, %v939_v22  }
 0x26f   :  { %v1895_v32 = vpop.eup %1894  ;;  %v915_v33 = vadd.f32 1e-05, %v883_v23  ;;  %v914_v34 = vadd.f32 1e-05, %v882_v24  ;;  %v901_v23 = vld [vmem:[%s2866_s3 + $0x50] sm:$0xff]  ;;  %v900_v24 = vld [vmem:[%s2866_s3 + $0x48] sm:$0xff] }
 0x270   :  { %v864_v38 = vpop.xlane.xlu1 %863  ;;  %v862_v39 = vpop.xlane.xlu0 %861  ;;  %v941_v42 = vmul.f32 %v1895_v32, %v893_v25 }
 0x271   :  { %1904 = vrsqrt.f32 %v915_v33  ;;  %v885_v43 = vmul.f32 0.0078125, %v864_v38  ;;  %v884_v44 = vmul.f32 0.0078125, %v862_v39 }
 0x272   :  { %1906 = vrsqrt.f32 %v914_v34  ;;  %967 = vperm.xlu0 %1888, %v941_v42   ;;  %v903_v34 = vld [vmem:[%s2866_s3 + $0x60] sm:$0xff] }
 0x273   :  { %v1897_v36 = vpop.eup %1896  ;;  %v917_v53 = vadd.f32 1e-05, %v885_v43  ;;  %v916_v28 = vadd.f32 1e-05, %v884_v44  ;;  %v904_v44 = vld [vmem:[%s2866_s3 + $0x68] sm:$0xff] }
 0x274   :  { %v1899_v54 = vpop.eup %1898  ;;  %v868_v45 = vpop.xlane.xlu1 %867  ;;  %v943_v63 = vmul.f32 %v1897_v36, %v895_v46 }
 0x275   :  { %v866_v58 = vpop.xlane.xlu0 %865  ;;  %1908 = vrsqrt.f32 %v917_v53  ;;  %v887_v26 = vmul.f32 0.0078125, %v868_v45  ;;  %v942_v61 = vmul.f32 %v1899_v54, %v894_v48  ;;  %v1066_v53 = vld [vmem:[%s2863_s4 + $0x78] sm:$0xff] }
 0x276   :  { %v886_v17 = vmul.f32 0.0078125, %v866_v58  ;;  %1910 = vrsqrt.f32 %v916_v28  ;;  %977 = vperm.xlu0 %1888, %v943_v63   ;;  %v905_v63 = vld [vmem:[%s2866_s3 + $0x70] sm:$0xff] }
 0x277   :  { %v1901_v47 = vpop.eup %1900  ;;  %v919_v1 = vadd.f32 1e-05, %v887_v26  ;;  %972 = vperm.xlu1 %1889, %v942_v61   ;;  %v1065_v61 = vld [vmem:[%s2863_s4 + $0x70] sm:$0xff] }
 0x278   :  { %v918_v0 = vadd.f32 1e-05, %v886_v17  ;;  %v1903_v2 = vpop.eup %1902  ;;  %v945_v4 = vmul.f32 %v1901_v47, %v897_v59  ;;  %v1070_v28 = vpop.permute.xlu1 %1069  ;;  %v1425_v59 = vld [vmem:[#allocation2] sm:$0x1] }
 0x279   :  { %v870_v3 = vpop.xlane.xlu0 %869  ;;  %1912 = vrsqrt.f32 %v919_v1  ;;  %v944_v9 = vmul.f32 %v1903_v2, %v896_v37 }
 0x27a   :  { %v888_v5 = vmul.f32 0.0078125, %v870_v3  ;;  %1914 = vrsqrt.f32 %v918_v0  ;;  %987 = vperm.xlu0 %1888, %v945_v4  }
 0x27b   :  { %v1905_v14 = vpop.eup %1904  ;;  %982 = vperm.xlu1 %1889, %v944_v9  }
 0x27c   :  { %v920_v15 = vadd.f32 1e-05, %v888_v5  ;;  %v1907_v16 = vpop.eup %1906  ;;  %v947_v57 = vmul.f32 %v1905_v14, %v899_v10  ;;  %v1075_v55 = vpop.permute.xlu1 %1074 }
 0x27d   :  { %v874_v18 = vpop.xlane.xlu0 %873  ;;  %v946_v22 = vmul.f32 %v1907_v16, %v898_v11 }
 0x27e   :  { %1916 = vrsqrt.f32 %v920_v15  ;;  %v890_v19 = vmul.f32 0.0078125, %v874_v18  ;;  %997 = vperm.xlu0 %1888, %v947_v57  }
 0x27f   :  { %v1909_v25 = vpop.eup %1908  ;;  %992 = vperm.xlu1 %1889, %v946_v22  }
 0x280   :  { %v922_v27 = vadd.f32 1e-05, %v890_v19  ;;  %v1911_v29 = vpop.eup %1910  ;;  %v949_v32 = vmul.f32 %v1909_v25, %v901_v23 }
 0x281   :  { %v948_v33 = vmul.f32 %v1911_v29, %v900_v24  ;;  %v1211_v29 = vld [vmem:[%s2867_s5] sm:$0xff] }
 0x282   :  { %1918 = vrsqrt.f32 %v922_v27  ;;  %1007 = vperm.xlu0 %1888, %v949_v32  }
 0x283   :  { %v1913_v38 = vpop.eup %1912  ;;  %1002 = vperm.xlu1 %1889, %v948_v33  }
 0x284   :  { %v1915_v39 = vpop.eup %1914  ;;  %v951_v42 = vmul.f32 %v1913_v38, %v903_v34  ;;  %v1080_v37 = vpop.permute.xlu0 %1079 }
 0x285   :  { %v950_v43 = vmul.f32 %v1915_v39, %v902_v35 }
 0x286   :  { %1017 = vperm.xlu0 %1888, %v951_v42  }
 0x287   :  { %1012 = vperm.xlu1 %1889, %v950_v43  }
 0x288   :  { %v1917_v46 = vpop.eup %1916  ;;  %v1090_v1 = vpop.permute.xlu0 %1089 }
 0x289   :  { %v952_v48 = vmul.f32 %v1917_v46, %v904_v44 }
 0x28b   :  { %1022 = vperm.xlu1 %1889, %v952_v48  }
 0x28c   :  { %v1919_v52 = vpop.eup %1918  ;;  %v1100_v2 = vpop.permute.xlu0 %1099 }
 0x28d   :  { %v954_v36 = vmul.f32 %v1919_v52, %v906_v49 }
 0x28f   :  { %1032 = vperm.xlu1 %1889, %v954_v36  }
 0x290   :  { %v2774_v4 = vpop.permute.xlu0 %1109 }
 0x293   :  { %1144 = vperm.xlu1 %1889, %v1066_v53  }
 0x294   :  { %v2778_v9 = vpop.permute.xlu0 %1119 }
 0x298   :  { %v2782_v11 = vpop.permute.xlu0 %1129 }
 0x2ad   :  { %v872_v54 = vpop.xlane.xlu1 %871 }
 0x2ae   :  { %v889_v45 = vmul.f32 0.0078125, %v872_v54 }
 0x2b0   :  { %v921_v58 = vadd.f32 1e-05, %v889_v45  ;;  %v1214_v45 = vld [vmem:[%s2867_s5 + $0x18] sm:$0xff] }
 0x2b1   :  { %v1085_v47 = vpop.permute.xlu1 %1084 }
 0x2b2   :  { %1920 = vrsqrt.f32 %v921_v58 }
 0x2b5   :  { %v1095_v0 = vpop.permute.xlu1 %1094 }
 0x2b9   :  { %v2772_v3 = vpop.permute.xlu1 %1104 }
 0x2bc   :  { %v1921_v26 = vpop.eup %1920 }
 0x2bd   :  { %v953_v17 = vmul.f32 %v1921_v26, %v905_v63  ;;  %v2776_v5 = vpop.permute.xlu1 %1114 }
 0x2bf   :  { %1027 = vperm.xlu0 %1888, %v953_v17  }
 0x2c1   :  { %v2780_v10 = vpop.permute.xlu1 %1124 }
 0x2c3   :  { %1139 = vperm.xlu0 %1888, %v1065_v61  }
 0x2c5   :  { %v2784_v14 = vpop.permute.xlu1 %1134 }
 0x2c7   :  { %1428 = vperm.xlu0 %1888, %v1425_v59  }
 0x2ec   :  { %v963_v15 = vpop.permute.xlu0 %962 }
 0x2ed   :  { %v1036_v16 = vmul.f32 %v963_v15, %v2552_v6  ;;  %v958_v18 = vpop.permute.xlu1 %957  ;;  %v1212_v6 = vld [vmem:[%s2867_s5 + $0x8] sm:$0xff] }
 0x2ee   :  { %v1035_v57 = vmul.f32 %v958_v18, %v2554_v7 }
 0x2ef   :  { %v1148_v19 = vadd.f32 %v1075_v55, %v1036_v16 }
 0x2f0   :  { %v1147_v22 = vadd.f32 %v1070_v28, %v1035_v57 }
 0x2f1   :  { %vm1164_vm1 = vcmp.ge.f32.partialorder %v1148_v19, 0.0  ;;  %v1180_v23 = vmul.f32 0.2, %v1148_v19  ;;  %v968_v24 = vpop.permute.xlu0 %967 }
 0x2f2   :  { %vm1163_vm2 = vcmp.ge.f32.partialorder %v1147_v22, 0.0  ;;  %v1179_v25 = vmul.f32 0.2, %v1147_v22  ;;  %v1037_v27 = vmul.f32 %v968_v24, %v2560_v13  ;;  %v1213_v13 = vld [vmem:[%s2867_s5 + $0x10] sm:$0xff] }
 0x2f3   :  { %v1196_v32 = vsel %vm1164_vm1, %v1148_v19, %v1180_v23 }
 0x2f4   :  { %v1149_v33 = vadd.f32 %v1080_v37, %v1037_v27  ;;  %v1195_v7 = vsel %vm1163_vm2, %v1147_v22, %v1179_v25  ;;  %v1228_v38 = vmul.f32 %v1212_v6, %v1196_v32  ;;  %v1219_v27 = vld [vmem:[%s2867_s5 + $0x40] sm:$0xff] }
 0x2f5   :  { %v978_v34 = vpop.permute.xlu0 %977  ;;  %v1227_v35 = vmul.f32 %v1211_v29, %v1195_v7 }
 0x2f6   :  { %vm1165_vm3 = vcmp.ge.f32.partialorder %v1149_v33, 0.0  ;;  %v1181_v39 = vmul.f32 0.2, %v1149_v33  ;;  %v973_v42 = vpop.permute.xlu1 %972  ;;  %v1039_v43 = vmul.f32 %v978_v34, %v2564_v20  ;;  %v1215_v20 = vld [vmem:[%s2867_s5 + $0x20] sm:$0xff] }
 0x2f7   :  { %v1038_v44 = vmul.f32 %v973_v42, %v2566_v21  ;;  %1751 = vmatprep.mubr.f32.mxu1 %v1227_v35  ;;  %v1221_v42 = vld [vmem:[%s2867_s5 + $0x50] sm:$0xff] }
 0x2f8   :  { %v1151_v46 = vadd.f32 %v1090_v1, %v1039_v43  ;;  %1752 = vmatmul.mubr.f32.vlgmr.msra.gmra.mrb[32].mxu1 %v1228_v38  ;;  %v1197_v48 = vsel %vm1165_vm3, %v1149_v33, %v1181_v39 }
 0x2f9   :  { %v1150_v49 = vadd.f32 %v1085_v47, %v1038_v44  ;;  %v988_v52 = vpop.permute.xlu0 %987  ;;  %v1229_v36 = vmul.f32 %v1213_v13, %v1197_v48 }
 0x2fa   :  { %vm1167_vm4 = vcmp.ge.f32.partialorder %v1151_v46, 0.0  ;;  %v1183_v53 = vmul.f32 0.2, %v1151_v46  ;;  %v983_v28 = vpop.permute.xlu1 %982  ;;  %v1041_v55 = vmul.f32 %v988_v52, %v2572_v30 }
 0x2fb   :  { %vm1166_vm5 = vcmp.ge.f32.partialorder %v1150_v49, 0.0  ;;  %v1182_v54 = vmul.f32 0.2, %v1150_v49  ;;  %v1040_v21 = vmul.f32 %v983_v28, %v2575_v31  ;;  %1754 = vmatprep.mubr.f32.mxu1 %v1229_v36  ;;  %v1217_v31 = vld [vmem:[%s2867_s5 + $0x30] sm:$0xff] }
 0x2fc   :  { %v1153_v58 = vadd.f32 %v1100_v2, %v1041_v55  ;;  %v1199_v63 = vsel %vm1167_vm4, %v1151_v46, %v1183_v53 }
 0x2fd   :  { %v1152_v26 = vadd.f32 %v1095_v0, %v1040_v21  ;;  %v998_v17 = vpop.permute.xlu0 %997  ;;  %v1198_v61 = vsel %vm1166_vm5, %v1150_v49, %v1182_v54  ;;  %v1231_v59 = vmul.f32 %v1215_v20, %v1199_v63  ;;  %v1216_v0 = vld [vmem:[%s2867_s5 + $0x28] sm:$0xff] }
 0x2fe   :  { %vm1169_vm6 = vcmp.ge.f32.partialorder %v1153_v58, 0.0  ;;  %v1185_v30 = vmul.f32 0.2, %v1153_v58  ;;  %v993_v37 = vpop.permute.xlu1 %992  ;;  %v1043_v47 = vmul.f32 %v998_v17, %v2581_v40  ;;  %v1230_v1 = vmul.f32 %v1214_v45, %v1198_v61 }
 0x2ff   :  { %vm1168_vm7 = vcmp.ge.f32.partialorder %v1152_v26, 0.0  ;;  %v1184_v15 = vmul.f32 0.2, %v1152_v26  ;;  %v1042_v16 = vmul.f32 %v993_v37, %v2584_v41 }
 0x300   :  { %v1155_v2 = vadd.f32 %v2774_v4, %v1043_v47  ;;  %1755 = vmatmul.mubr.f32.gmra.mrb[34].mxu1 %v1230_v1  ;;  %v1201_v18 = vsel %vm1169_vm6, %v1153_v58, %v1185_v30  ;;  %v1224_v58 = vld [vmem:[%s2867_s5 + $0x68] sm:$0xff] }
 0x301   :  { %v1154_v57 = vadd.f32 %v2772_v3, %v1042_v16  ;;  %1757 = vmatprep.mubr.f32.mxu1 %v1231_v59  ;;  %v1008_v40 = vpop.permute.xlu0 %1007  ;;  %v1200_v19 = vsel %vm1168_vm7, %v1152_v26, %v1184_v15  ;;  %v1233_v22 = vmul.f32 %v1217_v31, %v1201_v18  ;;  %v1218_v3 = vld [vmem:[%s2867_s5 + $0x38] sm:$0xff]  ;;  %v1225_v15 = vld [vmem:[%s2867_s5 + $0x70] sm:$0xff] }
 0x302   :  { %vm1171_vm8 = vcmp.ge.f32.partialorder %v1155_v2, 0.0  ;;  %v1187_v23 = vmul.f32 0.2, %v1155_v2  ;;  %v1003_v24 = vpop.permute.xlu1 %1002  ;;  %v1045_v25 = vmul.f32 %v1008_v40, %v2591_v50  ;;  %v1232_v41 = vmul.f32 %v1216_v0, %v1200_v19  ;;  %v1226_v0 = vld [vmem:[%s2867_s5 + $0x78] sm:$0xff] }
 0x303   :  { %vm1170_vm9 = vcmp.ge.f32.partialorder %v1154_v57, 0.0  ;;  %v1186_v4 = vmul.f32 0.2, %v1154_v57  ;;  %v1044_v29 = vmul.f32 %v1003_v24, %v2594_v51 }
 0x304   :  { %v1157_v6 = vadd.f32 %v2778_v9, %v1045_v25  ;;  %1758 = vmatmul.mubr.f32.gmra.mrb[36].mxu1 %v1232_v41  ;;  %v1203_v32 = vsel %vm1171_vm8, %v1155_v2, %v1187_v23 }
 0x305   :  { %v1156_v33 = vadd.f32 %v2776_v5, %v1044_v29  ;;  %1760 = vmatprep.mubr.f32.mxu1 %v1233_v22  ;;  %v1018_v50 = vpop.permute.xlu0 %1017  ;;  %v1202_v7 = vsel %vm1170_vm9, %v1154_v57, %v1186_v4  ;;  %v1235_v34 = vmul.f32 %v1219_v27, %v1203_v32  ;;  %v1220_v5 = vld [vmem:[%s2867_s5 + $0x48] sm:$0xff] }
 0x306   :  { %vm1173_vm10 = vcmp.ge.f32.partialorder %v1157_v6, 0.0  ;;  %v1189_v35 = vmul.f32 0.2, %v1157_v6  ;;  %v1013_v38 = vpop.permute.xlu1 %1012  ;;  %v1047_v39 = vmul.f32 %v1018_v50, %v2601_v56  ;;  %v1234_v51 = vmul.f32 %v1218_v3, %v1202_v7 }
 0x307   :  { %vm1172_vm11 = vcmp.ge.f32.partialorder %v1156_v33, 0.0  ;;  %v1188_v9 = vmul.f32 0.2, %v1156_v33  ;;  %v1046_v43 = vmul.f32 %v1013_v38, %v2604_v8  ;;  %v1223_v8 = vld [vmem:[%s2867_s5 + $0x60] sm:$0xff] }
 0x308   :  { %v1159_v13 = vadd.f32 %v2782_v11, %v1047_v39  ;;  %1761 = vmatmul.mubr.f32.gmra.mrb[38].mxu1 %v1234_v51  ;;  %v1205_v44 = vsel %vm1173_vm10, %v1157_v6, %v1189_v35  ;;  %v1222_v11 = vld [vmem:[%s2867_s5 + $0x58] sm:$0xff] }
 0x309   :  { %v1158_v46 = vadd.f32 %v2780_v10, %v1046_v43  ;;  %1763 = vmatprep.mubr.f32.mxu1 %v1235_v34  ;;  %v1204_v56 = vsel %vm1172_vm11, %v1156_v33, %v1188_v9  ;;  %v1237_v48 = vmul.f32 %v1221_v42, %v1205_v44 }
 0x30a   :  { %vm1175_vm12 = vcmp.ge.f32.partialorder %v1159_v13, 0.0  ;;  %v1191_v49 = vmul.f32 0.2, %v1159_v13  ;;  %v1023_v52 = vpop.permute.xlu1 %1022  ;;  %v1236_v36 = vmul.f32 %v1220_v5, %v1204_v56  ;;  %v1431_v56 = vlaneseq }
 0x30b   :  { %vm1174_vm13 = vcmp.ge.f32.partialorder %v1158_v46, 0.0  ;;  %v1190_v53 = vmul.f32 0.2, %v1158_v46  ;;  %v1048_v28 = vmul.f32 %v1023_v52, %v2611_v60 }
 0x30c   :  { %1764 = vmatmul.mubr.f32.gmra.mrb[40].mxu1 %v1236_v36  ;;  %v1207_v10 = vsel %vm1175_vm12, %v1159_v13, %v1191_v49  ;;  %v1432_v52 = vshrl.u32 %v1431_v56, 7 }
 0x30d   :  { %v1160_v55 = vadd.f32 %v2784_v14, %v1048_v28  ;;  %1766 = vmatprep.mubr.f32.mxu1 %v1237_v48  ;;  %v1206_v20 = vsel %vm1174_vm13, %v1158_v46, %v1190_v53  ;;  %v1239_v54 = vmul.f32 %v1223_v8, %v1207_v10 }
 0x30e   :  { %v1238_v21 = vmul.f32 %v1222_v11, %v1206_v20  ;;  %v1033_v26 = vpop.permute.xlu1 %1032  ;;  %v1433_v53 = vsub.s32 0, %v1432_v52 }
 0x30f   :  { %vm1176_vm14 = vcmp.ge.f32.partialorder %v1160_v55, 0.0  ;;  %v1192_v45 = vmul.f32 0.2, %v1160_v55  ;;  %v1050_v61 = vmul.f32 %v1033_v26, %v2616_v62 }
 0x310   :  { %1767 = vmatmul.mubr.f32.gmra.mrb[42].mxu1 %v1238_v21 }
 0x311   :  { %1769 = vmatprep.mubr.f32.mxu1 %v1239_v54  ;;  %v1208_v60 = vsel %vm1176_vm14, %v1160_v55, %v1192_v45 }
 0x312   :  { %v1240_v63 = vmul.f32 %v1224_v58, %v1208_v60  ;;  %v1145_v17 = vpop.permute.xlu1 %1144 }
 0x313   :  { %v1162_v14 = vadd.f32 %v1145_v17, %v1050_v61 }
 0x314   :  { %1770 = vmatmul.mubr.f32.gmra.mrb[44].mxu1 %v1240_v63 }
 0x315   :  { %v1194_v37 = vmul.f32 0.2, %v1162_v14  ;;  %vm1178_vm15 = vcmp.ge.f32.partialorder %v1162_v14, 0.0 }
 0x317   :  { %v1210_v16 = vsel %vm1178_vm15, %v1162_v14, %v1194_v37 }
 0x318   :  { %v1242_v18 = vmul.f32 %v1226_v0, %v1210_v16 }
 0x33e   :  { %v1028_v59 = vpop.permute.xlu0 %1027 }
 0x33f   :  { %v1049_v30 = vmul.f32 %v1028_v59, %v2645_v12 }
 0x342   :  { %v1140_v47 = vpop.permute.xlu0 %1139 }
 0x343   :  { %v1161_v1 = vadd.f32 %v1140_v47, %v1049_v30 }
 0x345   :  { %vm1177_vm0 = vcmp.ge.f32.partialorder %v1161_v1, 0.0  ;;  %v1193_v31 = vmul.f32 0.2, %v1161_v1 }
 0x346   :  { %v1429_v11 = vpop.permute.xlu0 %1428 }
 0x347   :  { %v1209_v62 = vsel %vm1177_vm0, %v1161_v1, %v1193_v31  ;;  %v1434_v55 = vrot.slane %v1429_v11, %v1433_v53 }
 0x348   :  { %v1241_v2 = vmul.f32 %v1225_v15, %v1209_v62 }
 0x34a   :  { %1772 = vmatprep.mubr.f32.mxu1 %v1241_v2 }
 0x34b   :  { %1773 = vmatmul.mubr.f32.gmra.mrb[46].mxu1 %v1242_v18 }
 0x3cb   :  { %v1753_v12 = vpop.f32.mrb[32].mxu1 }
 0x3cc   :  { %v1325_v57 = vpop.f32.mrb[33].mxu1 }
 0x3cd   :  { %v1404_v40 = vadd.f32 %v1753_v12, %v1325_v57 }
 0x3d3   :  { %v1756_v19 = vpop.f32.mrb[34].mxu1 }
 0x3d4   :  { %v1335_v22 = vpop.f32.mrb[35].mxu1 }
 0x3d5   :  { %v1405_v23 = vadd.f32 %v1404_v40, %v1335_v22 }
 0x3d7   :  { %v1759_v24 = vpop.f32.mrb[36].mxu1  ;;  %v1406_v25 = vadd.f32 %v1756_v19, %v1405_v23 }
 0x3d8   :  { %v1345_v41 = vpop.f32.mrb[37].mxu1 }
 0x3d9   :  { %v1407_v27 = vadd.f32 %v1406_v25, %v1345_v41 }
 0x3db   :  { %v1762_v4 = vpop.f32.mrb[38].mxu1  ;;  %v1408_v29 = vadd.f32 %v1759_v24, %v1407_v27 }
 0x3dc   :  { %v1355_v3 = vpop.f32.mrb[39].mxu1 }
 0x3dd   :  { %v1409_v6 = vadd.f32 %v1408_v29, %v1355_v3 }
 0x3df   :  { %v1765_v32 = vpop.f32.mrb[40].mxu1  ;;  %v1410_v33 = vadd.f32 %v1762_v4, %v1409_v6 }
 0x3e0   :  { %v1365_v50 = vpop.f32.mrb[41].mxu1 }
 0x3e1   :  { %v1411_v7 = vadd.f32 %v1410_v33, %v1365_v50 }
 0x3e3   :  { %v1768_v34 = vpop.f32.mrb[42].mxu1  ;;  %v1412_v35 = vadd.f32 %v1765_v32, %v1411_v7 }
 0x3e4   :  { %v1375_v38 = vpop.f32.mrb[43].mxu1 }
 0x3e5   :  { %v1413_v39 = vadd.f32 %v1412_v35, %v1375_v38 }
 0x3e7   :  { %v1771_v51 = vpop.f32.mrb[44].mxu1  ;;  %v1414_v42 = vadd.f32 %v1768_v34, %v1413_v39 }
 0x3e8   :  { %v1385_v9 = vpop.f32.mrb[45].mxu1 }
 0x3e9   :  { %v1415_v43 = vadd.f32 %v1414_v42, %v1385_v9 }
 0x3eb   :  { %v1416_v5 = vadd.f32 %v1771_v51, %v1415_v43 }
 0x41e   :  { %v1774_v13 = vpop.f32.mrb[46].mxu1 }
 0x41f   :  { %v1395_v44 = vpop.f32.mrb[47].mxu1 }
 0x420   :  { %v1417_v46 = vadd.f32 %v1416_v5, %v1395_v44 }
 0x422   :  { %v1418_v48 = vadd.f32 %v1774_v13, %v1417_v46 }
 0x424   :  { %v1419_v49 = vrot.slane %v1418_v48, 4 }
 0x426   :  { %v1420_v36 = vadd.f32 %v1419_v49, %v1418_v48 }
 0x428   :  { %v1421_v8 = vrot.slane %v1420_v36, 2 }
 0x42a   :  { %v1422_v28 = vadd.f32 %v1421_v8, %v1420_v36 }
 0x42c   :  { %v1423_v10 = vrot.slane %v1422_v28, 1 }
 0x42e   :  { %v1424_v20 = vadd.f32 %v1423_v10, %v1422_v28 }
 0x430   :  { %v1435_v54 = vadd.f32 %v1434_v55, %v1424_v20 }
 0x432   :  { %v1436_v21 = vsub.f32 0.0, %v1435_v54 }
 0x434   :  { %v1437_v45 = vmul.f32 1.442695, %v1436_v21 }
 0x436   :  { %1922 = vpow2.f32 %v1437_v45 }
 0x440   :  { %v1923_v58 = vpop.eup %1922 }
 0x441   :  { %v1439_v60 = vadd.f32 1.0, %v1923_v58 }
 0x443   :  { %1924 = vrcp.f32 %v1439_v60 }
 0x44d   :  { %v1925_v63 = vpop.eup %1924 }
 0x44e   :  { %1442 = vst [vmem:[%s2868_s8] sm:$0x1] %v1925_v63 }

</bundles_post_ra>
